<compile_context>
chip_gen: v5e
topology: v5e:2x2
jax: 0.10.0
libtpu: 0.0.40
codegen_flags: <defaults>
</compile_context>

<pallas_src>
import jax
import jax.numpy as jnp
from jax.experimental import pallas as pl
from jax.experimental.pallas import tpu as pltpu


# ---------------------------------------------------------------------------
# Fused kernel: [3x3 conv + folded BN + ReLU] x2 + SCSE, one image per step.
# ---------------------------------------------------------------------------
def _decoder_block_kernel(x_ref, w1_ref, b1_ref, w2_ref, b2_ref,
                          fc1w_ref, fc1b_ref, fc2w_ref, fc2b_ref, spaw_ref,
                          o_ref,
                          pad1_ref, pad2_ref):
    H = x_ref.shape[1]
    W = x_ref.shape[2]

    def zero_border(pad_ref):
        # Only the 1-pixel halo needs zeros; the interior is overwritten
        # every step, so never zero the whole buffer.
        Hp, Wp, C = pad_ref.shape
        z_row = jnp.zeros((1, Wp, C), jnp.float32)
        z_col = jnp.zeros((Hp, 1, C), jnp.float32)
        pad_ref[pl.ds(0, 1), :, :] = z_row
        pad_ref[pl.ds(Hp - 1, 1), :, :] = z_row
        pad_ref[:, pl.ds(0, 1), :] = z_col
        pad_ref[:, pl.ds(Wp - 1, 1), :] = z_col

    def conv3x3_bias_relu(x_hwc, pad_ref, w_ref, bias):
        # w_ref: (9*C, Cout) with BN scale already folded into the columns.
        C = x_hwc.shape[-1]
        Cout = w_ref.shape[-1]
        zero_border(pad_ref)
        pad_ref[pl.ds(1, H), pl.ds(1, W), :] = x_hwc
        acc = jnp.zeros((H * W, Cout), jnp.float32)
        # 9 shifted-tap matmuls accumulated directly (no im2col patch scratch).
        for kh in range(3):
            for kw in range(3):
                tap = pad_ref[pl.ds(kh, H), pl.ds(kw, W), :]        # (H, W, C)
                w_tap = w_ref[pl.ds((kh * 3 + kw) * C, C), :]       # (C, Cout)
                acc = acc + jnp.dot(tap.reshape(H * W, C), w_tap,
                                    preferred_element_type=jnp.float32)
        return jnp.maximum(acc + bias, 0.0)                         # (H*W, Cout)

    y1 = conv3x3_bias_relu(x_ref[0], pad1_ref, w1_ref, b1_ref[...])  # (H*W, C1)
    C1 = y1.shape[-1]
    y2 = conv3x3_bias_relu(y1.reshape(H, W, C1), pad2_ref,
                           w2_ref, b2_ref[...])                      # (H*W, C2)

    # ---- SCSE epilogue, fully in VMEM ----
    # Channel SE: global average pool -> FC -> ReLU -> FC -> sigmoid.
    m = jnp.sum(y2, axis=0, keepdims=True) * (1.0 / (H * W))         # (1, C2)
    h = jnp.maximum(
        jnp.dot(m, fc1w_ref[...], preferred_element_type=jnp.float32)
        + fc1b_ref[...], 0.0)                                        # (1, Cr)
    s = jax.nn.sigmoid(
        jnp.dot(h, fc2w_ref[...], preferred_element_type=jnp.float32)
        + fc2b_ref[...])                                             # (1, C2)
    # Spatial SE: 1x1 conv (no bias) -> sigmoid, as VPU mul + lane reduction.
    spa = jax.nn.sigmoid(
        jnp.sum(y2 * spaw_ref[...], axis=-1, keepdims=True))         # (H*W, 1)

    out = y2 * s + y2 * spa                                          # (H*W, C2)
    # Lane-dense store: (C2, H*W) puts H*W (multiple of 128) on the lane axis.
    o_ref[0] = jnp.transpose(out)


def decoder_fused_call(x_nhwc, p):
    B, H, W, Cin = x_nhwc.shape
    w1 = p["w1_mat_scaled"]               # (9*Cin, C1)  BN1 scale folded in
    w2 = p["w2_mat_scaled"]               # (9*C1,  C2)  BN2 scale folded in
    C1 = w1.shape[1]
    C2 = w2.shape[1]
    fc1w = p["fc1_wT"]                    # (C2, Cr)
    Cr = fc1w.shape[1]
    b1 = p["bn1_bias"].reshape(1, C1)
    b2 = p["bn2_bias"].reshape(1, C2)
    fc1b = p["fc1_b"].reshape(1, Cr)
    fc2w = p["fc2_wT"]                    # (Cr, C2)
    fc2b = p["fc2_b"].reshape(1, C2)
    spaw = p["spa_w"].reshape(1, C2)      # row vector for VPU-mul + lane-reduce

    const2 = lambda b: (0, 0)
    return pl.pallas_call(
        _decoder_block_kernel,
        out_shape=jax.ShapeDtypeStruct((B, C2, H * W), jnp.float32),
        grid=(B,),
        in_specs=[
            pl.BlockSpec((1, H, W, Cin), lambda b: (b, 0, 0, 0)),
            pl.BlockSpec((9 * Cin, C1), const2),
            pl.BlockSpec((1, C1), const2),
            pl.BlockSpec((9 * C1, C2), const2),
            pl.BlockSpec((1, C2), const2),
            pl.BlockSpec((C2, Cr), const2),
            pl.BlockSpec((1, Cr), const2),
            pl.BlockSpec((Cr, C2), const2),
            pl.BlockSpec((1, C2), const2),
            pl.BlockSpec((1, C2), const2),
        ],
        out_specs=pl.BlockSpec((1, C2, H * W), lambda b: (b, 0, 0)),
        scratch_shapes=[
            pltpu.VMEM((H + 2, W + 2, Cin), jnp.float32),   # padded conv1 input
            pltpu.VMEM((H + 2, W + 2, C1), jnp.float32),    # padded conv2 input
        ],
        compiler_params=pltpu.CompilerParams(
            dimension_semantics=("parallel",)),
    )(x_nhwc, w1, b1, w2, b2, fc1w, fc1b, fc2w, fc2b, spaw)


# ---------------------------------------------------------------------------
# Glue (plain JAX): bilinear x2 upsample (align_corners=True) + channel concat,
# executed in NHWC so the fused kernel's input is produced in its layout.
# ---------------------------------------------------------------------------
def bilinear_upsample_x2_align_corners_nhwc(x):
    B, H, W, C = x.shape
    Ho, Wo = 2 * H, 2 * W
    ys = jnp.arange(Ho, dtype=jnp.float32) * ((H - 1) / max(Ho - 1, 1))
    xs = jnp.arange(Wo, dtype=jnp.float32) * ((W - 1) / max(Wo - 1, 1))
    y0 = jnp.floor(ys).astype(jnp.int32)
    y1 = jnp.minimum(y0 + 1, H - 1)
    wy = (ys - y0.astype(jnp.float32))[None, :, None, None]
    x0 = jnp.floor(xs).astype(jnp.int32)
    x1 = jnp.minimum(x0 + 1, W - 1)
    wx = (xs - x0.astype(jnp.float32))[None, None, :, None]
    r = x[:, y0, :, :] * (1.0 - wy) + x[:, y1, :, :] * wy
    return r[:, :, x0, :] * (1.0 - wx) + r[:, :, x1, :] * wx


def bilinear_upsample_x2_align_corners_nchw(x):
    B, C, H, W = x.shape
    Ho, Wo = 2 * H, 2 * W
    ys = jnp.arange(Ho, dtype=jnp.float32) * ((H - 1) / max(Ho - 1, 1))
    xs = jnp.arange(Wo, dtype=jnp.float32) * ((W - 1) / max(Wo - 1, 1))
    y0 = jnp.floor(ys).astype(jnp.int32)
    y1 = jnp.minimum(y0 + 1, H - 1)
    wy = (ys - y0.astype(jnp.float32))[None, None, :, None]
    x0 = jnp.floor(xs).astype(jnp.int32)
    x1 = jnp.minimum(x0 + 1, W - 1)
    wx = (xs - x0.astype(jnp.float32))[None, None, None, :]
    r = x[:, :, y0, :] * (1.0 - wy) + x[:, :, y1, :] * wy
    return r[:, :, :, x0] * (1.0 - wx) + r[:, :, :, x1] * wx


def fold_bn(gamma, beta, mean, var, eps=1e-5):
    scale = gamma / jnp.sqrt(var + eps)
    bias = beta - mean * scale
    return scale, bias


def decoder_block_forward(x_nchw, skip_nchw, p):
    # NCHW -> NHWC before upsample/concat so channels stay on the lane axis.
    x = jnp.transpose(x_nchw, (0, 2, 3, 1))
    x = bilinear_upsample_x2_align_corners_nhwc(x)
    if skip_nchw is not None:
        skip = jnp.transpose(skip_nchw, (0, 2, 3, 1))
        x = jnp.concatenate([x, skip], axis=-1)
    B, H, W, _ = x.shape
    y = decoder_fused_call(x, p)                     # (B, C_out, H*W)
    return y.reshape(B, -1, H, W)                    # free reshape -> NCHW


# ---------------------------------------------------------------------------
# Pure-JAX reference for validation (NCHW, lax conv).
# ---------------------------------------------------------------------------
def reference_forward(x, skip, p):
    x = bilinear_upsample_x2_align_corners_nchw(x)
    if skip is not None:
        x = jnp.concatenate([x, skip], axis=1)

    def conv_bn_relu_ref(x, w_oihw, scale, bias):
        y = jax.lax.conv_general_dilated(
            x, w_oihw, window_strides=(1, 1), padding=((1, 1), (1, 1)),
            dimension_numbers=("NCHW", "OIHW", "NCHW"))
        y = y * scale[None, :, None, None] + bias[None, :, None, None]
        return jnp.maximum(y, 0.0)

    x = conv_bn_relu_ref(x, p["w1_oihw"], p["bn1_scale"], p["bn1_bias"])
    x = conv_bn_relu_ref(x, p["w2_oihw"], p["bn2_scale"], p["bn2_bias"])

    m = jnp.mean(x, axis=(2, 3))                                     # (B, C)
    h = jnp.maximum(m @ p["fc1_wT"] + p["fc1_b"], 0.0)
    s = jax.nn.sigmoid(h @ p["fc2_wT"] + p["fc2_b"])                 # (B, C)
    chn = x * s[:, :, None, None]
    spa = jax.nn.sigmoid(jnp.einsum("bchw,c->bhw", x, p["spa_w"][:, 0]))
    return chn + x * spa[:, None, :, :]


if __name__ == "__main__":
    # DecoderBlock(in_channels=8, channels=16, out_channels=16), reduction=16.
    B, Cx, Hs, Ws = 2, 4, 8, 8            # low-res input (upsampled to 16x16)
    Cskip = 4                             # skip channels -> concat gives 8
    in_channels, channels, out_channels = Cx + Cskip, 16, 16
    reduction = 16
    cr = max(out_channels // reduction, 1)

    key = jax.random.PRNGKey(0)
    ks = jax.random.split(key, 17)

    x = jax.random.normal(ks[0], (B, Cx, Hs, Ws), jnp.float32)
    skip = jax.random.normal(ks[1], (B, Cskip, 2 * Hs, 2 * Ws), jnp.float32)

    # Conv weights (OIHW, PyTorch convention).
    w1_oihw = 0.1 * jax.random.normal(ks[2], (channels, in_channels, 3, 3), jnp.float32)
    w2_oihw = 0.1 * jax.random.normal(ks[3], (out_channels, channels, 3, 3), jnp.float32)

    # BatchNorm params (inference mode), folded to scale/bias.
    g1 = 1.0 + 0.1 * jax.random.normal(ks[4], (channels,), jnp.float32)
    be1 = 0.1 * jax.random.normal(ks[5], (channels,), jnp.float32)
    rm1 = 0.1 * jax.random.normal(ks[6], (channels,), jnp.float32)
    rv1 = 0.5 + jnp.abs(jax.random.normal(ks[7], (channels,), jnp.float32))
    g2 = 1.0 + 0.1 * jax.random.normal(ks[8], (out_channels,), jnp.float32)
    be2 = 0.1 * jax.random.normal(ks[9], (out_channels,), jnp.float32)
    rm2 = 0.1 * jax.random.normal(ks[10], (out_channels,), jnp.float32)
    rv2 = 0.5 + jnp.abs(jax.random.normal(ks[11], (out_channels,), jnp.float32))
    bn1_scale, bn1_bias = fold_bn(g1, be1, rm1, rv1)
    bn2_scale, bn2_bias = fold_bn(g2, be2, rm2, rv2)

    # SCSE params: Linear(C, C//16) -> ReLU -> Linear(C//16, C) -> Sigmoid,
    # plus Conv2d(C, 1, 1x1, bias=False).
    fc1_w = 0.2 * jax.random.normal(ks[12], (cr, out_channels), jnp.float32)
    fc1_b = 0.1 * jax.random.normal(ks[13], (cr,), jnp.float32)
    fc2_w = 0.2 * jax.random.normal(ks[14], (out_channels, cr), jnp.float32)
    fc2_b = 0.1 * jax.random.normal(ks[15], (out_channels,), jnp.float32)
    spa_w = 0.2 * jax.random.normal(ks[16], (out_channels, 1), jnp.float32)

    w1_hwio = jnp.transpose(w1_oihw, (2, 3, 1, 0))   # (3,3,Cin,C1)
    w2_hwio = jnp.transpose(w2_oihw, (2, 3, 1, 0))   # (3,3,C1,C2)
    # im2col weight layout: row = (kh*3+kw)*Cin + cin, col = cout.
    w1_mat = w1_hwio.reshape(9 * in_channels, channels)
    w2_mat = w2_hwio.reshape(9 * channels, out_channels)

    params = {
        "w1_oihw": w1_oihw, "w2_oihw": w2_oihw,
        # BN scale folded into the weight columns (inference-mode BN).
        "w1_mat_scaled": w1_mat * bn1_scale[None, :],
        "w2_mat_scaled": w2_mat * bn2_scale[None, :],
        "bn1_scale": bn1_scale, "bn1_bias": bn1_bias,
        "bn2_scale": bn2_scale, "bn2_bias": bn2_bias,
        "fc1_wT": fc1_w.T, "fc1_b": fc1_b,
        "fc2_wT": fc2_w.T, "fc2_b": fc2_b,
        "spa_w": spa_w,
    }

    out = jax.block_until_ready(decoder_block_forward(x, skip, params))
    ref = jax.block_until_ready(reference_forward(x, skip, params))

    assert out.shape == (B, out_channels, 2 * Hs, 2 * Ws), out.shape
    assert jnp.allclose(out, ref, atol=1e-3, rtol=1e-3), float(
        jnp.max(jnp.abs(out - ref)))

    print("KERNEL_OK")
</pallas_src>

<mosaic_0001>
module attributes {stable_mosaic.version = 11 : i64} {
  func.func @_decoder_block_kernel(%arg0: i32, %arg1: memref<1x16x16x8xf32, #tpu.memory_space<vmem>>, %arg2: memref<72x16xf32, #tpu.memory_space<vmem>>, %arg3: memref<1x16xf32, #tpu.memory_space<vmem>>, %arg4: memref<144x16xf32, #tpu.memory_space<vmem>>, %arg5: memref<1x16xf32, #tpu.memory_space<vmem>>, %arg6: memref<16x1xf32, #tpu.memory_space<vmem>>, %arg7: memref<1x1xf32, #tpu.memory_space<vmem>>, %arg8: memref<1x16xf32, #tpu.memory_space<vmem>>, %arg9: memref<1x16xf32, #tpu.memory_space<vmem>>, %arg10: memref<1x16xf32, #tpu.memory_space<vmem>>, %arg11: memref<1x16x256xf32, #tpu.memory_space<vmem>>, %arg12: memref<18x18x8xf32, #tpu.memory_space<vmem>>, %arg13: memref<18x18x16xf32, #tpu.memory_space<vmem>>) attributes {dimension_semantics = [#tpu.dimension_semantics<parallel>], iteration_bounds = array<i64: 2>, scalar_prefetch = 0 : i64, scratch_operands = 2 : i64, tpu.core_type = #tpu.core_type<tc>, window_params = [{transform_indices = @transform_0, window_bounds = array<i64: 1, 16, 16, 8>}, {pipeline_mode = #tpu.pipeline_mode<synchronous>, transform_indices = @transform_1, window_bounds = array<i64: 72, 16>}, {pipeline_mode = #tpu.pipeline_mode<synchronous>, transform_indices = @transform_2, window_bounds = array<i64: 1, 16>}, {pipeline_mode = #tpu.pipeline_mode<synchronous>, transform_indices = @transform_3, window_bounds = array<i64: 144, 16>}, {pipeline_mode = #tpu.pipeline_mode<synchronous>, transform_indices = @transform_4, window_bounds = array<i64: 1, 16>}, {pipeline_mode = #tpu.pipeline_mode<synchronous>, transform_indices = @transform_5, window_bounds = array<i64: 16, 1>}, {pipeline_mode = #tpu.pipeline_mode<synchronous>, transform_indices = @transform_6, window_bounds = array<i64: 1, 1>}, {pipeline_mode = #tpu.pipeline_mode<synchronous>, transform_indices = @transform_7, window_bounds = array<i64: 1, 16>}, {pipeline_mode = #tpu.pipeline_mode<synchronous>, transform_indices = @transform_8, window_bounds = array<i64: 1, 16>}, {pipeline_mode = #tpu.pipeline_mode<synchronous>, transform_indices = @transform_9, window_bounds = array<i64: 1, 16>}, {transform_indices = @transform_10, window_bounds = array<i64: 1, 16, 256>}]} {
    %c0 = arith.constant 0 : index
    %c0_0 = arith.constant 0 : index
    %c0_1 = arith.constant 0 : index
    %c0_2 = arith.constant 0 : index
    %0 = vector.load %arg1[%c0, %c0_0, %c0_1, %c0_2] : memref<1x16x16x8xf32, #tpu.memory_space<vmem>>, vector<1x16x16x8xf32>
    %1 = vector.shape_cast %0 : vector<1x16x16x8xf32> to vector<16x16x8xf32>
    %c0_3 = arith.constant 0 : index
    %c0_4 = arith.constant 0 : index
    %2 = vector.load %arg3[%c0_3, %c0_4] : memref<1x16xf32, #tpu.memory_space<vmem>>, vector<1x16xf32>
    %cst = arith.constant 0.000000e+00 : f32
    %3 = vector.broadcast %cst : f32 to vector<1x18x8xf32>
    %cst_5 = arith.constant 0.000000e+00 : f32
    %4 = vector.broadcast %cst_5 : f32 to vector<18x1x8xf32>
    %c0_6 = arith.constant 0 : index
    %c0_7 = arith.constant 0 : index
    %c0_8 = arith.constant 0 : index
    %5 = vector.load %arg12[%c0_6, %c0_7, %c0_8] : memref<18x18x8xf32, #tpu.memory_space<vmem>>, vector<1x18x8xf32>
    tpu.vector_store %arg12[%c0_6, %c0_7, %c0_8], %3 {strides = array<i32>} : memref<18x18x8xf32, #tpu.memory_space<vmem>>, vector<1x18x8xf32>,
    %c17 = arith.constant 17 : index
    %c0_9 = arith.constant 0 : index
    %c0_10 = arith.constant 0 : index
    %6 = vector.load %arg12[%c17, %c0_9, %c0_10] : memref<18x18x8xf32, #tpu.memory_space<vmem>>, vector<1x18x8xf32>
    tpu.vector_store %arg12[%c17, %c0_9, %c0_10], %3 {strides = array<i32>} : memref<18x18x8xf32, #tpu.memory_space<vmem>>, vector<1x18x8xf32>,
    %c0_11 = arith.constant 0 : index
    %c0_12 = arith.constant 0 : index
    %c0_13 = arith.constant 0 : index
    %7 = vector.load %arg12[%c0_11, %c0_12, %c0_13] : memref<18x18x8xf32, #tpu.memory_space<vmem>>, vector<18x1x8xf32>
    tpu.vector_store %arg12[%c0_11, %c0_12, %c0_13], %4 {strides = array<i32>} : memref<18x18x8xf32, #tpu.memory_space<vmem>>, vector<18x1x8xf32>,
    %c0_14 = arith.constant 0 : index
    %c17_15 = arith.constant 17 : index
    %c0_16 = arith.constant 0 : index
    %8 = vector.load %arg12[%c0_14, %c17_15, %c0_16] : memref<18x18x8xf32, #tpu.memory_space<vmem>>, vector<18x1x8xf32>
    tpu.vector_store %arg12[%c0_14, %c17_15, %c0_16], %4 {strides = array<i32>} : memref<18x18x8xf32, #tpu.memory_space<vmem>>, vector<18x1x8xf32>,
    %c1 = arith.constant 1 : index
    %c1_17 = arith.constant 1 : index
    %c0_18 = arith.constant 0 : index
    %9 = vector.load %arg12[%c1, %c1_17, %c0_18] : memref<18x18x8xf32, #tpu.memory_space<vmem>>, vector<16x16x8xf32>
    tpu.vector_store %arg12[%c1, %c1_17, %c0_18], %1 {strides = array<i32>} : memref<18x18x8xf32, #tpu.memory_space<vmem>>, vector<16x16x8xf32>,
    %cst_19 = arith.constant 0.000000e+00 : f32
    %10 = vector.broadcast %cst_19 : f32 to vector<256x16xf32>
    %c0_20 = arith.constant 0 : index
    %c0_21 = arith.constant 0 : index
    %c0_22 = arith.constant 0 : index
    %11 = vector.load %arg12[%c0_20, %c0_21, %c0_22] : memref<18x18x8xf32, #tpu.memory_space<vmem>>, vector<16x16x8xf32>
    %c0_23 = arith.constant 0 : index
    %c0_24 = arith.constant 0 : index
    %12 = vector.load %arg2[%c0_23, %c0_24] : memref<72x16xf32, #tpu.memory_space<vmem>>, vector<8x16xf32>
    %13 = vector.shape_cast %11 : vector<16x16x8xf32> to vector<256x8xf32>
    %cst_25 = arith.constant dense<0.000000e+00> : vector<256x16xf32>
    %14 = tpu.matmul %13, %12, %cst_25 {dimension_numbers = #tpu.dot_dimension_numbers<[1], [0], [0], [1], [0, 0, 1, 1], [], []>} : vector<256x8xf32>, vector<8x16xf32>, vector<256x16xf32> -> vector<256x16xf32>
    %15 = arith.addf %10, %14 : vector<256x16xf32>
    %c0_26 = arith.constant 0 : index
    %c1_27 = arith.constant 1 : index
    %c0_28 = arith.constant 0 : index
    %16 = vector.load %arg12[%c0_26, %c1_27, %c0_28] : memref<18x18x8xf32, #tpu.memory_space<vmem>>, vector<16x16x8xf32>
    %c8 = arith.constant 8 : index
    %c0_29 = arith.constant 0 : index
    %17 = vector.load %arg2[%c8, %c0_29] : memref<72x16xf32, #tpu.memory_space<vmem>>, vector<8x16xf32>
    %18 = vector.shape_cast %16 : vector<16x16x8xf32> to vector<256x8xf32>
    %cst_30 = arith.constant dense<0.000000e+00> : vector<256x16xf32>
    %19 = tpu.matmul %18, %17, %cst_30 {dimension_numbers = #tpu.dot_dimension_numbers<[1], [0], [0], [1], [0, 0, 1, 1], [], []>} : vector<256x8xf32>, vector<8x16xf32>, vector<256x16xf32> -> vector<256x16xf32>
    %20 = arith.addf %15, %19 : vector<256x16xf32>
    %c0_31 = arith.constant 0 : index
    %c2 = arith.constant 2 : index
    %c0_32 = arith.constant 0 : index
    %21 = vector.load %arg12[%c0_31, %c2, %c0_32] : memref<18x18x8xf32, #tpu.memory_space<vmem>>, vector<16x16x8xf32>
    %c16 = arith.constant 16 : index
    %c0_33 = arith.constant 0 : index
    %22 = vector.load %arg2[%c16, %c0_33] : memref<72x16xf32, #tpu.memory_space<vmem>>, vector<8x16xf32>
    %23 = vector.shape_cast %21 : vector<16x16x8xf32> to vector<256x8xf32>
    %cst_34 = arith.constant dense<0.000000e+00> : vector<256x16xf32>
    %24 = tpu.matmul %23, %22, %cst_34 {dimension_numbers = #tpu.dot_dimension_numbers<[1], [0], [0], [1], [0, 0, 1, 1], [], []>} : vector<256x8xf32>, vector<8x16xf32>, vector<256x16xf32> -> vector<256x16xf32>
    %25 = arith.addf %20, %24 : vector<256x16xf32>
    %c1_35 = arith.constant 1 : index
    %c0_36 = arith.constant 0 : index
    %c0_37 = arith.constant 0 : index
    %26 = vector.load %arg12[%c1_35, %c0_36, %c0_37] : memref<18x18x8xf32, #tpu.memory_space<vmem>>, vector<16x16x8xf32>
    %c24 = arith.constant 24 : index
    %c0_38 = arith.constant 0 : index
    %27 = vector.load %arg2[%c24, %c0_38] : memref<72x16xf32, #tpu.memory_space<vmem>>, vector<8x16xf32>
    %28 = vector.shape_cast %26 : vector<16x16x8xf32> to vector<256x8xf32>
    %cst_39 = arith.constant dense<0.000000e+00> : vector<256x16xf32>
    %29 = tpu.matmul %28, %27, %cst_39 {dimension_numbers = #tpu.dot_dimension_numbers<[1], [0], [0], [1], [0, 0, 1, 1], [], []>} : vector<256x8xf32>, vector<8x16xf32>, vector<256x16xf32> -> vector<256x16xf32>
    %30 = arith.addf %25, %29 : vector<256x16xf32>
    %c1_40 = arith.constant 1 : index
    %c1_41 = arith.constant 1 : index
    %c0_42 = arith.constant 0 : index
    %31 = vector.load %arg12[%c1_40, %c1_41, %c0_42] : memref<18x18x8xf32, #tpu.memory_space<vmem>>, vector<16x16x8xf32>
    %c32 = arith.constant 32 : index
    %c0_43 = arith.constant 0 : index
    %32 = vector.load %arg2[%c32, %c0_43] : memref<72x16xf32, #tpu.memory_space<vmem>>, vector<8x16xf32>
    %33 = vector.shape_cast %31 : vector<16x16x8xf32> to vector<256x8xf32>
    %cst_44 = arith.constant dense<0.000000e+00> : vector<256x16xf32>
    %34 = tpu.matmul %33, %32, %cst_44 {dimension_numbers = #tpu.dot_dimension_numbers<[1], [0], [0], [1], [0, 0, 1, 1], [], []>} : vector<256x8xf32>, vector<8x16xf32>, vector<256x16xf32> -> vector<256x16xf32>
    %35 = arith.addf %30, %34 : vector<256x16xf32>
    %c1_45 = arith.constant 1 : index
    %c2_46 = arith.constant 2 : index
    %c0_47 = arith.constant 0 : index
    %36 = vector.load %arg12[%c1_45, %c2_46, %c0_47] : memref<18x18x8xf32, #tpu.memory_space<vmem>>, vector<16x16x8xf32>
    %c40 = arith.constant 40 : index
    %c0_48 = arith.constant 0 : index
    %37 = vector.load %arg2[%c40, %c0_48] : memref<72x16xf32, #tpu.memory_space<vmem>>, vector<8x16xf32>
    %38 = vector.shape_cast %36 : vector<16x16x8xf32> to vector<256x8xf32>
    %cst_49 = arith.constant dense<0.000000e+00> : vector<256x16xf32>
    %39 = tpu.matmul %38, %37, %cst_49 {dimension_numbers = #tpu.dot_dimension_numbers<[1], [0], [0], [1], [0, 0, 1, 1], [], []>} : vector<256x8xf32>, vector<8x16xf32>, vector<256x16xf32> -> vector<256x16xf32>
    %40 = arith.addf %35, %39 : vector<256x16xf32>
    %c2_50 = arith.constant 2 : index
    %c0_51 = arith.constant 0 : index
    %c0_52 = arith.constant 0 : index
    %41 = vector.load %arg12[%c2_50, %c0_51, %c0_52] : memref<18x18x8xf32, #tpu.memory_space<vmem>>, vector<16x16x8xf32>
    %c48 = arith.constant 48 : index
    %c0_53 = arith.constant 0 : index
    %42 = vector.load %arg2[%c48, %c0_53] : memref<72x16xf32, #tpu.memory_space<vmem>>, vector<8x16xf32>
    %43 = vector.shape_cast %41 : vector<16x16x8xf32> to vector<256x8xf32>
    %cst_54 = arith.constant dense<0.000000e+00> : vector<256x16xf32>
    %44 = tpu.matmul %43, %42, %cst_54 {dimension_numbers = #tpu.dot_dimension_numbers<[1], [0], [0], [1], [0, 0, 1, 1], [], []>} : vector<256x8xf32>, vector<8x16xf32>, vector<256x16xf32> -> vector<256x16xf32>
    %45 = arith.addf %40, %44 : vector<256x16xf32>
    %c2_55 = arith.constant 2 : index
    %c1_56 = arith.constant 1 : index
    %c0_57 = arith.constant 0 : index
    %46 = vector.load %arg12[%c2_55, %c1_56, %c0_57] : memref<18x18x8xf32, #tpu.memory_space<vmem>>, vector<16x16x8xf32>
    %c56 = arith.constant 56 : index
    %c0_58 = arith.constant 0 : index
    %47 = vector.load %arg2[%c56, %c0_58] : memref<72x16xf32, #tpu.memory_space<vmem>>, vector<8x16xf32>
    %48 = vector.shape_cast %46 : vector<16x16x8xf32> to vector<256x8xf32>
    %cst_59 = arith.constant dense<0.000000e+00> : vector<256x16xf32>
    %49 = tpu.matmul %48, %47, %cst_59 {dimension_numbers = #tpu.dot_dimension_numbers<[1], [0], [0], [1], [0, 0, 1, 1], [], []>} : vector<256x8xf32>, vector<8x16xf32>, vector<256x16xf32> -> vector<256x16xf32>
    %50 = arith.addf %45, %49 : vector<256x16xf32>
    %c2_60 = arith.constant 2 : index
    %c2_61 = arith.constant 2 : index
    %c0_62 = arith.constant 0 : index
    %51 = vector.load %arg12[%c2_60, %c2_61, %c0_62] : memref<18x18x8xf32, #tpu.memory_space<vmem>>, vector<16x16x8xf32>
    %c64 = arith.constant 64 : index
    %c0_63 = arith.constant 0 : index
    %52 = vector.load %arg2[%c64, %c0_63] : memref<72x16xf32, #tpu.memory_space<vmem>>, vector<8x16xf32>
    %53 = vector.shape_cast %51 : vector<16x16x8xf32> to vector<256x8xf32>
    %cst_64 = arith.constant dense<0.000000e+00> : vector<256x16xf32>
    %54 = tpu.matmul %53, %52, %cst_64 {dimension_numbers = #tpu.dot_dimension_numbers<[1], [0], [0], [1], [0, 0, 1, 1], [], []>} : vector<256x8xf32>, vector<8x16xf32>, vector<256x16xf32> -> vector<256x16xf32>
    %55 = arith.addf %50, %54 : vector<256x16xf32>
    %56 = vector.broadcast %2 : vector<1x16xf32> to vector<256x16xf32>
    %57 = arith.addf %55, %56 : vector<256x16xf32>
    %cst_65 = arith.constant 0.000000e+00 : f32
    %58 = vector.broadcast %cst_65 : f32 to vector<256x16xf32>
    %59 = arith.maximumf %57, %58 : vector<256x16xf32>
    %60 = vector.shape_cast %59 : vector<256x16xf32> to vector<16x16x16xf32>
    %c0_66 = arith.constant 0 : index
    %c0_67 = arith.constant 0 : index
    %61 = vector.load %arg5[%c0_66, %c0_67] : memref<1x16xf32, #tpu.memory_space<vmem>>, vector<1x16xf32>
    %cst_68 = arith.constant 0.000000e+00 : f32
    %62 = vector.broadcast %cst_68 : f32 to vector<1x18x16xf32>
    %cst_69 = arith.constant 0.000000e+00 : f32
    %63 = vector.broadcast %cst_69 : f32 to vector<18x1x16xf32>
    %c0_70 = arith.constant 0 : index
    %c0_71 = arith.constant 0 : index
    %c0_72 = arith.constant 0 : index
    %64 = vector.load %arg13[%c0_70, %c0_71, %c0_72] : memref<18x18x16xf32, #tpu.memory_space<vmem>>, vector<1x18x16xf32>
    tpu.vector_store %arg13[%c0_70, %c0_71, %c0_72], %62 {strides = array<i32>} : memref<18x18x16xf32, #tpu.memory_space<vmem>>, vector<1x18x16xf32>,
    %c17_73 = arith.constant 17 : index
    %c0_74 = arith.constant 0 : index
    %c0_75 = arith.constant 0 : index
    %65 = vector.load %arg13[%c17_73, %c0_74, %c0_75] : memref<18x18x16xf32, #tpu.memory_space<vmem>>, vector<1x18x16xf32>
    tpu.vector_store %arg13[%c17_73, %c0_74, %c0_75], %62 {strides = array<i32>} : memref<18x18x16xf32, #tpu.memory_space<vmem>>, vector<1x18x16xf32>,
    %c0_76 = arith.constant 0 : index
    %c0_77 = arith.constant 0 : index
    %c0_78 = arith.constant 0 : index
    %66 = vector.load %arg13[%c0_76, %c0_77, %c0_78] : memref<18x18x16xf32, #tpu.memory_space<vmem>>, vector<18x1x16xf32>
    tpu.vector_store %arg13[%c0_76, %c0_77, %c0_78], %63 {strides = array<i32>} : memref<18x18x16xf32, #tpu.memory_space<vmem>>, vector<18x1x16xf32>,
    %c0_79 = arith.constant 0 : index
    %c17_80 = arith.constant 17 : index
    %c0_81 = arith.constant 0 : index
    %67 = vector.load %arg13[%c0_79, %c17_80, %c0_81] : memref<18x18x16xf32, #tpu.memory_space<vmem>>, vector<18x1x16xf32>
    tpu.vector_store %arg13[%c0_79, %c17_80, %c0_81], %63 {strides = array<i32>} : memref<18x18x16xf32, #tpu.memory_space<vmem>>, vector<18x1x16xf32>,
    %c1_82 = arith.constant 1 : index
    %c1_83 = arith.constant 1 : index
    %c0_84 = arith.constant 0 : index
    %68 = vector.load %arg13[%c1_82, %c1_83, %c0_84] : memref<18x18x16xf32, #tpu.memory_space<vmem>>, vector<16x16x16xf32>
    tpu.vector_store %arg13[%c1_82, %c1_83, %c0_84], %60 {strides = array<i32>} : memref<18x18x16xf32, #tpu.memory_space<vmem>>, vector<16x16x16xf32>,
    %cst_85 = arith.constant 0.000000e+00 : f32
    %69 = vector.broadcast %cst_85 : f32 to vector<256x16xf32>
    %c0_86 = arith.constant 0 : index
    %c0_87 = arith.constant 0 : index
    %c0_88 = arith.constant 0 : index
    %70 = vector.load %arg13[%c0_86, %c0_87, %c0_88] : memref<18x18x16xf32, #tpu.memory_space<vmem>>, vector<16x16x16xf32>
    %c0_89 = arith.constant 0 : index
    %c0_90 = arith.constant 0 : index
    %71 = vector.load %arg4[%c0_89, %c0_90] : memref<144x16xf32, #tpu.memory_space<vmem>>, vector<16x16xf32>
    %72 = vector.shape_cast %70 : vector<16x16x16xf32> to vector<256x16xf32>
    %cst_91 = arith.constant dense<0.000000e+00> : vector<256x16xf32>
    %73 = tpu.matmul %72, %71, %cst_91 {dimension_numbers = #tpu.dot_dimension_numbers<[1], [0], [0], [1], [0, 0, 1, 1], [], []>} : vector<256x16xf32>, vector<16x16xf32>, vector<256x16xf32> -> vector<256x16xf32>
    %74 = arith.addf %69, %73 : vector<256x16xf32>
    %c0_92 = arith.constant 0 : index
    %c1_93 = arith.constant 1 : index
    %c0_94 = arith.constant 0 : index
    %75 = vector.load %arg13[%c0_92, %c1_93, %c0_94] : memref<18x18x16xf32, #tpu.memory_space<vmem>>, vector<16x16x16xf32>
    %c16_95 = arith.constant 16 : index
    %c0_96 = arith.constant 0 : index
    %76 = vector.load %arg4[%c16_95, %c0_96] : memref<144x16xf32, #tpu.memory_space<vmem>>, vector<16x16xf32>
    %77 = vector.shape_cast %75 : vector<16x16x16xf32> to vector<256x16xf32>
    %cst_97 = arith.constant dense<0.000000e+00> : vector<256x16xf32>
    %78 = tpu.matmul %77, %76, %cst_97 {dimension_numbers = #tpu.dot_dimension_numbers<[1], [0], [0], [1], [0, 0, 1, 1], [], []>} : vector<256x16xf32>, vector<16x16xf32>, vector<256x16xf32> -> vector<256x16xf32>
    %79 = arith.addf %74, %78 : vector<256x16xf32>
    %c0_98 = arith.constant 0 : index
    %c2_99 = arith.constant 2 : index
    %c0_100 = arith.constant 0 : index
    %80 = vector.load %arg13[%c0_98, %c2_99, %c0_100] : memref<18x18x16xf32, #tpu.memory_space<vmem>>, vector<16x16x16xf32>
    %c32_101 = arith.constant 32 : index
    %c0_102 = arith.constant 0 : index
    %81 = vector.load %arg4[%c32_101, %c0_102] : memref<144x16xf32, #tpu.memory_space<vmem>>, vector<16x16xf32>
    %82 = vector.shape_cast %80 : vector<16x16x16xf32> to vector<256x16xf32>
    %cst_103 = arith.constant dense<0.000000e+00> : vector<256x16xf32>
    %83 = tpu.matmul %82, %81, %cst_103 {dimension_numbers = #tpu.dot_dimension_numbers<[1], [0], [0], [1], [0, 0, 1, 1], [], []>} : vector<256x16xf32>, vector<16x16xf32>, vector<256x16xf32> -> vector<256x16xf32>
    %84 = arith.addf %79, %83 : vector<256x16xf32>
    %c1_104 = arith.constant 1 : index
    %c0_105 = arith.constant 0 : index
    %c0_106 = arith.constant 0 : index
    %85 = vector.load %arg13[%c1_104, %c0_105, %c0_106] : memref<18x18x16xf32, #tpu.memory_space<vmem>>, vector<16x16x16xf32>
    %c48_107 = arith.constant 48 : index
    %c0_108 = arith.constant 0 : index
    %86 = vector.load %arg4[%c48_107, %c0_108] : memref<144x16xf32, #tpu.memory_space<vmem>>, vector<16x16xf32>
    %87 = vector.shape_cast %85 : vector<16x16x16xf32> to vector<256x16xf32>
    %cst_109 = arith.constant dense<0.000000e+00> : vector<256x16xf32>
    %88 = tpu.matmul %87, %86, %cst_109 {dimension_numbers = #tpu.dot_dimension_numbers<[1], [0], [0], [1], [0, 0, 1, 1], [], []>} : vector<256x16xf32>, vector<16x16xf32>, vector<256x16xf32> -> vector<256x16xf32>
    %89 = arith.addf %84, %88 : vector<256x16xf32>
    %c1_110 = arith.constant 1 : index
    %c1_111 = arith.constant 1 : index
    %c0_112 = arith.constant 0 : index
    %90 = vector.load %arg13[%c1_110, %c1_111, %c0_112] : memref<18x18x16xf32, #tpu.memory_space<vmem>>, vector<16x16x16xf32>
    %c64_113 = arith.constant 64 : index
    %c0_114 = arith.constant 0 : index
    %91 = vector.load %arg4[%c64_113, %c0_114] : memref<144x16xf32, #tpu.memory_space<vmem>>, vector<16x16xf32>
    %92 = vector.shape_cast %90 : vector<16x16x16xf32> to vector<256x16xf32>
    %cst_115 = arith.constant dense<0.000000e+00> : vector<256x16xf32>
    %93 = tpu.matmul %92, %91, %cst_115 {dimension_numbers = #tpu.dot_dimension_numbers<[1], [0], [0], [1], [0, 0, 1, 1], [], []>} : vector<256x16xf32>, vector<16x16xf32>, vector<256x16xf32> -> vector<256x16xf32>
    %94 = arith.addf %89, %93 : vector<256x16xf32>
    %c1_116 = arith.constant 1 : index
    %c2_117 = arith.constant 2 : index
    %c0_118 = arith.constant 0 : index
    %95 = vector.load %arg13[%c1_116, %c2_117, %c0_118] : memref<18x18x16xf32, #tpu.memory_space<vmem>>, vector<16x16x16xf32>
    %c80 = arith.constant 80 : index
    %c0_119 = arith.constant 0 : index
    %96 = vector.load %arg4[%c80, %c0_119] : memref<144x16xf32, #tpu.memory_space<vmem>>, vector<16x16xf32>
    %97 = vector.shape_cast %95 : vector<16x16x16xf32> to vector<256x16xf32>
    %cst_120 = arith.constant dense<0.000000e+00> : vector<256x16xf32>
    %98 = tpu.matmul %97, %96, %cst_120 {dimension_numbers = #tpu.dot_dimension_numbers<[1], [0], [0], [1], [0, 0, 1, 1], [], []>} : vector<256x16xf32>, vector<16x16xf32>, vector<256x16xf32> -> vector<256x16xf32>
    %99 = arith.addf %94, %98 : vector<256x16xf32>
    %c2_121 = arith.constant 2 : index
    %c0_122 = arith.constant 0 : index
    %c0_123 = arith.constant 0 : index
    %100 = vector.load %arg13[%c2_121, %c0_122, %c0_123] : memref<18x18x16xf32, #tpu.memory_space<vmem>>, vector<16x16x16xf32>
    %c96 = arith.constant 96 : index
    %c0_124 = arith.constant 0 : index
    %101 = vector.load %arg4[%c96, %c0_124] : memref<144x16xf32, #tpu.memory_space<vmem>>, vector<16x16xf32>
    %102 = vector.shape_cast %100 : vector<16x16x16xf32> to vector<256x16xf32>
    %cst_125 = arith.constant dense<0.000000e+00> : vector<256x16xf32>
    %103 = tpu.matmul %102, %101, %cst_125 {dimension_numbers = #tpu.dot_dimension_numbers<[1], [0], [0], [1], [0, 0, 1, 1], [], []>} : vector<256x16xf32>, vector<16x16xf32>, vector<256x16xf32> -> vector<256x16xf32>
    %104 = arith.addf %99, %103 : vector<256x16xf32>
    %c2_126 = arith.constant 2 : index
    %c1_127 = arith.constant 1 : index
    %c0_128 = arith.constant 0 : index
    %105 = vector.load %arg13[%c2_126, %c1_127, %c0_128] : memref<18x18x16xf32, #tpu.memory_space<vmem>>, vector<16x16x16xf32>
    %c112 = arith.constant 112 : index
    %c0_129 = arith.constant 0 : index
    %106 = vector.load %arg4[%c112, %c0_129] : memref<144x16xf32, #tpu.memory_space<vmem>>, vector<16x16xf32>
    %107 = vector.shape_cast %105 : vector<16x16x16xf32> to vector<256x16xf32>
    %cst_130 = arith.constant dense<0.000000e+00> : vector<256x16xf32>
    %108 = tpu.matmul %107, %106, %cst_130 {dimension_numbers = #tpu.dot_dimension_numbers<[1], [0], [0], [1], [0, 0, 1, 1], [], []>} : vector<256x16xf32>, vector<16x16xf32>, vector<256x16xf32> -> vector<256x16xf32>
    %109 = arith.addf %104, %108 : vector<256x16xf32>
    %c2_131 = arith.constant 2 : index
    %c2_132 = arith.constant 2 : index
    %c0_133 = arith.constant 0 : index
    %110 = vector.load %arg13[%c2_131, %c2_132, %c0_133] : memref<18x18x16xf32, #tpu.memory_space<vmem>>, vector<16x16x16xf32>
    %c128 = arith.constant 128 : index
    %c0_134 = arith.constant 0 : index
    %111 = vector.load %arg4[%c128, %c0_134] : memref<144x16xf32, #tpu.memory_space<vmem>>, vector<16x16xf32>
    %112 = vector.shape_cast %110 : vector<16x16x16xf32> to vector<256x16xf32>
    %cst_135 = arith.constant dense<0.000000e+00> : vector<256x16xf32>
    %113 = tpu.matmul %112, %111, %cst_135 {dimension_numbers = #tpu.dot_dimension_numbers<[1], [0], [0], [1], [0, 0, 1, 1], [], []>} : vector<256x16xf32>, vector<16x16xf32>, vector<256x16xf32> -> vector<256x16xf32>
    %114 = arith.addf %109, %113 : vector<256x16xf32>
    %115 = vector.broadcast %61 : vector<1x16xf32> to vector<256x16xf32>
    %116 = arith.addf %114, %115 : vector<256x16xf32>
    %cst_136 = arith.constant 0.000000e+00 : f32
    %117 = vector.broadcast %cst_136 : f32 to vector<256x16xf32>
    %118 = arith.maximumf %116, %117 : vector<256x16xf32>
    %cst_137 = arith.constant dense<0.000000e+00> : vector<16xf32>
    %119 = vector.multi_reduction <add>, %118, %cst_137 [0] : vector<256x16xf32> to vector<16xf32>
    %120 = vector.shape_cast %119 : vector<16xf32> to vector<1x16xf32>
    %cst_138 = arith.constant 3.906250e-03 : f32
    %121 = vector.broadcast %cst_138 : f32 to vector<1x16xf32>
    %122 = arith.mulf %120, %121 : vector<1x16xf32>
    %c0_139 = arith.constant 0 : index
    %c0_140 = arith.constant 0 : index
    %123 = vector.load %arg6[%c0_139, %c0_140] : memref<16x1xf32, #tpu.memory_space<vmem>>, vector<16x1xf32>
    %cst_141 = arith.constant dense<0.000000e+00> : vector<1x1xf32>
    %124 = tpu.matmul %122, %123, %cst_141 {dimension_numbers = #tpu.dot_dimension_numbers<[1], [0], [0], [1], [0, 0, 1, 1], [], []>} : vector<1x16xf32>, vector<16x1xf32>, vector<1x1xf32> -> vector<1x1xf32>
    %c0_142 = arith.constant 0 : index
    %c0_143 = arith.constant 0 : index
    %125 = vector.load %arg7[%c0_142, %c0_143] : memref<1x1xf32, #tpu.memory_space<vmem>>, vector<1x1xf32>
    %126 = arith.addf %124, %125 : vector<1x1xf32>
    %cst_144 = arith.constant 0.000000e+00 : f32
    %127 = vector.broadcast %cst_144 : f32 to vector<1x1xf32>
    %128 = arith.maximumf %126, %127 : vector<1x1xf32>
    %c0_145 = arith.constant 0 : index
    %c0_146 = arith.constant 0 : index
    %129 = vector.load %arg8[%c0_145, %c0_146] : memref<1x16xf32, #tpu.memory_space<vmem>>, vector<1x16xf32>
    %cst_147 = arith.constant dense<0.000000e+00> : vector<1x16xf32>
    %130 = tpu.matmul %128, %129, %cst_147 {dimension_numbers = #tpu.dot_dimension_numbers<[1], [0], [0], [1], [0, 0, 1, 1], [], []>} : vector<1x1xf32>, vector<1x16xf32>, vector<1x16xf32> -> vector<1x16xf32>
    %c0_148 = arith.constant 0 : index
    %c0_149 = arith.constant 0 : index
    %131 = vector.load %arg9[%c0_148, %c0_149] : memref<1x16xf32, #tpu.memory_space<vmem>>, vector<1x16xf32>
    %132 = arith.addf %130, %131 : vector<1x16xf32>
    %133 = arith.negf %132 : vector<1x16xf32>
    %134 = math.exp %133 : vector<1x16xf32>
    %cst_150 = arith.constant 1.000000e+00 : f32
    %135 = vector.broadcast %cst_150 : f32 to vector<1x16xf32>
    %136 = arith.addf %135, %134 : vector<1x16xf32>
    %137 = arith.divf %135, %136 : vector<1x16xf32>
    %c0_151 = arith.constant 0 : index
    %c0_152 = arith.constant 0 : index
    %138 = vector.load %arg10[%c0_151, %c0_152] : memref<1x16xf32, #tpu.memory_space<vmem>>, vector<1x16xf32>
    %139 = vector.broadcast %138 : vector<1x16xf32> to vector<256x16xf32>
    %140 = arith.mulf %118, %139 : vector<256x16xf32>
    %cst_153 = arith.constant dense<0.000000e+00> : vector<256xf32>
    %141 = vector.multi_reduction <add>, %140, %cst_153 [1] : vector<256x16xf32> to vector<256xf32>
    %142 = vector.shape_cast %141 : vector<256xf32> to vector<256x1xf32>
    %143 = arith.negf %142 : vector<256x1xf32>
    %144 = math.exp %143 : vector<256x1xf32>
    %cst_154 = arith.constant 1.000000e+00 : f32
    %145 = vector.broadcast %cst_154 : f32 to vector<256x1xf32>
    %146 = arith.addf %145, %144 : vector<256x1xf32>
    %147 = arith.divf %145, %146 : vector<256x1xf32>
    %148 = vector.broadcast %137 : vector<1x16xf32> to vector<256x16xf32>
    %149 = arith.mulf %118, %148 : vector<256x16xf32>
    %150 = vector.broadcast %147 : vector<256x1xf32> to vector<256x16xf32>
    %151 = arith.mulf %118, %150 : vector<256x16xf32>
    %152 = arith.addf %149, %151 : vector<256x16xf32>
    %153 = tpu.transpose %152, [1, 0] : vector<256x16xf32> -> vector<16x256xf32>
    %c0_155 = arith.constant 0 : index
    %c0_156 = arith.constant 0 : index
    %c0_157 = arith.constant 0 : index
    %154 = vector.load %arg11[%c0_155, %c0_156, %c0_157] : memref<1x16x256xf32, #tpu.memory_space<vmem>>, vector<1x16x256xf32>
    %155 = vector.shape_cast %154 : vector<1x16x256xf32> to vector<16x256xf32>
    %156 = vector.shape_cast %153 : vector<16x256xf32> to vector<1x16x256xf32>
    tpu.vector_store %arg11[%c0_155, %c0_156, %c0_157], %156 {strides = array<i32>} : memref<1x16x256xf32, #tpu.memory_space<vmem>>, vector<1x16x256xf32>,
    return
  }
  func.func @transform_0(%arg0: i32) -> (i32, i32, i32, i32) {
    %c0_i32 = arith.constant 0 : i32
    %c0_i32_0 = arith.constant 0 : i32
    %c0_i32_1 = arith.constant 0 : i32
    %c0_i32_2 = arith.constant 0 : i32
    return %arg0, %c0_i32, %c0_i32_0, %c0_i32_1 : i32, i32, i32, i32
  }
  func.func @transform_1(%arg0: i32) -> (i32, i32) {
    %c0_i32 = arith.constant 0 : i32
    %c0_i32_0 = arith.constant 0 : i32
    %c0_i32_1 = arith.constant 0 : i32
    return %c0_i32, %c0_i32_0 : i32, i32
  }
  func.func @transform_2(%arg0: i32) -> (i32, i32) {
    %c0_i32 = arith.constant 0 : i32
    %c0_i32_0 = arith.constant 0 : i32
    %c0_i32_1 = arith.constant 0 : i32
    return %c0_i32, %c0_i32_0 : i32, i32
  }
  func.func @transform_3(%arg0: i32) -> (i32, i32) {
    %c0_i32 = arith.constant 0 : i32
    %c0_i32_0 = arith.constant 0 : i32
    %c0_i32_1 = arith.constant 0 : i32
    return %c0_i32, %c0_i32_0 : i32, i32
  }
  func.func @transform_4(%arg0: i32) -> (i32, i32) {
    %c0_i32 = arith.constant 0 : i32
    %c0_i32_0 = arith.constant 0 : i32
    %c0_i32_1 = arith.constant 0 : i32
    return %c0_i32, %c0_i32_0 : i32, i32
  }
  func.func @transform_5(%arg0: i32) -> (i32, i32) {
    %c0_i32 = arith.constant 0 : i32
    %c0_i32_0 = arith.constant 0 : i32
    %c0_i32_1 = arith.constant 0 : i32
    return %c0_i32, %c0_i32_0 : i32, i32
  }
  func.func @transform_6(%arg0: i32) -> (i32, i32) {
    %c0_i32 = arith.constant 0 : i32
    %c0_i32_0 = arith.constant 0 : i32
    %c0_i32_1 = arith.constant 0 : i32
    return %c0_i32, %c0_i32_0 : i32, i32
  }
  func.func @transform_7(%arg0: i32) -> (i32, i32) {
    %c0_i32 = arith.constant 0 : i32
    %c0_i32_0 = arith.constant 0 : i32
    %c0_i32_1 = arith.constant 0 : i32
    return %c0_i32, %c0_i32_0 : i32, i32
  }
  func.func @transform_8(%arg0: i32) -> (i32, i32) {
    %c0_i32 = arith.constant 0 : i32
    %c0_i32_0 = arith.constant 0 : i32
    %c0_i32_1 = arith.constant 0 : i32
    return %c0_i32, %c0_i32_0 : i32, i32
  }
  func.func @transform_9(%arg0: i32) -> (i32, i32) {
    %c0_i32 = arith.constant 0 : i32
    %c0_i32_0 = arith.constant 0 : i32
    %c0_i32_1 = arith.constant 0 : i32
    return %c0_i32, %c0_i32_0 : i32, i32
  }
  func.func @transform_10(%arg0: i32) -> (i32, i32, i32) {
    %c0_i32 = arith.constant 0 : i32
    %c0_i32_0 = arith.constant 0 : i32
    %c0_i32_1 = arith.constant 0 : i32
    return %arg0, %c0_i32, %c0_i32_0 : i32, i32, i32
  }
}

</mosaic_0001>

<bundles_post_ra>
// kernel: tpu_custom_call.1
= control target key start
LH: loop header
LB: loop body
LE: loop exit
PB: predicated region body
PF: predicated region fallthrough
CT: control target
= control target key end

     0   :  { %s11478_s0 = inlined_call_operand.vmem [shape: f32[2,16,16,8], index: 0, kind: input, shape index: {}]   ;;  %s11479_s1 = inlined_call_operand.vmem [shape: f32[72,16], index: 1, kind: input, shape index: {}]   ;;  %s11480_s2 = inlined_call_operand.vmem [shape: f32[1,16], index: 2, kind: input, shape index: {}]   ;;  %s11481_s3 = inlined_call_operand.vmem [shape: f32[144,16], index: 3, kind: input, shape index: {}]   ;;  %s11482_s4 = inlined_call_operand.vmem [shape: f32[1,16], index: 4, kind: input, shape index: {}]   ;;  %s11483_s5 = inlined_call_operand.vmem [shape: f32[16,1], index: 5, kind: input, shape index: {}]   ;;  %s11484_s6 = inlined_call_operand.<no memory space> [shape: f32[1,1], index: 6, kind: input, shape index: {}]   ;;  %s11485_s7 = inlined_call_operand.vmem [shape: f32[1,16], index: 7, kind: input, shape index: {}]   ;;  %s11486_s8 = inlined_call_operand.vmem [shape: f32[1,16], index: 8, kind: input, shape index: {}]   ;;  %s11487_s9 = inlined_call_operand.vmem [shape: f32[1,16], index: 9, kind: input, shape index: {}]   ;;  %s11488_s10 = inlined_call_operand.hbm [shape: f32[2,16,256], index: 10, kind: output, shape index: {}]  }
   0x1   :  { %11598 = sst [smem:[#allocation91_spill]] %s11478_s0  ;;  %v15_v0 = vstv %s11484_s6 }
   0x2   :  { %16 = vst [vmem:[#allocation4] sm:$0x1] %v15_v0 }
   0x3   :  { %17 = vsyncpa [#allocation6], 0 }
   0x4   :  { %19 = vsyncpa [#allocation6 + $0x1], 0  ;;  %s7563_s15 = smov 0   ;;  %s7565_s16 = smov 0  }
   0x5   :  { %s7567_s17 = smov 0   ;;  %s7569_s18 = smov 0  }
   0x6 LB: > { %s7584_s6 = sadd.s32 4294967295, %s7500_s18   ;;  %s6630_s19 = sadd.s32 4294967294, %s7500_s18   ;;  %s7500_s18 = sphi %s7569_s18, %s12098_s18   ;;  %s7496_s17 = sphi %s7567_s17, %s12097_s17   ;;  %s7492_s16 = sphi %s7565_s16, %s12096_s16   ;;  %s7488_s15 = sphi %s7563_s15, %s12095_s15  }
   0x7   : > { %s7588_s20 = sadd.s32 1, %s7500_s18   ;;  %s247_s21 = sadd.s32 1, %s7496_s17 }
   0x8   : > { %s244_s22 = ssub.s32 %s7500_s18, %s7588_s20  ;;  %p257_p0 = scmp.ne.s32.totalorder %s7496_s17, %s7492_s16 }
   0x9   : > { %p245_p1 = scmp.eq.s32.totalorder %s244_s22, 0  ;;  %p258_p2 = scmp.eq.s32.totalorder %s7584_s6, 1 }
   0xa   : > { %p263_p3 = scmp.ne.s32.totalorder %s7492_s16, %s7488_s15  ;;  %p264_p4 = scmp.eq.s32.totalorder %s6630_s19, 1 }
   0xb   : > { %s7599_s23 = scalar_select %p245_p1, %s7496_s17, %s247_s21  }
   0xc   : > { %p7601_p5 = por %p258_p2, %p257_p0  ;;  %p7605_p6 = por %p264_p4, %p263_p3 }
   0xd   : > { %p6633_p7 = scmp.ge.s32.totalorder %s7500_s18, 1  ;;  %p317_p8 = scmp.lt.s32.totalorder %s7500_s18, 3 }
   0xf   : > { %p318_p9 = pnand %p6633_p7, %p317_p8 }
  0x11   : > { %321 = sbr.rel (%p318_p9) target bundleno = 1970 (0x7b2), region = 60 }
  0x16   : > { %v537_v1 = vld [vmem:[%s11479_s1 + $0x8] sm:$0xff]  ;;  %vm393_vm0 = vcmask 64512   ;;  %v504_v2 = vld [vmem:[%s11479_s1] sm:$0xff]  ;;  %v11489_v4 = vmov 0.0   ;;  %vm402_vm1 = vcmask 57344   ;;  %v988_v7 = vld [vmem:[%s11479_s1 + $0x10] sm:$0xff] }
  0x17   : > { %v1536_v3 = vld [vmem:[%s11479_s1 + $0x20] sm:$0xff]  ;;  %649 = vmatpush.msra.mxu0 %v537_v1  ;;  %394 = vst.msk [vmem:[#allocation2] sm:$0xff] %vm393_vm0, %v11489_v4  ;;  %858 = vmatpush.msra.mxu1 %v504_v2  ;;  %v1262_v8 = vld [vmem:[%s11479_s1 + $0x18] sm:$0xff]  ;;  %p355_p10 = scmp.lt.s32.totalorder %s7584_s6, 1  ;;  %s11601_s0 = sld [smem:[#allocation91_spill]]  ;;  %vm396_vm2 = vcmask 58368  }
  0x18   : > { %395 = vst.msk [vmem:[#allocation2 + $0x8] sm:$0xff] %vm393_vm0, %v11489_v4  ;;  %7256 = vmatpush.msra.mxu2 %v537_v1  ;;  %7257 = vmatpush.msra.mxu3 %v504_v2  ;;  %vm2943_vm3 = vcmask 130048   ;;  %vm2946_vm4 = vcmask 123904   ;;  %vm2952_vm5 = vcmask 122880   ;;  %vm5604_vm6 = vcmask 1040384   ;;  %s352_s13 = sand.u32 1, %s7492_s16  }
  0x19   : > { %1648 = vmatpush.msrb.mxu0 %v1536_v3  ;;  %399 = vst.msk [vmem:[#allocation2 + $0x198] sm:$0xff] %vm393_vm0, %v11489_v4  ;;  %s356_s21 = scalar_select %p355_p10, %s7584_s6, 1  ;;  %vm5600_vm7 = vcmask 7168  }
  0x1a   : > { %400 = vst.msk [vmem:[#allocation2 + $0x1a0] sm:$0xff] %vm393_vm0, %v11489_v4  ;;  %1100 = vmatpush.msrb.mxu2 %v988_v7  ;;  %1374 = vmatpush.msrb.mxu3 %v1262_v8  ;;  %s6634_s14 = sshll.u32 %s352_s13, 5  ;;  %s6553_s30 = scalar_lea.sflag [#allocation6], %s352_s13 }
  0x1b   : > { %403 = vst.msk [vmem:[#allocation2] sm:$0x1] %vm402_vm1, %v11489_v4  ;;  %s7254_s22 = sshll.u32 %s356_s21, 8  ;;  %s354_s19 = scalar_lea.vmem [#allocation5], %s6634_s14 }
  0x1c   : > { %404 = vst.msk [vmem:[#allocation2 + $0x18] sm:$0x1] %vm402_vm1, %v11489_v4  ;;  %s7255_s21 = sshll.u32 %s7584_s6, 5 }
  0x1d   : > { %405 = vst.msk [vmem:[#allocation2 + $0x30] sm:$0x1] %vm402_vm1, %v11489_v4  ;;  %s7700_s28 = scalar_lea.vmem %s11601_s0, %s7254_s22  ;;  %s6564_s27 = scalar_lea.hbm %s11488_s10, %s7255_s21 }
  0x1e   : > { %406 = vst.msk [vmem:[#allocation2 + $0x48] sm:$0x1] %vm402_vm1, %v11489_v4  ;;  %v375_v10 = vld [vmem:[%s7700_s28 + $0x78] sm:$0xff]  ;;  %v374_v11 = vld [vmem:[%s7700_s28 + $0x70] sm:$0xff]  ;;  %v376_v12 = vld [vmem:[%s7700_s28 + $0x80] sm:$0xff]  ;;  %s6567_s29 = sshll.u32 %s6564_s27, 4  ;;  %s6568_s29 = int_to_ptr.hbm [resolvable:$true] %s6567_s29 }
  0x1f   : > { %v505_v5 = vld [vmem:[#allocation2 + $0x1] sm:$0xff]  ;;  %407 = vst.msk [vmem:[#allocation2 + $0x60] sm:$0x1] %vm402_vm1, %v11489_v4  ;;  %v378_v17 = vld [vmem:[%s7700_s28 + $0x90] sm:$0xff]  ;;  %v379_v21 = vld [vmem:[%s7700_s28 + $0x98] sm:$0xff]  ;;  %s7452_s11 = sshra.s32 %s6568_s29, 4  ;;  %s7453_s11 = int_to_ptr.hbm [resolvable:$true] %s7452_s11 }
  0x20   : > { %6637 = vmatmul.msk.f32.vlgmr.msra.gmra.mxu0 %vm393_vm0, %v505_v5  ;;  %408 = vst.msk [vmem:[#allocation2 + $0x78] sm:$0x1] %vm402_vm1, %v11489_v4  ;;  %v473_v9 = vld [vmem:[#allocation2 + $0x8] sm:$0xff]  ;;  %v360_v13 = vld [vmem:[%s7700_s28] sm:$0xff]  ;;  %v362_v19 = vld [vmem:[%s7700_s28 + $0x10] sm:$0xff]  ;;  %s7454_s12 = scalar_lea.hbm %s7453_s11, 32  ;;  %p7459_p0 = scmp.lt.s32.totalorder %s7453_s11, %s11488_s10 }
  0x21   : > { %409 = vst.msk [vmem:[#allocation2 + $0x90] sm:$0x1] %vm402_vm1, %v11489_v4  ;;  %v377_v14 = vld [vmem:[%s7700_s28 + $0x88] sm:$0xff]  ;;  %v363_v22 = vld [vmem:[%s7700_s28 + $0x18] sm:$0xff]  ;;  %v380_v23 = vld [vmem:[%s7700_s28 + $0xa0] sm:$0xff]  ;;  %p7455_p11 = scmp.ne.s32.totalorder %s7453_s11, %s7454_s12  ;;  %s7458_s0 = scalar_lea.hbm %s11488_s10, 64 }
  0x22   : > { %v472_v6 = vld [vmem:[#allocation2] sm:$0xff]  ;;  %410 = vst.msk [vmem:[#allocation2 + $0xa8] sm:$0x1] %vm402_vm1, %v11489_v4  ;;  %v361_v15 = vld [vmem:[%s7700_s28 + $0x8] sm:$0xff]  ;;  %v382_v35 = vld [vmem:[%s7700_s28 + $0xb0] sm:$0xff]  ;;  %p7460_p1 = scmp.lt.s32.totalorder %s7458_s0, %s7454_s12 }
  0x23   : > { %6669 = vmatmul.msk.f32.vlgmr.msra.gmra.mxu1 %vm393_vm0, %v472_v6  ;;  %411 = vst.msk [vmem:[#allocation2 + $0xc0] sm:$0x1] %vm402_vm1, %v11489_v4  ;;  %v364_v24 = vld [vmem:[%s7700_s28 + $0x20] sm:$0xff]  ;;  %v381_v29 = vld [vmem:[%s7700_s28 + $0xa8] sm:$0xff]  ;;  %v366_v36 = vld [vmem:[%s7700_s28 + $0x30] sm:$0xff]  ;;  %p7456_p12 = pnand %p7455_p11, %p7601_p5 }
  0x24   : > { %412 = vst.msk [vmem:[#allocation2 + $0xd8] sm:$0x1] %vm402_vm1, %v11489_v4  ;;  %v365_v30 = vld [vmem:[%s7700_s28 + $0x28] sm:$0xff]  ;;  %v383_v41 = vld [vmem:[%s7700_s28 + $0xb8] sm:$0xff]  ;;  %v384_v47 = vld [vmem:[%s7700_s28 + $0xc0] sm:$0xff]  ;;  %p7461_p2 = por %p7460_p1, %p7459_p0 }
  0x25   : > { %413 = vst.msk [vmem:[#allocation2 + $0xf0] sm:$0x1] %vm402_vm1, %v11489_v4  ;;  %v367_v42 = vld [vmem:[%s7700_s28 + $0x38] sm:$0xff]  ;;  %v368_v48 = vld [vmem:[%s7700_s28 + $0x40] sm:$0xff]  ;;  %v385_v53 = vld [vmem:[%s7700_s28 + $0xc8] sm:$0xff]  ;;  %p7457_p13 = pneg %p7456_p12 }
  0x26   : > { %414 = vst.msk [vmem:[#allocation2 + $0x108] sm:$0x1] %vm402_vm1, %v11489_v4  ;;  %v369_v54 = vld [vmem:[%s7700_s28 + $0x48] sm:$0xff]  ;;  %v386_v59 = vld [vmem:[%s7700_s28 + $0xd0] sm:$0xff]  ;;  %v387_v1 = vld [vmem:[%s7700_s28 + $0xd8] sm:$0xff] }
  0x27   : > { %415 = vst.msk [vmem:[#allocation2 + $0x120] sm:$0x1] %vm402_vm1, %v11489_v4  ;;  %v370_v60 = vld [vmem:[%s7700_s28 + $0x50] sm:$0xff]  ;;  %v371_v2 = vld [vmem:[%s7700_s28 + $0x58] sm:$0xff]  ;;  %v388_v8 = vld [vmem:[%s7700_s28 + $0xe0] sm:$0xff]  ;;  %p7462_p3 = pnand %p7461_p2, %p7457_p13 }
  0x28   : > { %416 = vst.msk [vmem:[#allocation2 + $0x138] sm:$0x1] %vm402_vm1, %v11489_v4 }
  0x29   : > { %417 = vst.msk [vmem:[#allocation2 + $0x150] sm:$0x1] %vm402_vm1, %v11489_v4 }
  0x2a   : > { %418 = vst.msk [vmem:[#allocation2 + $0x168] sm:$0x1] %vm402_vm1, %v11489_v4 }
  0x2b   : > { %419 = vst.msk [vmem:[#allocation2 + $0x180] sm:$0x1] %vm402_vm1, %v11489_v4  ;;  %6670 = vmatmul.msk.f32.gmra.mxu1 %vm393_vm0, %v473_v9  ;;  %v372_v9 = vld [vmem:[%s7700_s28 + $0x60] sm:$0xff] }
  0x2c   : > { %420 = vst.msk [vmem:[#allocation2 + $0x198] sm:$0x1] %vm402_vm1, %v11489_v4 }
  0x2d   : > { %422 = vst.msk [vmem:[#allocation2 + $0x29] sm:$0x1] %vm402_vm1, %v11489_v4 }
  0x2e   : > { %423 = vst.msk [vmem:[#allocation2 + $0x41] sm:$0x1] %vm402_vm1, %v11489_v4 }
  0x2f   : > { %424 = vst.msk [vmem:[#allocation2 + $0x59] sm:$0x1] %vm402_vm1, %v11489_v4 }
  0x30   : > { %425 = vst.msk [vmem:[#allocation2 + $0x71] sm:$0x1] %vm402_vm1, %v11489_v4 }
  0x31   : > { %426 = vst.msk [vmem:[#allocation2 + $0x89] sm:$0x1] %vm402_vm1, %v11489_v4 }
  0x32   : > { %427 = vst.msk [vmem:[#allocation2 + $0xa1] sm:$0x1] %vm402_vm1, %v11489_v4 }
  0x33   : > { %428 = vst.msk [vmem:[#allocation2 + $0xb9] sm:$0x1] %vm402_vm1, %v11489_v4 }
  0x34   : > { %429 = vst.msk [vmem:[#allocation2 + $0xd1] sm:$0x1] %vm402_vm1, %v11489_v4 }
  0x35   : > { %430 = vst.msk [vmem:[#allocation2 + $0xe9] sm:$0x1] %vm402_vm1, %v11489_v4 }
  0x36   : > { %431 = vst.msk [vmem:[#allocation2 + $0x101] sm:$0x1] %vm402_vm1, %v11489_v4 }
  0x37   : > { %432 = vst.msk [vmem:[#allocation2 + $0x119] sm:$0x1] %vm402_vm1, %v11489_v4 }
  0x38   : > { %433 = vst.msk [vmem:[#allocation2 + $0x131] sm:$0x1] %vm402_vm1, %v11489_v4 }
  0x39   : > { %434 = vst.msk [vmem:[#allocation2 + $0x149] sm:$0x1] %vm402_vm1, %v11489_v4 }
  0x3a   : > { %435 = vst.msk [vmem:[#allocation2 + $0x161] sm:$0x1] %vm402_vm1, %v11489_v4 }
  0x3b   : > { %436 = vst.msk [vmem:[#allocation2 + $0x179] sm:$0x1] %vm402_vm1, %v11489_v4 }
  0x3c   : > { %437 = vst.msk [vmem:[#allocation2 + $0x191] sm:$0x1] %vm402_vm1, %v11489_v4 }
  0x3d   : > { %455 = vst.msk [vmem:[#allocation2 + $0xc9] sm:$0xff] %vm393_vm0, %v375_v10 }
  0x3e   : > { %454 = vst.msk [vmem:[#allocation2 + $0xc1] sm:$0xff] %vm393_vm0, %v374_v11 }
  0x3f   : > { %397 = vst.msk [vmem:[#allocation2 + $0x10] sm:$0x3] %vm396_vm2, %v11489_v4 }
  0x40   : > { %401 = vst.msk [vmem:[#allocation2 + $0x1a8] sm:$0x3] %vm396_vm2, %v11489_v4 }
  0x41   : > { %421 = vst.msk [vmem:[#allocation2 + $0x11] sm:$0x1] %vm402_vm1, %v11489_v4 }
  0x42   : > { %438 = vst.msk [vmem:[#allocation2 + $0x1a9] sm:$0x1] %vm402_vm1, %v11489_v4 }
  0x43   : > { %456 = vst.msk [vmem:[#allocation2 + $0xd9] sm:$0xff] %vm393_vm0, %v376_v12 }
  0x44   : > { %v7727_v16 = vld [vmem:[#allocation2 + $0xc9] sm:$0xff]  ;;  %440 = vst.msk [vmem:[#allocation2 + $0x19] sm:$0xff] %vm393_vm0, %v360_v13 }
  0x45   : > { %6654 = vmatmul.msk.f32.vlgmr.msra.gmra.mxu2 %vm393_vm0, %v7727_v16  ;;  %v7733_v18 = vld [vmem:[#allocation2 + $0xc8] sm:$0xff]  ;;  %457 = vst.msk [vmem:[#allocation2 + $0xe1] sm:$0xff] %vm393_vm0, %v377_v14 }
  0x46   : > { %6686 = vmatmul.msk.f32.vlgmr.msra.gmra.mxu3 %vm393_vm0, %v7733_v18  ;;  %v506_v20 = vld [vmem:[#allocation2 + $0x9] sm:$0xff]  ;;  %441 = vst.msk [vmem:[#allocation2 + $0x21] sm:$0xff] %vm393_vm0, %v361_v15 }
  0x47   : > { %6638 = vmatmul.msk.f32.gmra.mxu0 %vm393_vm0, %v506_v20  ;;  %458 = vst.msk [vmem:[#allocation2 + $0xf1] sm:$0xff] %vm393_vm0, %v378_v17  ;;  %v389_v14 = vld [vmem:[%s7700_s28 + $0xe8] sm:$0xff] }
  0x48   : > { %442 = vst.msk [vmem:[#allocation2 + $0x31] sm:$0xff] %vm393_vm0, %v362_v19  ;;  %v373_v15 = vld [vmem:[%s7700_s28 + $0x68] sm:$0xff] }
  0x49   : > { %459 = vst.msk [vmem:[#allocation2 + $0xf9] sm:$0xff] %vm393_vm0, %v379_v21 }
  0x4a   : > { %v7748_v25 = vld [vmem:[#allocation2 + $0xd9] sm:$0xff]  ;;  %443 = vst.msk [vmem:[#allocation2 + $0x39] sm:$0xff] %vm393_vm0, %v363_v22  ;;  %v1810_v22 = vld [vmem:[%s11479_s1 + $0x28] sm:$0xff] }
  0x4b   : > { %v7751_v26 = vld [vmem:[#allocation2 + $0xd8] sm:$0xff]  ;;  %460 = vst.msk [vmem:[#allocation2 + $0x109] sm:$0xff] %vm393_vm0, %v380_v23  ;;  %1922 = vmatpush.msrb.mxu1 %v1810_v22  ;;  %v8025_v22 = vld [vmem:[#allocation2 + $0xc0] sm:$0xff] }
  0x4c   : > { %v7753_v27 = vld [vmem:[#allocation2 + $0x18] sm:$0xff]  ;;  %444 = vst.msk [vmem:[#allocation2 + $0x49] sm:$0xff] %vm393_vm0, %v364_v24  ;;  %v7773_v32 = vld [vmem:[#allocation2 + $0xe1] sm:$0xff] }
  0x4d   : > { %v7756_v28 = vld [vmem:[#allocation2 + $0x19] sm:$0xff]  ;;  %6671 = vmatmul.msk.f32.gmra.mxu1 %vm393_vm0, %v7753_v27  ;;  %6655 = vmatmul.msk.f32.gmra.mxu2 %vm393_vm0, %v7748_v25  ;;  %461 = vst.msk [vmem:[#allocation2 + $0x111] sm:$0xff] %vm393_vm0, %v381_v29  ;;  %v7777_v34 = vld [vmem:[#allocation2 + $0x21] sm:$0xff] }
  0x4e   : > { %6687 = vmatmul.msk.f32.gmra.mxu3 %vm393_vm0, %v7751_v26  ;;  %445 = vst.msk [vmem:[#allocation2 + $0x51] sm:$0xff] %vm393_vm0, %v365_v30  ;;  %v7771_v31 = vld [vmem:[#allocation2 + $0x20] sm:$0xff]  ;;  %v7793_v38 = vld [vmem:[#allocation2 + $0xf1] sm:$0xff] }
  0x4f   : > { %6639 = vmatmul.msk.f32.gmra.mxu0 %vm393_vm0, %v7756_v28  ;;  %v7775_v33 = vld [vmem:[#allocation2 + $0xe0] sm:$0xff]  ;;  %462 = vst.msk [vmem:[#allocation2 + $0x121] sm:$0xff] %vm393_vm0, %v382_v35  ;;  %v7791_v37 = vld [vmem:[#allocation2 + $0x30] sm:$0xff] }
  0x50   : > { %446 = vst.msk [vmem:[#allocation2 + $0x61] sm:$0xff] %vm393_vm0, %v366_v36  ;;  %v7795_v39 = vld [vmem:[#allocation2 + $0xf0] sm:$0xff]  ;;  %v7813_v44 = vld [vmem:[#allocation2 + $0xf9] sm:$0xff] }
  0x51   : > { %v7797_v40 = vld [vmem:[#allocation2 + $0x31] sm:$0xff]  ;;  %463 = vst.msk [vmem:[#allocation2 + $0x129] sm:$0xff] %vm393_vm0, %v383_v41  ;;  %v7817_v46 = vld [vmem:[#allocation2 + $0x39] sm:$0xff] }
  0x52   : > { %447 = vst.msk [vmem:[#allocation2 + $0x69] sm:$0xff] %vm393_vm0, %v367_v42  ;;  %v7811_v43 = vld [vmem:[#allocation2 + $0x38] sm:$0xff]  ;;  %v7833_v50 = vld [vmem:[#allocation2 + $0x109] sm:$0xff] }
  0x53   : > { %v7815_v45 = vld [vmem:[#allocation2 + $0xf8] sm:$0xff]  ;;  %464 = vst.msk [vmem:[#allocation2 + $0x139] sm:$0xff] %vm393_vm0, %v384_v47  ;;  %v7831_v49 = vld [vmem:[#allocation2 + $0x48] sm:$0xff]  ;;  %v2085_v35 = vld [vmem:[%s11479_s1 + $0x30] sm:$0xff] }
  0x54   : > { %448 = vst.msk [vmem:[#allocation2 + $0x79] sm:$0xff] %vm393_vm0, %v368_v48  ;;  %v7835_v51 = vld [vmem:[#allocation2 + $0x108] sm:$0xff]  ;;  %v7853_v56 = vld [vmem:[#allocation2 + $0x111] sm:$0xff]  ;;  %2197 = vmatpush.msra.mxu2 %v2085_v35 }
  0x55   : > { %6672 = vmatmul.msk.f32.gmra.mxu1 %vm393_vm0, %v7771_v31  ;;  %6656 = vmatmul.msk.f32.gmra.mxu2 %vm393_vm0, %v7773_v32  ;;  %v7837_v52 = vld [vmem:[#allocation2 + $0x49] sm:$0xff]  ;;  %465 = vst.msk [vmem:[#allocation2 + $0x141] sm:$0xff] %vm393_vm0, %v385_v53  ;;  %v7857_v58 = vld [vmem:[#allocation2 + $0x51] sm:$0xff]  ;;  %v2633_v53 = vld [vmem:[%s11479_s1 + $0x40] sm:$0xff] }
  0x56   : > { %6688 = vmatmul.msk.f32.gmra.mxu3 %vm393_vm0, %v7775_v33  ;;  %449 = vst.msk [vmem:[#allocation2 + $0x81] sm:$0xff] %vm393_vm0, %v369_v54  ;;  %v7851_v55 = vld [vmem:[#allocation2 + $0x50] sm:$0xff]  ;;  %v7873_v62 = vld [vmem:[#allocation2 + $0x121] sm:$0xff]  ;;  %v2359_v36 = vld [vmem:[%s11479_s1 + $0x38] sm:$0xff]  ;;  %2745 = vmatpush.msra.mxu0 %v2633_v53 }
  0x57   : > { %6640 = vmatmul.msk.f32.gmra.mxu0 %vm393_vm0, %v7777_v34  ;;  %v7855_v57 = vld [vmem:[#allocation2 + $0x110] sm:$0xff]  ;;  %466 = vst.msk [vmem:[#allocation2 + $0x151] sm:$0xff] %vm393_vm0, %v386_v59  ;;  %v7871_v61 = vld [vmem:[#allocation2 + $0x60] sm:$0xff]  ;;  %2471 = vmatpush.msra.mxu3 %v2359_v36 }
  0x58   : > { %450 = vst.msk [vmem:[#allocation2 + $0x91] sm:$0xff] %vm393_vm0, %v370_v60  ;;  %v7875_v63 = vld [vmem:[#allocation2 + $0x120] sm:$0xff]  ;;  %v7893_v5 = vld [vmem:[#allocation2 + $0x129] sm:$0xff] }
  0x59   : > { %v7877_v0 = vld [vmem:[#allocation2 + $0x61] sm:$0xff]  ;;  %467 = vst.msk [vmem:[#allocation2 + $0x159] sm:$0xff] %vm393_vm0, %v387_v1  ;;  %v7897_v7 = vld [vmem:[#allocation2 + $0x69] sm:$0xff] }
  0x5a   : > { %451 = vst.msk [vmem:[#allocation2 + $0x99] sm:$0xff] %vm393_vm0, %v371_v2  ;;  %v7891_v3 = vld [vmem:[#allocation2 + $0x68] sm:$0xff]  ;;  %v7913_v11 = vld [vmem:[#allocation2 + $0x139] sm:$0xff] }
  0x5b   : > { %v7895_v6 = vld [vmem:[#allocation2 + $0x128] sm:$0xff]  ;;  %468 = vst.msk [vmem:[#allocation2 + $0x169] sm:$0xff] %vm393_vm0, %v388_v8  ;;  %v7911_v10 = vld [vmem:[#allocation2 + $0x78] sm:$0xff] }
  0x5c   : > { %452 = vst.msk [vmem:[#allocation2 + $0xa9] sm:$0xff] %vm393_vm0, %v372_v9  ;;  %v7915_v12 = vld [vmem:[#allocation2 + $0x138] sm:$0xff]  ;;  %v7933_v19 = vld [vmem:[#allocation2 + $0x141] sm:$0xff] }
  0x5d   : > { %6673 = vmatmul.msk.f32.gmra.mxu1 %vm393_vm0, %v7791_v37  ;;  %6657 = vmatmul.msk.f32.gmra.mxu2 %vm393_vm0, %v7793_v38  ;;  %v7917_v13 = vld [vmem:[#allocation2 + $0x79] sm:$0xff]  ;;  %469 = vst.msk [vmem:[#allocation2 + $0x171] sm:$0xff] %vm393_vm0, %v389_v14  ;;  %v7937_v21 = vld [vmem:[#allocation2 + $0x81] sm:$0xff] }
  0x5e   : > { %6689 = vmatmul.msk.f32.gmra.mxu3 %vm393_vm0, %v7795_v39  ;;  %453 = vst.msk [vmem:[#allocation2 + $0xb1] sm:$0xff] %vm393_vm0, %v373_v15  ;;  %v7931_v17 = vld [vmem:[#allocation2 + $0x80] sm:$0xff]  ;;  %v7952_v24 = vld [vmem:[#allocation2 + $0x151] sm:$0xff] }
  0x5f   : > { %6641 = vmatmul.msk.f32.gmra.mxu0 %vm393_vm0, %v7797_v40  ;;  %11602 = vst [vmem:[#allocation8_spill] sm:$0xff] %v7933_v19  ;;  %v7935_v20 = vld [vmem:[#allocation2 + $0x140] sm:$0xff]  ;;  %v7950_v23 = vld [vmem:[#allocation2 + $0x90] sm:$0xff] }
  0x60   : > { %11603 = vst [vmem:[#allocation9_spill] sm:$0xff] %v7952_v24  ;;  %v7954_v29 = vld [vmem:[#allocation2 + $0x150] sm:$0xff]  ;;  %v7974_v42 = vld [vmem:[#allocation2 + $0x159] sm:$0xff]  ;;  %v956_v36 = vld [vmem:[#allocation2 + $0x2] sm:$0xff] }
  0x61   : > { %v7956_v30 = vld [vmem:[#allocation2 + $0x91] sm:$0xff]  ;;  %11604 = vst [vmem:[#allocation10_spill] sm:$0xff] %v7974_v42  ;;  %v7978_v48 = vld [vmem:[#allocation2 + $0x99] sm:$0xff]  ;;  %v8029_v53 = vld [vmem:[#allocation2 + $0xc1] sm:$0xff] }
  0x62   : > { %v7972_v41 = vld [vmem:[#allocation2 + $0x98] sm:$0xff]  ;;  %v7993_v59 = vld [vmem:[#allocation2 + $0x169] sm:$0xff] }
  0x63   : > { %v7976_v47 = vld [vmem:[#allocation2 + $0x158] sm:$0xff]  ;;  %v7991_v54 = vld [vmem:[#allocation2 + $0xa8] sm:$0xff]  ;;  %11606 = vst [vmem:[#allocation12_spill] sm:$0xff] %v7993_v59 }
  0x64   : > { %11605 = vst [vmem:[#allocation11_spill] sm:$0xff] %v7976_v47  ;;  %v7995_v60 = vld [vmem:[#allocation2 + $0x168] sm:$0xff]  ;;  %v8009_v8 = vld [vmem:[#allocation2 + $0x171] sm:$0xff] }
  0x65   : > { %6674 = vmatmul.msk.f32.gmra.mxu1 %vm393_vm0, %v7811_v43  ;;  %6658 = vmatmul.msk.f32.gmra.mxu2 %vm393_vm0, %v7813_v44  ;;  %11607 = vst [vmem:[#allocation13_spill] sm:$0xff] %v7995_v60  ;;  %v7997_v1 = vld [vmem:[#allocation2 + $0xa9] sm:$0xff]  ;;  %v8013_v14 = vld [vmem:[#allocation2 + $0xb1] sm:$0xff] }
  0x66   : > { %6690 = vmatmul.msk.f32.gmra.mxu3 %vm393_vm0, %v7815_v45  ;;  %v8007_v2 = vld [vmem:[#allocation2 + $0xb0] sm:$0xff]  ;;  %11608 = vst [vmem:[#allocation14_spill] sm:$0xff] %v8009_v8 }
  0x67   : > { %6642 = vmatmul.msk.f32.gmra.mxu0 %vm393_vm0, %v7817_v46  ;;  %v8011_v9 = vld [vmem:[#allocation2 + $0x170] sm:$0xff] }
  0x68   : > { %11609 = vst [vmem:[#allocation15_spill] sm:$0xff] %v8011_v9 }
  0x6d   : > { %6675 = vmatmul.msk.f32.gmra.mxu1 %vm393_vm0, %v7831_v49  ;;  %6659 = vmatmul.msk.f32.gmra.mxu2 %vm393_vm0, %v7833_v50 }
  0x6e   : > { %6691 = vmatmul.msk.f32.gmra.mxu3 %vm393_vm0, %v7835_v51 }
  0x6f   : > { %6643 = vmatmul.msk.f32.gmra.mxu0 %vm393_vm0, %v7837_v52 }
  0x75   : > { %6676 = vmatmul.msk.f32.gmra.mxu1 %vm393_vm0, %v7851_v55  ;;  %6660 = vmatmul.msk.f32.gmra.mxu2 %vm393_vm0, %v7853_v56 }
  0x76   : > { %6692 = vmatmul.msk.f32.gmra.mxu3 %vm393_vm0, %v7855_v57 }
  0x77   : > { %6644 = vmatmul.msk.f32.gmra.mxu0 %vm393_vm0, %v7857_v58 }
  0x7d   : > { %6677 = vmatmul.msk.f32.gmra.mxu1 %vm393_vm0, %v7871_v61  ;;  %6661 = vmatmul.msk.f32.gmra.mxu2 %vm393_vm0, %v7873_v62 }
  0x7e   : > { %6693 = vmatmul.msk.f32.gmra.mxu3 %vm393_vm0, %v7875_v63 }
  0x7f   : > { %6645 = vmatmul.msk.f32.gmra.mxu0 %vm393_vm0, %v7877_v0 }
  0x85   : > { %6678 = vmatmul.msk.f32.gmra.mxu1 %vm393_vm0, %v7891_v3  ;;  %6662 = vmatmul.msk.f32.gmra.mxu2 %vm393_vm0, %v7893_v5 }
  0x86   : > { %6694 = vmatmul.msk.f32.gmra.mxu3 %vm393_vm0, %v7895_v6 }
  0x87   : > { %6646 = vmatmul.msk.f32.gmra.mxu0 %vm393_vm0, %v7897_v7 }
  0x8d   : > { %6679 = vmatmul.msk.f32.gmra.mxu1 %vm393_vm0, %v7911_v10  ;;  %6663 = vmatmul.msk.f32.gmra.mxu2 %vm393_vm0, %v7913_v11 }
  0x8e   : > { %6695 = vmatmul.msk.f32.gmra.mxu3 %vm393_vm0, %v7915_v12 }
  0x8f   : > { %6647 = vmatmul.msk.f32.gmra.mxu0 %vm393_vm0, %v7917_v13 }
  0x95   : > { %6680 = vmatmul.msk.f32.gmra.mxu1 %vm393_vm0, %v7931_v17  ;;  %6664 = vmatmul.msk.f32.gmra.mxu2 %vm393_vm0, %v7933_v19  ;;  %v8062_v19 = vld [vmem:[#allocation2 + $0x32] sm:$0xff] }
  0x96   : > { %6696 = vmatmul.msk.f32.gmra.mxu3 %vm393_vm0, %v7935_v20  ;;  %11611 = vst [vmem:[#allocation17_spill] sm:$0xff] %v8062_v19 }
  0x97   : > { %6648 = vmatmul.msk.f32.gmra.mxu0 %vm393_vm0, %v7937_v21 }
  0x9d   : > { %6681 = vmatmul.msk.f32.gmra.mxu1 %vm393_vm0, %v7950_v23  ;;  %6665 = vmatmul.msk.f32.gmra.mxu2 %vm393_vm0, %v7952_v24  ;;  %v8027_v35 = vpop.f32.mrf.mxu0 }
  0x9e   : > { %6697 = vmatmul.msk.f32.gmra.mxu3 %vm393_vm0, %v7954_v29 }
  0x9f   : > { %6649 = vmatmul.msk.f32.gmra.mxu0 %vm393_vm0, %v7956_v30 }
  0xa0   : > { %v8019_v15 = vpop.f32.mrf.mxu1 }
  0xa5   : > { %6682 = vmatmul.msk.f32.gmra.mxu1 %vm393_vm0, %v7972_v41  ;;  %6666 = vmatmul.msk.f32.gmra.mxu2 %vm393_vm0, %v7974_v42 }
  0xa6   : > { %6698 = vmatmul.msk.f32.gmra.mxu3 %vm393_vm0, %v7976_v47 }
  0xa7   : > { %6650 = vmatmul.msk.f32.gmra.mxu0 %vm393_vm0, %v7978_v48 }
  0xa8   : > { %v8038_v4 = vpop.f32.mrf.mxu1 }
  0xad   : > { %6683 = vmatmul.msk.f32.gmra.mxu1 %vm393_vm0, %v7991_v54  ;;  %6667 = vmatmul.msk.f32.gmra.mxu2 %vm393_vm0, %v7993_v59  ;;  %v957_v59 = vld [vmem:[#allocation2 + $0xa] sm:$0xff] }
  0xae   : > { %6699 = vmatmul.msk.f32.gmra.mxu3 %vm393_vm0, %v7995_v60  ;;  %v1779_v60 = vld [vmem:[#allocation2 + $0x22] sm:$0xff] }
  0xaf   : > { %6651 = vmatmul.msk.f32.gmra.mxu0 %vm393_vm0, %v7997_v1 }
  0xb5   : > { %6684 = vmatmul.msk.f32.gmra.mxu1 %vm393_vm0, %v8007_v2  ;;  %6668 = vmatmul.msk.f32.gmra.mxu2 %vm393_vm0, %v8009_v8  ;;  %v1778_v8 = vld [vmem:[#allocation2 + $0x1a] sm:$0xff] }
  0xb6   : > { %6700 = vmatmul.msk.f32.gmra.mxu3 %vm393_vm0, %v8011_v9 }
  0xb7   : > { %6652 = vmatmul.msk.f32.gmra.mxu0 %vm393_vm0, %v8013_v14 }
  0xbd   : > { %6685 = vmatmul.msk.f32.gmra.mxu1 %vm393_vm0, %v8025_v22  ;;  %6701 = vmatmul.msk.f32.vlgmr.msrb.gmra.mxu2 %vm393_vm0, %v956_v36 }
  0xbe   : > { %6733 = vmatmul.msk.f32.vlgmr.msrb.gmra.mxu3 %vm393_vm0, %v7753_v27 }
  0xbf   : > { %6653 = vmatmul.msk.f32.gmra.mxu0 %vm393_vm0, %v8029_v53 }
  0xc4   : > { %v8040_v9 = vpop.f32.mrf.mxu0 }
  0xc5   : > { %6797 = vmatmul.msk.f32.vlgmr.msrb.gmra.mxu1 %vm393_vm0, %v1778_v8  ;;  %6702 = vmatmul.msk.f32.gmra.mxu2 %vm393_vm0, %v957_v59 }
  0xc6   : > { %6734 = vmatmul.msk.f32.gmra.mxu3 %vm393_vm0, %v7771_v31 }
  0xc7   : > { %6765 = vmatmul.msk.f32.vlgmr.msrb.gmra.mxu0 %vm393_vm0, %v7756_v28 }
  0xc8   : > { %v702_v27 = vpop.f32.mrf.mxu2 }
  0xc9   : > { %v911_v36 = vpop.f32.mrf.mxu3 }
  0xca   : > { %v8048_v42 = vpop.f32.mrf.mxu1  ;;  %v8050_v24 = vadd.f32 %v911_v36, %v702_v27 }
  0xcc   : > { %11610 = vst [vmem:[#allocation16_spill] sm:$0xff] %v8050_v24  ;;  %v8052_v47 = vpop.f32.mrf.mxu0  ;;  %v8077_v24 = vld [vmem:[#allocation2 + $0x3a] sm:$0xff] }
  0xcd   : > { %6798 = vmatmul.msk.f32.gmra.mxu1 %vm393_vm0, %v1779_v60  ;;  %6703 = vmatmul.msk.f32.gmra.mxu2 %vm393_vm0, %v1778_v8  ;;  %11613 = vst [vmem:[#allocation19_spill] sm:$0xff] %v8077_v24 }
  0xce   : > { %6735 = vmatmul.msk.f32.gmra.mxu3 %vm393_vm0, %v7791_v37 }
  0xcf   : > { %6766 = vmatmul.msk.f32.gmra.mxu0 %vm393_vm0, %v7777_v34 }
  0xd0   : > { %v705_v28 = vpop.f32.mrf.mxu2 }
  0xd1   : > { %v914_v31 = vpop.f32.mrf.mxu3 }
  0xd2   : > { %v8060_v59 = vpop.f32.mrf.mxu1  ;;  %v8064_v27 = vadd.f32 %v914_v31, %v705_v28 }
  0xd4   : > { %11612 = vst [vmem:[#allocation18_spill] sm:$0xff] %v8064_v27  ;;  %v8066_v36 = vpop.f32.mrf.mxu0 }
  0xd5   : > { %6799 = vmatmul.msk.f32.gmra.mxu1 %vm393_vm0, %v8062_v19  ;;  %6704 = vmatmul.msk.f32.gmra.mxu2 %vm393_vm0, %v1779_v60 }
  0xd6   : > { %6736 = vmatmul.msk.f32.gmra.mxu3 %vm393_vm0, %v7811_v43 }
  0xd7   : > { %6767 = vmatmul.msk.f32.gmra.mxu0 %vm393_vm0, %v7797_v40 }
  0xd8   : > { %v708_v34 = vpop.f32.mrf.mxu2 }
  0xd9   : > { %v917_v37 = vpop.f32.mrf.mxu3 }
  0xda   : > { %v8075_v8 = vpop.f32.mrf.mxu1  ;;  %v8079_v28 = vadd.f32 %v917_v37, %v708_v34  ;;  %v8093_v34 = vld [vmem:[#allocation2 + $0x4a] sm:$0xff] }
  0xdb   : > { %11615 = vst [vmem:[#allocation21_spill] sm:$0xff] %v8093_v34 }
  0xdc   : > { %11614 = vst [vmem:[#allocation20_spill] sm:$0xff] %v8079_v28  ;;  %v8081_v31 = vpop.f32.mrf.mxu0 }
  0xdd   : > { %6800 = vmatmul.msk.f32.gmra.mxu1 %vm393_vm0, %v8077_v24  ;;  %6705 = vmatmul.msk.f32.gmra.mxu2 %vm393_vm0, %v8062_v19 }
  0xde   : > { %6737 = vmatmul.msk.f32.gmra.mxu3 %vm393_vm0, %v7831_v49 }
  0xdf   : > { %6768 = vmatmul.msk.f32.gmra.mxu0 %vm393_vm0, %v7817_v46 }
  0xe0   : > { %v711_v40 = vpop.f32.mrf.mxu2 }
  0xe1   : > { %v920_v43 = vpop.f32.mrf.mxu3 }
  0xe2   : > { %v8091_v60 = vpop.f32.mrf.mxu1  ;;  %v8095_v37 = vadd.f32 %v920_v43, %v711_v40  ;;  %v8109_v40 = vld [vmem:[#allocation2 + $0x52] sm:$0xff] }
  0xe3   : > { %11617 = vst [vmem:[#allocation23_spill] sm:$0xff] %v8109_v40 }
  0xe4   : > { %11616 = vst [vmem:[#allocation22_spill] sm:$0xff] %v8095_v37  ;;  %v8097_v28 = vpop.f32.mrf.mxu0 }
  0xe5   : > { %6801 = vmatmul.msk.f32.gmra.mxu1 %vm393_vm0, %v8093_v34  ;;  %6706 = vmatmul.msk.f32.gmra.mxu2 %vm393_vm0, %v8077_v24 }
  0xe6   : > { %6738 = vmatmul.msk.f32.gmra.mxu3 %vm393_vm0, %v7851_v55 }
  0xe7   : > { %6769 = vmatmul.msk.f32.gmra.mxu0 %vm393_vm0, %v7837_v52 }
  0xe8   : > { %v714_v46 = vpop.f32.mrf.mxu2 }
  0xe9   : > { %v923_v49 = vpop.f32.mrf.mxu3 }
  0xea   : > { %v8107_v27 = vpop.f32.mrf.mxu1  ;;  %v8111_v43 = vadd.f32 %v923_v49, %v714_v46  ;;  %v8125_v46 = vld [vmem:[#allocation2 + $0x62] sm:$0xff] }
  0xeb   : > { %11619 = vst [vmem:[#allocation25_spill] sm:$0xff] %v8125_v46 }
  0xec   : > { %11618 = vst [vmem:[#allocation24_spill] sm:$0xff] %v8111_v43  ;;  %v8113_v37 = vpop.f32.mrf.mxu0 }
  0xed   : > { %6802 = vmatmul.msk.f32.gmra.mxu1 %vm393_vm0, %v8109_v40  ;;  %6707 = vmatmul.msk.f32.gmra.mxu2 %vm393_vm0, %v8093_v34 }
  0xee   : > { %6739 = vmatmul.msk.f32.gmra.mxu3 %vm393_vm0, %v7871_v61 }
  0xef   : > { %6770 = vmatmul.msk.f32.gmra.mxu0 %vm393_vm0, %v7857_v58 }
  0xf0   : > { %v717_v52 = vpop.f32.mrf.mxu2 }
  0xf1   : > { %v926_v55 = vpop.f32.mrf.mxu3 }
  0xf2   : > { %v8123_v24 = vpop.f32.mrf.mxu1  ;;  %v8127_v49 = vadd.f32 %v926_v55, %v717_v52  ;;  %v8141_v52 = vld [vmem:[#allocation2 + $0x6a] sm:$0xff] }
  0xf3   : > { %11621 = vst [vmem:[#allocation27_spill] sm:$0xff] %v8141_v52 }
  0xf4   : > { %11620 = vst [vmem:[#allocation26_spill] sm:$0xff] %v8127_v49  ;;  %v8129_v43 = vpop.f32.mrf.mxu0 }
  0xf5   : > { %6803 = vmatmul.msk.f32.gmra.mxu1 %vm393_vm0, %v8125_v46  ;;  %6708 = vmatmul.msk.f32.gmra.mxu2 %vm393_vm0, %v8109_v40 }
  0xf6   : > { %6740 = vmatmul.msk.f32.gmra.mxu3 %vm393_vm0, %v7891_v3 }
  0xf7   : > { %6771 = vmatmul.msk.f32.gmra.mxu0 %vm393_vm0, %v7877_v0 }
  0xf8   : > { %v720_v58 = vpop.f32.mrf.mxu2 }
  0xf9   : > { %v929_v61 = vpop.f32.mrf.mxu3 }
  0xfa   : > { %v8139_v34 = vpop.f32.mrf.mxu1  ;;  %v8143_v55 = vadd.f32 %v929_v61, %v720_v58  ;;  %v8157_v58 = vld [vmem:[#allocation2 + $0x7a] sm:$0xff] }
  0xfb   : > { %11623 = vst [vmem:[#allocation29_spill] sm:$0xff] %v8157_v58 }
  0xfc   : > { %11622 = vst [vmem:[#allocation28_spill] sm:$0xff] %v8143_v55  ;;  %v8145_v49 = vpop.f32.mrf.mxu0 }
  0xfd   : > { %6804 = vmatmul.msk.f32.gmra.mxu1 %vm393_vm0, %v8141_v52  ;;  %6709 = vmatmul.msk.f32.gmra.mxu2 %vm393_vm0, %v8125_v46 }
  0xfe   : > { %6741 = vmatmul.msk.f32.gmra.mxu3 %vm393_vm0, %v7911_v10 }
  0xff   : > { %6772 = vmatmul.msk.f32.gmra.mxu0 %vm393_vm0, %v7897_v7 }
 0x100   : > { %v723_v0 = vpop.f32.mrf.mxu2 }
 0x101   : > { %v932_v3 = vpop.f32.mrf.mxu3 }
 0x102   : > { %v8155_v40 = vpop.f32.mrf.mxu1  ;;  %v8159_v61 = vadd.f32 %v932_v3, %v723_v0  ;;  %v8173_v0 = vld [vmem:[#allocation2 + $0x82] sm:$0xff] }
 0x103   : > { %11625 = vst [vmem:[#allocation31_spill] sm:$0xff] %v8173_v0 }
 0x104   : > { %11624 = vst [vmem:[#allocation30_spill] sm:$0xff] %v8159_v61  ;;  %v8161_v55 = vpop.f32.mrf.mxu0 }
 0x105   : > { %6805 = vmatmul.msk.f32.gmra.mxu1 %vm393_vm0, %v8157_v58  ;;  %6710 = vmatmul.msk.f32.gmra.mxu2 %vm393_vm0, %v8141_v52 }
 0x106   : > { %6742 = vmatmul.msk.f32.gmra.mxu3 %vm393_vm0, %v7931_v17 }
 0x107   : > { %6773 = vmatmul.msk.f32.gmra.mxu0 %vm393_vm0, %v7917_v13 }
 0x108   : > { %v726_v7 = vpop.f32.mrf.mxu2 }
 0x109   : > { %v935_v10 = vpop.f32.mrf.mxu3 }
 0x10a   : > { %v8171_v46 = vpop.f32.mrf.mxu1  ;;  %v8175_v3 = vadd.f32 %v935_v10, %v726_v7  ;;  %v8189_v7 = vld [vmem:[#allocation2 + $0x92] sm:$0xff] }
 0x10b   : > { %11627 = vst [vmem:[#allocation33_spill] sm:$0xff] %v8189_v7 }
 0x10c   : > { %11626 = vst [vmem:[#allocation32_spill] sm:$0xff] %v8175_v3  ;;  %v8177_v61 = vpop.f32.mrf.mxu0 }
 0x10d   : > { %6806 = vmatmul.msk.f32.gmra.mxu1 %vm393_vm0, %v8173_v0  ;;  %6711 = vmatmul.msk.f32.gmra.mxu2 %vm393_vm0, %v8157_v58 }
 0x10e   : > { %6743 = vmatmul.msk.f32.gmra.mxu3 %vm393_vm0, %v7950_v23 }
 0x10f   : > { %6774 = vmatmul.msk.f32.gmra.mxu0 %vm393_vm0, %v7937_v21 }
 0x110   : > { %v729_v13 = vpop.f32.mrf.mxu2 }
 0x111   : > { %v938_v17 = vpop.f32.mrf.mxu3 }
 0x112   : > { %v8187_v52 = vpop.f32.mrf.mxu1  ;;  %v8191_v10 = vadd.f32 %v938_v17, %v729_v13  ;;  %v8205_v13 = vld [vmem:[#allocation2 + $0x9a] sm:$0xff] }
 0x113   : > { %11629 = vst [vmem:[#allocation35_spill] sm:$0xff] %v8205_v13 }
 0x114   : > { %11628 = vst [vmem:[#allocation34_spill] sm:$0xff] %v8191_v10  ;;  %v8193_v3 = vpop.f32.mrf.mxu0 }
 0x115   : > { %6807 = vmatmul.msk.f32.gmra.mxu1 %vm393_vm0, %v8189_v7  ;;  %6712 = vmatmul.msk.f32.gmra.mxu2 %vm393_vm0, %v8173_v0 }
 0x116   : > { %6744 = vmatmul.msk.f32.gmra.mxu3 %vm393_vm0, %v7972_v41 }
 0x117   : > { %6775 = vmatmul.msk.f32.gmra.mxu0 %vm393_vm0, %v7956_v30 }
 0x118   : > { %v732_v21 = vpop.f32.mrf.mxu2 }
 0x119   : > { %v941_v23 = vpop.f32.mrf.mxu3 }
 0x11a   : > { %v8203_v58 = vpop.f32.mrf.mxu1  ;;  %v8207_v17 = vadd.f32 %v941_v23, %v732_v21  ;;  %v8221_v21 = vld [vmem:[#allocation2 + $0xaa] sm:$0xff] }
 0x11b   : > { %11631 = vst [vmem:[#allocation37_spill] sm:$0xff] %v8221_v21 }
 0x11c   : > { %11630 = vst [vmem:[#allocation36_spill] sm:$0xff] %v8207_v17  ;;  %v8209_v10 = vpop.f32.mrf.mxu0  ;;  %v3089_v17 = vld [vmem:[%s11481_s3 + $0x18] sm:$0xff] }
 0x11d   : > { %6808 = vmatmul.msk.f32.gmra.mxu1 %vm393_vm0, %v8205_v13  ;;  %6713 = vmatmul.msk.f32.gmra.mxu2 %vm393_vm0, %v8189_v7 }
 0x11e   : > { %6745 = vmatmul.msk.f32.gmra.mxu3 %vm393_vm0, %v7991_v54  ;;  %3200 = vmatpush.msra.mxu1 %v3089_v17 }
 0x11f   : > { %6776 = vmatmul.msk.f32.gmra.mxu0 %vm393_vm0, %v7978_v48 }
 0x120   : > { %v735_v30 = vpop.f32.mrf.mxu2 }
 0x121   : > { %v944_v41 = vpop.f32.mrf.mxu3 }
 0x122   : > { %v8219_v0 = vpop.f32.mrf.mxu1  ;;  %v8223_v23 = vadd.f32 %v944_v41, %v735_v30  ;;  %v8240_v41 = vld [vmem:[#allocation2 + $0xb2] sm:$0xff] }
 0x123   : > { %11633 = vst [vmem:[#allocation39_spill] sm:$0xff] %v8240_v41 }
 0x124   : > { %11632 = vst [vmem:[#allocation38_spill] sm:$0xff] %v8223_v23  ;;  %v8228_v19 = vpop.f32.mrf.mxu0 }
 0x125   : > { %6809 = vmatmul.msk.f32.gmra.mxu1 %vm393_vm0, %v8221_v21  ;;  %6714 = vmatmul.msk.f32.gmra.mxu2 %vm393_vm0, %v8205_v13 }
 0x126   : > { %6746 = vmatmul.msk.f32.gmra.mxu3 %vm393_vm0, %v8007_v2 }
 0x127   : > { %6777 = vmatmul.msk.f32.gmra.mxu0 %vm393_vm0, %v7997_v1 }
 0x128   : > { %v738_v48 = vpop.f32.mrf.mxu2 }
 0x129   : > { %v947_v54 = vpop.f32.mrf.mxu3 }
 0x12a   : > { %v8238_v30 = vpop.f32.mrf.mxu1  ;;  %v8242_v23 = vadd.f32 %v947_v54, %v738_v48  ;;  %v8256_v48 = vld [vmem:[#allocation2 + $0xc2] sm:$0xff] }
 0x12b   : > { %11635 = vst [vmem:[#allocation41_spill] sm:$0xff] %v8256_v48 }
 0x12c   : > { %11634 = vst [vmem:[#allocation40_spill] sm:$0xff] %v8242_v23  ;;  %v8244_v7 = vpop.f32.mrf.mxu0 }
 0x12d   : > { %6810 = vmatmul.msk.f32.gmra.mxu1 %vm393_vm0, %v8240_v41  ;;  %6715 = vmatmul.msk.f32.gmra.mxu2 %vm393_vm0, %v8221_v21 }
 0x12e   : > { %6747 = vmatmul.msk.f32.gmra.mxu3 %vm393_vm0, %v8025_v22 }
 0x12f   : > { %6778 = vmatmul.msk.f32.gmra.mxu0 %vm393_vm0, %v8013_v14 }
 0x130   : > { %v741_v1 = vpop.f32.mrf.mxu2 }
 0x131   : > { %v950_v2 = vpop.f32.mrf.mxu3 }
 0x132   : > { %v8254_v17 = vpop.f32.mrf.mxu1  ;;  %v8258_v54 = vadd.f32 %v950_v2, %v741_v1  ;;  %v8272_v1 = vld [vmem:[#allocation2 + $0xca] sm:$0xff] }
 0x134   : > { %11636 = vst [vmem:[#allocation42_spill] sm:$0xff] %v8258_v54  ;;  %v8260_v23 = vpop.f32.mrf.mxu0 }
 0x135   : > { %6811 = vmatmul.msk.f32.gmra.mxu1 %vm393_vm0, %v8256_v48  ;;  %6716 = vmatmul.msk.f32.gmra.mxu2 %vm393_vm0, %v8240_v41  ;;  %v8288_v41 = vld [vmem:[#allocation2 + $0xda] sm:$0xff] }
 0x136   : > { %6748 = vmatmul.msk.f32.gmra.mxu3 %vm393_vm0, %v7733_v18  ;;  %v861_v18 = vadd.f32 %v8019_v15, %v8027_v35 }
 0x137   : > { %6779 = vmatmul.msk.f32.gmra.mxu0 %vm393_vm0, %v8029_v53 }
 0x138   : > { %v744_v14 = vpop.f32.mrf.mxu2 }
 0x139   : > { %v953_v22 = vpop.f32.mrf.mxu3 }
 0x13a   : > { %v8270_v21 = vpop.f32.mrf.mxu1  ;;  %v8274_v2 = vadd.f32 %v953_v22, %v744_v14 }
 0x13b   : > { %11637 = vst [vmem:[#allocation43_spill] sm:$0xff] %v8270_v21 }
 0x13c   : > { %11638 = vst [vmem:[#allocation44_spill] sm:$0xff] %v8274_v2  ;;  %v8276_v54 = vpop.f32.mrf.mxu0 }
 0x13d   : > { %6812 = vmatmul.msk.f32.gmra.mxu1 %vm393_vm0, %v8272_v1  ;;  %6717 = vmatmul.msk.f32.gmra.mxu2 %vm393_vm0, %v8256_v48 }
 0x13e   : > { %6749 = vmatmul.msk.f32.gmra.mxu3 %vm393_vm0, %v7751_v26 }
 0x13f   : > { %6780 = vmatmul.msk.f32.gmra.mxu0 %vm393_vm0, %v7727_v16  ;;  %v864_v16 = vadd.f32 %v8038_v4, %v8040_v9  ;;  %v867_v4 = vadd.f32 %v8048_v42, %v8052_v47 }
 0x140   : > { %v1102_v53 = vpop.f32.mrf.mxu2 }
 0x141   : > { %v1198_v14 = vadd.f32 %v1102_v53, %v861_v18  ;;  %v1376_v22 = vpop.f32.mrf.mxu3 }
 0x142   : > { %v1924_v2 = vpop.f32.mrf.mxu1 }
 0x143   : > { %v1472_v13 = vadd.f32 %v1376_v22, %v1198_v14  ;;  %v8302_v14 = vld [vmem:[#allocation2 + $0xe2] sm:$0xff] }
 0x144   : > { %v1650_v21 = vpop.f32.mrf.mxu0 }
 0x145   : > { %6813 = vmatmul.msk.f32.gmra.mxu1 %vm393_vm0, %v8288_v41  ;;  %v1746_v48 = vadd.f32 %v1650_v21, %v1472_v13  ;;  %6718 = vmatmul.msk.f32.gmra.mxu2 %vm393_vm0, %v8272_v1 }
 0x146   : > { %6750 = vmatmul.msk.f32.gmra.mxu3 %vm393_vm0, %v7775_v33 }
 0x147   : > { %v8298_v26 = vadd.f32 %v1924_v2, %v1746_v48  ;;  %6781 = vmatmul.msk.f32.gmra.mxu0 %vm393_vm0, %v7748_v25 }
 0x148   : > { %v1105_v15 = vpop.f32.mrf.mxu2 }
 0x149   : > { %v1199_v35 = vadd.f32 %v1105_v15, %v864_v16  ;;  %v1379_v18 = vpop.f32.mrf.mxu3  ;;  %v8316_v16 = vld [vmem:[#allocation2 + $0xf2] sm:$0xff] }
 0x14a   : > { %v1927_v53 = vpop.f32.mrf.mxu1 }
 0x14b   : > { %v1473_v13 = vadd.f32 %v1379_v18, %v1199_v35 }
 0x14c   : > { %v1653_v21 = vpop.f32.mrf.mxu0 }
 0x14d   : > { %6814 = vmatmul.msk.f32.gmra.mxu1 %vm393_vm0, %v8302_v14  ;;  %v1747_v33 = vadd.f32 %v1653_v21, %v1473_v13  ;;  %6719 = vmatmul.msk.f32.gmra.mxu2 %vm393_vm0, %v8288_v41  ;;  %v8330_v21 = vld [vmem:[#allocation2 + $0xfa] sm:$0xff] }
 0x14e   : > { %6751 = vmatmul.msk.f32.gmra.mxu3 %vm393_vm0, %v7795_v39 }
 0x14f   : > { %v8312_v25 = vadd.f32 %v1927_v53, %v1747_v33  ;;  %6782 = vmatmul.msk.f32.gmra.mxu0 %vm393_vm0, %v7773_v32  ;;  %v870_v32 = vadd.f32 %v8060_v59, %v8066_v36 }
 0x150   : > { %v1108_v9 = vpop.f32.mrf.mxu2 }
 0x151   : > { %v1200_v48 = vadd.f32 %v1108_v9, %v867_v4  ;;  %v1382_v2 = vpop.f32.mrf.mxu3 }
 0x152   : > { %v1930_v22 = vpop.f32.mrf.mxu1 }
 0x153   : > { %v1474_v15 = vadd.f32 %v1382_v2, %v1200_v48 }
 0x154   : > { %v1656_v35 = vpop.f32.mrf.mxu0 }
 0x155   : > { %6815 = vmatmul.msk.f32.gmra.mxu1 %vm393_vm0, %v8316_v16  ;;  %v1748_v39 = vadd.f32 %v1656_v35, %v1474_v15  ;;  %6720 = vmatmul.msk.f32.gmra.mxu2 %vm393_vm0, %v8302_v14 }
 0x156   : > { %6752 = vmatmul.msk.f32.gmra.mxu3 %vm393_vm0, %v7815_v45 }
 0x157   : > { %v8326_v42 = vadd.f32 %v1930_v22, %v1748_v39  ;;  %6783 = vmatmul.msk.f32.gmra.mxu0 %vm393_vm0, %v7793_v38  ;;  %v873_v38 = vadd.f32 %v8075_v8, %v8081_v31  ;;  %v8344_v22 = vld [vmem:[#allocation2 + $0x10a] sm:$0xff] }
 0x158   : > { %v1111_v47 = vpop.f32.mrf.mxu2 }
 0x159   : > { %v1201_v18 = vadd.f32 %v1111_v47, %v870_v32  ;;  %v1385_v53 = vpop.f32.mrf.mxu3 }
 0x15a   : > { %v1933_v13 = vpop.f32.mrf.mxu1 }
 0x15b   : > { %v1475_v33 = vadd.f32 %v1385_v53, %v1201_v18  ;;  %v8358_v18 = vld [vmem:[#allocation2 + $0x112] sm:$0xff] }
 0x15c   : > { %v1659_v4 = vpop.f32.mrf.mxu0 }
 0x15d   : > { %6816 = vmatmul.msk.f32.gmra.mxu1 %vm393_vm0, %v8330_v21  ;;  %v1749_v45 = vadd.f32 %v1659_v4, %v1475_v33  ;;  %6721 = vmatmul.msk.f32.gmra.mxu2 %vm393_vm0, %v8316_v16 }
 0x15e   : > { %6753 = vmatmul.msk.f32.gmra.mxu3 %vm393_vm0, %v7835_v51 }
 0x15f   : > { %v8340_v59 = vadd.f32 %v1933_v13, %v1749_v45  ;;  %6784 = vmatmul.msk.f32.gmra.mxu0 %vm393_vm0, %v7813_v44  ;;  %v876_v44 = vadd.f32 %v8091_v60, %v8097_v28  ;;  %v8372_v45 = vld [vmem:[#allocation2 + $0x122] sm:$0xff] }
 0x160   : > { %v1114_v36 = vpop.f32.mrf.mxu2 }
 0x161   : > { %v1202_v9 = vadd.f32 %v1114_v36, %v873_v38  ;;  %v1388_v48 = vpop.f32.mrf.mxu3 }
 0x162   : > { %v1936_v2 = vpop.f32.mrf.mxu1 }
 0x163   : > { %v1476_v15 = vadd.f32 %v1388_v48, %v1202_v9 }
 0x164   : > { %v1662_v35 = vpop.f32.mrf.mxu0 }
 0x165   : > { %6817 = vmatmul.msk.f32.gmra.mxu1 %vm393_vm0, %v8344_v22  ;;  %v1750_v51 = vadd.f32 %v1662_v35, %v1476_v15  ;;  %6722 = vmatmul.msk.f32.gmra.mxu2 %vm393_vm0, %v8330_v21  ;;  %v8386_v15 = vld [vmem:[#allocation2 + $0x12a] sm:$0xff] }
 0x166   : > { %6754 = vmatmul.msk.f32.gmra.mxu3 %vm393_vm0, %v7855_v57 }
 0x167   : > { %v8354_v8 = vadd.f32 %v1936_v2, %v1750_v51  ;;  %6785 = vmatmul.msk.f32.gmra.mxu0 %vm393_vm0, %v7833_v50  ;;  %v879_v50 = vadd.f32 %v8107_v27, %v8113_v37 }
 0x168   : > { %v1117_v31 = vpop.f32.mrf.mxu2 }
 0x169   : > { %v1203_v39 = vadd.f32 %v1117_v31, %v876_v44  ;;  %v1391_v32 = vpop.f32.mrf.mxu3 }
 0x16a   : > { %v1939_v47 = vpop.f32.mrf.mxu1 }
 0x16b   : > { %v1477_v53 = vadd.f32 %v1391_v32, %v1203_v39  ;;  %v8400_v32 = vld [vmem:[#allocation2 + $0x13a] sm:$0xff] }
 0x16c   : > { %v1665_v13 = vpop.f32.mrf.mxu0 }
 0x16d   : > { %6818 = vmatmul.msk.f32.gmra.mxu1 %vm393_vm0, %v8358_v18  ;;  %v1751_v57 = vadd.f32 %v1665_v13, %v1477_v53  ;;  %6723 = vmatmul.msk.f32.gmra.mxu2 %vm393_vm0, %v8344_v22 }
 0x16e   : > { %6755 = vmatmul.msk.f32.gmra.mxu3 %vm393_vm0, %v7875_v63 }
 0x16f   : > { %v8368_v28 = vadd.f32 %v1939_v47, %v1751_v57  ;;  %6786 = vmatmul.msk.f32.gmra.mxu0 %vm393_vm0, %v7853_v56  ;;  %v882_v56 = vadd.f32 %v8123_v24, %v8129_v43  ;;  %v8418_v57 = vld [vmem:[#allocation2 + $0x142] sm:$0xff] }
 0x170   : > { %v1120_v60 = vpop.f32.mrf.mxu2 }
 0x171   : > { %v1204_v33 = vadd.f32 %v1120_v60, %v879_v50  ;;  %v1394_v4 = vpop.f32.mrf.mxu3 }
 0x172   : > { %v1942_v38 = vpop.f32.mrf.mxu1 }
 0x173   : > { %v1478_v36 = vadd.f32 %v1394_v4, %v1204_v33 }
 0x174   : > { %v1668_v9 = vpop.f32.mrf.mxu0 }
 0x175   : > { %6819 = vmatmul.msk.f32.gmra.mxu1 %vm393_vm0, %v8372_v45  ;;  %v1752_v63 = vadd.f32 %v1668_v9, %v1478_v36  ;;  %6724 = vmatmul.msk.f32.gmra.mxu2 %vm393_vm0, %v8358_v18 }
 0x176   : > { %6756 = vmatmul.msk.f32.gmra.mxu3 %vm393_vm0, %v7895_v6 }
 0x177   : > { %v8382_v27 = vadd.f32 %v1942_v38, %v1752_v63  ;;  %6787 = vmatmul.msk.f32.gmra.mxu0 %vm393_vm0, %v7873_v62  ;;  %v885_v62 = vadd.f32 %v8139_v34, %v8145_v49  ;;  %v8436_v38 = vld [vmem:[#allocation2 + $0x152] sm:$0xff] }
 0x178   : > { %v1123_v37 = vpop.f32.mrf.mxu2 }
 0x179   : > { %v1205_v48 = vadd.f32 %v1123_v37, %v882_v56  ;;  %v1397_v2 = vpop.f32.mrf.mxu3 }
 0x17a   : > { %v1945_v44 = vpop.f32.mrf.mxu1 }
 0x17b   : > { %v1479_v35 = vadd.f32 %v1397_v2, %v1205_v48  ;;  %v8452_v48 = vld [vmem:[#allocation2 + $0x15a] sm:$0xff] }
 0x17c   : > { %v1671_v51 = vpop.f32.mrf.mxu0 }
 0x17d   : > { %6820 = vmatmul.msk.f32.gmra.mxu1 %vm393_vm0, %v8386_v15  ;;  %v1753_v6 = vadd.f32 %v1671_v51, %v1479_v35  ;;  %6725 = vmatmul.msk.f32.gmra.mxu2 %vm393_vm0, %v8372_v45  ;;  %v11642_v51 = vld [vmem:[#allocation13_spill] sm:$0xff] }
 0x17e   : > { %6757 = vmatmul.msk.f32.gmra.mxu3 %vm393_vm0, %v7915_v12  ;;  %v390_v12 = vld [vmem:[%s7700_s28 + $0xf0] sm:$0xff] }
 0x17f   : > { %v8396_v24 = vadd.f32 %v1945_v44, %v1753_v6  ;;  %6788 = vmatmul.msk.f32.gmra.mxu0 %vm393_vm0, %v7893_v5  ;;  %470 = vst.msk [vmem:[#allocation2 + $0x181] sm:$0xff] %vm393_vm0, %v390_v12  ;;  %v888_v5 = vadd.f32 %v8155_v40, %v8161_v55  ;;  %v11639_v40 = vld [vmem:[#allocation8_spill] sm:$0xff] }
 0x180   : > { %v1126_v43 = vpop.f32.mrf.mxu2 }
 0x181   : > { %v1206_v31 = vadd.f32 %v1126_v43, %v885_v62  ;;  %v1400_v39 = vpop.f32.mrf.mxu3  ;;  %v8468_v43 = vld [vmem:[#allocation2 + $0x16a] sm:$0xff] }
 0x183   : > { %v8402_v47 = vadd.f32 %v1400_v39, %v1206_v31  ;;  %v3088_v39 = vld [vmem:[%s11481_s3 + $0x10] sm:$0xff] }
 0x184   : > { %v8404_v53 = vpop.f32.mrf.mxu0  ;;  %3201 = vmatpush.msra.mxu1 %v3088_v39 }
 0x185   : > { %6821 = vmatmul.msk.f32.gmra.mxu1 %vm393_vm0, %v8400_v32  ;;  %6726 = vmatmul.msk.f32.gmra.mxu2 %vm393_vm0, %v8386_v15 }
 0x186   : > { %6758 = vmatmul.msk.f32.gmra.mxu3 %vm393_vm0, %v7935_v20  ;;  %v391_v20 = vld [vmem:[%s7700_s28 + $0xf8] sm:$0xff]  ;;  %s6565_s28 = sshll.u32 %s354_s19, 4  ;;  %s6566_s28 = int_to_ptr.vmem [resolvable:$true] %s6565_s28 }
 0x187   : > { %6789 = vmatmul.msk.f32.gmra.mxu0 %vm393_vm0, %v7913_v11  ;;  %471 = vst.msk [vmem:[#allocation2 + $0x189] sm:$0xff] %vm393_vm0, %v391_v20  ;;  %v891_v11 = vadd.f32 %v8171_v46, %v8177_v61  ;;  %v894_v46 = vadd.f32 %v8187_v52, %v8193_v3  ;;  %v11641_v61 = vld [vmem:[#allocation9_spill] sm:$0xff]  ;;  %v897_v52 = vadd.f32 %v8203_v58, %v8209_v10  ;;  %v11643_v3 = vld [vmem:[#allocation10_spill] sm:$0xff]  ;;  %v11644_v58 = vld [vmem:[#allocation15_spill] sm:$0xff] }
 0x188   : > { %v1129_v34 = vpop.f32.mrf.mxu2  ;;  %v900_v10 = vadd.f32 %v8219_v0, %v8228_v19  ;;  %v8487_v20 = vld [vmem:[#allocation2 + $0x172] sm:$0xff]  ;;  %v903_v19 = vadd.f32 %v8238_v30, %v8244_v7  ;;  %v906_v7 = vadd.f32 %v8254_v17, %v8260_v23 }
 0x189   : > { %v1207_v49 = vadd.f32 %v1129_v34, %v888_v5  ;;  %v1403_v13 = vpop.f32.mrf.mxu3  ;;  %v11645_v5 = vld [vmem:[#allocation12_spill] sm:$0xff]  ;;  %v11646_v0 = vld [vmem:[#allocation14_spill] sm:$0xff]  ;;  %v11649_v23 = vld [vmem:[#allocation43_spill] sm:$0xff] }
 0x18a   : > { %v909_v17 = vadd.f32 %v11649_v23, %v8276_v54  ;;  %v11656_v23 = vld [vmem:[#allocation19_spill] sm:$0xff] }
 0x18b   : > { %v8420_v50 = vadd.f32 %v1403_v13, %v1207_v49 }
 0x18c   : > { %v8422_v60 = vpop.f32.mrf.mxu0 }
 0x18d   : > { %6822 = vmatmul.msk.f32.gmra.mxu1 %vm393_vm0, %v8418_v57  ;;  %6727 = vmatmul.msk.f32.gmra.mxu2 %vm393_vm0, %v8400_v32 }
 0x18e   : > { %6759 = vmatmul.msk.f32.gmra.mxu3 %vm393_vm0, %v7954_v29  ;;  %v11640_v29 = vld [vmem:[#allocation11_spill] sm:$0xff] }
 0x18f   : > { %6790 = vmatmul.msk.f32.gmra.mxu0 %vm393_vm0, %v11639_v40  ;;  %v8491_v40 = vld [vmem:[#allocation2 + $0x180] sm:$0xff] }
 0x190   : > { %v1132_v55 = vpop.f32.mrf.mxu2 }
 0x191   : > { %v1208_v33 = vadd.f32 %v1132_v55, %v891_v11  ;;  %v1406_v4 = vpop.f32.mrf.mxu3 }
 0x193   : > { %v8438_v36 = vadd.f32 %v1406_v4, %v1208_v33 }
 0x194   : > { %v8440_v9 = vpop.f32.mrf.mxu0 }
 0x195   : > { %6823 = vmatmul.msk.f32.gmra.mxu1 %vm393_vm0, %v8436_v38  ;;  %6728 = vmatmul.msk.f32.gmra.mxu2 %vm393_vm0, %v8418_v57 }
 0x196   : > { %6760 = vmatmul.msk.f32.gmra.mxu3 %vm393_vm0, %v11640_v29 }
 0x197   : > { %6791 = vmatmul.msk.f32.gmra.mxu0 %vm393_vm0, %v11641_v61 }
 0x198   : > { %v1135_v63 = vpop.f32.mrf.mxu2 }
 0x199   : > { %v1209_v56 = vadd.f32 %v1135_v63, %v894_v46  ;;  %v1409_v37 = vpop.f32.mrf.mxu3  ;;  %v8505_v46 = vld [vmem:[#allocation2 + $0x182] sm:$0xff] }
 0x19a   : > { %v8509_v63 = vld [vmem:[#allocation2 + $0x188] sm:$0xff] }
 0x19b   : > { %v8454_v2 = vadd.f32 %v1409_v37, %v1209_v56  ;;  %v8513_v37 = vld [vmem:[#allocation2 + $0x181] sm:$0xff] }
 0x19c   : > { %v8456_v35 = vpop.f32.mrf.mxu0 }
 0x19d   : > { %6824 = vmatmul.msk.f32.gmra.mxu1 %vm393_vm0, %v8452_v48  ;;  %6729 = vmatmul.msk.f32.gmra.mxu2 %vm393_vm0, %v8436_v38 }
 0x19e   : > { %6761 = vmatmul.msk.f32.gmra.mxu3 %vm393_vm0, %v11642_v51 }
 0x19f   : > { %6792 = vmatmul.msk.f32.gmra.mxu0 %vm393_vm0, %v11643_v3  ;;  %v8525_v3 = vld [vmem:[#allocation2 + $0x18a] sm:$0xff] }
 0x1a0   : > { %v1138_v44 = vpop.f32.mrf.mxu2 }
 0x1a1   : > { %v1210_v6 = vadd.f32 %v1138_v44, %v897_v52  ;;  %v1412_v62 = vpop.f32.mrf.mxu3  ;;  %v2053_v44 = vld [vmem:[#allocation2 + $0x30] sm:$0xff] }
 0x1a3   : > { %v8470_v31 = vadd.f32 %v1412_v62, %v1210_v6  ;;  %v2327_v62 = vld [vmem:[#allocation2 + $0x31] sm:$0xff] }
 0x1a4   : > { %v8475_v12 = vpop.f32.mrf.mxu0 }
 0x1a5   : > { %6825 = vmatmul.msk.f32.gmra.mxu1 %vm393_vm0, %v8468_v43  ;;  %6730 = vmatmul.msk.f32.gmra.mxu2 %vm393_vm0, %v8452_v48 }
 0x1a6   : > { %6762 = vmatmul.msk.f32.gmra.mxu3 %vm393_vm0, %v11644_v58  ;;  %v8531_v58 = vld [vmem:[#allocation2 + $0x189] sm:$0xff] }
 0x1a7   : > { %6793 = vmatmul.msk.f32.gmra.mxu0 %vm393_vm0, %v11645_v5 }
 0x1a8   : > { %v1141_v34 = vpop.f32.mrf.mxu2 }
 0x1a9   : > { %v1211_v49 = vadd.f32 %v1141_v34, %v900_v10  ;;  %v1415_v13 = vpop.f32.mrf.mxu3 }
 0x1ab   : > { %v8489_v11 = vadd.f32 %v1415_v13, %v1211_v49  ;;  %v2054_v49 = vld [vmem:[#allocation2 + $0x38] sm:$0xff] }
 0x1ac   : > { %v8493_v55 = vpop.f32.mrf.mxu0 }
 0x1ad   : > { %6826 = vmatmul.msk.f32.gmra.mxu1 %vm393_vm0, %v8487_v20  ;;  %6731 = vmatmul.msk.f32.gmra.mxu2 %vm393_vm0, %v8468_v43 }
 0x1ae   : > { %6763 = vmatmul.msk.f32.gmra.mxu3 %vm393_vm0, %v8491_v40 }
 0x1af   : > { %6794 = vmatmul.msk.f32.gmra.mxu0 %vm393_vm0, %v11646_v0 }
 0x1b0   : > { %v1144_v33 = vpop.f32.mrf.mxu2 }
 0x1b1   : > { %v1212_v4 = vadd.f32 %v1144_v33, %v903_v19  ;;  %v1418_v29 = vpop.f32.mrf.mxu3  ;;  %v2328_v19 = vld [vmem:[#allocation2 + $0x39] sm:$0xff]  ;;  %v11652_v33 = vld [vmem:[#allocation17_spill] sm:$0xff] }
 0x1b3   : > { %v8507_v61 = vadd.f32 %v1418_v29, %v1212_v4  ;;  %v11653_v4 = vld [vmem:[#allocation16_spill] sm:$0xff] }
 0x1b4   : > { %v8511_v56 = vpop.f32.mrf.mxu0 }
 0x1b5   : > { %6827 = vmatmul.msk.f32.gmra.mxu1 %vm393_vm0, %v8505_v46  ;;  %6732 = vmatmul.msk.f32.gmra.mxu2 %vm393_vm0, %v8487_v20 }
 0x1b6   : > { %6764 = vmatmul.msk.f32.gmra.mxu3 %vm393_vm0, %v8509_v63 }
 0x1b7   : > { %6795 = vmatmul.msk.f32.gmra.mxu0 %vm393_vm0, %v8513_v37 }
 0x1b8   : > { %v1147_v30 = vpop.f32.mrf.mxu2 }
 0x1b9   : > { %v1213_v51 = vadd.f32 %v1147_v30, %v906_v7  ;;  %v1421_v52 = vpop.f32.mrf.mxu3  ;;  %v2055_v30 = vld [vmem:[#allocation2 + $0x48] sm:$0xff] }
 0x1bb   : > { %v8527_v6 = vadd.f32 %v1421_v52, %v1213_v51  ;;  %v2329_v52 = vld [vmem:[#allocation2 + $0x49] sm:$0xff] }
 0x1bc   : > { %v8529_v39 = vpop.f32.mrf.mxu0 }
 0x1bd   : > { %11647 = vst [vmem:[#allocation8_spill] sm:$0xff] %v8527_v6  ;;  %6828 = vmatmul.msk.f32.gmra.mxu1 %vm393_vm0, %v8525_v3  ;;  %6829 = vmatmul.msk.f32.vlgmr.msra.gmra.mxu2 %vm393_vm0, %v2053_v44  ;;  %v2338_v6 = vld [vmem:[#allocation2 + $0xb1] sm:$0xff] }
 0x1be   : > { %11648 = vst [vmem:[#allocation11_spill] sm:$0xff] %v8529_v39  ;;  %6861 = vmatmul.msk.f32.vlgmr.msra.gmra.mxu3 %vm393_vm0, %v2327_v62  ;;  %v8555_v62 = vpop.f32.mrf.mxu1 }
 0x1bf   : > { %6796 = vmatmul.msk.f32.gmra.mxu0 %vm393_vm0, %v8531_v58 }
 0x1c0   : > { %v1150_v10 = vpop.f32.mrf.mxu2 }
 0x1c1   : > { %v1214_v5 = vadd.f32 %v1150_v10, %v909_v17  ;;  %v1424_v34 = vpop.f32.mrf.mxu3  ;;  %v11657_v10 = vld [vmem:[#allocation18_spill] sm:$0xff] }
 0x1c3   : > { %v8541_v13 = vadd.f32 %v1424_v34, %v1214_v5 }
 0x1c4   : > { %v8543_v0 = vpop.f32.mrf.mxu0 }
 0x1c5   : > { %11650 = vst [vmem:[#allocation9_spill] sm:$0xff] %v8541_v13  ;;  %6830 = vmatmul.msk.f32.gmra.mxu2 %vm393_vm0, %v2054_v49  ;;  %v2056_v49 = vld [vmem:[#allocation2 + $0x50] sm:$0xff] }
 0x1c6   : > { %11651 = vst [vmem:[#allocation13_spill] sm:$0xff] %v8543_v0  ;;  %6862 = vmatmul.msk.f32.gmra.mxu3 %vm393_vm0, %v2328_v19 }
 0x1c7   : > { %6893 = vmatmul.msk.f32.vlgmr.msra.gmra.mxu0 %vm393_vm0, %v11652_v33  ;;  %v2330_v33 = vld [vmem:[#allocation2 + $0x51] sm:$0xff] }
 0x1c8   : > { %v1153_v54 = vpop.f32.mrf.mxu2 }
 0x1c9   : > { %v1215_v29 = vadd.f32 %v1153_v54, %v11653_v4  ;;  %v1427_v7 = vpop.f32.mrf.mxu3  ;;  %v11660_v4 = vld [vmem:[#allocation21_spill] sm:$0xff] }
 0x1cb   : > { %v8550_v51 = vadd.f32 %v1427_v7, %v1215_v29  ;;  %v8569_v29 = vpop.f32.mrf.mxu1 }
 0x1cc   : > { %v8552_v44 = vpop.f32.mrf.mxu0 }
 0x1cd   : > { %11654 = vst [vmem:[#allocation10_spill] sm:$0xff] %v8550_v51  ;;  %6831 = vmatmul.msk.f32.gmra.mxu2 %vm393_vm0, %v2055_v30  ;;  %v11661_v30 = vld [vmem:[#allocation20_spill] sm:$0xff]  ;;  %v2333_v51 = vld [vmem:[#allocation2 + $0x79] sm:$0xff] }
 0x1ce   : > { %11655 = vst [vmem:[#allocation15_spill] sm:$0xff] %v8552_v44  ;;  %6863 = vmatmul.msk.f32.gmra.mxu3 %vm393_vm0, %v2329_v52 }
 0x1cf   : > { %6894 = vmatmul.msk.f32.gmra.mxu0 %vm393_vm0, %v11656_v23 }
 0x1d0   : > { %v1156_v17 = vpop.f32.mrf.mxu2 }
 0x1d1   : > { %v1216_v5 = vadd.f32 %v1156_v17, %v11657_v10  ;;  %v1430_v34 = vpop.f32.mrf.mxu3  ;;  %v2057_v17 = vld [vmem:[#allocation2 + $0x60] sm:$0xff] }
 0x1d3   : > { %v8561_v19 = vadd.f32 %v1430_v34, %v1216_v5  ;;  %v2331_v5 = vld [vmem:[#allocation2 + $0x61] sm:$0xff]  ;;  %v8581_v44 = vpop.f32.mrf.mxu1 }
 0x1d4   : > { %v8563_v54 = vpop.f32.mrf.mxu0 }
 0x1d5   : > { %11658 = vst [vmem:[#allocation12_spill] sm:$0xff] %v8561_v19  ;;  %6832 = vmatmul.msk.f32.gmra.mxu2 %vm393_vm0, %v2056_v49  ;;  %v11664_v49 = vld [vmem:[#allocation23_spill] sm:$0xff] }
 0x1d6   : > { %11659 = vst [vmem:[#allocation14_spill] sm:$0xff] %v8563_v54  ;;  %6864 = vmatmul.msk.f32.gmra.mxu3 %vm393_vm0, %v2330_v33 }
 0x1d7   : > { %6895 = vmatmul.msk.f32.gmra.mxu0 %vm393_vm0, %v11660_v4  ;;  %v11665_v4 = vld [vmem:[#allocation22_spill] sm:$0xff] }
 0x1d8   : > { %v1159_v7 = vpop.f32.mrf.mxu2 }
 0x1d9   : > { %v1217_v52 = vadd.f32 %v1159_v7, %v11661_v30  ;;  %v1433_v23 = vpop.f32.mrf.mxu3  ;;  %v2058_v7 = vld [vmem:[#allocation2 + $0x68] sm:$0xff] }
 0x1db   : > { %v8572_v10 = vadd.f32 %v1433_v23, %v1217_v52  ;;  %v2332_v52 = vld [vmem:[#allocation2 + $0x69] sm:$0xff] }
 0x1dc   : > { %v8574_v34 = vpop.f32.mrf.mxu0 }
 0x1dd   : > { %11662 = vst [vmem:[#allocation43_spill] sm:$0xff] %v8572_v10  ;;  %6833 = vmatmul.msk.f32.gmra.mxu2 %vm393_vm0, %v2057_v17  ;;  %v11668_v17 = vld [vmem:[#allocation25_spill] sm:$0xff] }
 0x1de   : > { %11663 = vst [vmem:[#allocation17_spill] sm:$0xff] %v8574_v34  ;;  %6865 = vmatmul.msk.f32.gmra.mxu3 %vm393_vm0, %v2331_v5 }
 0x1df   : > { %6896 = vmatmul.msk.f32.gmra.mxu0 %vm393_vm0, %v11664_v49  ;;  %v11669_v49 = vld [vmem:[#allocation24_spill] sm:$0xff] }
 0x1e0   : > { %v1162_v33 = vpop.f32.mrf.mxu2 }
 0x1e1   : > { %v1218_v54 = vadd.f32 %v1162_v33, %v11665_v4  ;;  %v1436_v19 = vpop.f32.mrf.mxu3  ;;  %v2059_v4 = vld [vmem:[#allocation2 + $0x78] sm:$0xff] }
 0x1e3   : > { %v8583_v30 = vadd.f32 %v1436_v19, %v1218_v54  ;;  %v8594_v19 = vpop.f32.mrf.mxu1 }
 0x1e4   : > { %v8585_v23 = vpop.f32.mrf.mxu0 }
 0x1e5   : > { %11666 = vst [vmem:[#allocation16_spill] sm:$0xff] %v8583_v30  ;;  %6834 = vmatmul.msk.f32.gmra.mxu2 %vm393_vm0, %v2058_v7  ;;  %v11672_v7 = vld [vmem:[#allocation27_spill] sm:$0xff] }
 0x1e6   : > { %11667 = vst [vmem:[#allocation19_spill] sm:$0xff] %v8585_v23  ;;  %6866 = vmatmul.msk.f32.gmra.mxu3 %vm393_vm0, %v2332_v52 }
 0x1e7   : > { %6897 = vmatmul.msk.f32.gmra.mxu0 %vm393_vm0, %v11668_v17  ;;  %v11673_v17 = vld [vmem:[#allocation26_spill] sm:$0xff] }
 0x1e8   : > { %v1165_v5 = vpop.f32.mrf.mxu2 }
 0x1e9   : > { %v1219_v34 = vadd.f32 %v1165_v5, %v11669_v49  ;;  %v1439_v33 = vpop.f32.mrf.mxu3  ;;  %v2060_v49 = vld [vmem:[#allocation2 + $0x80] sm:$0xff] }
 0x1eb   : > { %v8592_v10 = vadd.f32 %v1439_v33, %v1219_v34  ;;  %v2334_v34 = vld [vmem:[#allocation2 + $0x81] sm:$0xff] }
 0x1ec   : > { %v8596_v54 = vpop.f32.mrf.mxu0 }
 0x1ed   : > { %11670 = vst [vmem:[#allocation18_spill] sm:$0xff] %v8592_v10  ;;  %6835 = vmatmul.msk.f32.gmra.mxu2 %vm393_vm0, %v2059_v4 }
 0x1ee   : > { %11671 = vst [vmem:[#allocation21_spill] sm:$0xff] %v8596_v54  ;;  %6867 = vmatmul.msk.f32.gmra.mxu3 %vm393_vm0, %v2333_v51  ;;  %v8608_v54 = vpop.f32.mrf.mxu1  ;;  %v11676_v51 = vld [vmem:[#allocation29_spill] sm:$0xff] }
 0x1ef   : > { %6898 = vmatmul.msk.f32.gmra.mxu0 %vm393_vm0, %v11672_v7  ;;  %v11677_v7 = vld [vmem:[#allocation28_spill] sm:$0xff] }
 0x1f0   : > { %v1168_v52 = vpop.f32.mrf.mxu2 }
 0x1f1   : > { %v1220_v23 = vadd.f32 %v1168_v52, %v11673_v17  ;;  %v1442_v5 = vpop.f32.mrf.mxu3  ;;  %v2061_v17 = vld [vmem:[#allocation2 + $0x90] sm:$0xff] }
 0x1f3   : > { %v8603_v30 = vadd.f32 %v1442_v5, %v1220_v23  ;;  %v2335_v23 = vld [vmem:[#allocation2 + $0x91] sm:$0xff] }
 0x1f4   : > { %v8605_v33 = vpop.f32.mrf.mxu0 }
 0x1f5   : > { %11674 = vst [vmem:[#allocation20_spill] sm:$0xff] %v8603_v30  ;;  %6836 = vmatmul.msk.f32.gmra.mxu2 %vm393_vm0, %v2060_v49  ;;  %v11680_v49 = vld [vmem:[#allocation31_spill] sm:$0xff] }
 0x1f6   : > { %11675 = vst [vmem:[#allocation23_spill] sm:$0xff] %v8605_v33  ;;  %6868 = vmatmul.msk.f32.gmra.mxu3 %vm393_vm0, %v2334_v34  ;;  %v8622_v34 = vpop.f32.mrf.mxu1  ;;  %v11681_v33 = vld [vmem:[#allocation30_spill] sm:$0xff] }
 0x1f7   : > { %6899 = vmatmul.msk.f32.gmra.mxu0 %vm393_vm0, %v11676_v51 }
 0x1f8   : > { %v1171_v4 = vpop.f32.mrf.mxu2 }
 0x1f9   : > { %v1221_v10 = vadd.f32 %v1171_v4, %v11677_v7  ;;  %v1445_v52 = vpop.f32.mrf.mxu3  ;;  %v2062_v7 = vld [vmem:[#allocation2 + $0x98] sm:$0xff] }
 0x1fb   : > { %v8614_v0 = vadd.f32 %v1445_v52, %v1221_v10  ;;  %v2336_v10 = vld [vmem:[#allocation2 + $0x99] sm:$0xff] }
 0x1fc   : > { %v8616_v5 = vpop.f32.mrf.mxu0 }
 0x1fd   : > { %11678 = vst [vmem:[#allocation22_spill] sm:$0xff] %v8614_v0  ;;  %6837 = vmatmul.msk.f32.gmra.mxu2 %vm393_vm0, %v2061_v17  ;;  %v11684_v17 = vld [vmem:[#allocation33_spill] sm:$0xff] }
 0x1fe   : > { %11679 = vst [vmem:[#allocation25_spill] sm:$0xff] %v8616_v5  ;;  %6869 = vmatmul.msk.f32.gmra.mxu3 %vm393_vm0, %v2335_v23  ;;  %v8634_v39 = vpop.f32.mrf.mxu1 }
 0x1ff   : > { %6900 = vmatmul.msk.f32.gmra.mxu0 %vm393_vm0, %v11680_v49  ;;  %v11685_v49 = vld [vmem:[#allocation32_spill] sm:$0xff] }
 0x200   : > { %v1174_v51 = vpop.f32.mrf.mxu2 }
 0x201   : > { %v1222_v30 = vadd.f32 %v1174_v51, %v11681_v33  ;;  %v1448_v4 = vpop.f32.mrf.mxu3  ;;  %v2063_v33 = vld [vmem:[#allocation2 + $0xa8] sm:$0xff] }
 0x203   : > { %v8625_v13 = vadd.f32 %v1448_v4, %v1222_v30  ;;  %v2337_v30 = vld [vmem:[#allocation2 + $0xa9] sm:$0xff] }
 0x204   : > { %v8627_v52 = vpop.f32.mrf.mxu0 }
 0x205   : > { %11682 = vst [vmem:[#allocation24_spill] sm:$0xff] %v8625_v13  ;;  %6838 = vmatmul.msk.f32.gmra.mxu2 %vm393_vm0, %v2062_v7  ;;  %v11688_v7 = vld [vmem:[#allocation35_spill] sm:$0xff] }
 0x206   : > { %11683 = vst [vmem:[#allocation27_spill] sm:$0xff] %v8627_v52  ;;  %6870 = vmatmul.msk.f32.gmra.mxu3 %vm393_vm0, %v2336_v10 }
 0x207   : > { %6901 = vmatmul.msk.f32.gmra.mxu0 %vm393_vm0, %v11684_v17  ;;  %v11689_v17 = vld [vmem:[#allocation34_spill] sm:$0xff] }
 0x208   : > { %v1177_v23 = vpop.f32.mrf.mxu2 }
 0x209   : > { %v1223_v5 = vadd.f32 %v1177_v23, %v11685_v49  ;;  %v1451_v0 = vpop.f32.mrf.mxu3  ;;  %v2064_v49 = vld [vmem:[#allocation2 + $0xb0] sm:$0xff] }
 0x20b   : > { %v8636_v51 = vadd.f32 %v1451_v0, %v1223_v5  ;;  %v8647_v0 = vpop.f32.mrf.mxu1 }
 0x20c   : > { %v8638_v4 = vpop.f32.mrf.mxu0 }
 0x20d   : > { %11686 = vst [vmem:[#allocation26_spill] sm:$0xff] %v8636_v51  ;;  %6839 = vmatmul.msk.f32.gmra.mxu2 %vm393_vm0, %v2063_v33  ;;  %v11692_v33 = vld [vmem:[#allocation37_spill] sm:$0xff] }
 0x20e   : > { %11687 = vst [vmem:[#allocation29_spill] sm:$0xff] %v8638_v4  ;;  %6871 = vmatmul.msk.f32.gmra.mxu3 %vm393_vm0, %v2337_v30  ;;  %v3055_v30 = vld [vmem:[%s11481_s3 + $0x8] sm:$0xff] }
 0x20f   : > { %6902 = vmatmul.msk.f32.gmra.mxu0 %vm393_vm0, %v11688_v7  ;;  %3409 = vmatpush.msrb.mxu2 %v3055_v30  ;;  %v4091_v4 = vld [vmem:[%s11481_s3 + $0x48] sm:$0xff] }
 0x210   : > { %v1180_v10 = vpop.f32.mrf.mxu2  ;;  %4202 = vmatpush.msrb.mxu1 %v4091_v4  ;;  %v2067_v4 = vld [vmem:[#allocation2 + $0xd8] sm:$0xff] }
 0x211   : > { %v1224_v52 = vadd.f32 %v1180_v10, %v11689_v17  ;;  %v1454_v23 = vpop.f32.mrf.mxu3 }
 0x213   : > { %v8645_v13 = vadd.f32 %v1454_v23, %v1224_v52  ;;  %v11693_v52 = vld [vmem:[#allocation36_spill] sm:$0xff]  ;;  %v8671_v30 = vpop.f32.mrf.mxu1 }
 0x214   : > { %v8649_v5 = vpop.f32.mrf.mxu0  ;;  %v2065_v23 = vld [vmem:[#allocation2 + $0xc0] sm:$0xff]  ;;  %11697 = vst [vmem:[#allocation32_spill] sm:$0xff] %v8671_v30 }
 0x215   : > { %11690 = vst [vmem:[#allocation28_spill] sm:$0xff] %v8645_v13  ;;  %6840 = vmatmul.msk.f32.gmra.mxu2 %vm393_vm0, %v2064_v49  ;;  %v2341_v30 = vld [vmem:[#allocation2 + $0xd9] sm:$0xff] }
 0x216   : > { %11691 = vst [vmem:[#allocation31_spill] sm:$0xff] %v8649_v5  ;;  %6872 = vmatmul.msk.f32.gmra.mxu3 %vm393_vm0, %v2338_v6  ;;  %v2339_v5 = vld [vmem:[#allocation2 + $0xc1] sm:$0xff] }
 0x217   : > { %6903 = vmatmul.msk.f32.gmra.mxu0 %vm393_vm0, %v11692_v33  ;;  %v3541_v6 = vld [vmem:[%s11481_s3 + $0x28] sm:$0xff]  ;;  %v11696_v33 = vmov 0.0  }
 0x218   : > { %v1183_v7 = vpop.f32.mrf.mxu2  ;;  %3652 = vmatpush.msrb.mxu3 %v3541_v6  ;;  %2944 = vst.msk [vmem:[#allocation3] sm:$0xff] %vm2943_vm3, %v11696_v33  ;;  %v2066_v6 = vld [vmem:[#allocation2 + $0xc8] sm:$0xff] }
 0x219   : > { %v1225_v10 = vadd.f32 %v1183_v7, %v11693_v52  ;;  %v1457_v17 = vpop.f32.mrf.mxu3  ;;  %2945 = vst.msk [vmem:[#allocation3 + $0x8] sm:$0xff] %vm2943_vm3, %v11696_v33  ;;  %v11698_v7 = vld [vmem:[#allocation39_spill] sm:$0xff] }
 0x21a   : > { %2949 = vst.msk [vmem:[#allocation3 + $0x198] sm:$0xff] %vm2943_vm3, %v11696_v33 }
 0x21b   : > { %v8659_v13 = vadd.f32 %v1457_v17, %v1225_v10  ;;  %2950 = vst.msk [vmem:[#allocation3 + $0x1a0] sm:$0xff] %vm2943_vm3, %v11696_v33  ;;  %v11699_v10 = vld [vmem:[#allocation38_spill] sm:$0xff] }
 0x21c   : > { %v8664_v49 = vpop.f32.mrf.mxu0  ;;  %2947 = vst.msk [vmem:[#allocation3 + $0x10] sm:$0x3] %vm2946_vm4, %v11696_v33 }
 0x21d   : > { %11694 = vst [vmem:[#allocation30_spill] sm:$0xff] %v8659_v13  ;;  %6841 = vmatmul.msk.f32.gmra.mxu2 %vm393_vm0, %v2065_v23  ;;  %v2340_v13 = vld [vmem:[#allocation2 + $0xc9] sm:$0xff] }
 0x21e   : > { %11695 = vst [vmem:[#allocation33_spill] sm:$0xff] %v8664_v49  ;;  %6873 = vmatmul.msk.f32.gmra.mxu3 %vm393_vm0, %v2339_v5  ;;  %v3816_v5 = vld [vmem:[%s11481_s3 + $0x38] sm:$0xff] }
 0x21f   : > { %6904 = vmatmul.msk.f32.gmra.mxu0 %vm393_vm0, %v11698_v7  ;;  %2951 = vst.msk [vmem:[#allocation3 + $0x1a8] sm:$0x3] %vm2946_vm4, %v11696_v33 }
 0x220   : > { %v1186_v52 = vpop.f32.mrf.mxu2  ;;  %3927 = vmatpush.msrb.mxu0 %v3816_v5  ;;  %v3056_v51 = vld [vmem:[#allocation3 + $0x1] sm:$0xff]  ;;  %2953 = vst.msk [vmem:[#allocation3] sm:$0x1] %vm2952_vm5, %v11696_v33 }
 0x221   : > { %v1226_v17 = vadd.f32 %v1186_v52, %v11699_v10  ;;  %v1460_v23 = vpop.f32.mrf.mxu3  ;;  %6925 = vmatmul.msk.f32.vlgmr.msra.gmra.mxu1 %vm2943_vm3, %v3056_v51  ;;  %v11702_v52 = vld [vmem:[#allocation41_spill] sm:$0xff]  ;;  %v8698_v10 = vpop.f32.mrf.mxu1  ;;  %2954 = vst.msk [vmem:[#allocation3 + $0x18] sm:$0x1] %vm2952_vm5, %v11696_v33 }
 0x222   : > { %2955 = vst.msk [vmem:[#allocation3 + $0x30] sm:$0x1] %vm2952_vm5, %v11696_v33 }
 0x223   : > { %v8681_v49 = vadd.f32 %v1460_v23, %v1226_v17  ;;  %v11703_v23 = vld [vmem:[#allocation40_spill] sm:$0xff]  ;;  %2956 = vst.msk [vmem:[#allocation3 + $0x48] sm:$0x1] %vm2952_vm5, %v11696_v33 }
 0x224   : > { %v8689_v7 = vpop.f32.mrf.mxu0  ;;  %2957 = vst.msk [vmem:[#allocation3 + $0x60] sm:$0x1] %vm2952_vm5, %v11696_v33 }
 0x225   : > { %11700 = vst [vmem:[#allocation35_spill] sm:$0xff] %v8681_v49  ;;  %6842 = vmatmul.msk.f32.gmra.mxu2 %vm393_vm0, %v2066_v6  ;;  %v3057_v6 = vld [vmem:[#allocation3 + $0x9] sm:$0xff] }
 0x226   : > { %11701 = vst [vmem:[#allocation34_spill] sm:$0xff] %v8689_v7  ;;  %6874 = vmatmul.msk.f32.gmra.mxu3 %vm393_vm0, %v2340_v13 }
 0x227   : > { %6905 = vmatmul.msk.f32.gmra.mxu0 %vm393_vm0, %v11702_v52  ;;  %2958 = vst.msk [vmem:[#allocation3 + $0x78] sm:$0x1] %vm2952_vm5, %v11696_v33 }
 0x228   : > { %v1189_v17 = vpop.f32.mrf.mxu2  ;;  %2959 = vst.msk [vmem:[#allocation3 + $0x90] sm:$0x1] %vm2952_vm5, %v11696_v33 }
 0x229   : > { %v1227_v5 = vadd.f32 %v1189_v17, %v11703_v23  ;;  %v1463_v7 = vpop.f32.mrf.mxu3  ;;  %6926 = vmatmul.msk.f32.gmra.mxu1 %vm2943_vm3, %v3057_v6  ;;  %v2068_v23 = vld [vmem:[#allocation2 + $0xe0] sm:$0xff]  ;;  %2960 = vst.msk [vmem:[#allocation3 + $0xa8] sm:$0x1] %vm2952_vm5, %v11696_v33 }
 0x22a   : > { %2961 = vst.msk [vmem:[#allocation3 + $0xc0] sm:$0x1] %vm2952_vm5, %v11696_v33 }
 0x22b   : > { %v8701_v49 = vadd.f32 %v1463_v7, %v1227_v5  ;;  %v11704_v7 = vld [vmem:[#allocation42_spill] sm:$0xff]  ;;  %v2342_v5 = vld [vmem:[#allocation2 + $0xe1] sm:$0xff]  ;;  %2962 = vst.msk [vmem:[#allocation3 + $0xd8] sm:$0x1] %vm2952_vm5, %v11696_v33 }
 0x22c   : > { %v8703_v51 = vpop.f32.mrf.mxu0  ;;  %2963 = vst.msk [vmem:[#allocation3 + $0xf0] sm:$0x1] %vm2952_vm5, %v11696_v33 }
 0x22d   : > { %6843 = vmatmul.msk.f32.gmra.mxu2 %vm393_vm0, %v2067_v4  ;;  %2964 = vst.msk [vmem:[#allocation3 + $0x108] sm:$0x1] %vm2952_vm5, %v11696_v33 }
 0x22e   : > { %6875 = vmatmul.msk.f32.gmra.mxu3 %vm393_vm0, %v2341_v30  ;;  %v8723_v30 = vpop.f32.mrf.mxu1  ;;  %2965 = vst.msk [vmem:[#allocation3 + $0x120] sm:$0x1] %vm2952_vm5, %v11696_v33 }
 0x22f   : > { %6906 = vmatmul.msk.f32.gmra.mxu0 %vm393_vm0, %v8272_v1  ;;  %2966 = vst.msk [vmem:[#allocation3 + $0x138] sm:$0x1] %vm2952_vm5, %v11696_v33 }
 0x230   : > { %v1192_v13 = vpop.f32.mrf.mxu2  ;;  %2967 = vst.msk [vmem:[#allocation3 + $0x150] sm:$0x1] %vm2952_vm5, %v11696_v33 }
 0x231   : > { %v1228_v52 = vadd.f32 %v1192_v13, %v11704_v7  ;;  %v1466_v17 = vpop.f32.mrf.mxu3  ;;  %v11707_v13 = vld [vmem:[#allocation44_spill] sm:$0xff]  ;;  %2968 = vst.msk [vmem:[#allocation3 + $0x168] sm:$0x1] %vm2952_vm5, %v11696_v33 }
 0x232   : > { %2969 = vst.msk [vmem:[#allocation3 + $0x180] sm:$0x1] %vm2952_vm5, %v11696_v33 }
 0x233   : > { %v8727_v1 = vadd.f32 %v1466_v17, %v1228_v52  ;;  %v2069_v17 = vld [vmem:[#allocation2 + $0xf0] sm:$0xff]  ;;  %2970 = vst.msk [vmem:[#allocation3 + $0x198] sm:$0x1] %vm2952_vm5, %v11696_v33 }
 0x234   : > { %v8731_v4 = vpop.f32.mrf.mxu0  ;;  %2971 = vst.msk [vmem:[#allocation3 + $0x11] sm:$0x1] %vm2952_vm5, %v11696_v33 }
 0x235   : > { %11705 = vst [vmem:[#allocation37_spill] sm:$0xff] %v8727_v1  ;;  %6844 = vmatmul.msk.f32.gmra.mxu2 %vm393_vm0, %v2068_v23 }
 0x236   : > { %11706 = vst [vmem:[#allocation36_spill] sm:$0xff] %v8731_v4  ;;  %6876 = vmatmul.msk.f32.gmra.mxu3 %vm393_vm0, %v2342_v5  ;;  %v8756_v5 = vpop.f32.mrf.mxu1 }
 0x237   : > { %6907 = vmatmul.msk.f32.gmra.mxu0 %vm393_vm0, %v8288_v41  ;;  %v2343_v41 = vld [vmem:[#allocation2 + $0xf1] sm:$0xff]  ;;  %2972 = vst.msk [vmem:[#allocation3 + $0x29] sm:$0x1] %vm2952_vm5, %v11696_v33 }
 0x238   : > { %v1195_v6 = vpop.f32.mrf.mxu2  ;;  %2973 = vst.msk [vmem:[#allocation3 + $0x41] sm:$0x1] %vm2952_vm5, %v11696_v33 }
 0x239   : > { %v1229_v7 = vadd.f32 %v1195_v6, %v11707_v13  ;;  %v1469_v52 = vpop.f32.mrf.mxu3  ;;  %2974 = vst.msk [vmem:[#allocation3 + $0x59] sm:$0x1] %vm2952_vm5, %v11696_v33 }
 0x23a   : > { %2975 = vst.msk [vmem:[#allocation3 + $0x71] sm:$0x1] %vm2952_vm5, %v11696_v33 }
 0x23b   : > { %v8752_v23 = vadd.f32 %v1469_v52, %v1229_v7  ;;  %v2070_v52 = vld [vmem:[#allocation2 + $0xf8] sm:$0xff]  ;;  %2976 = vst.msk [vmem:[#allocation3 + $0x89] sm:$0x1] %vm2952_vm5, %v11696_v33 }
 0x23c   : > { %v8758_v4 = vpop.f32.mrf.mxu0  ;;  %2977 = vst.msk [vmem:[#allocation3 + $0xa1] sm:$0x1] %vm2952_vm5, %v11696_v33 }
 0x23d   : > { %11708 = vst [vmem:[#allocation39_spill] sm:$0xff] %v8752_v23  ;;  %6845 = vmatmul.msk.f32.gmra.mxu2 %vm393_vm0, %v2069_v17 }
 0x23e   : > { %11709 = vst [vmem:[#allocation38_spill] sm:$0xff] %v8758_v4  ;;  %6877 = vmatmul.msk.f32.gmra.mxu3 %vm393_vm0, %v2343_v41  ;;  %v2344_v41 = vld [vmem:[#allocation2 + $0xf9] sm:$0xff] }
 0x23f   : > { %6908 = vmatmul.msk.f32.gmra.mxu0 %vm393_vm0, %v8302_v14  ;;  %v8782_v14 = vld [vmem:[%s11480_s2] ss:$0 sm:$0xff]  ;;  %2978 = vst.msk [vmem:[#allocation3 + $0xb9] sm:$0x1] %vm2952_vm5, %v11696_v33 }
 0x240   : > { %v2199_v6 = vpop.f32.mrf.mxu2  ;;  %2979 = vst.msk [vmem:[#allocation3 + $0xd1] sm:$0x1] %vm2952_vm5, %v11696_v33 }
 0x241   : > { %v2295_v13 = vadd.f32 %v2199_v6, %v8298_v26  ;;  %v2473_v7 = vpop.f32.mrf.mxu3  ;;  %v8791_v6 = vpop.f32.mrf.mxu1  ;;  %2980 = vst.msk [vmem:[#allocation3 + $0xe9] sm:$0x1] %vm2952_vm5, %v11696_v33 }
 0x242   : > { %2981 = vst.msk [vmem:[#allocation3 + $0x101] sm:$0x1] %vm2952_vm5, %v11696_v33 }
 0x243   : > { %v2569_v17 = vadd.f32 %v2473_v7, %v2295_v13  ;;  %2982 = vst.msk [vmem:[#allocation3 + $0x119] sm:$0x1] %vm2952_vm5, %v11696_v33 }
 0x244   : > { %v2747_v4 = vpop.f32.mrf.mxu0  ;;  %2983 = vst.msk [vmem:[#allocation3 + $0x131] sm:$0x1] %vm2952_vm5, %v11696_v33 }
 0x245   : > { %v2843_v26 = vadd.f32 %v2747_v4, %v2569_v17  ;;  %6846 = vmatmul.msk.f32.gmra.mxu2 %vm393_vm0, %v2070_v52  ;;  %2984 = vst.msk [vmem:[#allocation3 + $0x149] sm:$0x1] %vm2952_vm5, %v11696_v33 }
 0x246   : > { %6878 = vmatmul.msk.f32.gmra.mxu3 %vm393_vm0, %v2344_v41  ;;  %v2071_v41 = vld [vmem:[#allocation2 + $0x108] sm:$0xff]  ;;  %2985 = vst.msk [vmem:[#allocation3 + $0x161] sm:$0x1] %vm2952_vm5, %v11696_v33 }
 0x247   : > { %v2878_v13 = vadd.f32 %v8782_v14, %v2843_v26  ;;  %6909 = vmatmul.msk.f32.gmra.mxu0 %vm393_vm0, %v8316_v16  ;;  %v2345_v26 = vld [vmem:[#allocation2 + $0x109] sm:$0xff]  ;;  %2986 = vst.msk [vmem:[#allocation3 + $0x179] sm:$0x1] %vm2952_vm5, %v11696_v33 }
 0x248   : > { %v2202_v4 = vpop.f32.mrf.mxu2  ;;  %2987 = vst.msk [vmem:[#allocation3 + $0x191] sm:$0x1] %vm2952_vm5, %v11696_v33 }
 0x249   : > { %v2910_v7 = vmax.f32 %v2878_v13, 0.0  ;;  %v2296_v52 = vadd.f32 %v2202_v4, %v8312_v25  ;;  %v2476_v17 = vpop.f32.mrf.mxu3  ;;  %v8822_v13 = vpop.f32.mrf.mxu1  ;;  %2988 = vst.msk [vmem:[#allocation3 + $0x1a9] sm:$0x1] %vm2952_vm5, %v11696_v33 }
 0x24b   : > { %2990 = vst.msk [vmem:[#allocation3 + $0x19] sm:$0xff] %vm2943_vm3, %v2910_v7  ;;  %v2570_v16 = vadd.f32 %v2476_v17, %v2296_v52 }
 0x24c   : > { %v2750_v23 = vpop.f32.mrf.mxu0 }
 0x24d   : > { %v2844_v1 = vadd.f32 %v2750_v23, %v2570_v16  ;;  %6847 = vmatmul.msk.f32.gmra.mxu2 %vm393_vm0, %v2071_v41  ;;  %v2072_v41 = vld [vmem:[#allocation2 + $0x110] sm:$0xff] }
 0x24e   : > { %6879 = vmatmul.msk.f32.gmra.mxu3 %vm393_vm0, %v2345_v26 }
 0x24f   : > { %v2879_v25 = vadd.f32 %v8782_v14, %v2844_v1  ;;  %6910 = vmatmul.msk.f32.gmra.mxu0 %vm393_vm0, %v8330_v21  ;;  %v2346_v21 = vld [vmem:[#allocation2 + $0x111] sm:$0xff] }
 0x250   : > { %v2205_v23 = vpop.f32.mrf.mxu2 }
 0x251   : > { %v2911_v4 = vmax.f32 %v2879_v25, 0.0  ;;  %v2297_v7 = vadd.f32 %v2205_v23, %v8326_v42  ;;  %v2479_v52 = vpop.f32.mrf.mxu3 }
 0x252   : > { %v3058_v17 = vld [vmem:[#allocation3 + $0x19] sm:$0xff] }
 0x253   : > { %2991 = vst.msk [vmem:[#allocation3 + $0x21] sm:$0xff] %vm2943_vm3, %v2911_v4  ;;  %v2571_v1 = vadd.f32 %v2479_v52, %v2297_v7  ;;  %6927 = vmatmul.msk.f32.gmra.mxu1 %vm2943_vm3, %v3058_v17  ;;  %v8835_v7 = vpop.f32.mrf.mxu1  ;;  %v2073_v17 = vld [vmem:[#allocation2 + $0x120] sm:$0xff] }
 0x254   : > { %v2753_v16 = vpop.f32.mrf.mxu0 }
 0x255   : > { %v2845_v26 = vadd.f32 %v2753_v16, %v2571_v1  ;;  %6848 = vmatmul.msk.f32.gmra.mxu2 %vm393_vm0, %v2072_v41  ;;  %v2347_v41 = vld [vmem:[#allocation2 + $0x121] sm:$0xff] }
 0x256   : > { %6880 = vmatmul.msk.f32.gmra.mxu3 %vm393_vm0, %v2346_v21 }
 0x257   : > { %v2880_v33 = vadd.f32 %v8782_v14, %v2845_v26  ;;  %6911 = vmatmul.msk.f32.gmra.mxu0 %vm393_vm0, %v8344_v22 }
 0x258   : > { %v2208_v42 = vpop.f32.mrf.mxu2 }
 0x259   : > { %v2912_v25 = vmax.f32 %v2880_v33, 0.0  ;;  %v2298_v23 = vadd.f32 %v2208_v42, %v8340_v59  ;;  %v2482_v4 = vpop.f32.mrf.mxu3 }
 0x25a   : > { %v3059_v52 = vld [vmem:[#allocation3 + $0x21] sm:$0xff] }
 0x25b   : > { %2992 = vst.msk [vmem:[#allocation3 + $0x31] sm:$0xff] %vm2943_vm3, %v2912_v25  ;;  %v2572_v1 = vadd.f32 %v2482_v4, %v2298_v23  ;;  %6928 = vmatmul.msk.f32.gmra.mxu1 %vm2943_vm3, %v3059_v52  ;;  %v2074_v23 = vld [vmem:[#allocation2 + $0x128] sm:$0xff] }
 0x25c   : > { %v2756_v21 = vpop.f32.mrf.mxu0  ;;  %v2348_v52 = vld [vmem:[#allocation2 + $0x129] sm:$0xff] }
 0x25d   : > { %v2846_v16 = vadd.f32 %v2756_v21, %v2572_v1  ;;  %6849 = vmatmul.msk.f32.gmra.mxu2 %vm393_vm0, %v2073_v17  ;;  %v8847_v17 = vpop.f32.mrf.mxu1 }
 0x25e   : > { %6881 = vmatmul.msk.f32.gmra.mxu3 %vm393_vm0, %v2347_v41 }
 0x25f   : > { %v2881_v22 = vadd.f32 %v8782_v14, %v2846_v16  ;;  %6912 = vmatmul.msk.f32.gmra.mxu0 %vm393_vm0, %v8358_v18 }
 0x260   : > { %v2211_v59 = vpop.f32.mrf.mxu2 }
 0x261   : > { %v2913_v26 = vmax.f32 %v2881_v22, 0.0  ;;  %v2299_v33 = vadd.f32 %v2211_v59, %v8354_v8  ;;  %v2485_v42 = vpop.f32.mrf.mxu3 }
 0x262   : > { %v3060_v25 = vld [vmem:[#allocation3 + $0x31] sm:$0xff] }
 0x263   : > { %2993 = vst.msk [vmem:[#allocation3 + $0x39] sm:$0xff] %vm2943_vm3, %v2913_v26  ;;  %v2573_v4 = vadd.f32 %v2485_v42, %v2299_v33  ;;  %6929 = vmatmul.msk.f32.gmra.mxu1 %vm2943_vm3, %v3060_v25  ;;  %v2075_v26 = vld [vmem:[#allocation2 + $0x138] sm:$0xff] }
 0x264   : > { %v2759_v1 = vpop.f32.mrf.mxu0  ;;  %v2349_v42 = vld [vmem:[#allocation2 + $0x139] sm:$0xff] }
 0x265   : > { %v2847_v41 = vadd.f32 %v2759_v1, %v2573_v4  ;;  %6850 = vmatmul.msk.f32.gmra.mxu2 %vm393_vm0, %v2074_v23  ;;  %v8858_v4 = vpop.f32.mrf.mxu1 }
 0x266   : > { %6882 = vmatmul.msk.f32.gmra.mxu3 %vm393_vm0, %v2348_v52 }
 0x267   : > { %v2882_v18 = vadd.f32 %v8782_v14, %v2847_v41  ;;  %6913 = vmatmul.msk.f32.gmra.mxu0 %vm393_vm0, %v8372_v45 }
 0x268   : > { %v2214_v8 = vpop.f32.mrf.mxu2 }
 0x269   : > { %v2914_v21 = vmax.f32 %v2882_v18, 0.0  ;;  %v2300_v16 = vadd.f32 %v2214_v8, %v8368_v28  ;;  %v2488_v22 = vpop.f32.mrf.mxu3  ;;  %v2076_v8 = vld [vmem:[#allocation2 + $0x140] sm:$0xff] }
 0x26a   : > { %v3061_v59 = vld [vmem:[#allocation3 + $0x39] sm:$0xff] }
 0x26b   : > { %2994 = vst.msk [vmem:[#allocation3 + $0x49] sm:$0xff] %vm2943_vm3, %v2914_v21  ;;  %v2574_v33 = vadd.f32 %v2488_v22, %v2300_v16  ;;  %6930 = vmatmul.msk.f32.gmra.mxu1 %vm2943_vm3, %v3061_v59  ;;  %v2350_v16 = vld [vmem:[#allocation2 + $0x141] sm:$0xff] }
 0x26c   : > { %v2762_v25 = vpop.f32.mrf.mxu0 }
 0x26d   : > { %v2848_v23 = vadd.f32 %v2762_v25, %v2574_v33  ;;  %6851 = vmatmul.msk.f32.gmra.mxu2 %vm393_vm0, %v2075_v26 }
 0x26e   : > { %6883 = vmatmul.msk.f32.gmra.mxu3 %vm393_vm0, %v2349_v42 }
 0x26f   : > { %v2883_v45 = vadd.f32 %v8782_v14, %v2848_v23  ;;  %6914 = vmatmul.msk.f32.gmra.mxu0 %vm393_vm0, %v8386_v15 }
 0x270   : > { %v2217_v28 = vpop.f32.mrf.mxu2 }
 0x271   : > { %v2915_v52 = vmax.f32 %v2883_v45, 0.0  ;;  %v2301_v1 = vadd.f32 %v2217_v28, %v8382_v27  ;;  %v2491_v41 = vpop.f32.mrf.mxu3  ;;  %v8872_v27 = vpop.f32.mrf.mxu1  ;;  %v2077_v45 = vld [vmem:[#allocation2 + $0x150] sm:$0xff]  ;;  %v1754_v28 = vadd.f32 %v8404_v53, %v8402_v47 }
 0x272   : > { %v3062_v18 = vld [vmem:[#allocation3 + $0x49] sm:$0xff] }
 0x273   : > { %2995 = vst.msk [vmem:[#allocation3 + $0x51] sm:$0xff] %vm2943_vm3, %v2915_v52  ;;  %v2575_v21 = vadd.f32 %v2491_v41, %v2301_v1  ;;  %6931 = vmatmul.msk.f32.gmra.mxu1 %vm2943_vm3, %v3062_v18  ;;  %v2351_v1 = vld [vmem:[#allocation2 + $0x151] sm:$0xff] }
 0x274   : > { %v2765_v22 = vpop.f32.mrf.mxu0 }
 0x275   : > { %v2849_v59 = vadd.f32 %v2765_v22, %v2575_v21  ;;  %6852 = vmatmul.msk.f32.gmra.mxu2 %vm393_vm0, %v2076_v8 }
 0x276   : > { %6884 = vmatmul.msk.f32.gmra.mxu3 %vm393_vm0, %v2350_v16 }
 0x277   : > { %v2884_v15 = vadd.f32 %v8782_v14, %v2849_v59  ;;  %6915 = vmatmul.msk.f32.gmra.mxu0 %vm393_vm0, %v8400_v32  ;;  %v2078_v59 = vld [vmem:[#allocation2 + $0x158] sm:$0xff] }
 0x278   : > { %v2220_v26 = vpop.f32.mrf.mxu2 }
 0x279   : > { %v2916_v33 = vmax.f32 %v2884_v15, 0.0  ;;  %v2302_v42 = vadd.f32 %v2220_v26, %v8396_v24  ;;  %v2494_v25 = vpop.f32.mrf.mxu3  ;;  %v2028_v24 = vadd.f32 %v8555_v62, %v1754_v28  ;;  %v8885_v16 = vpop.f32.mrf.mxu1  ;;  %v1755_v15 = vadd.f32 %v8422_v60, %v8420_v50  ;;  %v2352_v62 = vld [vmem:[#allocation2 + $0x159] sm:$0xff] }
 0x27a   : > { %v3063_v23 = vld [vmem:[#allocation3 + $0x51] sm:$0xff] }
 0x27b   : > { %2996 = vst.msk [vmem:[#allocation3 + $0x61] sm:$0xff] %vm2943_vm3, %v2916_v33  ;;  %v2576_v52 = vadd.f32 %v2494_v25, %v2302_v42  ;;  %6932 = vmatmul.msk.f32.gmra.mxu1 %vm2943_vm3, %v3063_v23 }
 0x27c   : > { %v2768_v41 = vpop.f32.mrf.mxu0 }
 0x27d   : > { %v2850_v32 = vadd.f32 %v2768_v41, %v2576_v52  ;;  %6853 = vmatmul.msk.f32.gmra.mxu2 %vm393_vm0, %v2077_v45  ;;  %v2079_v52 = vld [vmem:[#allocation2 + $0x168] sm:$0xff] }
 0x27e   : > { %6885 = vmatmul.msk.f32.gmra.mxu3 %vm393_vm0, %v2351_v1  ;;  %v1756_v1 = vadd.f32 %v8440_v9, %v8438_v36 }
 0x27f   : > { %v2885_v18 = vadd.f32 %v8782_v14, %v2850_v32  ;;  %6916 = vmatmul.msk.f32.gmra.mxu0 %vm393_vm0, %v8418_v57  ;;  %v2029_v57 = vadd.f32 %v8569_v29, %v1755_v15  ;;  %v2353_v29 = vld [vmem:[#allocation2 + $0x169] sm:$0xff] }
 0x280   : > { %v2223_v47 = vpop.f32.mrf.mxu2 }
 0x281   : > { %v2917_v53 = vmax.f32 %v2885_v18, 0.0  ;;  %v2303_v8 = vadd.f32 %v2223_v47, %v2028_v24  ;;  %v2497_v21 = vpop.f32.mrf.mxu3  ;;  %v8901_v32 = vpop.f32.mrf.mxu1 }
 0x282   : > { %v3064_v22 = vld [vmem:[#allocation3 + $0x61] sm:$0xff] }
 0x283   : > { %2997 = vst.msk [vmem:[#allocation3 + $0x69] sm:$0xff] %vm2943_vm3, %v2917_v53  ;;  %v2577_v26 = vadd.f32 %v2497_v21, %v2303_v8  ;;  %6933 = vmatmul.msk.f32.gmra.mxu1 %vm2943_vm3, %v3064_v22  ;;  %v2080_v22 = vld [vmem:[#allocation2 + $0x170] sm:$0xff] }
 0x284   : > { %v2771_v33 = vpop.f32.mrf.mxu0 }
 0x285   : > { %v2851_v42 = vadd.f32 %v2771_v33, %v2577_v26  ;;  %6854 = vmatmul.msk.f32.gmra.mxu2 %vm393_vm0, %v2078_v59  ;;  %v1757_v59 = vadd.f32 %v8456_v35, %v8454_v2 }
 0x286   : > { %6886 = vmatmul.msk.f32.gmra.mxu3 %vm393_vm0, %v2352_v62 }
 0x287   : > { %v2886_v25 = vadd.f32 %v8782_v14, %v2851_v42  ;;  %6917 = vmatmul.msk.f32.gmra.mxu0 %vm393_vm0, %v8436_v38  ;;  %v2030_v38 = vadd.f32 %v8581_v44, %v1756_v1  ;;  %v2354_v44 = vld [vmem:[#allocation2 + $0x171] sm:$0xff]  ;;  %v2031_v33 = vadd.f32 %v8594_v19, %v1757_v59  ;;  %v3054_v19 = vld [vmem:[%s11481_s3] sm:$0xff] }
 0x288   : > { %v2226_v50 = vpop.f32.mrf.mxu2  ;;  %3410 = vmatpush.msrb.mxu2 %v3054_v19  ;;  %v2083_v59 = vld [vmem:[#allocation2 + $0x198] sm:$0xff] }
 0x289   : > { %v2918_v60 = vmax.f32 %v2886_v25, 0.0  ;;  %v2304_v23 = vadd.f32 %v2226_v50, %v2029_v57  ;;  %v2500_v45 = vpop.f32.mrf.mxu3  ;;  %v2631_v19 = vld [vmem:[#allocation2 + $0x19a] sm:$0xff] }
 0x28a   : > { %v3065_v28 = vld [vmem:[#allocation3 + $0x69] sm:$0xff] }
 0x28b   : > { %2998 = vst.msk [vmem:[#allocation3 + $0x79] sm:$0xff] %vm2943_vm3, %v2918_v60  ;;  %v2578_v41 = vadd.f32 %v2500_v45, %v2304_v23  ;;  %6934 = vmatmul.msk.f32.gmra.mxu1 %vm2943_vm3, %v3065_v28  ;;  %v1758_v60 = vadd.f32 %v8475_v12, %v8470_v31 }
 0x28c   : > { %v2774_v24 = vpop.f32.mrf.mxu0 }
 0x28d   : > { %v2852_v18 = vadd.f32 %v2774_v24, %v2578_v41  ;;  %6855 = vmatmul.msk.f32.gmra.mxu2 %vm393_vm0, %v2079_v52  ;;  %v2032_v31 = vadd.f32 %v8608_v54, %v1758_v60  ;;  %v3815_v54 = vld [vmem:[%s11481_s3 + $0x30] sm:$0xff] }
 0x28e   : > { %6887 = vmatmul.msk.f32.gmra.mxu3 %vm393_vm0, %v2353_v29  ;;  %3928 = vmatpush.msrb.mxu0 %v3815_v54  ;;  %v3508_v54 = vld [vmem:[#allocation3 + $0x2] sm:$0xff] }
 0x28f   : > { %v2887_v47 = vadd.f32 %v8782_v14, %v2852_v18  ;;  %6918 = vmatmul.msk.f32.gmra.mxu0 %vm393_vm0, %v8452_v48  ;;  %v8914_v48 = vpop.f32.mrf.mxu1 }
 0x290   : > { %v2229_v36 = vpop.f32.mrf.mxu2 }
 0x291   : > { %v2919_v9 = vmax.f32 %v2887_v47, 0.0  ;;  %v2305_v53 = vadd.f32 %v2229_v36, %v2030_v38  ;;  %v2503_v8 = vpop.f32.mrf.mxu3 }
 0x292   : > { %v3066_v21 = vld [vmem:[#allocation3 + $0x79] sm:$0xff] }
 0x293   : > { %2999 = vst.msk [vmem:[#allocation3 + $0x81] sm:$0xff] %vm2943_vm3, %v2919_v9  ;;  %v2579_v15 = vadd.f32 %v2503_v8, %v2305_v53  ;;  %6935 = vmatmul.msk.f32.gmra.mxu1 %vm2943_vm3, %v3066_v21 }
 0x294   : > { %v2777_v26 = vpop.f32.mrf.mxu0 }
 0x295   : > { %v2853_v62 = vadd.f32 %v2777_v26, %v2579_v15  ;;  %6856 = vmatmul.msk.f32.gmra.mxu2 %vm393_vm0, %v2080_v22 }
 0x296   : > { %6888 = vmatmul.msk.f32.gmra.mxu3 %vm393_vm0, %v2354_v44 }
 0x297   : > { %v2888_v42 = vadd.f32 %v8782_v14, %v2853_v62  ;;  %6919 = vmatmul.msk.f32.gmra.mxu0 %vm393_vm0, %v8468_v43  ;;  %v3540_v43 = vld [vmem:[%s11481_s3 + $0x20] sm:$0xff]  ;;  %v8939_v52 = vpop.f32.mrf.mxu1 }
 0x298   : > { %v2232_v2 = vpop.f32.mrf.mxu2  ;;  %3653 = vmatpush.msrb.mxu3 %v3540_v43 }
 0x299   : > { %v2920_v35 = vmax.f32 %v2888_v42, 0.0  ;;  %v2306_v57 = vadd.f32 %v2232_v2, %v2031_v33  ;;  %v2506_v25 = vpop.f32.mrf.mxu3  ;;  %v2084_v2 = vld [vmem:[#allocation2 + $0x1a0] sm:$0xff] }
 0x29a   : > { %v3067_v50 = vld [vmem:[#allocation3 + $0x81] sm:$0xff] }
 0x29b   : > { %3000 = vst.msk [vmem:[#allocation3 + $0x91] sm:$0xff] %vm2943_vm3, %v2920_v35  ;;  %v2580_v23 = vadd.f32 %v2506_v25, %v2306_v57  ;;  %6936 = vmatmul.msk.f32.gmra.mxu1 %vm2943_vm3, %v3067_v50  ;;  %v11710_v35 = vld [vmem:[#allocation8_spill] sm:$0xff]  ;;  %v11711_v57 = vld [vmem:[#allocation11_spill] sm:$0xff] }
 0x29c   : > { %v2780_v45 = vpop.f32.mrf.mxu0  ;;  %v1761_v25 = vadd.f32 %v11711_v57, %v11710_v35 }
 0x29d   : > { %v2854_v28 = vadd.f32 %v2780_v45, %v2580_v23  ;;  %6857 = vmatmul.msk.f32.gmra.mxu2 %vm393_vm0, %v8491_v40  ;;  %v1759_v40 = vadd.f32 %v8493_v55, %v8489_v11 }
 0x29e   : > { %6889 = vmatmul.msk.f32.gmra.mxu3 %vm393_vm0, %v8513_v37  ;;  %v2035_v43 = vadd.f32 %v8647_v0, %v1761_v25 }
 0x29f   : > { %v2889_v12 = vadd.f32 %v8782_v14, %v2854_v28  ;;  %6920 = vmatmul.msk.f32.gmra.mxu0 %vm393_vm0, %v8487_v20  ;;  %v4090_v20 = vld [vmem:[%s11481_s3 + $0x40] sm:$0xff]  ;;  %v2033_v11 = vadd.f32 %v8622_v34, %v1759_v40  ;;  %v8959_v21 = vpop.f32.mrf.mxu1 }
 0x2a0   : > { %v2235_v1 = vpop.f32.mrf.mxu2  ;;  %4203 = vmatpush.msrb.mxu1 %v4090_v20  ;;  %v2357_v34 = vld [vmem:[#allocation2 + $0x199] sm:$0xff]  ;;  %v2632_v20 = vld [vmem:[#allocation2 + $0x1a2] sm:$0xff] }
 0x2a1   : > { %v2921_v41 = vmax.f32 %v2889_v12, 0.0  ;;  %v2307_v29 = vadd.f32 %v2235_v1, %v2032_v31  ;;  %v2509_v24 = vpop.f32.mrf.mxu3 }
 0x2a2   : > { %v3068_v18 = vld [vmem:[#allocation3 + $0x91] sm:$0xff] }
 0x2a3   : > { %3001 = vst.msk [vmem:[#allocation3 + $0x99] sm:$0xff] %vm2943_vm3, %v2921_v41  ;;  %v2581_v37 = vadd.f32 %v2509_v24, %v2307_v29  ;;  %6937 = vmatmul.msk.f32.gmra.mxu1 %vm2943_vm3, %v3068_v18  ;;  %v3022_v29 = vld [vmem:[#allocation3] sm:$0xff] }
 0x2a4   : > { %v2783_v38 = vpop.f32.mrf.mxu0  ;;  %v11712_v24 = vld [vmem:[#allocation9_spill] sm:$0xff] }
 0x2a5   : > { %v2855_v47 = vadd.f32 %v2783_v38, %v2581_v37  ;;  %6858 = vmatmul.msk.f32.gmra.mxu2 %vm393_vm0, %v8509_v63  ;;  %v1760_v63 = vadd.f32 %v8511_v56, %v8507_v61  ;;  %v11713_v18 = vld [vmem:[#allocation13_spill] sm:$0xff] }
 0x2a6   : > { %6890 = vmatmul.msk.f32.gmra.mxu3 %vm393_vm0, %v8531_v58  ;;  %v1762_v40 = vadd.f32 %v11713_v18, %v11712_v24 }
 0x2a7   : > { %v2890_v55 = vadd.f32 %v8782_v14, %v2855_v47  ;;  %6921 = vmatmul.msk.f32.gmra.mxu0 %vm393_vm0, %v8505_v46  ;;  %v2034_v46 = vadd.f32 %v8634_v39, %v1760_v63  ;;  %v2358_v39 = vld [vmem:[#allocation2 + $0x1a1] sm:$0xff]  ;;  %v8975_v60 = vpop.f32.mrf.mxu1  ;;  %v3023_v63 = vld [vmem:[#allocation3 + $0x8] sm:$0xff] }
 0x2a8   : > { %v2238_v36 = vpop.f32.mrf.mxu2 }
 0x2a9   : > { %v2922_v9 = vmax.f32 %v2890_v55, 0.0  ;;  %v2308_v53 = vadd.f32 %v2238_v36, %v2033_v11  ;;  %v2512_v8 = vpop.f32.mrf.mxu3  ;;  %v11714_v11 = vld [vmem:[#allocation32_spill] sm:$0xff] }
 0x2aa   : > { %v3069_v22 = vld [vmem:[#allocation3 + $0x99] sm:$0xff]  ;;  %v2036_v55 = vadd.f32 %v11714_v11, %v1762_v40  ;;  %v9032_v11 = vld [vmem:[#allocation3 + $0x22] sm:$0xff] }
 0x2ab   : > { %3002 = vst.msk [vmem:[#allocation3 + $0xa9] sm:$0xff] %vm2943_vm3, %v2922_v9  ;;  %v2582_v58 = vadd.f32 %v2512_v8, %v2308_v53  ;;  %6938 = vmatmul.msk.f32.gmra.mxu1 %vm2943_vm3, %v3069_v22 }
 0x2ac   : > { %v2786_v15 = vpop.f32.mrf.mxu0 }
 0x2ad   : > { %v2856_v44 = vadd.f32 %v2786_v15, %v2582_v58  ;;  %6859 = vmatmul.msk.f32.gmra.mxu2 %vm393_vm0, %v2083_v59  ;;  %v11715_v58 = vld [vmem:[#allocation10_spill] sm:$0xff] }
 0x2ae   : > { %6891 = vmatmul.msk.f32.gmra.mxu3 %vm393_vm0, %v2357_v34  ;;  %v11716_v34 = vld [vmem:[#allocation15_spill] sm:$0xff] }
 0x2af   : > { %v2891_v26 = vadd.f32 %v8782_v14, %v2856_v44  ;;  %6922 = vmatmul.msk.f32.gmra.mxu0 %vm393_vm0, %v8525_v3  ;;  %v8986_v38 = vpop.f32.mrf.mxu1  ;;  %v1763_v15 = vadd.f32 %v11716_v34, %v11715_v58 }
 0x2b0   : > { %v2241_v61 = vpop.f32.mrf.mxu2 }
 0x2b1   : > { %v2923_v56 = vmax.f32 %v2891_v26, 0.0  ;;  %v2309_v62 = vadd.f32 %v2241_v61, %v2034_v46  ;;  %v2515_v33 = vpop.f32.mrf.mxu3  ;;  %v3509_v46 = vld [vmem:[#allocation3 + $0xa] sm:$0xff] }
 0x2b2   : > { %v3070_v42 = vld [vmem:[#allocation3 + $0xa9] sm:$0xff] }
 0x2b3   : > { %3003 = vst.msk [vmem:[#allocation3 + $0xb1] sm:$0xff] %vm2943_vm3, %v2923_v56  ;;  %v2583_v50 = vadd.f32 %v2515_v33, %v2309_v62  ;;  %6939 = vmatmul.msk.f32.gmra.mxu1 %vm2943_vm3, %v3070_v42  ;;  %v3783_v56 = vld [vmem:[#allocation3 + $0x18] sm:$0xff]  ;;  %v2037_v33 = vadd.f32 %v8698_v10, %v1763_v15 }
 0x2b4   : > { %v2789_v23 = vpop.f32.mrf.mxu0  ;;  %v11721_v15 = vld [vmem:[#allocation16_spill] sm:$0xff] }
 0x2b5   : > { %v2857_v3 = vadd.f32 %v2789_v23, %v2583_v50  ;;  %6860 = vmatmul.msk.f32.gmra.mxu2 %vm393_vm0, %v2084_v2  ;;  %v11718_v23 = vld [vmem:[#allocation14_spill] sm:$0xff] }
 0x2b6   : > { %6892 = vmatmul.msk.f32.gmra.mxu3 %vm393_vm0, %v2358_v39  ;;  %v11717_v39 = vld [vmem:[#allocation12_spill] sm:$0xff] }
 0x2b7   : > { %v2892_v45 = vadd.f32 %v8782_v14, %v2857_v3  ;;  %6923 = vmatmul.msk.f32.gmra.mxu0 %vm393_vm0, %v2631_v19  ;;  %v9002_v62 = vpop.f32.mrf.mxu1  ;;  %v1764_v19 = vadd.f32 %v11718_v23, %v11717_v39 }
 0x2b8   : > { %v2244_v28 = vpop.f32.mrf.mxu2 }
 0x2b9   : > { %v2924_v31 = vmax.f32 %v2892_v45, 0.0  ;;  %v2310_v12 = vadd.f32 %v2244_v28, %v2035_v43  ;;  %v2518_v1 = vpop.f32.mrf.mxu3  ;;  %v9015_v45 = vld [vmem:[#allocation3 + $0x1a] sm:$0xff] }
 0x2ba   : > { %v3071_v41 = vld [vmem:[#allocation3 + $0xb1] sm:$0xff]  ;;  %v3784_v28 = vld [vmem:[#allocation3 + $0x20] sm:$0xff] }
 0x2bb   : > { %3004 = vst.msk [vmem:[#allocation3 + $0xc1] sm:$0xff] %vm2943_vm3, %v2924_v31  ;;  %v2584_v37 = vadd.f32 %v2518_v1, %v2310_v12  ;;  %6940 = vmatmul.msk.f32.gmra.mxu1 %vm2943_vm3, %v3071_v41  ;;  %v2038_v31 = vadd.f32 %v8723_v30, %v1764_v19 }
 0x2bc   : > { %v2792_v0 = vpop.f32.mrf.mxu0 }
 0x2bd   : > { %v2858_v47 = vadd.f32 %v2792_v0, %v2584_v37  ;;  %6957 = vmatmul.msk.f32.vlgmr.msrb.gmra.mxu2 %vm2943_vm3, %v3022_v29  ;;  %v11719_v37 = vld [vmem:[#allocation43_spill] sm:$0xff] }
 0x2be   : > { %6989 = vmatmul.msk.f32.vlgmr.msrb.gmra.mxu3 %vm2943_vm3, %v3508_v54  ;;  %v11720_v54 = vld [vmem:[#allocation17_spill] sm:$0xff] }
 0x2bf   : > { %v2893_v36 = vadd.f32 %v8782_v14, %v2858_v47  ;;  %6924 = vmatmul.msk.f32.gmra.mxu0 %vm393_vm0, %v2632_v20  ;;  %v1765_v0 = vadd.f32 %v11720_v54, %v11719_v37 }
 0x2c0   : > { %v2247_v9 = vpop.f32.mrf.mxu2 }
 0x2c1   : > { %v2925_v53 = vmax.f32 %v2893_v36, 0.0  ;;  %v2311_v8 = vadd.f32 %v2247_v9, %v2036_v55  ;;  %v2521_v22 = vpop.f32.mrf.mxu3  ;;  %v9036_v55 = vld [vmem:[#allocation3 + $0x30] sm:$0xff]  ;;  %v2039_v36 = vadd.f32 %v8756_v5, %v1765_v0 }
 0x2c2   : > { %v8993_v59 = vld [vmem:[#allocation3 + $0xc1] sm:$0xff] }
 0x2c3   : > { %3005 = vst.msk [vmem:[#allocation3 + $0xc9] sm:$0xff] %vm2943_vm3, %v2925_v53  ;;  %v2585_v44 = vadd.f32 %v2521_v22, %v2311_v8  ;;  %6941 = vmatmul.msk.f32.gmra.mxu1 %vm2943_vm3, %v8993_v59 }
 0x2c4   : > { %v2795_v26 = vpop.f32.mrf.mxu0 }
 0x2c5   : > { %v2859_v61 = vadd.f32 %v2795_v26, %v2585_v44  ;;  %6958 = vmatmul.msk.f32.gmra.mxu2 %vm2943_vm3, %v3023_v63  ;;  %v11722_v44 = vld [vmem:[#allocation19_spill] sm:$0xff] }
 0x2c6   : > { %6990 = vmatmul.msk.f32.gmra.mxu3 %vm2943_vm3, %v3509_v46  ;;  %v1766_v46 = vadd.f32 %v11722_v44, %v11721_v15 }
 0x2c7   : > { %v2894_v42 = vadd.f32 %v8782_v14, %v2859_v61  ;;  %7021 = vmatmul.msk.f32.vlgmr.msrb.gmra.mxu0 %vm2943_vm3, %v3783_v56 }
 0x2c8   : > { %v2250_v2 = vpop.f32.mrf.mxu2 }
 0x2c9   : > { %v2926_v35 = vmax.f32 %v2894_v42, 0.0  ;;  %v2312_v57 = vadd.f32 %v2250_v2, %v2037_v33  ;;  %v2524_v25 = vpop.f32.mrf.mxu3  ;;  %v9057_v33 = vld [vmem:[#allocation3 + $0x38] sm:$0xff]  ;;  %v2040_v42 = vadd.f32 %v8791_v6, %v1766_v46 }
 0x2ca   : > { %v9007_v50 = vld [vmem:[#allocation3 + $0xc9] sm:$0xff] }
 0x2cb   : > { %3006 = vst.msk [vmem:[#allocation3 + $0xd9] sm:$0xff] %vm2943_vm3, %v2926_v35  ;;  %v2586_v3 = vadd.f32 %v2524_v25, %v2312_v57  ;;  %6942 = vmatmul.msk.f32.gmra.mxu1 %vm2943_vm3, %v9007_v50 }
 0x2cc   : > { %v2798_v10 = vpop.f32.mrf.mxu0 }
 0x2cd   : > { %v2860_v43 = vadd.f32 %v2798_v10, %v2586_v3  ;;  %6959 = vmatmul.msk.f32.gmra.mxu2 %vm2943_vm3, %v3783_v56  ;;  %v9053_v56 = vld [vmem:[#allocation3 + $0x32] sm:$0xff]  ;;  %v11723_v3 = vld [vmem:[#allocation18_spill] sm:$0xff] }
 0x2ce   : > { %6991 = vmatmul.msk.f32.gmra.mxu3 %vm2943_vm3, %v9015_v45  ;;  %v11724_v10 = vld [vmem:[#allocation21_spill] sm:$0xff] }
 0x2cf   : > { %v2895_v12 = vadd.f32 %v8782_v14, %v2860_v43  ;;  %7022 = vmatmul.msk.f32.gmra.mxu0 %vm2943_vm3, %v3784_v28  ;;  %v1767_v43 = vadd.f32 %v11724_v10, %v11723_v3  ;;  %v9116_v10 = vld [vmem:[#allocation3 + $0x52] sm:$0xff] }
 0x2d0   : > { %v2253_v1 = vpop.f32.mrf.mxu2  ;;  %v9022_v41 = vpop.f32.mrf.mxu1 }
 0x2d1   : > { %v2927_v29 = vmax.f32 %v2895_v12, 0.0  ;;  %v2313_v24 = vadd.f32 %v2253_v1, %v2038_v31  ;;  %v2527_v18 = vpop.f32.mrf.mxu3  ;;  %v9074_v12 = vld [vmem:[#allocation3 + $0x3a] sm:$0xff]  ;;  %v9078_v1 = vld [vmem:[#allocation3 + $0x48] sm:$0xff] }
 0x2d2   : > { %v9024_v40 = vld [vmem:[#allocation3 + $0xd9] sm:$0xff] }
 0x2d3   : > { %3007 = vst.msk [vmem:[#allocation3 + $0xe1] sm:$0xff] %vm2943_vm3, %v2927_v29  ;;  %v2587_v20 = vadd.f32 %v2527_v18, %v2313_v24  ;;  %6943 = vmatmul.msk.f32.gmra.mxu1 %vm2943_vm3, %v9024_v40  ;;  %v2041_v29 = vadd.f32 %v8822_v13, %v1767_v43  ;;  %v9120_v43 = vld [vmem:[#allocation3 + $0x60] sm:$0xff] }
 0x2d4   : > { %v2801_v30 = vpop.f32.mrf.mxu0 }
 0x2d5   : > { %v2861_v47 = vadd.f32 %v2801_v30, %v2587_v20  ;;  %6960 = vmatmul.msk.f32.gmra.mxu2 %vm2943_vm3, %v3784_v28 }
 0x2d6   : > { %6992 = vmatmul.msk.f32.gmra.mxu3 %vm2943_vm3, %v9032_v11 }
 0x2d7   : > { %v2896_v9 = vadd.f32 %v8782_v14, %v2861_v47  ;;  %7023 = vmatmul.msk.f32.gmra.mxu0 %vm2943_vm3, %v9036_v55  ;;  %v11725_v47 = vld [vmem:[#allocation20_spill] sm:$0xff] }
 0x2d8   : > { %v2256_v53 = vpop.f32.mrf.mxu2  ;;  %v9042_v8 = vpop.f32.mrf.mxu1 }
 0x2d9   : > { %v2928_v22 = vmax.f32 %v2896_v9, 0.0  ;;  %v2314_v63 = vadd.f32 %v2256_v53, %v2039_v36  ;;  %v2530_v58 = vpop.f32.mrf.mxu3  ;;  %v11726_v36 = vld [vmem:[#allocation23_spill] sm:$0xff] }
 0x2da   : > { %v9044_v34 = vld [vmem:[#allocation3 + $0xe1] sm:$0xff]  ;;  %v1768_v9 = vadd.f32 %v11726_v36, %v11725_v47  ;;  %v11730_v47 = vld [vmem:[#allocation27_spill] sm:$0xff] }
 0x2db   : > { %3008 = vst.msk [vmem:[#allocation3 + $0xf1] sm:$0xff] %vm2943_vm3, %v2928_v22  ;;  %v2588_v26 = vadd.f32 %v2530_v58, %v2314_v63  ;;  %6944 = vmatmul.msk.f32.gmra.mxu1 %vm2943_vm3, %v9044_v34  ;;  %v9095_v63 = vld [vmem:[#allocation3 + $0x4a] sm:$0xff] }
 0x2dc   : > { %v2804_v5 = vpop.f32.mrf.mxu0  ;;  %v9099_v58 = vld [vmem:[#allocation3 + $0x50] sm:$0xff]  ;;  %v2042_v15 = vadd.f32 %v8835_v7, %v1768_v9 }
 0x2dd   : > { %v2862_v61 = vadd.f32 %v2804_v5, %v2588_v26  ;;  %6961 = vmatmul.msk.f32.gmra.mxu2 %vm2943_vm3, %v9036_v55 }
 0x2de   : > { %6993 = vmatmul.msk.f32.gmra.mxu3 %vm2943_vm3, %v9053_v56 }
 0x2df   : > { %v2897_v2 = vadd.f32 %v8782_v14, %v2862_v61  ;;  %7024 = vmatmul.msk.f32.gmra.mxu0 %vm2943_vm3, %v9057_v33 }
 0x2e0   : > { %v2259_v35 = vpop.f32.mrf.mxu2  ;;  %v9063_v57 = vpop.f32.mrf.mxu1 }
 0x2e1   : > { %v2929_v25 = vmax.f32 %v2897_v2, 0.0  ;;  %v2315_v39 = vadd.f32 %v2259_v35, %v2040_v42  ;;  %v2533_v23 = vpop.f32.mrf.mxu3  ;;  %v11727_v35 = vld [vmem:[#allocation22_spill] sm:$0xff] }
 0x2e2   : > { %v9065_v19 = vld [vmem:[#allocation3 + $0xf1] sm:$0xff] }
 0x2e3   : > { %3009 = vst.msk [vmem:[#allocation3 + $0xf9] sm:$0xff] %vm2943_vm3, %v2929_v25  ;;  %v2589_v28 = vadd.f32 %v2533_v23, %v2315_v39  ;;  %6945 = vmatmul.msk.f32.gmra.mxu1 %vm2943_vm3, %v9065_v19  ;;  %v11728_v25 = vld [vmem:[#allocation25_spill] sm:$0xff] }
 0x2e4   : > { %v2807_v6 = vpop.f32.mrf.mxu0  ;;  %v1769_v39 = vadd.f32 %v11728_v25, %v11727_v35 }
 0x2e5   : > { %v2863_v31 = vadd.f32 %v2807_v6, %v2589_v28  ;;  %6962 = vmatmul.msk.f32.gmra.mxu2 %vm2943_vm3, %v9057_v33 }
 0x2e6   : > { %6994 = vmatmul.msk.f32.gmra.mxu3 %vm2943_vm3, %v9074_v12  ;;  %v2043_v28 = vadd.f32 %v8847_v17, %v1769_v39  ;;  %v11731_v39 = vld [vmem:[#allocation26_spill] sm:$0xff] }
 0x2e7   : > { %v2898_v24 = vadd.f32 %v8782_v14, %v2863_v31  ;;  %7025 = vmatmul.msk.f32.gmra.mxu0 %vm2943_vm3, %v9078_v1 }
 0x2e8   : > { %v2262_v18 = vpop.f32.mrf.mxu2  ;;  %v9084_v37 = vpop.f32.mrf.mxu1 }
 0x2e9   : > { %v2930_v54 = vmax.f32 %v2898_v24, 0.0  ;;  %v2316_v0 = vadd.f32 %v2262_v18, %v2041_v29  ;;  %v2536_v20 = vpop.f32.mrf.mxu3 }
 0x2ea   : > { %v9086_v30 = vld [vmem:[#allocation3 + $0xf9] sm:$0xff] }
 0x2eb   : > { %3010 = vst.msk [vmem:[#allocation3 + $0x109] sm:$0xff] %vm2943_vm3, %v2930_v54  ;;  %v2590_v53 = vadd.f32 %v2536_v20, %v2316_v0  ;;  %6946 = vmatmul.msk.f32.gmra.mxu1 %vm2943_vm3, %v9086_v30  ;;  %v11729_v20 = vld [vmem:[#allocation24_spill] sm:$0xff] }
 0x2ec   : > { %v2810_v13 = vpop.f32.mrf.mxu0  ;;  %v1770_v36 = vadd.f32 %v11730_v47, %v11729_v20 }
 0x2ed   : > { %v2864_v22 = vadd.f32 %v2810_v13, %v2590_v53  ;;  %6963 = vmatmul.msk.f32.gmra.mxu2 %vm2943_vm3, %v9078_v1  ;;  %v9137_v13 = vld [vmem:[#allocation3 + $0x62] sm:$0xff] }
 0x2ee   : > { %6995 = vmatmul.msk.f32.gmra.mxu3 %vm2943_vm3, %v9095_v63 }
 0x2ef   : > { %v2899_v44 = vadd.f32 %v8782_v14, %v2864_v22  ;;  %7026 = vmatmul.msk.f32.gmra.mxu0 %vm2943_vm3, %v9099_v58  ;;  %v9141_v22 = vld [vmem:[#allocation3 + $0x68] sm:$0xff] }
 0x2f0   : > { %v2265_v46 = vpop.f32.mrf.mxu2  ;;  %v9105_v26 = vpop.f32.mrf.mxu1 }
 0x2f1   : > { %v2931_v5 = vmax.f32 %v2899_v44, 0.0  ;;  %v2317_v61 = vadd.f32 %v2265_v46, %v2042_v15  ;;  %v2539_v42 = vpop.f32.mrf.mxu3  ;;  %v2044_v15 = vadd.f32 %v8858_v4, %v1770_v36 }
 0x2f2   : > { %v9107_v2 = vld [vmem:[#allocation3 + $0x109] sm:$0xff] }
 0x2f3   : > { %3011 = vst.msk [vmem:[#allocation3 + $0x111] sm:$0xff] %vm2943_vm3, %v2931_v5  ;;  %v2591_v23 = vadd.f32 %v2539_v42, %v2317_v61  ;;  %6947 = vmatmul.msk.f32.gmra.mxu1 %vm2943_vm3, %v9107_v2 }
 0x2f4   : > { %v2813_v7 = vpop.f32.mrf.mxu0 }
 0x2f5   : > { %v2865_v3 = vadd.f32 %v2813_v7, %v2591_v23  ;;  %6964 = vmatmul.msk.f32.gmra.mxu2 %vm2943_vm3, %v9099_v58  ;;  %v11732_v23 = vld [vmem:[#allocation29_spill] sm:$0xff] }
 0x2f6   : > { %6996 = vmatmul.msk.f32.gmra.mxu3 %vm2943_vm3, %v9116_v10  ;;  %v1771_v7 = vadd.f32 %v11732_v23, %v11731_v39 }
 0x2f7   : > { %v2900_v6 = vadd.f32 %v8782_v14, %v2865_v3  ;;  %7027 = vmatmul.msk.f32.gmra.mxu0 %vm2943_vm3, %v9120_v43 }
 0x2f8   : > { %v2268_v31 = vpop.f32.mrf.mxu2  ;;  %v9126_v29 = vpop.f32.mrf.mxu1 }
 0x2f9   : > { %v2932_v24 = vmax.f32 %v2900_v6, 0.0  ;;  %v2318_v18 = vadd.f32 %v2268_v31, %v2043_v28  ;;  %v2542_v54 = vpop.f32.mrf.mxu3  ;;  %v9158_v6 = vld [vmem:[#allocation3 + $0x6a] sm:$0xff]  ;;  %v9162_v31 = vld [vmem:[#allocation3 + $0x78] sm:$0xff] }
 0x2fa   : > { %v9128_v0 = vld [vmem:[#allocation3 + $0x111] sm:$0xff] }
 0x2fb   : > { %3012 = vst.msk [vmem:[#allocation3 + $0x121] sm:$0xff] %vm2943_vm3, %v2932_v24  ;;  %v2592_v9 = vadd.f32 %v2542_v54, %v2318_v18  ;;  %6948 = vmatmul.msk.f32.gmra.mxu1 %vm2943_vm3, %v9128_v0  ;;  %v2045_v24 = vadd.f32 %v8872_v27, %v1771_v7 }
 0x2fc   : > { %v2816_v17 = vpop.f32.mrf.mxu0 }
 0x2fd   : > { %v2866_v53 = vadd.f32 %v2816_v17, %v2592_v9  ;;  %6965 = vmatmul.msk.f32.gmra.mxu2 %vm2943_vm3, %v9120_v43 }
 0x2fe   : > { %6997 = vmatmul.msk.f32.gmra.mxu3 %vm2943_vm3, %v9137_v13 }
 0x2ff   : > { %v2901_v44 = vadd.f32 %v8782_v14, %v2866_v53  ;;  %7028 = vmatmul.msk.f32.gmra.mxu0 %vm2943_vm3, %v9141_v22  ;;  %v11733_v53 = vld [vmem:[#allocation28_spill] sm:$0xff] }
 0x300   : > { %v2271_v46 = vpop.f32.mrf.mxu2  ;;  %v9147_v5 = vpop.f32.mrf.mxu1 }
 0x301   : > { %v2933_v61 = vmax.f32 %v2901_v44, 0.0  ;;  %v2319_v42 = vadd.f32 %v2271_v46, %v2044_v15  ;;  %v2545_v35 = vpop.f32.mrf.mxu3  ;;  %v11734_v15 = vld [vmem:[#allocation31_spill] sm:$0xff] }
 0x302   : > { %v9149_v25 = vld [vmem:[#allocation3 + $0x121] sm:$0xff]  ;;  %v1772_v44 = vadd.f32 %v11734_v15, %v11733_v53 }
 0x303   : > { %3013 = vst.msk [vmem:[#allocation3 + $0x129] sm:$0xff] %vm2943_vm3, %v2933_v61  ;;  %v2593_v3 = vadd.f32 %v2545_v35, %v2319_v42  ;;  %6949 = vmatmul.msk.f32.gmra.mxu1 %vm2943_vm3, %v9149_v25  ;;  %v9179_v42 = vld [vmem:[#allocation3 + $0x7a] sm:$0xff]  ;;  %v9200_v15 = vld [vmem:[#allocation3 + $0x82] sm:$0xff] }
 0x304   : > { %v2819_v4 = vpop.f32.mrf.mxu0  ;;  %v9183_v35 = vld [vmem:[#allocation3 + $0x80] sm:$0xff]  ;;  %v2046_v39 = vadd.f32 %v8885_v16, %v1772_v44  ;;  %v9204_v44 = vld [vmem:[#allocation3 + $0x90] sm:$0xff] }
 0x305   : > { %v2867_v28 = vadd.f32 %v2819_v4, %v2593_v3  ;;  %6966 = vmatmul.msk.f32.gmra.mxu2 %vm2943_vm3, %v9141_v22 }
 0x306   : > { %6998 = vmatmul.msk.f32.gmra.mxu3 %vm2943_vm3, %v9158_v6 }
 0x307   : > { %v2902_v18 = vadd.f32 %v8782_v14, %v2867_v28  ;;  %7029 = vmatmul.msk.f32.gmra.mxu0 %vm2943_vm3, %v9162_v31 }
 0x308   : > { %v2274_v54 = vpop.f32.mrf.mxu2  ;;  %v9168_v20 = vpop.f32.mrf.mxu1 }
 0x309   : > { %v2934_v47 = vmax.f32 %v2902_v18, 0.0  ;;  %v2320_v36 = vadd.f32 %v2274_v54, %v2045_v24  ;;  %v2548_v9 = vpop.f32.mrf.mxu3  ;;  %v11735_v54 = vld [vmem:[#allocation30_spill] sm:$0xff] }
 0x30a   : > { %v9170_v17 = vld [vmem:[#allocation3 + $0x129] sm:$0xff] }
 0x30b   : > { %3014 = vst.msk [vmem:[#allocation3 + $0x139] sm:$0xff] %vm2943_vm3, %v2934_v47  ;;  %v2594_v46 = vadd.f32 %v2548_v9, %v2320_v36  ;;  %6950 = vmatmul.msk.f32.gmra.mxu1 %vm2943_vm3, %v9170_v17  ;;  %v11736_v47 = vld [vmem:[#allocation33_spill] sm:$0xff] }
 0x30c   : > { %v2822_v27 = vpop.f32.mrf.mxu0  ;;  %v1773_v36 = vadd.f32 %v11736_v47, %v11735_v54  ;;  %v11739_v54 = vld [vmem:[#allocation34_spill] sm:$0xff] }
 0x30d   : > { %v2868_v61 = vadd.f32 %v2822_v27, %v2594_v46  ;;  %6967 = vmatmul.msk.f32.gmra.mxu2 %vm2943_vm3, %v9162_v31 }
 0x30e   : > { %6999 = vmatmul.msk.f32.gmra.mxu3 %vm2943_vm3, %v9179_v42  ;;  %v2047_v46 = vadd.f32 %v8901_v32, %v1773_v36  ;;  %v4642_v32 = vld [vmem:[%s11481_s3 + $0x68] sm:$0xff] }
 0x30f   : > { %v2903_v23 = vadd.f32 %v8782_v14, %v2868_v61  ;;  %7030 = vmatmul.msk.f32.gmra.mxu0 %vm2943_vm3, %v9183_v35  ;;  %4753 = vmatpush.msra.mxu3 %v4642_v32  ;;  %v4917_v32 = vld [vmem:[%s11481_s3 + $0x78] sm:$0xff] }
 0x310   : > { %v2277_v7 = vpop.f32.mrf.mxu2  ;;  %v9189_v3 = vpop.f32.mrf.mxu1  ;;  %5028 = vmatpush.msra.mxu0 %v4917_v32 }
 0x311   : > { %v2935_v4 = vmax.f32 %v2903_v23, 0.0  ;;  %v2321_v28 = vadd.f32 %v2277_v7, %v2046_v39  ;;  %v2551_v24 = vpop.f32.mrf.mxu3 }
 0x312   : > { %v9191_v18 = vld [vmem:[#allocation3 + $0x139] sm:$0xff] }
 0x313   : > { %3015 = vst.msk [vmem:[#allocation3 + $0x141] sm:$0xff] %vm2943_vm3, %v2935_v4  ;;  %v2595_v9 = vadd.f32 %v2551_v24, %v2321_v28  ;;  %6951 = vmatmul.msk.f32.gmra.mxu1 %vm2943_vm3, %v9191_v18  ;;  %v11738_v24 = vld [vmem:[#allocation35_spill] sm:$0xff] }
 0x314   : > { %v2825_v16 = vpop.f32.mrf.mxu0  ;;  %v1774_v47 = vadd.f32 %v11739_v54, %v11738_v24 }
 0x315   : > { %v2869_v53 = vadd.f32 %v2825_v16, %v2595_v9  ;;  %6968 = vmatmul.msk.f32.gmra.mxu2 %vm2943_vm3, %v9183_v35 }
 0x316   : > { %7000 = vmatmul.msk.f32.gmra.mxu3 %vm2943_vm3, %v9200_v15 }
 0x317   : > { %v2904_v27 = vadd.f32 %v8782_v14, %v2869_v53  ;;  %7031 = vmatmul.msk.f32.gmra.mxu0 %vm2943_vm3, %v9204_v44  ;;  %v4366_v14 = vld [vmem:[%s11481_s3 + $0x58] sm:$0xff]  ;;  %v9227_v53 = vld [vmem:[#allocation3 + $0x92] sm:$0xff] }
 0x318   : > { %v2280_v61 = vpop.f32.mrf.mxu2  ;;  %v9210_v39 = vpop.f32.mrf.mxu1  ;;  %4477 = vmatpush.msra.mxu2 %v4366_v14  ;;  %11740 = vst [vmem:[#allocation40_spill] sm:$0xff] %v9227_v53 }
 0x319   : > { %v2936_v23 = vmax.f32 %v2904_v27, 0.0  ;;  %v2322_v7 = vadd.f32 %v2280_v61, %v2047_v46  ;;  %v2554_v4 = vpop.f32.mrf.mxu3  ;;  %v9231_v46 = vld [vmem:[#allocation3 + $0x98] sm:$0xff]  ;;  %v2048_v27 = vadd.f32 %v8914_v48, %v1774_v47  ;;  %v9237_v61 = vld [vmem:[%s11480_s2] ss:$0 sm:$0xff]  ;;  %v1775_v48 = vadd.f32 %v8703_v51, %v8701_v49  ;;  %v9263_v51 = vld [vmem:[#allocation3 + $0xa8] sm:$0xff] }
 0x31a   : > { %v9212_v28 = vld [vmem:[#allocation3 + $0x141] sm:$0xff]  ;;  %11743 = vst [vmem:[#allocation8_spill] sm:$0xff] %v9263_v51 }
 0x31b   : > { %11737 = vst [vmem:[#allocation41_spill] sm:$0xff] %v9212_v28  ;;  %v2596_v9 = vadd.f32 %v2554_v4, %v2322_v7  ;;  %6952 = vmatmul.msk.f32.gmra.mxu1 %vm2943_vm3, %v9212_v28  ;;  %v9259_v49 = vld [vmem:[#allocation3 + $0x9a] sm:$0xff] }
 0x31c   : > { %3016 = vst.msk [vmem:[#allocation3 + $0x151] sm:$0xff] %vm2943_vm3, %v2936_v23  ;;  %v2828_v36 = vpop.f32.mrf.mxu0  ;;  %v9528_v28 = vld [vmem:[#allocation3 + $0x140] sm:$0xff] }
 0x31d   : > { %v2870_v16 = vadd.f32 %v2828_v36, %v2596_v9  ;;  %6969 = vmatmul.msk.f32.gmra.mxu2 %vm2943_vm3, %v9204_v44  ;;  %v5192_v36 = vld [vmem:[%s11481_s3 + $0x88] sm:$0xff]  ;;  %11742 = vst [vmem:[#allocation44_spill] sm:$0xff] %v9259_v49 }
 0x31e   : > { %7001 = vmatmul.msk.f32.gmra.mxu3 %vm2943_vm3, %v9227_v53  ;;  %5303 = vmatpush.msra.mxu1 %v5192_v36  ;;  %11796 = vst [vmem:[#allocation61_spill] sm:$0xff] %v9528_v28 }
 0x31f   : > { %v2905_v23 = vadd.f32 %v9237_v61, %v2870_v16  ;;  %7032 = vmatmul.msk.f32.gmra.mxu0 %vm2943_vm3, %v9231_v46 }
 0x320   : > { %v2283_v7 = vpop.f32.mrf.mxu2  ;;  %v9242_v4 = vpop.f32.mrf.mxu1 }
 0x321   : > { %v2937_v24 = vmax.f32 %v2905_v23, 0.0  ;;  %v2323_v54 = vadd.f32 %v2283_v7, %v2048_v27  ;;  %v2557_v9 = vpop.f32.mrf.mxu3  ;;  %v2049_v23 = vadd.f32 %v8939_v52, %v1775_v48 }
 0x323   : > { %v9244_v14 = vld [vmem:[#allocation3 + $0x151] sm:$0xff]  ;;  %3017 = vst.msk [vmem:[#allocation3 + $0x159] sm:$0xff] %vm2943_vm3, %v2937_v24  ;;  %v2597_v47 = vadd.f32 %v2557_v9, %v2323_v54 }
 0x324   : > { %11741 = vst [vmem:[#allocation42_spill] sm:$0xff] %v9244_v14  ;;  %6953 = vmatmul.msk.f32.gmra.mxu1 %vm2943_vm3, %v9244_v14  ;;  %v2831_v16 = vpop.f32.mrf.mxu0  ;;  %v11746_v14 = vld [vmem:[#allocation36_spill] sm:$0xff] }
 0x325   : > { %v2871_v27 = vadd.f32 %v2831_v16, %v2597_v47  ;;  %6970 = vmatmul.msk.f32.gmra.mxu2 %vm2943_vm3, %v9231_v46  ;;  %v11745_v16 = vld [vmem:[#allocation37_spill] sm:$0xff] }
 0x326   : > { %7002 = vmatmul.msk.f32.gmra.mxu3 %vm2943_vm3, %v9259_v49  ;;  %v1776_v49 = vadd.f32 %v11746_v14, %v11745_v16 }
 0x327   : > { %v2906_v7 = vadd.f32 %v9237_v61, %v2871_v27  ;;  %7033 = vmatmul.msk.f32.gmra.mxu0 %vm2943_vm3, %v9263_v51  ;;  %v9280_v27 = vld [vmem:[#allocation3 + $0xaa] sm:$0xff] }
 0x328   : > { %v2286_v24 = vpop.f32.mrf.mxu2  ;;  %v9269_v54 = vpop.f32.mrf.mxu1  ;;  %11747 = vst [vmem:[#allocation9_spill] sm:$0xff] %v9280_v27  ;;  %v2050_v14 = vadd.f32 %v8959_v21, %v1776_v49 }
 0x329   : > { %v2938_v9 = vmax.f32 %v2906_v7, 0.0  ;;  %v2324_v47 = vadd.f32 %v2286_v24, %v2049_v23  ;;  %v2560_v32 = vpop.f32.mrf.mxu3  ;;  %v9284_v23 = vld [vmem:[#allocation3 + $0xb0] sm:$0xff] }
 0x32a   : > { %v9271_v36 = vld [vmem:[#allocation3 + $0x159] sm:$0xff]  ;;  %11748 = vst [vmem:[#allocation13_spill] sm:$0xff] %v9284_v23 }
 0x32b   : > { %11744 = vst [vmem:[#allocation11_spill] sm:$0xff] %v9271_v36  ;;  %v2598_v53 = vadd.f32 %v2560_v32, %v2324_v47 }
 0x32c   : > { %3018 = vst.msk [vmem:[#allocation3 + $0x169] sm:$0xff] %vm2943_vm3, %v2938_v9  ;;  %6954 = vmatmul.msk.f32.gmra.mxu1 %vm2943_vm3, %v9271_v36  ;;  %v2834_v52 = vpop.f32.mrf.mxu0  ;;  %v11751_v36 = vld [vmem:[#allocation38_spill] sm:$0xff] }
 0x32d   : > { %v2872_v48 = vadd.f32 %v2834_v52, %v2598_v53  ;;  %6971 = vmatmul.msk.f32.gmra.mxu2 %vm2943_vm3, %v9263_v51  ;;  %v11750_v52 = vld [vmem:[#allocation39_spill] sm:$0xff] }
 0x32e   : > { %7003 = vmatmul.msk.f32.gmra.mxu3 %vm2943_vm3, %v9280_v27  ;;  %v1777_v27 = vadd.f32 %v11751_v36, %v11750_v52 }
 0x32f   : > { %v2907_v7 = vadd.f32 %v9237_v61, %v2872_v48  ;;  %7034 = vmatmul.msk.f32.gmra.mxu0 %vm2943_vm3, %v9284_v23  ;;  %v9301_v48 = vld [vmem:[#allocation3 + $0xb2] sm:$0xff] }
 0x330   : > { %v2289_v24 = vpop.f32.mrf.mxu2  ;;  %v9290_v9 = vpop.f32.mrf.mxu1  ;;  %11752 = vst [vmem:[#allocation10_spill] sm:$0xff] %v9301_v48  ;;  %v2051_v36 = vadd.f32 %v8975_v60, %v1777_v27 }
 0x331   : > { %v2939_v53 = vmax.f32 %v2907_v7, 0.0  ;;  %v2325_v47 = vadd.f32 %v2289_v24, %v2050_v14  ;;  %v2563_v32 = vpop.f32.mrf.mxu3  ;;  %v9305_v14 = vld [vmem:[#allocation3 + $0xc0] sm:$0xff] }
 0x332   : > { %11753 = vst [vmem:[#allocation15_spill] sm:$0xff] %v9305_v14 }
 0x333   : > { %v9292_v16 = vld [vmem:[#allocation3 + $0x169] sm:$0xff]  ;;  %3019 = vst.msk [vmem:[#allocation3 + $0x171] sm:$0xff] %vm2943_vm3, %v2939_v53  ;;  %v2599_v51 = vadd.f32 %v2563_v32, %v2325_v47 }
 0x334   : > { %11749 = vst [vmem:[#allocation32_spill] sm:$0xff] %v9292_v16  ;;  %6955 = vmatmul.msk.f32.gmra.mxu1 %vm2943_vm3, %v9292_v16  ;;  %v2837_v21 = vpop.f32.mrf.mxu0  ;;  %v9467_v16 = vld [vmem:[#allocation3 + $0x120] sm:$0xff] }
 0x335   : > { %v2873_v49 = vadd.f32 %v2837_v21, %v2599_v51  ;;  %6972 = vmatmul.msk.f32.gmra.mxu2 %vm2943_vm3, %v9284_v23  ;;  %11784 = vst [vmem:[#allocation49_spill] sm:$0xff] %v9467_v16  ;;  %v9516_v23 = vld [vmem:[#allocation3 + $0x81] sm:$0xff] }
 0x336   : > { %7004 = vmatmul.msk.f32.gmra.mxu3 %vm2943_vm3, %v9301_v48  ;;  %v9446_v48 = vld [vmem:[#allocation3 + $0x110] sm:$0xff] }
 0x337   : > { %v2908_v7 = vadd.f32 %v9237_v61, %v2873_v49  ;;  %7035 = vmatmul.msk.f32.gmra.mxu0 %vm2943_vm3, %v9305_v14  ;;  %v9320_v49 = vld [vmem:[#allocation3 + $0xc2] sm:$0xff]  ;;  %11780 = vst [vmem:[#allocation45_spill] sm:$0xff] %v9446_v48 }
 0x338   : > { %v2292_v24 = vpop.f32.mrf.mxu2  ;;  %v9311_v53 = vpop.f32.mrf.mxu1  ;;  %11755 = vst [vmem:[#allocation14_spill] sm:$0xff] %v9320_v49 }
 0x339   : > { %v2940_v51 = vmax.f32 %v2908_v7, 0.0  ;;  %v2326_v47 = vadd.f32 %v2292_v24, %v2051_v36  ;;  %v2566_v32 = vpop.f32.mrf.mxu3  ;;  %v9324_v36 = vld [vmem:[#allocation3 + $0xc8] sm:$0xff] }
 0x33a   : > { %v9313_v52 = vld [vmem:[#allocation3 + $0x171] sm:$0xff]  ;;  %11756 = vst [vmem:[#allocation43_spill] sm:$0xff] %v9324_v36 }
 0x33b   : > { %11754 = vst [vmem:[#allocation12_spill] sm:$0xff] %v9313_v52  ;;  %v2600_v21 = vadd.f32 %v2566_v32, %v2326_v47 }
 0x33c   : > { %3020 = vst.msk [vmem:[#allocation3 + $0x181] sm:$0xff] %vm2943_vm3, %v2940_v51  ;;  %6956 = vmatmul.msk.f32.gmra.mxu1 %vm2943_vm3, %v9313_v52  ;;  %v2840_v60 = vpop.f32.mrf.mxu0 }
 0x33d   : > { %v2874_v27 = vadd.f32 %v2840_v60, %v2600_v21  ;;  %6973 = vmatmul.msk.f32.gmra.mxu2 %vm2943_vm3, %v9305_v14  ;;  %v4058_v60 = vld [vmem:[#allocation3 + $0x19] sm:$0xff] }
 0x33e   : > { %7005 = vmatmul.msk.f32.gmra.mxu3 %vm2943_vm3, %v9320_v49 }
 0x33f   : > { %v2909_v7 = vadd.f32 %v9237_v61, %v2874_v27  ;;  %7036 = vmatmul.msk.f32.gmra.mxu0 %vm2943_vm3, %v9324_v36  ;;  %v9340_v61 = vld [vmem:[#allocation3 + $0xca] sm:$0xff]  ;;  %v9344_v27 = vld [vmem:[#allocation3 + $0xd8] sm:$0xff] }
 0x340   : > { %v9329_v24 = vpop.f32.mrf.mxu1  ;;  %v3412_v51 = vpop.f32.mrf.mxu2  ;;  %11759 = vst [vmem:[#allocation19_spill] sm:$0xff] %v9340_v61 }
 0x341   : > { %v2941_v47 = vmax.f32 %v2909_v7, 0.0  ;;  %v3413_v32 = vadd.f32 %v3412_v51, %v8986_v38  ;;  %v3655_v21 = vpop.f32.mrf.mxu3  ;;  %11760 = vst [vmem:[#allocation18_spill] sm:$0xff] %v9344_v27 }
 0x343   : > { %3021 = vst.msk [vmem:[#allocation3 + $0x189] sm:$0xff] %vm2943_vm3, %v2941_v47  ;;  %v9333_v52 = vadd.f32 %v3655_v21, %v3413_v32  ;;  %v4059_v32 = vld [vmem:[#allocation3 + $0x21] sm:$0xff] }
 0x344   : > { %7053 = vmatmul.msk.f32.vlgmr.msrb.gmra.mxu1 %vm2943_vm3, %v4058_v60  ;;  %v9336_v49 = vpop.f32.mrf.mxu0 }
 0x345   : > { %11757 = vst [vmem:[#allocation17_spill] sm:$0xff] %v9333_v52  ;;  %6974 = vmatmul.msk.f32.gmra.mxu2 %vm2943_vm3, %v9324_v36  ;;  %v9362_v52 = vld [vmem:[#allocation3 + $0xe0] sm:$0xff]  ;;  %v9425_v36 = vld [vmem:[#allocation3 + $0x108] sm:$0xff] }
 0x346   : > { %11758 = vst [vmem:[#allocation16_spill] sm:$0xff] %v9336_v49  ;;  %7006 = vmatmul.msk.f32.gmra.mxu3 %vm2943_vm3, %v9340_v61  ;;  %v9358_v49 = vld [vmem:[#allocation3 + $0xda] sm:$0xff]  ;;  %v9383_v61 = vld [vmem:[#allocation3 + $0xf0] sm:$0xff] }
 0x347   : > { %7037 = vmatmul.msk.f32.gmra.mxu0 %vm2943_vm3, %v9344_v27  ;;  %11763 = vst [vmem:[#allocation23_spill] sm:$0xff] %v9358_v49 }
 0x348   : > { %v9348_v38 = vpop.f32.mrf.mxu1  ;;  %v3415_v7 = vpop.f32.mrf.mxu2  ;;  %11764 = vst [vmem:[#allocation22_spill] sm:$0xff] %v9362_v52 }
 0x349   : > { %v3416_v51 = vadd.f32 %v3415_v7, %v9002_v62  ;;  %v3658_v47 = vpop.f32.mrf.mxu3  ;;  %11768 = vst [vmem:[#allocation26_spill] sm:$0xff] %v9383_v61 }
 0x34a   : > { %11776 = vst [vmem:[#allocation37_spill] sm:$0xff] %v9425_v36 }
 0x34b   : > { %v9351_v21 = vadd.f32 %v3658_v47, %v3416_v51 }
 0x34c   : > { %7054 = vmatmul.msk.f32.gmra.mxu1 %vm2943_vm3, %v4059_v32  ;;  %v9354_v60 = vpop.f32.mrf.mxu0  ;;  %v9369_v32 = vld [vmem:[#allocation3 + $0x31] sm:$0xff] }
 0x34d   : > { %11761 = vst [vmem:[#allocation21_spill] sm:$0xff] %v9351_v21  ;;  %6975 = vmatmul.msk.f32.gmra.mxu2 %vm2943_vm3, %v9344_v27  ;;  %v9404_v27 = vld [vmem:[#allocation3 + $0xf8] sm:$0xff] }
 0x34e   : > { %11762 = vst [vmem:[#allocation20_spill] sm:$0xff] %v9354_v60  ;;  %7007 = vmatmul.msk.f32.gmra.mxu3 %vm2943_vm3, %v9358_v49  ;;  %v9379_v49 = vld [vmem:[#allocation3 + $0xe2] sm:$0xff] }
 0x34f   : > { %7038 = vmatmul.msk.f32.gmra.mxu0 %vm2943_vm3, %v9362_v52  ;;  %11767 = vst [vmem:[#allocation27_spill] sm:$0xff] %v9379_v49 }
 0x350   : > { %v9366_v62 = vpop.f32.mrf.mxu1  ;;  %v3418_v7 = vpop.f32.mrf.mxu2  ;;  %11772 = vst [vmem:[#allocation30_spill] sm:$0xff] %v9404_v27 }
 0x351   : > { %v3419_v51 = vadd.f32 %v3418_v7, %v9022_v41  ;;  %v3661_v47 = vpop.f32.mrf.mxu3 }
 0x353   : > { %v9371_v60 = vadd.f32 %v3661_v47, %v3419_v51 }
 0x354   : > { %7055 = vmatmul.msk.f32.gmra.mxu1 %vm2943_vm3, %v9369_v32  ;;  %v9375_v21 = vpop.f32.mrf.mxu0 }
 0x355   : > { %11765 = vst [vmem:[#allocation25_spill] sm:$0xff] %v9371_v60  ;;  %6976 = vmatmul.msk.f32.gmra.mxu2 %vm2943_vm3, %v9362_v52 }
 0x356   : > { %11766 = vst [vmem:[#allocation24_spill] sm:$0xff] %v9375_v21  ;;  %7008 = vmatmul.msk.f32.gmra.mxu3 %vm2943_vm3, %v9379_v49  ;;  %v9390_v21 = vld [vmem:[#allocation3 + $0x39] sm:$0xff] }
 0x357   : > { %7039 = vmatmul.msk.f32.gmra.mxu0 %vm2943_vm3, %v9383_v61  ;;  %v9400_v49 = vld [vmem:[#allocation3 + $0xf2] sm:$0xff] }
 0x358   : > { %v9387_v41 = vpop.f32.mrf.mxu1  ;;  %v3421_v7 = vpop.f32.mrf.mxu2  ;;  %11771 = vst [vmem:[#allocation31_spill] sm:$0xff] %v9400_v49 }
 0x359   : > { %v3422_v51 = vadd.f32 %v3421_v7, %v9042_v8  ;;  %v3664_v47 = vpop.f32.mrf.mxu3 }
 0x35b   : > { %v9392_v60 = vadd.f32 %v3664_v47, %v3422_v51 }
 0x35c   : > { %7056 = vmatmul.msk.f32.gmra.mxu1 %vm2943_vm3, %v9390_v21  ;;  %v9396_v52 = vpop.f32.mrf.mxu0 }
 0x35d   : > { %11769 = vst [vmem:[#allocation29_spill] sm:$0xff] %v9392_v60  ;;  %6977 = vmatmul.msk.f32.gmra.mxu2 %vm2943_vm3, %v9383_v61 }
 0x35e   : > { %11770 = vst [vmem:[#allocation28_spill] sm:$0xff] %v9396_v52  ;;  %7009 = vmatmul.msk.f32.gmra.mxu3 %vm2943_vm3, %v9400_v49  ;;  %v9411_v52 = vld [vmem:[#allocation3 + $0x49] sm:$0xff]  ;;  %v9421_v49 = vld [vmem:[#allocation3 + $0xfa] sm:$0xff] }
 0x35f   : > { %7040 = vmatmul.msk.f32.gmra.mxu0 %vm2943_vm3, %v9404_v27  ;;  %11775 = vst [vmem:[#allocation34_spill] sm:$0xff] %v9421_v49 }
 0x360   : > { %v9408_v8 = vpop.f32.mrf.mxu1  ;;  %v3424_v7 = vpop.f32.mrf.mxu2 }
 0x361   : > { %v3425_v51 = vadd.f32 %v3424_v7, %v9063_v57  ;;  %v3667_v47 = vpop.f32.mrf.mxu3 }
 0x363   : > { %v9413_v60 = vadd.f32 %v3667_v47, %v3425_v51 }
 0x364   : > { %7057 = vmatmul.msk.f32.gmra.mxu1 %vm2943_vm3, %v9411_v52  ;;  %v9417_v61 = vpop.f32.mrf.mxu0 }
 0x365   : > { %11773 = vst [vmem:[#allocation33_spill] sm:$0xff] %v9413_v60  ;;  %6978 = vmatmul.msk.f32.gmra.mxu2 %vm2943_vm3, %v9404_v27 }
 0x366   : > { %11774 = vst [vmem:[#allocation35_spill] sm:$0xff] %v9417_v61  ;;  %7010 = vmatmul.msk.f32.gmra.mxu3 %vm2943_vm3, %v9421_v49  ;;  %v9432_v61 = vld [vmem:[#allocation3 + $0x51] sm:$0xff] }
 0x367   : > { %7041 = vmatmul.msk.f32.gmra.mxu0 %vm2943_vm3, %v9425_v36  ;;  %v9442_v49 = vld [vmem:[#allocation3 + $0x10a] sm:$0xff] }
 0x368   : > { %v9429_v57 = vpop.f32.mrf.mxu1  ;;  %v3427_v7 = vpop.f32.mrf.mxu2  ;;  %11779 = vst [vmem:[#allocation38_spill] sm:$0xff] %v9442_v49 }
 0x369   : > { %v3428_v51 = vadd.f32 %v3427_v7, %v9084_v37  ;;  %v3670_v47 = vpop.f32.mrf.mxu3 }
 0x36b   : > { %v9434_v60 = vadd.f32 %v3670_v47, %v3428_v51 }
 0x36c   : > { %7058 = vmatmul.msk.f32.gmra.mxu1 %vm2943_vm3, %v9432_v61  ;;  %v9438_v27 = vpop.f32.mrf.mxu0 }
 0x36d   : > { %11777 = vst [vmem:[#allocation36_spill] sm:$0xff] %v9434_v60  ;;  %6979 = vmatmul.msk.f32.gmra.mxu2 %vm2943_vm3, %v9425_v36 }
 0x36e   : > { %11778 = vst [vmem:[#allocation39_spill] sm:$0xff] %v9438_v27  ;;  %7011 = vmatmul.msk.f32.gmra.mxu3 %vm2943_vm3, %v9442_v49  ;;  %v9453_v27 = vld [vmem:[#allocation3 + $0x61] sm:$0xff]  ;;  %v9463_v49 = vld [vmem:[#allocation3 + $0x112] sm:$0xff] }
 0x36f   : > { %7042 = vmatmul.msk.f32.gmra.mxu0 %vm2943_vm3, %v9446_v48  ;;  %11783 = vst [vmem:[#allocation48_spill] sm:$0xff] %v9463_v49 }
 0x370   : > { %v9450_v37 = vpop.f32.mrf.mxu1  ;;  %v3430_v7 = vpop.f32.mrf.mxu2 }
 0x371   : > { %v3431_v51 = vadd.f32 %v3430_v7, %v9105_v26  ;;  %v3673_v47 = vpop.f32.mrf.mxu3 }
 0x373   : > { %v9455_v60 = vadd.f32 %v3673_v47, %v3431_v51 }
 0x374   : > { %7059 = vmatmul.msk.f32.gmra.mxu1 %vm2943_vm3, %v9453_v27  ;;  %v9459_v36 = vpop.f32.mrf.mxu0 }
 0x375   : > { %11781 = vst [vmem:[#allocation46_spill] sm:$0xff] %v9455_v60  ;;  %6980 = vmatmul.msk.f32.gmra.mxu2 %vm2943_vm3, %v9446_v48  ;;  %v9486_v48 = vld [vmem:[#allocation3 + $0x128] sm:$0xff] }
 0x376   : > { %11782 = vst [vmem:[#allocation47_spill] sm:$0xff] %v9459_v36  ;;  %7012 = vmatmul.msk.f32.gmra.mxu3 %vm2943_vm3, %v9463_v49  ;;  %v9474_v36 = vld [vmem:[#allocation3 + $0x69] sm:$0xff] }
 0x377   : > { %7043 = vmatmul.msk.f32.gmra.mxu0 %vm2943_vm3, %v9467_v16  ;;  %v9482_v49 = vld [vmem:[#allocation3 + $0x122] sm:$0xff]  ;;  %11787 = vst [vmem:[#allocation52_spill] sm:$0xff] %v9486_v48 }
 0x378   : > { %v9471_v26 = vpop.f32.mrf.mxu1  ;;  %v3433_v7 = vpop.f32.mrf.mxu2  ;;  %11786 = vst [vmem:[#allocation51_spill] sm:$0xff] %v9482_v49 }
 0x379   : > { %v3434_v51 = vadd.f32 %v3433_v7, %v9126_v29  ;;  %v3676_v47 = vpop.f32.mrf.mxu3 }
 0x37b   : > { %v9476_v60 = vadd.f32 %v3676_v47, %v3434_v51 }
 0x37c   : > { %7060 = vmatmul.msk.f32.gmra.mxu1 %vm2943_vm3, %v9474_v36  ;;  %v9488_v14 = vpop.f32.mrf.mxu0 }
 0x37d   : > { %11785 = vst [vmem:[#allocation50_spill] sm:$0xff] %v9476_v60  ;;  %6981 = vmatmul.msk.f32.gmra.mxu2 %vm2943_vm3, %v9467_v16  ;;  %v9495_v60 = vld [vmem:[#allocation3 + $0x79] sm:$0xff] }
 0x37e   : > { %7013 = vmatmul.msk.f32.gmra.mxu3 %vm2943_vm3, %v9482_v49  ;;  %11788 = vst [vmem:[#allocation53_spill] sm:$0xff] %v9488_v14  ;;  %v9503_v14 = vld [vmem:[#allocation3 + $0x12a] sm:$0xff]  ;;  %v9507_v49 = vld [vmem:[#allocation3 + $0x138] sm:$0xff] }
 0x37f   : > { %7044 = vmatmul.msk.f32.gmra.mxu0 %vm2943_vm3, %v9486_v48  ;;  %11790 = vst [vmem:[#allocation55_spill] sm:$0xff] %v9503_v14 }
 0x380   : > { %v9492_v29 = vpop.f32.mrf.mxu1  ;;  %v3436_v7 = vpop.f32.mrf.mxu2  ;;  %11791 = vst [vmem:[#allocation56_spill] sm:$0xff] %v9507_v49 }
 0x381   : > { %v3437_v51 = vadd.f32 %v3436_v7, %v9147_v5  ;;  %v3679_v47 = vpop.f32.mrf.mxu3 }
 0x383   : > { %v9497_v16 = vadd.f32 %v3679_v47, %v3437_v51 }
 0x384   : > { %7061 = vmatmul.msk.f32.gmra.mxu1 %vm2943_vm3, %v9495_v60  ;;  %v9513_v51 = vpop.f32.mrf.mxu0 }
 0x385   : > { %11789 = vst [vmem:[#allocation54_spill] sm:$0xff] %v9497_v16  ;;  %6982 = vmatmul.msk.f32.gmra.mxu2 %vm2943_vm3, %v9486_v48 }
 0x386   : > { %7014 = vmatmul.msk.f32.gmra.mxu3 %vm2943_vm3, %v9503_v14  ;;  %11793 = vst [vmem:[#allocation58_spill] sm:$0xff] %v9513_v51  ;;  %v9524_v14 = vld [vmem:[#allocation3 + $0x13a] sm:$0xff] }
 0x387   : > { %7045 = vmatmul.msk.f32.gmra.mxu0 %vm2943_vm3, %v9507_v49  ;;  %11795 = vst [vmem:[#allocation60_spill] sm:$0xff] %v9524_v14 }
 0x388   : > { %v9511_v5 = vpop.f32.mrf.mxu1  ;;  %v3439_v7 = vpop.f32.mrf.mxu2 }
 0x389   : > { %11792 = vst [vmem:[#allocation57_spill] sm:$0xff] %v9511_v5  ;;  %v3440_v47 = vadd.f32 %v3439_v7, %v9168_v20  ;;  %v3682_v16 = vpop.f32.mrf.mxu3 }
 0x38b   : > { %v9518_v48 = vadd.f32 %v3682_v16, %v3440_v47 }
 0x38c   : > { %7062 = vmatmul.msk.f32.gmra.mxu1 %vm2943_vm3, %v9516_v23  ;;  %v9537_v51 = vpop.f32.mrf.mxu0 }
 0x38d   : > { %11794 = vst [vmem:[#allocation59_spill] sm:$0xff] %v9518_v48  ;;  %6983 = vmatmul.msk.f32.gmra.mxu2 %vm2943_vm3, %v9507_v49  ;;  %v9535_v48 = vld [vmem:[#allocation3 + $0x91] sm:$0xff] }
 0x38e   : > { %7015 = vmatmul.msk.f32.gmra.mxu3 %vm2943_vm3, %v9524_v14  ;;  %11798 = vst [vmem:[#allocation63_spill] sm:$0xff] %v9537_v51  ;;  %v9545_v14 = vld [vmem:[#allocation3 + $0x142] sm:$0xff]  ;;  %v9559_v51 = vld [vmem:[#allocation3 + $0x99] sm:$0xff] }
 0x38f   : > { %7046 = vmatmul.msk.f32.gmra.mxu0 %vm2943_vm3, %v9528_v28  ;;  %11800 = vst [vmem:[#allocation65_spill] sm:$0xff] %v9545_v14 }
 0x390   : > { %v9532_v20 = vpop.f32.mrf.mxu1  ;;  %v3442_v16 = vpop.f32.mrf.mxu2 }
 0x391   : > { %11797 = vst [vmem:[#allocation62_spill] sm:$0xff] %v9532_v20  ;;  %v3443_v7 = vadd.f32 %v3442_v16, %v9189_v3  ;;  %v3685_v47 = vpop.f32.mrf.mxu3  ;;  %v9549_v20 = vld [vmem:[#allocation3 + $0x150] sm:$0xff]  ;;  %v4365_v3 = vld [vmem:[%s11481_s3 + $0x50] sm:$0xff] }
 0x392   : > { %11801 = vst [vmem:[#allocation66_spill] sm:$0xff] %v9549_v20  ;;  %4478 = vmatpush.msra.mxu2 %v4365_v3  ;;  %v9572_v3 = vld [vmem:[#allocation3 + $0x152] sm:$0xff] }
 0x393   : > { %v9539_v49 = vadd.f32 %v3685_v47, %v3443_v7  ;;  %11804 = vst [vmem:[#allocation69_spill] sm:$0xff] %v9572_v3 }
 0x394   : > { %7063 = vmatmul.msk.f32.gmra.mxu1 %vm2943_vm3, %v9535_v48  ;;  %v9568_v5 = vpop.f32.mrf.mxu0 }
 0x395   : > { %11799 = vst [vmem:[#allocation64_spill] sm:$0xff] %v9539_v49  ;;  %6984 = vmatmul.msk.f32.gmra.mxu2 %vm2943_vm3, %v9528_v28 }
 0x396   : > { %7016 = vmatmul.msk.f32.gmra.mxu3 %vm2943_vm3, %v9545_v14  ;;  %v4641_v14 = vld [vmem:[%s11481_s3 + $0x60] sm:$0xff]  ;;  %11803 = vst [vmem:[#allocation68_spill] sm:$0xff] %v9568_v5 }
 0x397   : > { %7047 = vmatmul.msk.f32.gmra.mxu0 %vm2943_vm3, %v9549_v20  ;;  %4754 = vmatpush.msra.mxu3 %v4641_v14 }
 0x398   : > { %v9556_v16 = vpop.f32.mrf.mxu1  ;;  %v3445_v7 = vpop.f32.mrf.mxu2 }
 0x399   : > { %v3446_v47 = vadd.f32 %v3445_v7, %v9210_v39  ;;  %v3688_v49 = vpop.f32.mrf.mxu3  ;;  %v9576_v39 = vld [vmem:[#allocation3 + $0x158] sm:$0xff] }
 0x39a   : > { %11805 = vst [vmem:[#allocation70_spill] sm:$0xff] %v9576_v39 }
 0x39b   : > { %v9561_v28 = vadd.f32 %v3688_v49, %v3446_v47 }
 0x39c   : > { %7064 = vmatmul.msk.f32.gmra.mxu1 %vm2943_vm3, %v9559_v51 }
 0x39d   : > { %11802 = vst [vmem:[#allocation67_spill] sm:$0xff] %v9561_v28  ;;  %6985 = vmatmul.msk.f32.gmra.mxu2 %vm2943_vm3, %v9549_v20  ;;  %v9583_v28 = vld [vmem:[#allocation3 + $0xa9] sm:$0xff] }
 0x39e   : > { %7017 = vmatmul.msk.f32.gmra.mxu3 %vm2943_vm3, %v9572_v3  ;;  %v4916_v3 = vld [vmem:[%s11481_s3 + $0x70] sm:$0xff]  ;;  %v5191_v20 = vld [vmem:[%s11481_s3 + $0x80] sm:$0xff] }
 0x39f   : > { %7048 = vmatmul.msk.f32.gmra.mxu0 %vm2943_vm3, %v9576_v39  ;;  %5304 = vmatpush.msra.mxu1 %v5191_v20 }
 0x3a0   : > { %v3448_v7 = vpop.f32.mrf.mxu2  ;;  %5029 = vmatpush.msra.mxu0 %v4916_v3 }
 0x3a1   : > { %v9580_v49 = vpop.f32.mrf.mxu1  ;;  %v3449_v14 = vadd.f32 %v3448_v7, %v9242_v4  ;;  %v3691_v47 = vpop.f32.mrf.mxu3  ;;  %v9597_v4 = vld [vmem:[#allocation3 + $0x15a] sm:$0xff]  ;;  %v9601_v7 = vld [vmem:[#allocation3 + $0x168] sm:$0xff] }
 0x3a2   : > { %11806 = vst [vmem:[#allocation71_spill] sm:$0xff] %v9580_v49  ;;  %v9610_v49 = vld [vmem:[#allocation3 + $0xb1] sm:$0xff] }
 0x3a3   : > { %v9585_v5 = vadd.f32 %v3691_v47, %v3449_v14  ;;  %11808 = vst [vmem:[#allocation73_spill] sm:$0xff] %v9597_v4  ;;  %v9603_v14 = vpop.f32.mrf.mxu0 }
 0x3a4   : > { %7065 = vmatmul.msk.f32.gmra.mxu1 %vm2943_vm3, %v9583_v28  ;;  %11809 = vst [vmem:[#allocation74_spill] sm:$0xff] %v9601_v7 }
 0x3a5   : > { %11807 = vst [vmem:[#allocation72_spill] sm:$0xff] %v9585_v5  ;;  %6986 = vmatmul.msk.f32.gmra.mxu2 %vm2943_vm3, %v9576_v39 }
 0x3a6   : > { %7018 = vmatmul.msk.f32.gmra.mxu3 %vm2943_vm3, %v9597_v4  ;;  %11810 = vst [vmem:[#allocation75_spill] sm:$0xff] %v9603_v14  ;;  %v9618_v14 = vld [vmem:[#allocation3 + $0x16a] sm:$0xff] }
 0x3a7   : > { %7049 = vmatmul.msk.f32.gmra.mxu0 %vm2943_vm3, %v9601_v7  ;;  %11813 = vst [vmem:[#allocation78_spill] sm:$0xff] %v9618_v14  ;;  %v9622_v4 = vld [vmem:[#allocation3 + $0x170] sm:$0xff] }
 0x3a8   : > { %v3451_v5 = vpop.f32.mrf.mxu2 }
 0x3a9   : > { %v9607_v47 = vpop.f32.mrf.mxu1  ;;  %v3452_v20 = vadd.f32 %v3451_v5, %v9269_v54  ;;  %v3694_v3 = vpop.f32.mrf.mxu3 }
 0x3aa   : > { %11811 = vst [vmem:[#allocation76_spill] sm:$0xff] %v9607_v47 }
 0x3ab   : > { %v9612_v39 = vadd.f32 %v3694_v3, %v3452_v20  ;;  %v9628_v20 = vpop.f32.mrf.mxu0 }
 0x3ac   : > { %7066 = vmatmul.msk.f32.gmra.mxu1 %vm2943_vm3, %v9610_v49  ;;  %11814 = vst [vmem:[#allocation79_spill] sm:$0xff] %v9628_v20  ;;  %v9658_v20 = vld [vmem:[#allocation3 + $0x188] sm:$0xff] }
 0x3ad   : > { %11812 = vst [vmem:[#allocation77_spill] sm:$0xff] %v9612_v39  ;;  %6987 = vmatmul.msk.f32.gmra.mxu2 %vm2943_vm3, %v9601_v7  ;;  %v9641_v7 = vld [vmem:[#allocation3 + $0x180] sm:$0xff] }
 0x3ae   : > { %7019 = vmatmul.msk.f32.gmra.mxu3 %vm2943_vm3, %v9618_v14  ;;  %v9637_v14 = vld [vmem:[#allocation3 + $0x172] sm:$0xff] }
 0x3af   : > { %7050 = vmatmul.msk.f32.gmra.mxu0 %vm2943_vm3, %v9622_v4 }
 0x3b0   : > { %v3454_v5 = vpop.f32.mrf.mxu2 }
 0x3b1   : > { %v9626_v54 = vpop.f32.mrf.mxu1  ;;  %v3455_v3 = vadd.f32 %v3454_v5, %v9290_v9  ;;  %v3697_v39 = vpop.f32.mrf.mxu3 }
 0x3b3   : > { %v9631_v47 = vadd.f32 %v3697_v39, %v3455_v3 }
 0x3b4   : > { %7067 = vmatmul.msk.f32.gmra.mxu1 %vm2943_vm3, %v8993_v59  ;;  %v9648_v59 = vpop.f32.mrf.mxu0 }
 0x3b5   : > { %11815 = vst [vmem:[#allocation80_spill] sm:$0xff] %v9631_v47  ;;  %6988 = vmatmul.msk.f32.gmra.mxu2 %vm2943_vm3, %v9622_v4 }
 0x3b6   : > { %7020 = vmatmul.msk.f32.gmra.mxu3 %vm2943_vm3, %v9637_v14 }
 0x3b7   : > { %7051 = vmatmul.msk.f32.gmra.mxu0 %vm2943_vm3, %v9641_v7 }
 0x3b8   : > { %v3457_v39 = vpop.f32.mrf.mxu2 }
 0x3b9   : > { %v9645_v9 = vpop.f32.mrf.mxu1  ;;  %v3458_v5 = vadd.f32 %v3457_v39, %v9311_v53  ;;  %v3700_v3 = vpop.f32.mrf.mxu3 }
 0x3bb   : > { %v9650_v47 = vadd.f32 %v3700_v3, %v3458_v5 }
 0x3bc   : > { %7068 = vmatmul.msk.f32.gmra.mxu1 %vm2943_vm3, %v9007_v50  ;;  %v9669_v50 = vpop.f32.mrf.mxu0 }
 0x3bd   : > { %11816 = vst [vmem:[#allocation81_spill] sm:$0xff] %v9650_v47  ;;  %7085 = vmatmul.msk.f32.vlgmr.msra.gmra.mxu2 %vm2943_vm3, %v9015_v45 }
 0x3be   : > { %7117 = vmatmul.msk.f32.vlgmr.msra.gmra.mxu3 %vm2943_vm3, %v9036_v55 }
 0x3bf   : > { %7052 = vmatmul.msk.f32.gmra.mxu0 %vm2943_vm3, %v9658_v20 }
 0x3c0   : > { %v3460_v53 = vpop.f32.mrf.mxu2 }
 0x3c1   : > { %v9662_v39 = vpop.f32.mrf.mxu1  ;;  %v3461_v5 = vadd.f32 %v3460_v53, %v9329_v24  ;;  %v3703_v3 = vpop.f32.mrf.mxu3 }
 0x3c3   : > { %v9665_v47 = vadd.f32 %v3703_v3, %v3461_v5 }
 0x3c4   : > { %7069 = vmatmul.msk.f32.gmra.mxu1 %vm2943_vm3, %v9024_v40  ;;  %v9688_v40 = vpop.f32.mrf.mxu0 }
 0x3c5   : > { %7086 = vmatmul.msk.f32.gmra.mxu2 %vm2943_vm3, %v9032_v11 }
 0x3c6   : > { %7118 = vmatmul.msk.f32.gmra.mxu3 %vm2943_vm3, %v9057_v33 }
 0x3c7   : > { %7149 = vmatmul.msk.f32.vlgmr.msra.gmra.mxu0 %vm2943_vm3, %v9369_v32 }
 0x3c8   : > { %v3463_v45 = vpop.f32.mrf.mxu2 }
 0x3c9   : > { %v9677_v55 = vpop.f32.mrf.mxu1  ;;  %v3464_v24 = vadd.f32 %v3463_v45, %v9348_v38  ;;  %v3706_v53 = vpop.f32.mrf.mxu3 }
 0x3cb   : > { %v9680_v5 = vadd.f32 %v3706_v53, %v3464_v24 }
 0x3cc   : > { %7070 = vmatmul.msk.f32.gmra.mxu1 %vm2943_vm3, %v9044_v34 }
 0x3cd   : > { %7087 = vmatmul.msk.f32.gmra.mxu2 %vm2943_vm3, %v9053_v56 }
 0x3ce   : > { %7119 = vmatmul.msk.f32.gmra.mxu3 %vm2943_vm3, %v9078_v1  ;;  %v9707_v1 = vpop.f32.mrf.mxu0 }
 0x3cf   : > { %7150 = vmatmul.msk.f32.gmra.mxu0 %vm2943_vm3, %v9390_v21 }
 0x3d0   : > { %v3466_v11 = vpop.f32.mrf.mxu2 }
 0x3d1   : > { %v9692_v33 = vpop.f32.mrf.mxu1  ;;  %v3467_v38 = vadd.f32 %v3466_v11, %v9366_v62  ;;  %v3709_v32 = vpop.f32.mrf.mxu3 }
 0x3d3   : > { %v9695_v3 = vadd.f32 %v3709_v32, %v3467_v38 }
 0x3d4   : > { %7071 = vmatmul.msk.f32.gmra.mxu1 %vm2943_vm3, %v9065_v19 }
 0x3d5   : > { %7088 = vmatmul.msk.f32.gmra.mxu2 %vm2943_vm3, %v9074_v12 }
 0x3d6   : > { %7120 = vmatmul.msk.f32.gmra.mxu3 %vm2943_vm3, %v9099_v58 }
 0x3d7   : > { %7151 = vmatmul.msk.f32.gmra.mxu0 %vm2943_vm3, %v9411_v52 }
 0x3d8   : > { %v3469_v34 = vpop.f32.mrf.mxu2 }
 0x3d9   : > { %v9705_v56 = vpop.f32.mrf.mxu1  ;;  %v3470_v21 = vadd.f32 %v3469_v34, %v9387_v41  ;;  %v3712_v62 = vpop.f32.mrf.mxu3 }
 0x3da   : > { %v9723_v41 = vpop.f32.mrf.mxu0 }
 0x3db   : > { %v9710_v45 = vadd.f32 %v3712_v62, %v3470_v21  ;;  %v11831_v62 = vld [vmem:[#allocation62_spill] sm:$0xff] }
 0x3dc   : > { %7072 = vmatmul.msk.f32.gmra.mxu1 %vm2943_vm3, %v9086_v30 }
 0x3dd   : > { %11817 = vst [vmem:[#allocation82_spill] sm:$0xff] %v9710_v45  ;;  %7089 = vmatmul.msk.f32.gmra.mxu2 %vm2943_vm3, %v9095_v63 }
 0x3de   : > { %7121 = vmatmul.msk.f32.gmra.mxu3 %vm2943_vm3, %v9120_v43 }
 0x3df   : > { %7152 = vmatmul.msk.f32.gmra.mxu0 %vm2943_vm3, %v9432_v61 }
 0x3e0   : > { %v3472_v19 = vpop.f32.mrf.mxu2 }
 0x3e1   : > { %v9720_v12 = vpop.f32.mrf.mxu1  ;;  %v3473_v58 = vadd.f32 %v3472_v19, %v9408_v8  ;;  %v3715_v52 = vpop.f32.mrf.mxu3 }
 0x3e3   : > { %v9725_v24 = vadd.f32 %v3715_v52, %v3473_v58 }
 0x3e4   : > { %7073 = vmatmul.msk.f32.gmra.mxu1 %vm2943_vm3, %v9107_v2  ;;  %v9742_v2 = vpop.f32.mrf.mxu0 }
 0x3e5   : > { %11818 = vst [vmem:[#allocation83_spill] sm:$0xff] %v9725_v24  ;;  %7090 = vmatmul.msk.f32.gmra.mxu2 %vm2943_vm3, %v9116_v10 }
 0x3e6   : > { %7122 = vmatmul.msk.f32.gmra.mxu3 %vm2943_vm3, %v9141_v22 }
 0x3e7   : > { %7153 = vmatmul.msk.f32.gmra.mxu0 %vm2943_vm3, %v9453_v27 }
 0x3e8   : > { %v3475_v30 = vpop.f32.mrf.mxu2 }
 0x3e9   : > { %v9735_v63 = vpop.f32.mrf.mxu1  ;;  %v3476_v43 = vadd.f32 %v3475_v30, %v9429_v57  ;;  %v3718_v61 = vpop.f32.mrf.mxu3  ;;  %v11833_v30 = vld [vmem:[#allocation42_spill] sm:$0xff] }
 0x3eb   : > { %v9738_v8 = vadd.f32 %v3718_v61, %v3476_v43  ;;  %v11835_v61 = vld [vmem:[#allocation44_spill] sm:$0xff] }
 0x3ec   : > { %7074 = vmatmul.msk.f32.gmra.mxu1 %vm2943_vm3, %v9128_v0  ;;  %v9761_v0 = vpop.f32.mrf.mxu0 }
 0x3ed   : > { %11819 = vst [vmem:[#allocation84_spill] sm:$0xff] %v9738_v8  ;;  %7091 = vmatmul.msk.f32.gmra.mxu2 %vm2943_vm3, %v9137_v13  ;;  %v10066_v8 = vld [vmem:[#allocation3 + $0x18a] sm:$0xff] }
 0x3ee   : > { %7123 = vmatmul.msk.f32.gmra.mxu3 %vm2943_vm3, %v9162_v31  ;;  %11821 = vst [vmem:[#allocation86_spill] sm:$0xff] %v9761_v0 }
 0x3ef   : > { %7154 = vmatmul.msk.f32.gmra.mxu0 %vm2943_vm3, %v9474_v36 }
 0x3f0   : > { %v3478_v10 = vpop.f32.mrf.mxu2 }
 0x3f1   : > { %v9750_v22 = vpop.f32.mrf.mxu1  ;;  %v3479_v27 = vadd.f32 %v3478_v10, %v9450_v37  ;;  %v3721_v57 = vpop.f32.mrf.mxu3  ;;  %v11836_v10 = vld [vmem:[#allocation13_spill] sm:$0xff] }
 0x3f3   : > { %v9753_v53 = vadd.f32 %v3721_v57, %v3479_v27 }
 0x3f4   : > { %7075 = vmatmul.msk.f32.gmra.mxu1 %vm2943_vm3, %v9149_v25 }
 0x3f5   : > { %11820 = vst [vmem:[#allocation85_spill] sm:$0xff] %v9753_v53  ;;  %7092 = vmatmul.msk.f32.gmra.mxu2 %vm2943_vm3, %v9158_v6 }
 0x3f6   : > { %7124 = vmatmul.msk.f32.gmra.mxu3 %vm2943_vm3, %v9183_v35  ;;  %v9780_v35 = vpop.f32.mrf.mxu0 }
 0x3f7   : > { %7155 = vmatmul.msk.f32.gmra.mxu0 %vm2943_vm3, %v9495_v60  ;;  %11823 = vst [vmem:[#allocation88_spill] sm:$0xff] %v9780_v35 }
 0x3f8   : > { %v3481_v13 = vpop.f32.mrf.mxu2 }
 0x3f9   : > { %v9765_v31 = vpop.f32.mrf.mxu1  ;;  %v3482_v36 = vadd.f32 %v3481_v13, %v9471_v26  ;;  %v3724_v37 = vpop.f32.mrf.mxu3 }
 0x3fb   : > { %v9768_v11 = vadd.f32 %v3724_v37, %v3482_v36  ;;  %v11838_v37 = vld [vmem:[#allocation11_spill] sm:$0xff] }
 0x3fc   : > { %7076 = vmatmul.msk.f32.gmra.mxu1 %vm2943_vm3, %v9170_v17 }
 0x3fd   : > { %11822 = vst [vmem:[#allocation87_spill] sm:$0xff] %v9768_v11  ;;  %7093 = vmatmul.msk.f32.gmra.mxu2 %vm2943_vm3, %v9179_v42 }
 0x3fe   : > { %7125 = vmatmul.msk.f32.gmra.mxu3 %vm2943_vm3, %v9204_v44  ;;  %v11825_v44 = vld [vmem:[#allocation57_spill] sm:$0xff]  ;;  %v9796_v32 = vpop.f32.mrf.mxu0 }
 0x3ff   : > { %7156 = vmatmul.msk.f32.gmra.mxu0 %vm2943_vm3, %v9516_v23  ;;  %11826 = vst [vmem:[#allocation57_spill] sm:$0xff] %v9796_v32 }
 0x400   : > { %v3484_v25 = vpop.f32.mrf.mxu2 }
 0x401   : > { %v9778_v6 = vpop.f32.mrf.mxu1  ;;  %v3485_v60 = vadd.f32 %v3484_v25, %v9492_v29  ;;  %v3727_v26 = vpop.f32.mrf.mxu3  ;;  %v11839_v25 = vld [vmem:[#allocation9_spill] sm:$0xff] }
 0x403   : > { %v9783_v38 = vadd.f32 %v3727_v26, %v3485_v60  ;;  %v11840_v60 = vld [vmem:[#allocation15_spill] sm:$0xff] }
 0x404   : > { %7077 = vmatmul.msk.f32.gmra.mxu1 %vm2943_vm3, %v9191_v18  ;;  %v11828_v18 = vld [vmem:[#allocation41_spill] sm:$0xff] }
 0x405   : > { %11824 = vst [vmem:[#allocation89_spill] sm:$0xff] %v9783_v38  ;;  %7094 = vmatmul.msk.f32.gmra.mxu2 %vm2943_vm3, %v9200_v15  ;;  %v11829_v15 = vld [vmem:[#allocation40_spill] sm:$0xff] }
 0x406   : > { %7126 = vmatmul.msk.f32.gmra.mxu3 %vm2943_vm3, %v9231_v46  ;;  %v11830_v46 = vld [vmem:[#allocation8_spill] sm:$0xff]  ;;  %v9815_v43 = vpop.f32.mrf.mxu0 }
 0x407   : > { %7157 = vmatmul.msk.f32.gmra.mxu0 %vm2943_vm3, %v9535_v48  ;;  %11834 = vst [vmem:[#allocation40_spill] sm:$0xff] %v9815_v43 }
 0x408   : > { %v3487_v17 = vpop.f32.mrf.mxu2 }
 0x409   : > { %v9793_v42 = vpop.f32.mrf.mxu1  ;;  %v3488_v23 = vadd.f32 %v3487_v17, %v11825_v44  ;;  %v3730_v29 = vpop.f32.mrf.mxu3 }
 0x40b   : > { %v9798_v34 = vadd.f32 %v3730_v29, %v3488_v23 }
 0x40c   : > { %7078 = vmatmul.msk.f32.gmra.mxu1 %vm2943_vm3, %v11828_v18  ;;  %v11844_v18 = vld [vmem:[#allocation32_spill] sm:$0xff] }
 0x40d   : > { %11827 = vst [vmem:[#allocation90_spill] sm:$0xff] %v9798_v34  ;;  %7095 = vmatmul.msk.f32.gmra.mxu2 %vm2943_vm3, %v11829_v15  ;;  %v11845_v15 = vld [vmem:[#allocation10_spill] sm:$0xff] }
 0x40e   : > { %7127 = vmatmul.msk.f32.gmra.mxu3 %vm2943_vm3, %v11830_v46  ;;  %v9834_v26 = vpop.f32.mrf.mxu0  ;;  %v11846_v46 = vld [vmem:[#allocation43_spill] sm:$0xff] }
 0x40f   : > { %7158 = vmatmul.msk.f32.gmra.mxu0 %vm2943_vm3, %v9559_v51  ;;  %11841 = vst [vmem:[#allocation62_spill] sm:$0xff] %v9834_v26 }
 0x410   : > { %v3490_v48 = vpop.f32.mrf.mxu2 }
 0x411   : > { %v9808_v21 = vpop.f32.mrf.mxu1  ;;  %v3491_v19 = vadd.f32 %v3490_v48, %v11831_v62  ;;  %v3733_v58 = vpop.f32.mrf.mxu3  ;;  %v4896_v48 = vld [vmem:[#allocation3 + $0xc1] sm:$0xff] }
 0x413   : > { %v9811_v52 = vadd.f32 %v3733_v58, %v3491_v19  ;;  %v11848_v58 = vld [vmem:[#allocation76_spill] sm:$0xff] }
 0x414   : > { %7079 = vmatmul.msk.f32.gmra.mxu1 %vm2943_vm3, %v11833_v30 }
 0x415   : > { %11832 = vst [vmem:[#allocation41_spill] sm:$0xff] %v9811_v52  ;;  %7096 = vmatmul.msk.f32.gmra.mxu2 %vm2943_vm3, %v11835_v61  ;;  %v5167_v52 = vld [vmem:[#allocation3 + $0x92] sm:$0xff] }
 0x416   : > { %7128 = vmatmul.msk.f32.gmra.mxu3 %vm2943_vm3, %v11836_v10  ;;  %v9852_v19 = vpop.f32.mrf.mxu0 }
 0x417   : > { %7159 = vmatmul.msk.f32.gmra.mxu0 %vm2943_vm3, %v9583_v28  ;;  %11847 = vst [vmem:[#allocation44_spill] sm:$0xff] %v9852_v19 }
 0x418   : > { %v3493_v51 = vpop.f32.mrf.mxu2 }
 0x419   : > { %v9823_v27 = vpop.f32.mrf.mxu1  ;;  %v3494_v57 = vadd.f32 %v3493_v51, %v9556_v16  ;;  %v3736_v13 = vpop.f32.mrf.mxu3  ;;  %v11842_v16 = vld [vmem:[#allocation71_spill] sm:$0xff]  ;;  %v11850_v51 = vld [vmem:[#allocation12_spill] sm:$0xff] }
 0x41b   : > { %v9826_v36 = vadd.f32 %v3736_v13, %v3494_v57  ;;  %v11851_v57 = vld [vmem:[#allocation14_spill] sm:$0xff] }
 0x41c   : > { %7080 = vmatmul.msk.f32.gmra.mxu1 %vm2943_vm3, %v11838_v37  ;;  %v11852_v13 = vld [vmem:[#allocation18_spill] sm:$0xff]  ;;  %v4897_v37 = vld [vmem:[#allocation3 + $0xc9] sm:$0xff] }
 0x41d   : > { %11837 = vst [vmem:[#allocation8_spill] sm:$0xff] %v9826_v36  ;;  %7097 = vmatmul.msk.f32.gmra.mxu2 %vm2943_vm3, %v11839_v25 }
 0x41e   : > { %7129 = vmatmul.msk.f32.gmra.mxu3 %vm2943_vm3, %v11840_v60 }
 0x41f   : > { %7160 = vmatmul.msk.f32.gmra.mxu0 %vm2943_vm3, %v9610_v49 }
 0x420   : > { %v3496_v28 = vpop.f32.mrf.mxu2 }
 0x421   : > { %v9838_v17 = vpop.f32.mrf.mxu1  ;;  %v3497_v44 = vadd.f32 %v3496_v28, %v11842_v16  ;;  %v3739_v23 = vpop.f32.mrf.mxu3 }
 0x423   : > { %v9841_v29 = vadd.f32 %v3739_v23, %v3497_v44  ;;  %v9867_v44 = vld [vmem:[#allocation3 + $0x181] sm:$0xff]  ;;  %v9869_v23 = vpop.f32.mrf.mxu0 }
 0x424   : > { %7081 = vmatmul.msk.f32.gmra.mxu1 %vm2943_vm3, %v11844_v18  ;;  %11853 = vst [vmem:[#allocation11_spill] sm:$0xff] %v9869_v23 }
 0x425   : > { %11843 = vst [vmem:[#allocation42_spill] sm:$0xff] %v9841_v29  ;;  %7098 = vmatmul.msk.f32.gmra.mxu2 %vm2943_vm3, %v11845_v15  ;;  %v11855_v15 = vld [vmem:[#allocation19_spill] sm:$0xff]  ;;  %v5165_v29 = vld [vmem:[#allocation3 + $0x7a] sm:$0xff] }
 0x426   : > { %7130 = vmatmul.msk.f32.gmra.mxu3 %vm2943_vm3, %v11846_v46  ;;  %v11856_v46 = vld [vmem:[#allocation22_spill] sm:$0xff] }
 0x427   : > { %7161 = vmatmul.msk.f32.gmra.mxu0 %vm2943_vm3, %v4896_v48  ;;  %v4898_v48 = vld [vmem:[#allocation3 + $0xd9] sm:$0xff] }
 0x428   : > { %v3499_v49 = vpop.f32.mrf.mxu2 }
 0x429   : > { %v9850_v62 = vpop.f32.mrf.mxu1  ;;  %v3500_v30 = vadd.f32 %v3499_v49, %v11848_v58  ;;  %v3742_v61 = vpop.f32.mrf.mxu3 }
 0x42b   : > { %v9855_v10 = vadd.f32 %v3742_v61, %v3500_v30  ;;  %v9883_v61 = vld [vmem:[#allocation3 + $0x189] sm:$0xff] }
 0x42c   : > { %7082 = vmatmul.msk.f32.gmra.mxu1 %vm2943_vm3, %v11850_v51 }
 0x42d   : > { %11849 = vst [vmem:[#allocation13_spill] sm:$0xff] %v9855_v10  ;;  %7099 = vmatmul.msk.f32.gmra.mxu2 %vm2943_vm3, %v11851_v57  ;;  %v9889_v57 = vpop.f32.mrf.mxu0  ;;  %v11875_v10 = vld [vmem:[#allocation48_spill] sm:$0xff] }
 0x42e   : > { %7131 = vmatmul.msk.f32.gmra.mxu3 %vm2943_vm3, %v11852_v13  ;;  %11858 = vst [vmem:[#allocation71_spill] sm:$0xff] %v9889_v57  ;;  %v11859_v13 = vld [vmem:[#allocation23_spill] sm:$0xff] }
 0x42f   : > { %7162 = vmatmul.msk.f32.gmra.mxu0 %vm2943_vm3, %v4897_v37  ;;  %v11860_v37 = vld [vmem:[#allocation26_spill] sm:$0xff] }
 0x430   : > { %v3502_v25 = vpop.f32.mrf.mxu2  ;;  %v5166_v57 = vld [vmem:[#allocation3 + $0x82] sm:$0xff] }
 0x431   : > { %v9864_v60 = vpop.f32.mrf.mxu1  ;;  %v3503_v28 = vadd.f32 %v3502_v25, %v9626_v54  ;;  %v3745_v16 = vpop.f32.mrf.mxu3  ;;  %v4899_v25 = vld [vmem:[#allocation3 + $0xe1] sm:$0xff] }
 0x433   : > { %v9871_v18 = vadd.f32 %v3745_v16, %v3503_v28  ;;  %v5159_v28 = vld [vmem:[#allocation3 + $0x32] sm:$0xff]  ;;  %v11861_v16 = vld [vmem:[#allocation27_spill] sm:$0xff] }
 0x434   : > { %7083 = vmatmul.msk.f32.gmra.mxu1 %vm2943_vm3, %v9867_v44 }
 0x435   : > { %11854 = vst [vmem:[#allocation9_spill] sm:$0xff] %v9871_v18  ;;  %7100 = vmatmul.msk.f32.gmra.mxu2 %vm2943_vm3, %v11855_v15  ;;  %v11862_v15 = vld [vmem:[#allocation30_spill] sm:$0xff] }
 0x436   : > { %7132 = vmatmul.msk.f32.gmra.mxu3 %vm2943_vm3, %v11856_v46  ;;  %v4900_v46 = vld [vmem:[#allocation3 + $0xf1] sm:$0xff]  ;;  %v5163_v18 = vld [vmem:[#allocation3 + $0x62] sm:$0xff] }
 0x437   : > { %7163 = vmatmul.msk.f32.gmra.mxu0 %vm2943_vm3, %v4898_v48  ;;  %v9903_v48 = vpop.f32.mrf.mxu0 }
 0x438   : > { %v3505_v54 = vpop.f32.mrf.mxu2  ;;  %11863 = vst [vmem:[#allocation32_spill] sm:$0xff] %v9903_v48 }
 0x439   : > { %v9880_v49 = vpop.f32.mrf.mxu1  ;;  %v3506_v58 = vadd.f32 %v3505_v54, %v9645_v9  ;;  %v3748_v30 = vpop.f32.mrf.mxu3 }
 0x43b   : > { %v9885_v51 = vadd.f32 %v3748_v30, %v3506_v58  ;;  %v5160_v58 = vld [vmem:[#allocation3 + $0x3a] sm:$0xff]  ;;  %v11864_v30 = vld [vmem:[#allocation31_spill] sm:$0xff] }
 0x43c   : > { %7084 = vmatmul.msk.f32.gmra.mxu1 %vm2943_vm3, %v9883_v61 }
 0x43d   : > { %11857 = vst [vmem:[#allocation15_spill] sm:$0xff] %v9885_v51  ;;  %7101 = vmatmul.msk.f32.gmra.mxu2 %vm2943_vm3, %v11859_v13  ;;  %v11865_v13 = vld [vmem:[#allocation37_spill] sm:$0xff]  ;;  %v11871_v51 = vld [vmem:[#allocation38_spill] sm:$0xff] }
 0x43e   : > { %7133 = vmatmul.msk.f32.gmra.mxu3 %vm2943_vm3, %v11860_v37  ;;  %v4901_v37 = vld [vmem:[#allocation3 + $0xf9] sm:$0xff] }
 0x43f   : > { %7164 = vmatmul.msk.f32.gmra.mxu0 %vm2943_vm3, %v4899_v25 }
 0x441   : > { %v9896_v9 = vpop.f32.mrf.mxu1 }
 0x444   : > { %7181 = vmatmul.msk.f32.vlgmr.msra.gmra.mxu1 %vm2943_vm3, %v5159_v28  ;;  %v9916_v28 = vpop.f32.mrf.mxu0 }
 0x445   : > { %7102 = vmatmul.msk.f32.gmra.mxu2 %vm2943_vm3, %v11861_v16  ;;  %11866 = vst [vmem:[#allocation10_spill] sm:$0xff] %v9916_v28  ;;  %v5161_v16 = vld [vmem:[#allocation3 + $0x4a] sm:$0xff] }
 0x446   : > { %7134 = vmatmul.msk.f32.gmra.mxu3 %vm2943_vm3, %v11862_v15  ;;  %v11867_v15 = vld [vmem:[#allocation34_spill] sm:$0xff] }
 0x447   : > { %7165 = vmatmul.msk.f32.gmra.mxu0 %vm2943_vm3, %v4900_v46  ;;  %v11868_v46 = vld [vmem:[#allocation45_spill] sm:$0xff] }
 0x449   : > { %v9906_v54 = vpop.f32.mrf.mxu1 }
 0x44c   : > { %7182 = vmatmul.msk.f32.gmra.mxu1 %vm2943_vm3, %v5160_v58  ;;  %v4902_v58 = vld [vmem:[#allocation3 + $0x109] sm:$0xff] }
 0x44d   : > { %7103 = vmatmul.msk.f32.gmra.mxu2 %vm2943_vm3, %v11864_v30 }
 0x44e   : > { %7135 = vmatmul.msk.f32.gmra.mxu3 %vm2943_vm3, %v11865_v13  ;;  %v5162_v13 = vld [vmem:[#allocation3 + $0x52] sm:$0xff] }
 0x44f   : > { %7166 = vmatmul.msk.f32.gmra.mxu0 %vm2943_vm3, %v4901_v37  ;;  %v9926_v37 = vpop.f32.mrf.mxu0 }
 0x450   : > { %11870 = vst [vmem:[#allocation76_spill] sm:$0xff] %v9926_v37  ;;  %v5164_v37 = vld [vmem:[#allocation3 + $0x6a] sm:$0xff] }
 0x451   : > { %v9914_v25 = vpop.f32.mrf.mxu1 }
 0x454   : > { %7183 = vmatmul.msk.f32.gmra.mxu1 %vm2943_vm3, %v5161_v16  ;;  %v11872_v16 = vld [vmem:[#allocation49_spill] sm:$0xff] }
 0x455   : > { %7104 = vmatmul.msk.f32.gmra.mxu2 %vm2943_vm3, %v11867_v15  ;;  %v4903_v15 = vld [vmem:[#allocation3 + $0x111] sm:$0xff] }
 0x456   : > { %7136 = vmatmul.msk.f32.gmra.mxu3 %vm2943_vm3, %v11868_v46 }
 0x457   : > { %7167 = vmatmul.msk.f32.gmra.mxu0 %vm2943_vm3, %v4902_v58  ;;  %v9937_v58 = vpop.f32.mrf.mxu0 }
 0x458   : > { %11874 = vst [vmem:[#allocation14_spill] sm:$0xff] %v9937_v58  ;;  %v4905_v58 = vld [vmem:[#allocation3 + $0x129] sm:$0xff] }
 0x459   : > { %v9924_v30 = vpop.f32.mrf.mxu1 }
 0x45a   : > { %11869 = vst [vmem:[#allocation43_spill] sm:$0xff] %v9924_v30 }
 0x45c   : > { %7184 = vmatmul.msk.f32.gmra.mxu1 %vm2943_vm3, %v5162_v13  ;;  %v11876_v13 = vld [vmem:[#allocation52_spill] sm:$0xff] }
 0x45d   : > { %7105 = vmatmul.msk.f32.gmra.mxu2 %vm2943_vm3, %v11871_v51  ;;  %v4904_v51 = vld [vmem:[#allocation3 + $0x121] sm:$0xff] }
 0x45e   : > { %7137 = vmatmul.msk.f32.gmra.mxu3 %vm2943_vm3, %v11872_v16 }
 0x45f   : > { %7168 = vmatmul.msk.f32.gmra.mxu0 %vm2943_vm3, %v4903_v15  ;;  %v11878_v15 = vld [vmem:[#allocation51_spill] sm:$0xff]  ;;  %v9951_v28 = vpop.f32.mrf.mxu0 }
 0x460   : > { %11880 = vst [vmem:[#allocation19_spill] sm:$0xff] %v9951_v28 }
 0x461   : > { %v9934_v46 = vpop.f32.mrf.mxu1 }
 0x462   : > { %11873 = vst [vmem:[#allocation12_spill] sm:$0xff] %v9934_v46  ;;  %v4914_v46 = vld [vmem:[#allocation3 + $0x199] sm:$0xff] }
 0x464   : > { %7185 = vmatmul.msk.f32.gmra.mxu1 %vm2943_vm3, %v5163_v18  ;;  %v11879_v18 = vld [vmem:[#allocation56_spill] sm:$0xff] }
 0x465   : > { %7106 = vmatmul.msk.f32.gmra.mxu2 %vm2943_vm3, %v11875_v10  ;;  %v9953_v10 = vpop.f32.mrf.mxu2 }
 0x466   : > { %7138 = vmatmul.msk.f32.gmra.mxu3 %vm2943_vm3, %v11876_v13  ;;  %v9956_v13 = vpop.f32.mrf.mxu3 }
 0x467   : > { %7169 = vmatmul.msk.f32.gmra.mxu0 %vm2943_vm3, %v4904_v51  ;;  %v9968_v48 = vpop.f32.mrf.mxu0 }
 0x469   : > { %v9944_v16 = vpop.f32.mrf.mxu1 }
 0x46a   : > { %11877 = vst [vmem:[#allocation18_spill] sm:$0xff] %v9944_v16  ;;  %v10054_v16 = vld [vmem:[#allocation3 + $0x182] sm:$0xff] }
 0x46c   : > { %7186 = vmatmul.msk.f32.gmra.mxu1 %vm2943_vm3, %v5164_v37  ;;  %v11882_v37 = vld [vmem:[#allocation55_spill] sm:$0xff] }
 0x46d   : > { %7107 = vmatmul.msk.f32.gmra.mxu2 %vm2943_vm3, %v11878_v15  ;;  %v11883_v15 = vld [vmem:[#allocation61_spill] sm:$0xff] }
 0x46e   : > { %7139 = vmatmul.msk.f32.gmra.mxu3 %vm2943_vm3, %v11879_v18  ;;  %v4906_v18 = vld [vmem:[#allocation3 + $0x139] sm:$0xff]  ;;  %v9972_v36 = vpop.f32.mrf.mxu3 }
 0x46f   : > { %7170 = vmatmul.msk.f32.gmra.mxu0 %vm2943_vm3, %v4905_v58  ;;  %v9970_v58 = vpop.f32.mrf.mxu2  ;;  %v9982_v23 = vpop.f32.mrf.mxu0 }
 0x471   : > { %v9958_v51 = vpop.f32.mrf.mxu1 }
 0x472   : > { %11881 = vst [vmem:[#allocation22_spill] sm:$0xff] %v9958_v51 }
 0x474   : > { %7187 = vmatmul.msk.f32.gmra.mxu1 %vm2943_vm3, %v5165_v29  ;;  %v11885_v29 = vld [vmem:[#allocation60_spill] sm:$0xff] }
 0x475   : > { %7108 = vmatmul.msk.f32.gmra.mxu2 %vm2943_vm3, %v11882_v37  ;;  %v11886_v37 = vld [vmem:[#allocation66_spill] sm:$0xff] }
 0x476   : > { %7140 = vmatmul.msk.f32.gmra.mxu3 %vm2943_vm3, %v11883_v15  ;;  %v4907_v15 = vld [vmem:[#allocation3 + $0x141] sm:$0xff]  ;;  %v9987_v19 = vpop.f32.mrf.mxu3 }
 0x477   : > { %7171 = vmatmul.msk.f32.gmra.mxu0 %vm2943_vm3, %v4906_v18  ;;  %v9984_v34 = vpop.f32.mrf.mxu2  ;;  %v9997_v38 = vpop.f32.mrf.mxu0 }
 0x479   : > { %v9966_v28 = vpop.f32.mrf.mxu1 }
 0x47a   : > { %11884 = vst [vmem:[#allocation23_spill] sm:$0xff] %v9966_v28 }
 0x47c   : > { %7188 = vmatmul.msk.f32.gmra.mxu1 %vm2943_vm3, %v5166_v57  ;;  %v11888_v57 = vld [vmem:[#allocation65_spill] sm:$0xff] }
 0x47d   : > { %7109 = vmatmul.msk.f32.gmra.mxu2 %vm2943_vm3, %v11885_v29  ;;  %v11889_v29 = vld [vmem:[#allocation70_spill] sm:$0xff] }
 0x47e   : > { %7141 = vmatmul.msk.f32.gmra.mxu3 %vm2943_vm3, %v11886_v37  ;;  %v4908_v37 = vld [vmem:[#allocation3 + $0x151] sm:$0xff]  ;;  %v10003_v26 = vpop.f32.mrf.mxu3 }
 0x47f   : > { %7172 = vmatmul.msk.f32.gmra.mxu0 %vm2943_vm3, %v4907_v15  ;;  %v9999_v28 = vpop.f32.mrf.mxu2  ;;  %v10015_v11 = vpop.f32.mrf.mxu0 }
 0x481   : > { %v9980_v18 = vpop.f32.mrf.mxu1 }
 0x482   : > { %11887 = vst [vmem:[#allocation26_spill] sm:$0xff] %v9980_v18  ;;  %v5168_v18 = vld [vmem:[#allocation3 + $0x9a] sm:$0xff] }
 0x484   : > { %7189 = vmatmul.msk.f32.gmra.mxu1 %vm2943_vm3, %v5167_v52  ;;  %v11891_v52 = vld [vmem:[#allocation69_spill] sm:$0xff] }
 0x485   : > { %7110 = vmatmul.msk.f32.gmra.mxu2 %vm2943_vm3, %v11888_v57  ;;  %v11892_v57 = vld [vmem:[#allocation74_spill] sm:$0xff] }
 0x486   : > { %7142 = vmatmul.msk.f32.gmra.mxu3 %vm2943_vm3, %v11889_v29  ;;  %v4909_v29 = vld [vmem:[#allocation3 + $0x159] sm:$0xff] }
 0x487   : > { %7173 = vmatmul.msk.f32.gmra.mxu0 %vm2943_vm3, %v4908_v37  ;;  %v10017_v51 = vpop.f32.mrf.mxu2  ;;  %v10032_v43 = vpop.f32.mrf.mxu0 }
 0x489   : > { %v9994_v15 = vpop.f32.mrf.mxu1 }
 0x48a   : > { %11890 = vst [vmem:[#allocation27_spill] sm:$0xff] %v9994_v15  ;;  %v5169_v15 = vld [vmem:[#allocation3 + $0xaa] sm:$0xff] }
 0x48c   : > { %7190 = vmatmul.msk.f32.gmra.mxu1 %vm2943_vm3, %v5168_v18  ;;  %v11894_v18 = vld [vmem:[#allocation73_spill] sm:$0xff] }
 0x48d   : > { %7111 = vmatmul.msk.f32.gmra.mxu2 %vm2943_vm3, %v11891_v52  ;;  %v4910_v52 = vld [vmem:[#allocation3 + $0x169] sm:$0xff] }
 0x48e   : > { %7143 = vmatmul.msk.f32.gmra.mxu3 %vm2943_vm3, %v11892_v57  ;;  %v10020_v57 = vpop.f32.mrf.mxu3 }
 0x48f   : > { %7174 = vmatmul.msk.f32.gmra.mxu0 %vm2943_vm3, %v4909_v29 }
 0x491   : > { %v10008_v37 = vpop.f32.mrf.mxu1 }
 0x492   : > { %11893 = vst [vmem:[#allocation30_spill] sm:$0xff] %v10008_v37  ;;  %v5170_v37 = vld [vmem:[#allocation3 + $0xb2] sm:$0xff] }
 0x494   : > { %7191 = vmatmul.msk.f32.gmra.mxu1 %vm2943_vm3, %v5169_v15  ;;  %v11896_v15 = vld [vmem:[#allocation78_spill] sm:$0xff] }
 0x495   : > { %7112 = vmatmul.msk.f32.gmra.mxu2 %vm2943_vm3, %v11894_v18 }
 0x496   : > { %7144 = vmatmul.msk.f32.gmra.mxu3 %vm2943_vm3, %v9622_v4  ;;  %v4911_v4 = vld [vmem:[#allocation3 + $0x171] sm:$0xff]  ;;  %v10036_v53 = vpop.f32.mrf.mxu3 }
 0x497   : > { %7175 = vmatmul.msk.f32.gmra.mxu0 %vm2943_vm3, %v4910_v52  ;;  %v10034_v52 = vpop.f32.mrf.mxu2 }
 0x499   : > { %v10022_v29 = vpop.f32.mrf.mxu1 }
 0x49a   : > { %11895 = vst [vmem:[#allocation31_spill] sm:$0xff] %v10022_v29  ;;  %v5171_v29 = vld [vmem:[#allocation3 + $0xc2] sm:$0xff] }
 0x49c   : > { %7192 = vmatmul.msk.f32.gmra.mxu1 %vm2943_vm3, %v5170_v37  ;;  %v5172_v37 = vld [vmem:[#allocation3 + $0xca] sm:$0xff] }
 0x49d   : > { %7113 = vmatmul.msk.f32.gmra.mxu2 %vm2943_vm3, %v11896_v15  ;;  %v10047_v15 = vpop.f32.mrf.mxu0 }
 0x49e   : > { %7145 = vmatmul.msk.f32.gmra.mxu3 %vm2943_vm3, %v9641_v7 }
 0x49f   : > { %7176 = vmatmul.msk.f32.gmra.mxu0 %vm2943_vm3, %v4911_v4  ;;  %v10049_v4 = vpop.f32.mrf.mxu2 }
 0x4a1   : > { %v10030_v18 = vpop.f32.mrf.mxu1 }
 0x4a2   : > { %11897 = vst [vmem:[#allocation37_spill] sm:$0xff] %v10030_v18  ;;  %v4639_v18 = vld [vmem:[#allocation3 + $0x198] sm:$0xff] }
 0x4a4   : > { %7193 = vmatmul.msk.f32.gmra.mxu1 %vm2943_vm3, %v5171_v29  ;;  %v10052_v29 = vpop.f32.mrf.mxu3 }
 0x4a5   : > { %7114 = vmatmul.msk.f32.gmra.mxu2 %vm2943_vm3, %v9637_v14  ;;  %v10069_v24 = vpop.f32.mrf.mxu0 }
 0x4a6   : > { %7146 = vmatmul.msk.f32.gmra.mxu3 %vm2943_vm3, %v9658_v20  ;;  %v5173_v20 = vld [vmem:[#allocation3 + $0xda] sm:$0xff] }
 0x4a7   : > { %7177 = vmatmul.msk.f32.gmra.mxu0 %vm2943_vm3, %v9867_v44  ;;  %v11900_v44 = vld [vmem:[#allocation17_spill] sm:$0xff] }
 0x4a9   : > { %v10045_v7 = vpop.f32.mrf.mxu1 }
 0x4aa   : > { %11898 = vst [vmem:[#allocation34_spill] sm:$0xff] %v10045_v7  ;;  %v11901_v7 = vld [vmem:[#allocation16_spill] sm:$0xff] }
 0x4ab   : > { %v4026_v32 = vadd.f32 %v11901_v7, %v11900_v44  ;;  %v11903_v44 = vld [vmem:[#allocation21_spill] sm:$0xff] }
 0x4ac   : > { %7194 = vmatmul.msk.f32.gmra.mxu1 %vm2943_vm3, %v5172_v37  ;;  %v4640_v37 = vld [vmem:[#allocation3 + $0x1a0] sm:$0xff] }
 0x4ad   : > { %7115 = vmatmul.msk.f32.gmra.mxu2 %vm2943_vm3, %v10054_v16  ;;  %v4301_v35 = vadd.f32 %v9662_v39, %v4026_v32  ;;  %v5572_v39 = vld [vmem:[%s11483_s5 + $0x8] sm:$0xff]  ;;  %v5174_v32 = vld [vmem:[#allocation3 + $0xe2] sm:$0xff] }
 0x4ae   : > { %7147 = vmatmul.msk.f32.gmra.mxu3 %vm2943_vm3, %v4639_v18  ;;  %v10071_v18 = vpop.f32.mrf.mxu2  ;;  %5591 = vmatpush.msrb.mxu2 %v5572_v39  ;;  %v10098_v39 = vld [vmem:[%s11482_s4] ss:$0 sm:$0xff] }
 0x4af   : > { %7178 = vmatmul.msk.f32.gmra.mxu0 %vm2943_vm3, %v9883_v61  ;;  %v10075_v61 = vpop.f32.mrf.mxu3  ;;  %v4576_v7 = vadd.f32 %v9953_v10, %v4301_v35 }
 0x4b1   : > { %v10061_v14 = vpop.f32.mrf.mxu1  ;;  %v4852_v0 = vadd.f32 %v9956_v13, %v4576_v7  ;;  %v5175_v7 = vld [vmem:[#allocation3 + $0xf2] sm:$0xff] }
 0x4b2   : > { %11899 = vst [vmem:[#allocation45_spill] sm:$0xff] %v10061_v14  ;;  %v11904_v14 = vld [vmem:[#allocation20_spill] sm:$0xff] }
 0x4b3   : > { %v4027_v30 = vadd.f32 %v11904_v14, %v11903_v44  ;;  %v11906_v44 = vld [vmem:[#allocation24_spill] sm:$0xff] }
 0x4b4   : > { %7195 = vmatmul.msk.f32.gmra.mxu1 %vm2943_vm3, %v5173_v20 }
 0x4b5   : > { %7116 = vmatmul.msk.f32.gmra.mxu2 %vm2943_vm3, %v10066_v8  ;;  %v4302_v35 = vadd.f32 %v9677_v55, %v4027_v30 }
 0x4b6   : > { %7148 = vmatmul.msk.f32.gmra.mxu3 %vm2943_vm3, %v4640_v37  ;;  %v4915_v37 = vld [vmem:[#allocation3 + $0x1a1] sm:$0xff] }
 0x4b7   : > { %7179 = vmatmul.msk.f32.gmra.mxu0 %vm2943_vm3, %v4914_v46  ;;  %v5127_v46 = vadd.f32 %v9968_v48, %v4852_v0  ;;  %v4577_v10 = vadd.f32 %v9970_v58, %v4302_v35  ;;  %v10108_v48 = vld [vmem:[%s11487_s9] ss:$0 sm:$0xff] }
 0x4b9   : > { %v10080_v20 = vpop.f32.mrf.mxu1  ;;  %v4853_v55 = vadd.f32 %v9972_v36, %v4577_v10 }
 0x4ba   : > { %11902 = vst [vmem:[#allocation38_spill] sm:$0xff] %v10080_v20  ;;  %v10092_v20 = vpop.f32.mrf.mxu0 }
 0x4bb   : > { %v5128_v35 = vadd.f32 %v9982_v23, %v4853_v55  ;;  %v10125_v23 = vpop.f32.mrf.mxu3 }
 0x4bc   : > { %7196 = vmatmul.msk.f32.gmra.mxu1 %vm2943_vm3, %v5174_v32  ;;  %v11905_v32 = vld [vmem:[#allocation25_spill] sm:$0xff] }
 0x4bd   : > { %v4028_v45 = vadd.f32 %v11906_v44, %v11905_v32  ;;  %v11907_v32 = vld [vmem:[#allocation29_spill] sm:$0xff]  ;;  %v11908_v44 = vld [vmem:[#allocation28_spill] sm:$0xff] }
 0x4bf   : > { %7180 = vmatmul.msk.f32.gmra.mxu0 %vm2943_vm3, %v4915_v37  ;;  %v4303_v30 = vadd.f32 %v9692_v33, %v4028_v45  ;;  %v10113_v37 = vpop.f32.mrf.mxu2  ;;  %v4029_v33 = vadd.f32 %v11908_v44, %v11907_v32  ;;  %v11910_v32 = vld [vmem:[#allocation35_spill] sm:$0xff] }
 0x4c1   : > { %v5306_v14 = vpop.f32.mrf.mxu1 }
 0x4c2   : > { %v5402_v13 = vadd.f32 %v5306_v14, %v5127_v46  ;;  %v4578_v46 = vadd.f32 %v9984_v34, %v4303_v30  ;;  %v4304_v34 = vadd.f32 %v9705_v56, %v4029_v33  ;;  %v10130_v30 = vpop.f32.mrf.mxu0  ;;  %v11909_v56 = vld [vmem:[#allocation33_spill] sm:$0xff] }
 0x4c3   : > { %v4030_v44 = vadd.f32 %v11910_v32, %v11909_v56  ;;  %v11912_v56 = vld [vmem:[#allocation39_spill] sm:$0xff] }
 0x4c4   : > { %v5437_v0 = vadd.f32 %v10098_v39, %v5402_v13  ;;  %7197 = vmatmul.msk.f32.gmra.mxu1 %vm2943_vm3, %v5175_v7  ;;  %v5176_v7 = vld [vmem:[#allocation3 + $0xfa] sm:$0xff]  ;;  %v4854_v45 = vadd.f32 %v9987_v19, %v4578_v46 }
 0x4c6   : > { %v10111_v58 = vmax.f32 %v5437_v0, 0.0 }
 0x4c7   : > { %v10136_v19 = vpop.f32.mrf.mxu2 }
 0x4c8   : > { %v5651_v36 = vmul.f32 %v10108_v48, %v10111_v58 }
 0x4c9   : > { %v5309_v10 = vpop.f32.mrf.mxu1 }
 0x4ca   : > { %v5403_v14 = vadd.f32 %v5309_v10, %v5128_v35  ;;  %v5683_v13 = vsel %vm2943_vm3, %v5651_v36, 0.0  ;;  %v5129_v35 = vadd.f32 %v9997_v38, %v4854_v45  ;;  %v4579_v36 = vadd.f32 %v9999_v28, %v4304_v34 }
 0x4cb   : > { %5684 = vadd.xlane.f32.xlu0 %v5683_v13  ;;  %v4305_v28 = vadd.f32 %v9720_v12, %v4030_v44  ;;  %v5178_v12 = vld [vmem:[#allocation3 + $0x112] sm:$0xff] }
 0x4cc   : > { %v5438_v0 = vadd.f32 %v10098_v39, %v5403_v14  ;;  %7198 = vmatmul.msk.f32.gmra.mxu1 %vm2943_vm3, %v5176_v7  ;;  %v5177_v7 = vld [vmem:[#allocation3 + $0x10a] sm:$0xff]  ;;  %v4855_v33 = vadd.f32 %v10003_v26, %v4579_v36 }
 0x4ce   : > { %v10128_v55 = vmax.f32 %v5438_v0, 0.0  ;;  %v10147_v0 = vpop.f32.mrf.mxu3  ;;  %v5130_v34 = vadd.f32 %v10015_v11, %v4855_v33 }
 0x4d0   : > { %v5652_v10 = vmul.f32 %v10108_v48, %v10128_v55 }
 0x4d1   : > { %v5312_v46 = vpop.f32.mrf.mxu1 }
 0x4d2   : > { %v5404_v14 = vadd.f32 %v5312_v46, %v5129_v35  ;;  %v5686_v13 = vsel %vm2943_vm3, %v5652_v10, 0.0  ;;  %v4580_v35 = vadd.f32 %v10017_v51, %v4305_v28  ;;  %v10153_v46 = vpop.f32.mrf.mxu0 }
 0x4d3   : > { %5687 = vadd.xlane.f32.xlu0 %v5686_v13  ;;  %v10156_v13 = vpop.f32.mrf.mxu2 }
 0x4d4   : > { %v5439_v38 = vadd.f32 %v10098_v39, %v5404_v14  ;;  %7199 = vmatmul.msk.f32.gmra.mxu1 %vm2943_vm3, %v5177_v7  ;;  %v11911_v7 = vld [vmem:[#allocation36_spill] sm:$0xff]  ;;  %v4856_v11 = vadd.f32 %v10020_v57, %v4580_v35 }
 0x4d5   : > { %v4031_v32 = vadd.f32 %v11912_v56, %v11911_v7 }
 0x4d6   : > { %v10145_v45 = vmax.f32 %v5439_v38, 0.0  ;;  %v5131_v38 = vadd.f32 %v10032_v43, %v4856_v11 }
 0x4d7   : > { %v4306_v44 = vadd.f32 %v9735_v63, %v4031_v32  ;;  %v11914_v63 = vld [vmem:[#allocation46_spill] sm:$0xff] }
 0x4d8   : > { %v5653_v10 = vmul.f32 %v10108_v48, %v10145_v45 }
 0x4d9   : > { %v5315_v26 = vpop.f32.mrf.mxu1  ;;  %v4581_v28 = vadd.f32 %v10034_v52, %v4306_v44 }
 0x4da   : > { %v5405_v36 = vadd.f32 %v5315_v26, %v5130_v34  ;;  %v5689_v14 = vsel %vm2943_vm3, %v5653_v10, 0.0  ;;  %v10170_v10 = vpop.f32.mrf.mxu3  ;;  %v10173_v35 = vpop.f32.mrf.mxu0 }
 0x4db   : > { %5690 = vadd.xlane.f32.xlu1 %v5689_v14  ;;  %v4857_v43 = vadd.f32 %v10036_v53, %v4581_v28  ;;  %v10180_v56 = vpop.f32.mrf.mxu2 }
 0x4dc   : > { %v5440_v51 = vadd.f32 %v10098_v39, %v5405_v36  ;;  %7200 = vmatmul.msk.f32.gmra.mxu1 %vm2943_vm3, %v5178_v12  ;;  %v5179_v36 = vld [vmem:[#allocation3 + $0x122] sm:$0xff] }
 0x4dd   : > { %v11915_v12 = vld [vmem:[#allocation47_spill] sm:$0xff] }
 0x4de   : > { %v10164_v33 = vmax.f32 %v5440_v51, 0.0  ;;  %v4032_v7 = vadd.f32 %v11915_v12, %v11914_v63  ;;  %v5132_v51 = vadd.f32 %v10047_v15, %v4857_v43 }
 0x4e0   : > { %11913 = vst [vmem:[#allocation49_spill] sm:$0xff] %v10164_v33  ;;  %v5654_v34 = vmul.f32 %v10108_v48, %v10164_v33  ;;  %v4307_v32 = vadd.f32 %v9750_v22, %v4032_v7 }
 0x4e1   : > { %v5318_v26 = vpop.f32.mrf.mxu1 }
 0x4e2   : > { %v5406_v14 = vadd.f32 %v5318_v26, %v5131_v38  ;;  %v5692_v57 = vsel %vm2943_vm3, %v5654_v34, 0.0  ;;  %v4582_v44 = vadd.f32 %v10049_v4, %v4307_v32  ;;  %v10190_v28 = vpop.f32.mrf.mxu3  ;;  %v10197_v4 = vpop.f32.mrf.mxu0 }
 0x4e3   : > { %5693 = vadd.xlane.f32.xlu1 %v5692_v57  ;;  %v11917_v57 = vld [vmem:[#allocation50_spill] sm:$0xff]  ;;  %v10202_v43 = vpop.f32.mrf.mxu2 }
 0x4e4   : > { %v5441_v52 = vadd.f32 %v10098_v39, %v5406_v14  ;;  %7201 = vmatmul.msk.f32.gmra.mxu1 %vm2943_vm3, %v5179_v36  ;;  %v5180_v14 = vld [vmem:[#allocation3 + $0x12a] sm:$0xff]  ;;  %v11918_v36 = vld [vmem:[#allocation53_spill] sm:$0xff]  ;;  %v4858_v63 = vadd.f32 %v10052_v29, %v4582_v44 }
 0x4e5   : > { %v4033_v22 = vadd.f32 %v11918_v36, %v11917_v57 }
 0x4e6   : > { %v10183_v11 = vmax.f32 %v5441_v52, 0.0  ;;  %v5133_v52 = vadd.f32 %v10069_v24, %v4858_v63 }
 0x4e7   : > { %v4308_v12 = vadd.f32 %v9765_v31, %v4033_v22 }
 0x4e8   : > { %11916 = vst [vmem:[#allocation48_spill] sm:$0xff] %v10183_v11  ;;  %v5655_v38 = vmul.f32 %v10108_v48, %v10183_v11 }
 0x4e9   : > { %v5321_v34 = vpop.f32.mrf.mxu1  ;;  %v4583_v32 = vadd.f32 %v10071_v18, %v4308_v12 }
 0x4ea   : > { %v5407_v26 = vadd.f32 %v5321_v34, %v5132_v51  ;;  %v5695_v53 = vsel %vm2943_vm3, %v5655_v38, 0.0  ;;  %v5181_v34 = vld [vmem:[#allocation3 + $0x13a] sm:$0xff]  ;;  %v10214_v24 = vpop.f32.mrf.mxu3  ;;  %v10219_v22 = vpop.f32.mrf.mxu0 }
 0x4eb   : > { %5696 = vadd.xlane.f32.xlu2 %v5695_v53  ;;  %v11921_v53 = vld [vmem:[#allocation58_spill] sm:$0xff] }
 0x4ec   : > { %v5442_v15 = vadd.f32 %v10098_v39, %v5407_v26  ;;  %7202 = vmatmul.msk.f32.gmra.mxu1 %vm2943_vm3, %v5180_v14  ;;  %v11920_v26 = vld [vmem:[#allocation54_spill] sm:$0xff]  ;;  %v4859_v14 = vadd.f32 %v10075_v61, %v4583_v32  ;;  %v10225_v61 = vpop.f32.mrf.mxu2 }
 0x4ed   : > { %v4034_v31 = vadd.f32 %v11921_v53, %v11920_v26 }
 0x4ee   : > { %v10200_v7 = vmax.f32 %v5442_v15, 0.0  ;;  %v5134_v63 = vadd.f32 %v10092_v20, %v4859_v14 }
 0x4ef   : > { %v4309_v18 = vadd.f32 %v9778_v6, %v4034_v31  ;;  %v11923_v6 = vld [vmem:[#allocation59_spill] sm:$0xff] }
 0x4f0   : > { %11919 = vst [vmem:[#allocation52_spill] sm:$0xff] %v10200_v7  ;;  %v5656_v51 = vmul.f32 %v10108_v48, %v10200_v7 }
 0x4f1   : > { %v5324_v29 = vpop.f32.mrf.mxu1  ;;  %v4584_v15 = vadd.f32 %v10113_v37, %v4309_v18 }
 0x4f2   : > { %v5408_v44 = vadd.f32 %v5324_v29, %v5133_v52  ;;  %v5698_v38 = vsel %vm2943_vm3, %v5656_v51, 0.0  ;;  %v5182_v29 = vld [vmem:[#allocation3 + $0x142] sm:$0xff]  ;;  %v10236_v53 = vpop.f32.mrf.mxu3  ;;  %v10242_v18 = vpop.f32.mrf.mxu0 }
 0x4f3   : > { %5699 = vadd.xlane.f32.xlu2 %v5698_v38 }
 0x4f4   : > { %v5443_v57 = vadd.f32 %v10098_v39, %v5408_v44  ;;  %7203 = vmatmul.msk.f32.gmra.mxu1 %vm2943_vm3, %v5181_v34  ;;  %v11924_v44 = vld [vmem:[#allocation63_spill] sm:$0xff]  ;;  %v4860_v34 = vadd.f32 %v10125_v23, %v4584_v15 }
 0x4f5   : > { %v4035_v38 = vadd.f32 %v11924_v44, %v11923_v6 }
 0x4f6   : > { %v10217_v36 = vmax.f32 %v5443_v57, 0.0  ;;  %v5135_v31 = vadd.f32 %v10130_v30, %v4860_v34 }
 0x4f7   : > { %v4310_v37 = vadd.f32 %v9793_v42, %v4035_v38  ;;  %v5183_v42 = vld [vmem:[#allocation3 + $0x152] sm:$0xff] }
 0x4f8   : > { %11922 = vst [vmem:[#allocation51_spill] sm:$0xff] %v10217_v36  ;;  %v5657_v12 = vmul.f32 %v10108_v48, %v10217_v36 }
 0x4f9   : > { %v5327_v52 = vpop.f32.mrf.mxu1  ;;  %v4585_v14 = vadd.f32 %v10136_v19, %v4310_v37 }
 0x4fa   : > { %v5409_v32 = vadd.f32 %v5327_v52, %v5134_v63  ;;  %v5701_v51 = vsel %vm2943_vm3, %v5657_v12, 0.0  ;;  %v10245_v12 = vpop.f32.mrf.mxu2  ;;  %v11926_v52 = vld [vmem:[#allocation64_spill] sm:$0xff] }
 0x4fb   : > { %5702 = vadd.xlane.f32.xlu0 %v5701_v51  ;;  %v4861_v30 = vadd.f32 %v10147_v0, %v4585_v14  ;;  %v10262_v14 = vpop.f32.mrf.mxu0 }
 0x4fc   : > { %v5444_v20 = vadd.f32 %v10098_v39, %v5409_v32  ;;  %7204 = vmatmul.msk.f32.gmra.mxu1 %vm2943_vm3, %v5182_v29  ;;  %v11927_v32 = vld [vmem:[#allocation68_spill] sm:$0xff] }
 0x4fd   : > { %v4036_v51 = vadd.f32 %v11927_v32, %v11926_v52  ;;  %v5136_v44 = vadd.f32 %v10153_v46, %v4861_v30 }
 0x4fe   : > { %v10234_v26 = vmax.f32 %v5444_v20, 0.0  ;;  %v10259_v20 = vpop.f32.mrf.mxu3 }
 0x4ff   : > { %v4311_v29 = vadd.f32 %v9808_v21, %v4036_v51  ;;  %v11928_v21 = vld [vmem:[#allocation67_spill] sm:$0xff] }
 0x500   : > { %11925 = vst [vmem:[#allocation56_spill] sm:$0xff] %v10234_v26  ;;  %v5658_v57 = vmul.f32 %v10108_v48, %v10234_v26 }
 0x501   : > { %v5330_v23 = vpop.f32.mrf.mxu1  ;;  %v4586_v38 = vadd.f32 %v10156_v13, %v4311_v29 }
 0x502   : > { %v5410_v63 = vadd.f32 %v5330_v23, %v5135_v31  ;;  %v5704_v15 = vsel %vm2943_vm3, %v5658_v57, 0.0  ;;  %v5184_v57 = vld [vmem:[#allocation3 + $0x15a] sm:$0xff]  ;;  %v11929_v23 = vld [vmem:[#allocation75_spill] sm:$0xff] }
 0x503   : > { %5705 = vadd.xlane.f32.xlu1 %v5704_v15  ;;  %v4862_v46 = vadd.f32 %v10170_v10, %v4586_v38  ;;  %v10269_v15 = vpop.f32.mrf.mxu2  ;;  %v5185_v38 = vld [vmem:[#allocation3 + $0x16a] sm:$0xff] }
 0x504   : > { %v5445_v19 = vadd.f32 %v10098_v39, %v5410_v63  ;;  %7205 = vmatmul.msk.f32.gmra.mxu1 %vm2943_vm3, %v5183_v42  ;;  %v4037_v63 = vadd.f32 %v11929_v23, %v11928_v21 }
 0x505   : > { %v5137_v32 = vadd.f32 %v10173_v35, %v4862_v46 }
 0x506   : > { %v10253_v6 = vmax.f32 %v5445_v19, 0.0  ;;  %v4312_v42 = vadd.f32 %v9823_v27, %v4037_v63 }
 0x508   : > { %v5659_v34 = vmul.f32 %v10108_v48, %v10253_v6  ;;  %v4587_v51 = vadd.f32 %v10180_v56, %v4312_v42  ;;  %v10286_v56 = vpop.f32.mrf.mxu0 }
 0x509   : > { %v5333_v37 = vpop.f32.mrf.mxu1 }
 0x50a   : > { %v5411_v31 = vadd.f32 %v5333_v37, %v5136_v44  ;;  %v5707_v0 = vsel %vm2943_vm3, %v5659_v34, 0.0  ;;  %v10279_v44 = vpop.f32.mrf.mxu3  ;;  %v11930_v34 = vld [vmem:[#allocation72_spill] sm:$0xff]  ;;  %v11931_v37 = vld [vmem:[#allocation79_spill] sm:$0xff] }
 0x50b   : > { %5708 = vadd.xlane.f32.xlu2 %v5707_v0  ;;  %v4038_v27 = vadd.f32 %v11931_v37, %v11930_v34  ;;  %v10291_v21 = vpop.f32.mrf.mxu2 }
 0x50c   : > { %v5446_v13 = vadd.f32 %v10098_v39, %v5411_v31  ;;  %7206 = vmatmul.msk.f32.gmra.mxu1 %vm2943_vm3, %v5184_v57  ;;  %v4863_v31 = vadd.f32 %v10190_v28, %v4587_v51  ;;  %v11932_v51 = vld [vmem:[#allocation77_spill] sm:$0xff] }
 0x50d   : > { %v4313_v0 = vadd.f32 %v9838_v17, %v4038_v27  ;;  %v4039_v17 = vadd.f32 %v9648_v59, %v11932_v51 }
 0x50e   : > { %v10272_v52 = vmax.f32 %v5446_v13, 0.0  ;;  %v5138_v23 = vadd.f32 %v10197_v4, %v4863_v31 }
 0x50f   : > { %v4588_v63 = vadd.f32 %v10202_v43, %v4313_v0  ;;  %v4314_v43 = vadd.f32 %v9850_v62, %v4039_v17 }
 0x510   : > { %v5660_v30 = vmul.f32 %v10108_v48, %v10272_v52 }
 0x511   : > { %v5336_v19 = vpop.f32.mrf.mxu1  ;;  %v4589_v34 = vadd.f32 %v10225_v61, %v4314_v43 }
 0x512   : > { %v5412_v29 = vadd.f32 %v5336_v19, %v5137_v32  ;;  %v5710_v10 = vsel %vm2943_vm3, %v5660_v30, 0.0  ;;  %v5186_v32 = vld [vmem:[#allocation3 + $0x172] sm:$0xff]  ;;  %v4864_v30 = vadd.f32 %v10214_v24, %v4588_v63  ;;  %v4804_v4 = vpop.f32.mrf.mxu3 }
 0x513   : > { %5711 = vadd.xlane.f32.xlu0 %v5710_v10  ;;  %v10306_v10 = vpop.f32.mrf.mxu0  ;;  %v4531_v37 = vpop.f32.mrf.mxu2  ;;  %v4865_v0 = vadd.f32 %v10236_v53, %v4589_v34 }
 0x514   : > { %v5447_v35 = vadd.f32 %v10098_v39, %v5412_v29  ;;  %7207 = vmatmul.msk.f32.gmra.mxu1 %vm2943_vm3, %v5185_v38  ;;  %v5139_v38 = vadd.f32 %v10219_v22, %v4864_v30 }
 0x516   : > { %v10289_v57 = vmax.f32 %v5447_v35, 0.0  ;;  %v11933_v35 = vld [vmem:[#allocation80_spill] sm:$0xff] }
 0x517   : > { %v4040_v62 = vadd.f32 %v9669_v50, %v11933_v35 }
 0x518   : > { %v5661_v46 = vmul.f32 %v10108_v48, %v10289_v57 }
 0x519   : > { %v5339_v28 = vpop.f32.mrf.mxu1  ;;  %v4315_v22 = vadd.f32 %v9864_v60, %v4040_v62 }
 0x51a   : > { %v5413_v13 = vadd.f32 %v5339_v28, %v5138_v23  ;;  %v5713_v42 = vsel %vm2943_vm3, %v5661_v46, 0.0  ;;  %v4807_v63 = vpop.f32.mrf.mxu3  ;;  %v5140_v46 = vadd.f32 %v10242_v18, %v4865_v0 }
 0x51b   : > { %5714 = vadd.xlane.f32.xlu1 %v5713_v42  ;;  %v4590_v28 = vadd.f32 %v10245_v12, %v4315_v22  ;;  %v5082_v50 = vpop.f32.mrf.mxu0  ;;  %v4534_v51 = vpop.f32.mrf.mxu2 }
 0x51c   : > { %v5448_v19 = vadd.f32 %v10098_v39, %v5413_v13  ;;  %7208 = vmatmul.msk.f32.gmra.mxu1 %vm2943_vm3, %v5186_v32 }
 0x51d   : > { %v4866_v17 = vadd.f32 %v10259_v20, %v4590_v28  ;;  %v4043_v28 = vadd.f32 %v9723_v41, %v9680_v5  ;;  %v5571_v41 = vld [vmem:[%s11483_s5] sm:$0xff] }
 0x51e   : > { %v10304_v29 = vmax.f32 %v5448_v19, 0.0  ;;  %5592 = vmatpush.msrb.mxu2 %v5571_v41 }
 0x51f   : > { %v5141_v19 = vadd.f32 %v10262_v14, %v4866_v17 }
 0x520   : > { %v5662_v59 = vmul.f32 %v10108_v48, %v10304_v29 }
 0x521   : > { %v5342_v24 = vpop.f32.mrf.mxu1 }
 0x522   : > { %v5414_v27 = vadd.f32 %v5342_v24, %v5139_v38  ;;  %v5716_v31 = vsel %vm2943_vm3, %v5662_v59, 0.0  ;;  %v4810_v34 = vpop.f32.mrf.mxu3  ;;  %v5189_v59 = vld [vmem:[#allocation3 + $0x19a] sm:$0xff] }
 0x523   : > { %5717 = vadd.xlane.f32.xlu2 %v5716_v31 }
 0x524   : > { %v5449_v23 = vadd.f32 %v10098_v39, %v5414_v27  ;;  %7209 = vmatmul.msk.f32.gmra.mxu1 %vm2943_vm3, %v10054_v16  ;;  %v11934_v16 = vld [vmem:[#allocation81_spill] sm:$0xff]  ;;  %v5085_v27 = vpop.f32.mrf.mxu0 }
 0x525   : > { %v4041_v60 = vadd.f32 %v9688_v40, %v11934_v16 }
 0x526   : > { %v10320_v61 = vmax.f32 %v5449_v23, 0.0 }
 0x527   : > { %v4316_v18 = vadd.f32 %v9880_v49, %v4041_v60 }
 0x528   : > { %v5663_v13 = vmul.f32 %v10108_v48, %v10320_v61 }
 0x529   : > { %v5345_v42 = vpop.f32.mrf.mxu1  ;;  %v4591_v43 = vadd.f32 %v10269_v15, %v4316_v18  ;;  %v4537_v15 = vpop.f32.mrf.mxu2 }
 0x52a   : > { %v5415_v53 = vadd.f32 %v5345_v42, %v5140_v46  ;;  %v5719_v32 = vsel %vm2943_vm3, %v5663_v13, 0.0  ;;  %v4813_v46 = vpop.f32.mrf.mxu3 }
 0x52b   : > { %5720 = vadd.xlane.f32.xlu0 %v5719_v32  ;;  %v4867_v49 = vadd.f32 %v10279_v44, %v4591_v43 }
 0x52c   : > { %v5450_v30 = vadd.f32 %v10098_v39, %v5415_v53  ;;  %7210 = vmatmul.msk.f32.gmra.mxu1 %vm2943_vm3, %v10066_v8  ;;  %v4042_v8 = vadd.f32 %v9707_v1, %v9665_v47  ;;  %v5190_v47 = vld [vmem:[#allocation3 + $0x1a2] sm:$0xff] }
 0x52d   : > { %v5142_v62 = vadd.f32 %v10286_v56, %v4867_v49  ;;  %v5088_v56 = vpop.f32.mrf.mxu0 }
 0x52e   : > { %v10334_v12 = vmax.f32 %v5450_v30, 0.0  ;;  %v4317_v31 = vadd.f32 %v9896_v9, %v4042_v8 }
 0x530   : > { %v5664_v38 = vmul.f32 %v10108_v48, %v10334_v12  ;;  %v4592_v0 = vadd.f32 %v10291_v21, %v4317_v31  ;;  %v4318_v21 = vadd.f32 %v9906_v54, %v4043_v28  ;;  %v4044_v54 = vadd.f32 %v9742_v2, %v9695_v3  ;;  %v5598_v2 = vld [vmem:[%s11485_s7] sm:$0x1] }
 0x531   : > { %v5348_v40 = vpop.f32.mrf.mxu1  ;;  %v4540_v53 = vpop.f32.mrf.mxu2  ;;  %7214 = vmatpush.msk.msrb.mxu3 %vm5604_vm6, %v5598_v2  ;;  %v11943_v2 = vld [vmem:[#allocation18_spill] sm:$0xff] }
 0x532   : > { %v5416_v20 = vadd.f32 %v5348_v40, %v5141_v19  ;;  %v5722_v24 = vsel %vm2943_vm3, %v5664_v38, 0.0  ;;  %v4868_v9 = vadd.f32 %v4804_v4, %v4592_v0  ;;  %v4593_v16 = vadd.f32 %v4531_v37, %v4318_v21  ;;  %v11939_v21 = vld [vmem:[#allocation88_spill] sm:$0xff] }
 0x533   : > { %5723 = vadd.xlane.f32.xlu1 %v5722_v24  ;;  %v4319_v37 = vadd.f32 %v9914_v25, %v4044_v54  ;;  %v11935_v25 = vld [vmem:[#allocation82_spill] sm:$0xff] }
 0x534   : > { %v5451_v14 = vadd.f32 %v10098_v39, %v5416_v20  ;;  %7211 = vmatmul.msk.f32.gmra.mxu1 %vm2943_vm3, %v5189_v59  ;;  %v5143_v32 = vadd.f32 %v10306_v10, %v4868_v9  ;;  %v4869_v4 = vadd.f32 %v4807_v63, %v4593_v16  ;;  %v4816_v10 = vpop.f32.mrf.mxu3  ;;  %v11936_v63 = vld [vmem:[#allocation86_spill] sm:$0xff] }
 0x535   : > { %v5091_v43 = vpop.f32.mrf.mxu0  ;;  %v4594_v40 = vadd.f32 %v4534_v51, %v4319_v37  ;;  %v4045_v49 = vadd.f32 %v11936_v63, %v11935_v25  ;;  %v11937_v51 = vld [vmem:[#allocation43_spill] sm:$0xff] }
 0x536   : > { %v10347_v35 = vmax.f32 %v5451_v14, 0.0  ;;  %v5144_v38 = vadd.f32 %v5082_v50, %v4869_v4 }
 0x537   : > { %v4870_v14 = vadd.f32 %v4810_v34, %v4594_v40  ;;  %v4320_v31 = vadd.f32 %v11937_v51, %v4045_v49  ;;  %v11938_v34 = vld [vmem:[#allocation83_spill] sm:$0xff]  ;;  %v11941_v40 = vld [vmem:[#allocation84_spill] sm:$0xff] }
 0x538   : > { %v5665_v23 = vmul.f32 %v10108_v48, %v10347_v35 }
 0x539   : > { %v5351_v22 = vpop.f32.mrf.mxu1  ;;  %v4543_v20 = vpop.f32.mrf.mxu2 }
 0x53a   : > { %v5417_v1 = vadd.f32 %v5351_v22, %v5142_v62  ;;  %v5725_v44 = vsel %vm2943_vm3, %v5665_v23, 0.0  ;;  %v5145_v23 = vadd.f32 %v5085_v27, %v4870_v14  ;;  %v4595_v22 = vadd.f32 %v4537_v15, %v4320_v31 }
 0x53b   : > { %5726 = vadd.xlane.f32.xlu2 %v5725_v44 }
 0x53c   : > { %v5452_v13 = vadd.f32 %v10098_v39, %v5417_v1  ;;  %7212 = vmatmul.msk.f32.gmra.mxu1 %vm2943_vm3, %v5190_v47  ;;  %v4819_v0 = vpop.f32.mrf.mxu3  ;;  %v4871_v16 = vadd.f32 %v4813_v46, %v4595_v22  ;;  %v11942_v46 = vld [vmem:[#allocation57_spill] sm:$0xff] }
 0x53d   : > { %v5094_v1 = vpop.f32.mrf.mxu0 }
 0x53e   : > { %v10359_v42 = vmax.f32 %v5452_v13, 0.0  ;;  %v5146_v15 = vadd.f32 %v5088_v56, %v4871_v16 }
 0x540   : > { %v5666_v60 = vmul.f32 %v10108_v48, %v10359_v42 }
 0x541   : > { %v5354_v17 = vpop.f32.mrf.mxu1  ;;  %v4546_v13 = vpop.f32.mrf.mxu2 }
 0x542   : > { %v5418_v30 = vadd.f32 %v5354_v17, %v5143_v32  ;;  %v5728_v5 = vsel %vm2943_vm3, %v5666_v60, 0.0  ;;  %v4046_v32 = vadd.f32 %v11939_v21, %v11938_v34  ;;  %v11940_v17 = vld [vmem:[#allocation12_spill] sm:$0xff] }
 0x543   : > { %5729 = vadd.xlane.f32.xlu0 %v5728_v5 }
 0x544   : > { %v5453_v18 = vadd.f32 %v10098_v39, %v5418_v30  ;;  %v4321_v30 = vadd.f32 %v11940_v17, %v4046_v32  ;;  %v4822_v54 = vpop.f32.mrf.mxu3 }
 0x546   : > { %v10372_v19 = vmax.f32 %v5453_v18, 0.0  ;;  %v4596_v5 = vadd.f32 %v4540_v53, %v4321_v30 }
 0x548   : > { %v5667_v59 = vmul.f32 %v10108_v48, %v10372_v19 }
 0x549   : > { %v5357_v24 = vpop.f32.mrf.mxu1 }
 0x54a   : > { %v5419_v8 = vadd.f32 %v5357_v24, %v5144_v38  ;;  %v5731_v3 = vsel %vm2943_vm3, %v5667_v59, 0.0  ;;  %v5097_v38 = vpop.f32.mrf.mxu0  ;;  %v4047_v59 = vadd.f32 %v11942_v46, %v11941_v40  ;;  %v4872_v24 = vadd.f32 %v4816_v10, %v4596_v5  ;;  %v11946_v10 = vld [vmem:[#allocation40_spill] sm:$0xff] }
 0x54b   : > { %5732 = vadd.xlane.f32.xlu1 %v5731_v3  ;;  %v4549_v3 = vpop.f32.mrf.mxu2 }
 0x54c   : > { %v5454_v50 = vadd.f32 %v10098_v39, %v5419_v8  ;;  %v4322_v56 = vadd.f32 %v11943_v2, %v4047_v59  ;;  %v5147_v25 = vadd.f32 %v5091_v43, %v4872_v24  ;;  %v4825_v31 = vpop.f32.mrf.mxu3 }
 0x54e   : > { %v10384_v62 = vmax.f32 %v5454_v50, 0.0  ;;  %v4597_v63 = vadd.f32 %v4543_v20, %v4322_v56 }
 0x550   : > { %v5668_v47 = vmul.f32 %v10108_v48, %v10384_v62 }
 0x551   : > { %v5360_v44 = vpop.f32.mrf.mxu1 }
 0x552   : > { %v5420_v28 = vadd.f32 %v5360_v44, %v5145_v23  ;;  %v5734_v9 = vsel %vm2943_vm3, %v5668_v47, 0.0  ;;  %v11945_v23 = vld [vmem:[#allocation85_spill] sm:$0xff]  ;;  %v4873_v47 = vadd.f32 %v4819_v0, %v4597_v63  ;;  %v11950_v0 = vld [vmem:[#allocation62_spill] sm:$0xff]  ;;  %v11954_v63 = vld [vmem:[#allocation44_spill] sm:$0xff] }
 0x553   : > { %5735 = vadd.xlane.f32.xlu2 %v5734_v9  ;;  %v4048_v22 = vadd.f32 %v11946_v10, %v11945_v23  ;;  %v11947_v9 = vld [vmem:[#allocation22_spill] sm:$0xff]  ;;  %v4552_v20 = vpop.f32.mrf.mxu2 }
 0x554   : > { %v5455_v60 = vadd.f32 %v10098_v39, %v5420_v28  ;;  %v5100_v28 = vpop.f32.mrf.mxu0  ;;  %v5148_v21 = vadd.f32 %v5094_v1, %v4873_v47 }
 0x555   : > { %v4323_v34 = vadd.f32 %v11947_v9, %v4048_v22 }
 0x556   : > { %v10393_v27 = vmax.f32 %v5455_v60, 0.0 }
 0x557   : > { %v4598_v32 = vadd.f32 %v4546_v13, %v4323_v34 }
 0x558   : > { %v5669_v41 = vmul.f32 %v10108_v48, %v10393_v27 }
 0x559   : > { %v5363_v4 = vpop.f32.mrf.mxu1 }
 0x55a   : > { %v5421_v18 = vadd.f32 %v5363_v4, %v5146_v15  ;;  %v5737_v37 = vsel %vm2943_vm3, %v5669_v41, 0.0  ;;  %v11949_v15 = vld [vmem:[#allocation87_spill] sm:$0xff]  ;;  %v4874_v41 = vadd.f32 %v4822_v54, %v4598_v32  ;;  %v11953_v54 = vld [vmem:[#allocation89_spill] sm:$0xff] }
 0x55b   : > { %5738 = vadd.xlane.f32.xlu0 %v5737_v37  ;;  %v4049_v5 = vadd.f32 %v11950_v0, %v11949_v15  ;;  %v11951_v37 = vld [vmem:[#allocation23_spill] sm:$0xff] }
 0x55c   : > { %v5456_v8 = vadd.f32 %v10098_v39, %v5421_v18  ;;  %v4828_v18 = vpop.f32.mrf.mxu3  ;;  %v5103_v1 = vpop.f32.mrf.mxu0  ;;  %v5149_v13 = vadd.f32 %v5097_v38, %v4874_v41  ;;  %v11959_v15 = vld [vmem:[#allocation27_spill] sm:$0xff] }
 0x55d   : > { %v4324_v40 = vadd.f32 %v11951_v37, %v4049_v5 }
 0x55e   : > { %v10402_v53 = vmax.f32 %v5456_v8, 0.0  ;;  %v4555_v8 = vpop.f32.mrf.mxu2 }
 0x55f   : > { %v4599_v59 = vadd.f32 %v4549_v3, %v4324_v40  ;;  %v5502_v40 = vsel %vm2943_vm3, %v10128_v55, 0.0 }
 0x560   : > { %11944 = vst [vmem:[#allocation55_spill] sm:$0xff] %v10402_v53  ;;  %v5670_v49 = vmul.f32 %v10108_v48, %v10402_v53 }
 0x561   : > { %v5366_v14 = vpop.f32.mrf.mxu1 }
 0x562   : > { %v5422_v50 = vadd.f32 %v5366_v14, %v5147_v25  ;;  %v5740_v51 = vsel %vm2943_vm3, %v5670_v49, 0.0  ;;  %v4050_v49 = vadd.f32 %v11954_v63, %v11953_v54  ;;  %v4875_v14 = vadd.f32 %v4825_v31, %v4599_v59  ;;  %v11957_v31 = vld [vmem:[#allocation90_spill] sm:$0xff] }
 0x563   : > { %5741 = vadd.xlane.f32.xlu1 %v5740_v51  ;;  %v11955_v51 = vld [vmem:[#allocation26_spill] sm:$0xff] }
 0x564   : > { %v5457_v44 = vadd.f32 %v10098_v39, %v5422_v50  ;;  %v4325_v23 = vadd.f32 %v11955_v51, %v4050_v49  ;;  %v4831_v38 = vpop.f32.mrf.mxu3  ;;  %v5150_v3 = vadd.f32 %v5100_v28, %v4875_v14  ;;  %v11963_v14 = vld [vmem:[#allocation30_spill] sm:$0xff]  ;;  %v5506_v51 = vsel %vm2943_vm3, %v10164_v33, 0.0 }
 0x566   : > { %v10411_v43 = vmax.f32 %v5457_v44, 0.0  ;;  %v4600_v22 = vadd.f32 %v4552_v20, %v4325_v23  ;;  %v5106_v44 = vpop.f32.mrf.mxu0  ;;  %v4558_v32 = vpop.f32.mrf.mxu2 }
 0x568   : > { %11948 = vst [vmem:[#allocation61_spill] sm:$0xff] %v10411_v43  ;;  %v5671_v16 = vmul.f32 %v10108_v48, %v10411_v43 }
 0x569   : > { %v5369_v60 = vpop.f32.mrf.mxu1 }
 0x56a   : > { %v5423_v17 = vadd.f32 %v5369_v60, %v5148_v21  ;;  %v5743_v30 = vsel %vm2943_vm3, %v5671_v16, 0.0  ;;  %v11958_v16 = vld [vmem:[#allocation11_spill] sm:$0xff] }
 0x56b   : > { %5744 = vadd.xlane.f32.xlu2 %v5743_v30  ;;  %v4051_v60 = vadd.f32 %v11958_v16, %v11957_v31  ;;  %v5510_v31 = vsel %vm2943_vm3, %v10200_v7, 0.0 }
 0x56c   : > { %v5458_v4 = vadd.f32 %v10098_v39, %v5423_v17  ;;  %v4876_v17 = vadd.f32 %v4828_v18, %v4600_v22  ;;  %v11961_v18 = vld [vmem:[#allocation41_spill] sm:$0xff]  ;;  %v5508_v22 = vsel %vm2943_vm3, %v10183_v11, 0.0 }
 0x56d   : > { %v4326_v0 = vadd.f32 %v11959_v15, %v4051_v60  ;;  %v11965_v15 = vld [vmem:[#allocation8_spill] sm:$0xff] }
 0x56e   : > { %v10420_v46 = vmax.f32 %v5458_v4, 0.0  ;;  %v5151_v20 = vadd.f32 %v5103_v1, %v4876_v17  ;;  %v4834_v4 = vpop.f32.mrf.mxu3  ;;  %v5501_v1 = vsel %vm2943_vm3, %v10111_v58, 0.0  ;;  %v4561_v49 = vpop.f32.mrf.mxu2 }
 0x56f   : > { %v4601_v5 = vadd.f32 %v4555_v8, %v4326_v0  ;;  %v5504_v8 = vsel %vm2943_vm3, %v10145_v45, 0.0  ;;  %v5503_v63 = vadd.f32 %v5502_v40, %v5501_v1  ;;  %v11966_v0 = vld [vmem:[#allocation32_spill] sm:$0xff]  ;;  %v11967_v40 = vld [vmem:[#allocation31_spill] sm:$0xff]  ;;  %v5516_v1 = vsel %vm2943_vm3, %v10253_v6, 0.0 }
 0x570   : > { %11952 = vst [vmem:[#allocation60_spill] sm:$0xff] %v10420_v46  ;;  %v5672_v24 = vmul.f32 %v10108_v48, %v10420_v46 }
 0x571   : > { %v5372_v2 = vpop.f32.mrf.mxu1 }
 0x572   : > { %v5424_v56 = vadd.f32 %v5372_v2, %v5149_v13  ;;  %v5746_v25 = vsel %vm2943_vm3, %v5672_v24, 0.0  ;;  %v11962_v24 = vld [vmem:[#allocation71_spill] sm:$0xff] }
 0x573   : > { %5747 = vadd.xlane.f32.xlu0 %v5746_v25  ;;  %v4052_v2 = vadd.f32 %v11962_v24, %v11961_v18  ;;  %v4877_v25 = vadd.f32 %v4831_v38, %v4601_v5 }
 0x574   : > { %v5459_v50 = vadd.f32 %v10098_v39, %v5424_v56  ;;  %v5109_v56 = vpop.f32.mrf.mxu0 }
 0x576   : > { %v10429_v10 = vmax.f32 %v5459_v50, 0.0  ;;  %v4327_v50 = vadd.f32 %v11963_v14, %v4052_v2  ;;  %v4564_v2 = vpop.f32.mrf.mxu2  ;;  %v5518_v14 = vsel %vm2943_vm3, %v10272_v52, 0.0 }
 0x578   : > { %11956 = vst [vmem:[#allocation66_spill] sm:$0xff] %v10429_v10  ;;  %v5673_v47 = vmul.f32 %v10108_v48, %v10429_v10 }
 0x579   : > { %v5375_v9 = vpop.f32.mrf.mxu1 }
 0x57a   : > { %v5425_v34 = vadd.f32 %v5375_v9, %v5150_v3  ;;  %v5749_v21 = vsel %vm2943_vm3, %v5673_v47, 0.0  ;;  %v5505_v3 = vadd.f32 %v5504_v8, %v5503_v63  ;;  %v5152_v47 = vadd.f32 %v5106_v44, %v4877_v25 }
 0x57b   : > { %5750 = vadd.xlane.f32.xlu1 %v5749_v21  ;;  %v4602_v9 = vadd.f32 %v4558_v32, %v4327_v50  ;;  %v5512_v44 = vsel %vm2943_vm3, %v10217_v36, 0.0 }
 0x57c   : > { %v5460_v30 = vadd.f32 %v10098_v39, %v5425_v34  ;;  %v5507_v34 = vadd.f32 %v5506_v51, %v5505_v3 }
 0x57d   : > { %v4878_v32 = vadd.f32 %v4834_v4, %v4602_v9 }
 0x57e   : > { %v10438_v28 = vmax.f32 %v5460_v30, 0.0  ;;  %v5509_v17 = vadd.f32 %v5508_v22, %v5507_v34  ;;  %v4837_v30 = vpop.f32.mrf.mxu3  ;;  %v11969_v22 = vld [vmem:[#allocation42_spill] sm:$0xff] }
 0x57f   : > { %v5153_v8 = vadd.f32 %v5109_v56, %v4878_v32  ;;  %v5520_v56 = vsel %vm2943_vm3, %v10289_v57, 0.0  ;;  %v5524_v32 = vsel %vm2943_vm3, %v10320_v61, 0.0 }
 0x580   : > { %11960 = vst [vmem:[#allocation65_spill] sm:$0xff] %v10438_v28  ;;  %v5674_v41 = vmul.f32 %v10108_v48, %v10438_v28 }
 0x581   : > { %v5378_v37 = vpop.f32.mrf.mxu1 }
 0x582   : > { %v5426_v13 = vadd.f32 %v5378_v37, %v5151_v20  ;;  %v5752_v59 = vsel %vm2943_vm3, %v5674_v41, 0.0  ;;  %v4053_v20 = vadd.f32 %v11966_v0, %v11965_v15  ;;  %v5511_v41 = vadd.f32 %v5510_v31, %v5509_v17  ;;  %v5112_v37 = vpop.f32.mrf.mxu0  ;;  %v11971_v31 = vld [vmem:[#allocation37_spill] sm:$0xff] }
 0x583   : > { %5753 = vadd.xlane.f32.xlu2 %v5752_v59  ;;  %v5514_v59 = vsel %vm2943_vm3, %v10234_v26, 0.0 }
 0x584   : > { %v5461_v54 = vadd.f32 %v10098_v39, %v5426_v13  ;;  %v4328_v13 = vadd.f32 %v11967_v40, %v4053_v20  ;;  %v5513_v24 = vadd.f32 %v5512_v44, %v5511_v41  ;;  %v4567_v41 = vpop.f32.mrf.mxu2 }
 0x586   : > { %v10455_v23 = vmax.f32 %v5461_v54, 0.0  ;;  %v4603_v25 = vadd.f32 %v4561_v49, %v4328_v13  ;;  %v5515_v54 = vadd.f32 %v5514_v59, %v5513_v24  ;;  %v5526_v13 = vsel %vm2943_vm3, %v10334_v12, 0.0 }
 0x588   : > { %11964 = vst [vmem:[#allocation70_spill] sm:$0xff] %v10455_v23  ;;  %v5675_v38 = vmul.f32 %v10108_v48, %v10455_v23  ;;  %v5517_v3 = vadd.f32 %v5516_v1, %v5515_v54  ;;  %v4879_v49 = vadd.f32 %v4837_v30, %v4603_v25 }
 0x589   : > { %v5381_v21 = vpop.f32.mrf.mxu1 }
 0x58a   : > { %v5427_v16 = vadd.f32 %v5381_v21, %v5152_v47  ;;  %v5755_v60 = vsel %vm2943_vm3, %v5675_v38, 0.0  ;;  %v11970_v47 = vld [vmem:[#allocation10_spill] sm:$0xff]  ;;  %v5519_v34 = vadd.f32 %v5518_v14, %v5517_v3  ;;  %v4840_v21 = vpop.f32.mrf.mxu3  ;;  %v5115_v0 = vpop.f32.mrf.mxu0  ;;  %v5154_v20 = vadd.f32 %v5112_v37, %v4879_v49  ;;  %v11974_v37 = vld [vmem:[#allocation76_spill] sm:$0xff] }
 0x58b   : > { %5756 = vadd.xlane.f32.xlu0 %v5755_v60  ;;  %v4054_v9 = vadd.f32 %v11970_v47, %v11969_v22  ;;  %v5522_v60 = vsel %vm2943_vm3, %v10304_v29, 0.0  ;;  %v11975_v14 = vld [vmem:[#allocation34_spill] sm:$0xff]  ;;  %v5532_v49 = vsel %vm2943_vm3, %v10372_v19, 0.0 }
 0x58c   : > { %v5462_v5 = vadd.f32 %v10098_v39, %v5427_v16  ;;  %v5521_v15 = vadd.f32 %v5520_v56, %v5519_v34 }
 0x58d   : > { %v4329_v16 = vadd.f32 %v11971_v31, %v4054_v9 }
 0x58e   : > { %v10472_v18 = vmax.f32 %v5462_v5, 0.0  ;;  %v5523_v5 = vadd.f32 %v5522_v60, %v5521_v15 }
 0x58f   : > { %v4604_v44 = vadd.f32 %v4564_v2, %v4329_v16  ;;  %v5534_v16 = vsel %vm2943_vm3, %v10384_v62, 0.0 }
 0x590   : > { %11968 = vst [vmem:[#allocation69_spill] sm:$0xff] %v10472_v18  ;;  %v5676_v4 = vmul.f32 %v10108_v48, %v10472_v18  ;;  %v5525_v1 = vadd.f32 %v5524_v32, %v5523_v5  ;;  %v11978_v32 = vld [vmem:[#allocation14_spill] sm:$0xff] }
 0x591   : > { %v5384_v63 = vpop.f32.mrf.mxu1  ;;  %v4880_v25 = vadd.f32 %v4840_v21, %v4604_v44 }
 0x592   : > { %v5428_v50 = vadd.f32 %v5384_v63, %v5153_v8  ;;  %v5758_v51 = vsel %vm2943_vm3, %v5676_v4, 0.0  ;;  %v11973_v8 = vld [vmem:[#allocation13_spill] sm:$0xff]  ;;  %v5528_v4 = vsel %vm2943_vm3, %v10347_v35, 0.0  ;;  %v5527_v63 = vadd.f32 %v5526_v13, %v5525_v1  ;;  %v4843_v22 = vpop.f32.mrf.mxu3  ;;  %v5118_v34 = vpop.f32.mrf.mxu0 }
 0x593   : > { %5759 = vadd.xlane.f32.xlu1 %v5758_v51  ;;  %v4055_v2 = vadd.f32 %v11974_v37, %v11973_v8  ;;  %v5530_v51 = vsel %vm2943_vm3, %v10359_v42, 0.0  ;;  %v5155_v9 = vadd.f32 %v5115_v0, %v4880_v25  ;;  %v11977_v0 = vld [vmem:[#allocation9_spill] sm:$0xff]  ;;  %v5538_v1 = vsel %vm2943_vm3, %v10402_v53, 0.0 }
 0x594   : > { %v5463_v38 = vadd.f32 %v10098_v39, %v5428_v50  ;;  %v5529_v47 = vadd.f32 %v5528_v4, %v5527_v63 }
 0x595   : > { %v4330_v50 = vadd.f32 %v11975_v14, %v4055_v2 }
 0x596   : > { %v10489_v17 = vmax.f32 %v5463_v38, 0.0  ;;  %v5531_v21 = vadd.f32 %v5530_v51, %v5529_v47  ;;  %v5542_v51 = vsel %vm2943_vm3, %v10420_v46, 0.0 }
 0x597   : > { %v4605_v56 = vadd.f32 %v4567_v41, %v4330_v50  ;;  %v5536_v41 = vsel %vm2943_vm3, %v10393_v27, 0.0 }
 0x598   : > { %11972 = vst [vmem:[#allocation74_spill] sm:$0xff] %v10489_v17  ;;  %v5677_v30 = vmul.f32 %v10108_v48, %v10489_v17  ;;  %v5533_v44 = vadd.f32 %v5532_v49, %v5531_v21  ;;  %v11981_v49 = vld [vmem:[#allocation15_spill] sm:$0xff] }
 0x599   : > { %v5387_v40 = vpop.f32.mrf.mxu1  ;;  %v4881_v5 = vadd.f32 %v4843_v22, %v4605_v56 }
 0x59a   : > { %v5429_v59 = vadd.f32 %v5387_v40, %v5154_v20  ;;  %v5761_v24 = vsel %vm2943_vm3, %v5677_v30, 0.0  ;;  %v4570_v20 = vpop.f32.mrf.mxu2  ;;  %v4056_v30 = vadd.f32 %v11978_v32, %v11977_v0  ;;  %v5535_v13 = vadd.f32 %v5534_v16, %v5533_v44  ;;  %v4846_v37 = vpop.f32.mrf.mxu3 }
 0x59b   : > { %5762 = vadd.xlane.f32.xlu2 %v5761_v24  ;;  %v5156_v25 = vadd.f32 %v5118_v34, %v4881_v5  ;;  %v5546_v0 = vsel %vm2943_vm3, %v10438_v28, 0.0 }
 0x59c   : > { %v5464_v54 = vadd.f32 %v10098_v39, %v5429_v59  ;;  %v11979_v59 = vld [vmem:[#allocation45_spill] sm:$0xff]  ;;  %v5537_v2 = vadd.f32 %v5536_v41, %v5535_v13 }
 0x59d   : > { %v4331_v24 = vadd.f32 %v11979_v59, %v4056_v30 }
 0x59e   : > { %v10506_v3 = vmax.f32 %v5464_v54, 0.0  ;;  %v5540_v54 = vsel %vm2943_vm3, %v10411_v43, 0.0  ;;  %v5539_v14 = vadd.f32 %v5538_v1, %v5537_v2  ;;  %v5550_v1 = vsel %vm2943_vm3, %v10472_v18, 0.0 }
 0x59f   : > { %v4606_v4 = vadd.f32 %v4570_v20, %v4331_v24  ;;  %v11983_v20 = vld [vmem:[#allocation38_spill] sm:$0xff] }
 0x5a0   : > { %11976 = vst [vmem:[#allocation73_spill] sm:$0xff] %v10506_v3  ;;  %v5678_v38 = vmul.f32 %v10108_v48, %v10506_v3  ;;  %v5541_v56 = vadd.f32 %v5540_v54, %v5539_v14  ;;  %v5552_v54 = vsel %vm2943_vm3, %v10489_v17, 0.0 }
 0x5a1   : > { %v5390_v31 = vpop.f32.mrf.mxu1  ;;  %v4882_v21 = vadd.f32 %v4846_v37, %v4606_v4 }
 0x5a2   : > { %v5430_v60 = vadd.f32 %v5390_v31, %v5155_v9  ;;  %v5764_v15 = vsel %vm2943_vm3, %v5678_v38, 0.0  ;;  %v5121_v9 = vpop.f32.mrf.mxu0  ;;  %v11982_v38 = vld [vmem:[#allocation19_spill] sm:$0xff]  ;;  %v5544_v31 = vsel %vm2943_vm3, %v10429_v10, 0.0  ;;  %v4849_v59 = vpop.f32.mrf.mxu3 }
 0x5a3   : > { %5765 = vadd.xlane.f32.xlu0 %v5764_v15  ;;  %v4057_v34 = vadd.f32 %v11982_v38, %v11981_v49  ;;  %v5543_v15 = vadd.f32 %v5542_v51, %v5541_v56  ;;  %v5157_v5 = vadd.f32 %v5121_v9, %v4882_v21  ;;  %v5554_v51 = vsel %vm2943_vm3, %v10506_v3, 0.0  ;;  %v7437_v49 = vld [vmem:[%s11487_s9] ss:$0 sm:$0xff] }
 0x5a4   : > { %v5465_v40 = vadd.f32 %v10098_v39, %v5430_v60  ;;  %v4573_v60 = vpop.f32.mrf.mxu2 }
 0x5a5   : > { %v4332_v44 = vadd.f32 %v11983_v20, %v4057_v34  ;;  %v5545_v30 = vadd.f32 %v5544_v31, %v5543_v15 }
 0x5a6   : > { %v10523_v8 = vmax.f32 %v5465_v40, 0.0  ;;  %v5548_v40 = vsel %vm2943_vm3, %v10455_v23, 0.0 }
 0x5a7   : > { %v4607_v41 = vadd.f32 %v4573_v60, %v4332_v44 }
 0x5a8   : > { %11980 = vst [vmem:[#allocation78_spill] sm:$0xff] %v10523_v8  ;;  %v5679_v63 = vmul.f32 %v10108_v48, %v10523_v8  ;;  %v5556_v56 = vsel %vm2943_vm3, %v10523_v8, 0.0 }
 0x5a9   : > { %v5393_v50 = vpop.f32.mrf.mxu1  ;;  %v4883_v4 = vadd.f32 %v4849_v59, %v4607_v41 }
 0x5aa   : > { %v5431_v22 = vadd.f32 %v5393_v50, %v5156_v25  ;;  %v5767_v47 = vsel %vm2943_vm3, %v5679_v63, 0.0  ;;  %v7436_v63 = vld [vmem:[%s11482_s4] ss:$0 sm:$0xff]  ;;  %v5124_v14 = vpop.f32.mrf.mxu0 }
 0x5ab   : > { %5768 = vadd.xlane.f32.xlu1 %v5767_v47  ;;  %v5158_v9 = vadd.f32 %v5124_v14, %v4883_v4 }
 0x5ac   : > { %v5466_v16 = vadd.f32 %v10098_v39, %v5431_v22  ;;  %v5547_v39 = vadd.f32 %v5546_v0, %v5545_v30 }
 0x5ae   : > { %v10540_v32 = vmax.f32 %v5466_v16, 0.0  ;;  %v5549_v25 = vadd.f32 %v5548_v40, %v5547_v39 }
 0x5b0   : > { %11984 = vst [vmem:[#allocation17_spill] sm:$0xff] %v10540_v32  ;;  %v5680_v13 = vmul.f32 %v10108_v48, %v10540_v32  ;;  %v5551_v50 = vadd.f32 %v5550_v1, %v5549_v25  ;;  %v5558_v31 = vsel %vm2943_vm3, %v10540_v32, 0.0 }
 0x5b1   : > { %v5396_v24 = vpop.f32.mrf.mxu1 }
 0x5b2   : > { %v5432_v37 = vadd.f32 %v5396_v24, %v5157_v5  ;;  %v5770_v2 = vsel %vm2943_vm3, %v5680_v13, 0.0  ;;  %v5553_v47 = vadd.f32 %v5552_v54, %v5551_v50  ;;  %v5573_v54 = vld [vmem:[#allocation4] sm:$0x1]  ;;  %v5685_v50 = vpop.xlane.xlu0 %5684 }
 0x5b3   : > { %5771 = vadd.xlane.f32.xlu2 %v5770_v2 }
 0x5b4   : > { %v5467_v48 = vadd.f32 %v7436_v63, %v5432_v37  ;;  %v5555_v34 = vadd.f32 %v5554_v51, %v5553_v47  ;;  %v7217_v51 = vmul.f32 -1.442695, %v5685_v50 }
 0x5b6   : > { %v10556_v22 = vmax.f32 %v5467_v48, 0.0  ;;  %v5557_v15 = vadd.f32 %v5556_v56, %v5555_v34  ;;  %v5697_v56 = vpop.xlane.xlu2 %5696  ;;  %7303 = vpow2.f32 %v7217_v51 }
 0x5b8   : > { %11985 = vst [vmem:[#allocation16_spill] sm:$0xff] %v10556_v22  ;;  %v5681_v38 = vmul.f32 %v7437_v49, %v10556_v22  ;;  %v5560_v20 = vsel %vm2943_vm3, %v10556_v22, 0.0  ;;  %v5559_v0 = vadd.f32 %v5558_v31, %v5557_v15 }
 0x5b9   : > { %v5399_v21 = vpop.f32.mrf.mxu1 }
 0x5ba   : > { %v5433_v16 = vadd.f32 %v5399_v21, %v5158_v9  ;;  %v5773_v60 = vsel %vm2943_vm3, %v5681_v38, 0.0  ;;  %v5561_v5 = vadd.f32 %v5560_v20, %v5559_v0  ;;  %v5688_v47 = vpop.xlane.xlu0 %5687  ;;  %v5691_v9 = vpop.xlane.xlu1 %5690 }
 0x5bb   : > { %5774 = vadd.xlane.f32.xlu0 %v5773_v60  ;;  %v7219_v38 = vmul.f32 -1.442695, %v5691_v9 }
 0x5bc   : > { %v5468_v44 = vadd.f32 %v7436_v63, %v5433_v16  ;;  %v7304_v34 = vpop.eup %7303 }
 0x5bd   : > { %v10576_v16 = vadd.f32 1.0, %v7304_v34 }
 0x5be   : > { %v10569_v30 = vmax.f32 %v5468_v44, 0.0  ;;  %v5700_v31 = vpop.xlane.xlu2 %5699 }
 0x5bf   : > { %vm5912_vm9 = vweird.f32 %v10576_v16 }
 0x5c0   : > { %11986 = vst [vmem:[#allocation21_spill] sm:$0xff] %v10569_v30  ;;  %v5562_v41 = vsel %vm2943_vm3, %v10569_v30, 0.0  ;;  %v5682_v40 = vmul.f32 %v7437_v49, %v10569_v30  ;;  %v7218_v49 = vmul.f32 -1.442695, %v5688_v47 }
 0x5c1   : > { %v5563_v13 = vadd.f32 %v5562_v41, %v5561_v5 }
 0x5c2   : > { %v5776_v59 = vsel %vm2943_vm3, %v5682_v40, 0.0  ;;  %7305 = vpow2.f32 %v7218_v49  ;;  %v5694_v21 = vpop.xlane.xlu1 %5693  ;;  %v10578_v60 = vpop.xlane.xlu0 %5702 }
 0x5c3   : > { %v5564_v39 = vrot.slane %v5563_v13, 4  ;;  %5777 = vadd.xlane.f32.xlu1 %v5776_v59  ;;  %7307 = vpow2.f32 %v7219_v38  ;;  %v7220_v20 = vmul.f32 -1.442695, %v5694_v21  ;;  %v7221_v59 = vmul.f32 -1.442695, %v5697_v56 }
 0x5c4   : > { %7309 = vrcp.f32 %v10576_v16 }
 0x5c5   : > { %v5565_v24 = vadd.f32 %v5564_v39, %v5563_v13  ;;  %7311 = vpow2.f32 %v7220_v20 }
 0x5c6   : > { %v5709_v41 = vpop.xlane.xlu2 %5708 }
 0x5c7   : > { %v5566_v1 = vrot.slane %v5565_v24, 2 }
 0x5c8   : > { %v7306_v15 = vpop.eup %7305 }
 0x5c9   : > { %v5567_v37 = vadd.f32 %v5566_v1, %v5565_v24  ;;  %v10581_v44 = vadd.f32 1.0, %v7306_v15  ;;  %v7308_v0 = vpop.eup %7307  ;;  %v7225_v24 = vmul.f32 -1.442695, %v5709_v41 }
 0x5ca   : > { %v10583_v5 = vpop.xlane.xlu1 %5705  ;;  %v10586_v40 = vadd.f32 1.0, %v7308_v0  ;;  %v5712_v13 = vpop.xlane.xlu0 %5711 }
 0x5cb   : > { %v5568_v2 = vrot.slane %v5567_v37, 1  ;;  %7313 = vrcp.f32 %v10581_v44  ;;  %v10588_v39 = vpop.eup %7309  ;;  %v7226_v1 = vmul.f32 -1.442695, %v5712_v13  ;;  %vm5927_vm13 = vweird.f32 %v10581_v44 }
 0x5cc   : > { %7315 = vrcp.f32 %v10586_v40  ;;  %vm5913_vm8 = vweird.f32 %v10588_v39  ;;  %vm5942_vm1 = vweird.f32 %v10586_v40 }
 0x5cd   : > { %v5569_v25 = vadd.f32 %v5568_v2, %v5567_v37  ;;  %v7312_v37 = vpop.eup %7311  ;;  %v5908_v2 = vmul.f32 %v10588_v39, %v10576_v16  ;;  %7317 = vpow2.f32 %v7221_v59  ;;  %vm10624_vm10 = vmor %vm5912_vm9, %vm5913_vm8 }
 0x5ce   : > { %7319 = vpow2.f32 %v7225_v24  ;;  %v5718_v21 = vpop.xlane.xlu2 %5717 }
 0x5cf   : > { %v5570_v4 = vmul.f32 0.00390625, %v5569_v25  ;;  %7321 = vpow2.f32 %v7226_v1  ;;  %v7228_v13 = vmul.f32 -1.442695, %v5718_v21 }
 0x5d1   : > { %7213 = vmatmul.msk.f32.vlgmr.msrb.gmra.mxu2 %vm2943_vm3, %v5570_v4  ;;  %v10593_v25 = vpop.eup %7313 }
 0x5d2   : > { %v5715_v4 = vpop.xlane.xlu1 %5714  ;;  %v10599_v50 = vpop.eup %7315  ;;  %vm5928_vm11 = vweird.f32 %v10593_v25 }
 0x5d3   : > { %v7318_v51 = vpop.eup %7317  ;;  %v5938_v38 = vmul.f32 %v10599_v50, %v10586_v40  ;;  %v5721_v20 = vpop.xlane.xlu0 %5720  ;;  %vm10641_vm14 = vmor %vm5927_vm13, %vm5928_vm11  ;;  %vm5943_vm15 = vweird.f32 %v10599_v50 }
 0x5d4   : > { %v7320_v47 = vpop.eup %7319  ;;  %v10605_v34 = vadd.f32 1.0, %v7318_v51  ;;  %v7222_v51 = vmul.f32 -1.442695, %v5700_v31  ;;  %vm10669_vm3 = vmor %vm5942_vm1, %vm5943_vm15 }
 0x5d5   : > { %v7322_v9 = vpop.eup %7321  ;;  %v10607_v15 = vadd.f32 1.0, %v7320_v47  ;;  %v5939_v1 = vsub.f32 1.0, %v5938_v38 }
 0x5d6   : > { %v10609_v0 = vadd.f32 1.0, %v7322_v9  ;;  %v5933_v9 = vand.u32 2147483648, %v10581_v44 }
 0x5d7   : > { %v5940_v38 = vmul.f32 %v10599_v50, %v5939_v1 }
 0x5d8   : > { %vm6047_vm13 = vweird.f32 %v10609_v0 }
 0x5db   : > { %v5730_v30 = vpop.xlane.xlu0 %5729 }
 0x5dc   : > { %v7232_v8 = vmul.f32 -1.442695, %v5730_v30 }
 0x654   : > { %v5594_v63 = vpop.f32.mrf.mxu2 }
 0x655   : > { %v5595_v48 = vadd.f32 %v5594_v63, %v5573_v54  ;;  %v10595_v54 = vadd.f32 1.0, %v7312_v37  ;;  %v5923_v63 = vmul.f32 %v10593_v25, %v10581_v44  ;;  %v7229_v37 = vmul.f32 -1.442695, %v5721_v20 }
 0x656   : > { %v5931_v20 = vand.u32 2147483647, %v10581_v44  ;;  %v5948_v44 = vand.u32 2147483648, %v10586_v40 }
 0x657   : > { %v5597_v14 = vmax.f32 %v5595_v48, 0.0  ;;  %v7227_v48 = vmul.f32 -1.442695, %v5715_v4  ;;  %7323 = vrcp.f32 %v10595_v54  ;;  %v5924_v56 = vsub.f32 1.0, %v5923_v63 }
 0x658   : > { %v5918_v4 = vand.u32 2147483648, %v10576_v16  ;;  %vm5932_vm0 = vcmp.eq.f32.partialorder %v5931_v20, 8.507059e+37  ;;  %v5961_v20 = vand.u32 2147483647, %v10595_v54  ;;  %vm5957_vm4 = vweird.f32 %v10595_v54 }
 0x659   : > { %7215 = vmatmul.msk.f32.vlgmr.msrb.gmra.mxu3 %vm5600_vm7, %v5597_v14  ;;  %v5909_v14 = vsub.f32 1.0, %v5908_v2  ;;  %7325 = vpow2.f32 %v7227_v48  ;;  %v5925_v24 = vmul.f32 %v10593_v25, %v5924_v56  ;;  %v5724_v2 = vpop.xlane.xlu1 %5723  ;;  %v5916_v48 = vand.u32 2147483647, %v10576_v16 }
 0x65a   : > { %7327 = vrcp.f32 %v10605_v34  ;;  %v5919_v31 = vor.u32 1.1754944e-38, %v5918_v4  ;;  %v7230_v21 = vmul.f32 -1.442695, %v5724_v2  ;;  %v5934_v2 = vor.u32 1.1754944e-38, %v5933_v9 }
 0x65b   : > { %v5910_v49 = vmul.f32 %v10588_v39, %v5909_v14  ;;  %7329 = vrcp.f32 %v10607_v15  ;;  %vm5917_vm12 = vcmp.eq.f32.partialorder %v5916_v48, 8.507059e+37  ;;  %v5727_v48 = vpop.xlane.xlu2 %5726  ;;  %vm10699_vm6 = vcmp.eq.f32.partialorder %v5961_v20, 8.507059e+37 }
 0x65c   : > { %7331 = vrcp.f32 %v10609_v0  ;;  %v7231_v32 = vmul.f32 -1.442695, %v5727_v48  ;;  %v6051_v48 = vand.u32 2147483647, %v10609_v0 }
 0x65d   : > { %v10611_v41 = vpop.eup %7323  ;;  %v5911_v59 = vadd.f32 %v10588_v39, %v5910_v49  ;;  %7333 = vpow2.f32 %v7228_v13  ;;  %v5926_v49 = vadd.f32 %v10593_v25, %v5925_v24  ;;  %v5946_v24 = vand.u32 2147483647, %v10586_v40 }
 0x65e   : > { %v5953_v14 = vmul.f32 %v10611_v41, %v10595_v54  ;;  %7335 = vpow2.f32 %v7229_v37  ;;  %vm5958_vm5 = vweird.f32 %v10611_v41  ;;  %vm10783_vm15 = vcmp.eq.f32.partialorder %v6051_v48, 8.507059e+37 }
 0x65f   : > { %v7326_v63 = vpop.eup %7325  ;;  %v5915_v56 = vsel %vm10624_vm10, %v10588_v39, %v5911_v59  ;;  %7337 = vpow2.f32 %v7222_v51  ;;  %v5930_v1 = vsel %vm10641_vm14, %v10593_v25, %v5926_v49  ;;  %v5941_v51 = vadd.f32 %v10599_v50, %v5940_v38  ;;  %vm10708_vm7 = vmor %vm5957_vm4, %vm5958_vm5 }
 0x660   : > { %v10634_v16 = vadd.f32 1.0, %v7326_v63  ;;  %v10639_v13 = vpop.eup %7327  ;;  %v5954_v47 = vsub.f32 1.0, %v5953_v14  ;;  %v5920_v39 = vsel %vm5917_vm12, %v5919_v31, %v5915_v56  ;;  %v7223_v63 = vmul.f32 -1.442695, %v10578_v60 }
 0x661   : > { %11989 = vst [vmem:[#allocation20_spill] sm:$0xff] %v10639_v13  ;;  %v10646_v37 = vpop.eup %7329  ;;  %v5733_v14 = vpop.xlane.xlu1 %5732  ;;  %v10659_v31 = vmul.f32 %v5920_v39, %v10111_v58  ;;  %v5935_v9 = vsel %vm5932_vm0, %v5934_v2, %v5930_v1  ;;  %vm10662_vm2 = vcmp.eq.f32.partialorder %v5946_v24, 8.507059e+37  ;;  %v5949_v39 = vor.u32 1.1754944e-38, %v5948_v44 }
 0x662   : > { %v10652_v4 = vpop.eup %7331  ;;  %7339 = vrcp.f32 %v10634_v16  ;;  %v5955_v49 = vmul.f32 %v10611_v41, %v5954_v47  ;;  %v6028_v38 = vmul.f32 %v10646_v37, %v10607_v15  ;;  %v7233_v59 = vmul.f32 -1.442695, %v5733_v14 }
 0x663   : > { %v7334_v56 = vpop.eup %7333  ;;  %7341 = vpow2.f32 %v7230_v21  ;;  %v6043_v40 = vmul.f32 %v10652_v4, %v10609_v0  ;;  %v5945_v47 = vsel %vm10669_vm3, %v10599_v50, %v5941_v51  ;;  %v5968_v2 = vmul.f32 %v10639_v13, %v10605_v34  ;;  %v5736_v3 = vpop.xlane.xlu2 %5735 }
 0x664   : > { %v7336_v25 = vpop.eup %7335  ;;  %7343 = vpow2.f32 %v7223_v63  ;;  %v10676_v24 = vadd.f32 1.0, %v7334_v56  ;;  %v10686_v44 = vmul.f32 %v5935_v9, %v10128_v55  ;;  %v5963_v63 = vand.u32 2147483648, %v10595_v54 }
 0x665   : > { %v7338_v1 = vpop.eup %7337  ;;  %v10683_v14 = vadd.f32 1.0, %v7336_v25  ;;  %v5956_v56 = vadd.f32 %v10611_v41, %v5955_v49  ;;  %v6029_v25 = vsub.f32 1.0, %v6028_v38  ;;  %7345 = vpow2.f32 %v7233_v59 }
 0x666   : > { %v10694_v51 = vadd.f32 1.0, %v7338_v1  ;;  %v5950_v9 = vsel %vm10662_vm2, %v5949_v39, %v5945_v47  ;;  %v6044_v21 = vsub.f32 1.0, %v6043_v40  ;;  %7347 = vrcp.f32 %v10676_v24 }
 0x667   : > { %v5969_v49 = vsub.f32 1.0, %v5968_v2  ;;  %7349 = vrcp.f32 %v10683_v14  ;;  %v5964_v38 = vor.u32 1.1754944e-38, %v5963_v63  ;;  %v10715_v39 = vmul.f32 %v5950_v9, %v10145_v45 }
 0x668   : > { %v10689_v22 = vpop.eup %7339  ;;  %11996 = vst [vmem:[#allocation25_spill] sm:$0xff] %v10694_v51  ;;  %7351 = vpow2.f32 %v7231_v32  ;;  %v5960_v20 = vsel %vm10708_vm7, %v10611_v41, %v5956_v56  ;;  %v7234_v1 = vmul.f32 -1.442695, %v5736_v3  ;;  %v6030_v40 = vmul.f32 %v10646_v37, %v6029_v25 }
 0x669   : > { %v7342_v50 = vpop.eup %7341  ;;  %v6058_v17 = vmul.f32 %v10689_v22, %v10634_v16  ;;  %12001 = vst [vmem:[#allocation24_spill] sm:$0xff] %v10715_v39  ;;  %7353 = vrcp.f32 %v10694_v51  ;;  %v7224_v47 = vmul.f32 -1.442695, %v10583_v5  ;;  %v6045_v32 = vmul.f32 %v10652_v4, %v6044_v21  ;;  %v5742_v10 = vpop.xlane.xlu1 %5741 }
 0x66a   : > { %v7344_v59 = vpop.eup %7343  ;;  %v10712_v30 = vadd.f32 1.0, %v7342_v50  ;;  %7355 = vpow2.f32 %v7232_v8  ;;  %v10730_v41 = vsel %vm10699_vm6, %v5964_v38, %v5960_v20  ;;  %v10733_v3 = vmul.f32 %v10639_v13, %v5969_v49  ;;  %v5739_v8 = vpop.xlane.xlu0 %5738 }
 0x66b   : > { %v7346_v63 = vpop.eup %7345  ;;  %v10726_v50 = vadd.f32 1.0, %v7344_v59  ;;  %v6059_v9 = vsub.f32 1.0, %v6058_v17  ;;  %12003 = vst [vmem:[#allocation28_spill] sm:$0xff] %v10730_v41  ;;  %vm6033_vm8 = vweird.f32 %v10646_v37  ;;  %v6036_v5 = vand.u32 2147483647, %v10607_v15 }
 0x66c   : > { %v10735_v56 = vpop.eup %7347  ;;  %7357 = vrcp.f32 %v10712_v30  ;;  %v6038_v25 = vand.u32 2147483648, %v10607_v15  ;;  %v6031_v17 = vadd.f32 %v10646_v37, %v6030_v40  ;;  %v6053_v49 = vand.u32 2147483648, %v10609_v0  ;;  %v5599_v40 = vld [vmem:[%s11486_s8] sm:$0x1] }
 0x66d   : > { %12002 = vst [vmem:[#allocation29_spill] sm:$0xff] %v10726_v50  ;;  %v10741_v21 = vpop.eup %7349  ;;  %7359 = vpow2.f32 %v7234_v1  ;;  %v10746_v38 = vadd.f32 1.0, %v7346_v63  ;;  %v6046_v59 = vadd.f32 %v10652_v4, %v6045_v32  ;;  %vm6048_vm9 = vweird.f32 %v10652_v4 }
 0x66e   : > { %v7352_v60 = vpop.eup %7351  ;;  %7361 = vpow2.f32 %v7224_v47  ;;  %v6073_v2 = vmul.f32 %v10735_v56, %v10676_v24  ;;  %v7235_v1 = vmul.f32 -1.442695, %v5739_v8  ;;  %vm6032_vm10 = vweird.f32 %v10607_v15  ;;  %vm10779_vm14 = vmor %vm6047_vm13, %vm6048_vm9 }
 0x66f   : > { %v10750_v20 = vpop.eup %7353  ;;  %v6060_v47 = vmul.f32 %v10689_v22, %v6059_v9  ;;  %v6088_v32 = vmul.f32 %v10741_v21, %v10683_v14  ;;  %vm10763_vm11 = vmor %vm6032_vm10, %vm6033_vm8  ;;  %vm10767_vm12 = vcmp.eq.f32.partialorder %v6036_v5, 8.507059e+37  ;;  %v6039_v18 = vor.u32 1.1754944e-38, %v6038_v25 }
 0x670   : > { %12004 = vst [vmem:[#allocation33_spill] sm:$0xff] %v10750_v20  ;;  %v7356_v63 = vpop.eup %7355  ;;  %v10772_v15 = vadd.f32 1.0, %v7352_v60  ;;  %v6035_v23 = vsel %vm10763_vm11, %v10646_v37, %v6031_v17  ;;  %v6054_v25 = vor.u32 1.1754944e-38, %v6053_v49  ;;  %7363 = vrcp.f32 %v10746_v38 }
 0x671   : > { %v6050_v37 = vsel %vm10779_vm14, %v10652_v4, %v6046_v59  ;;  %vm6063_vm0 = vweird.f32 %v10689_v22  ;;  %v6074_v17 = vsub.f32 1.0, %v6073_v2  ;;  %v10794_v60 = vadd.f32 1.0, %v7356_v63 }
 0x672   : > { %v10787_v28 = vpop.eup %7357  ;;  %7365 = vpow2.f32 %v7235_v1  ;;  %v6061_v48 = vadd.f32 %v10689_v22, %v6060_v47  ;;  %v6089_v49 = vsub.f32 1.0, %v6088_v32  ;;  %v6068_v26 = vand.u32 2147483648, %v10634_v16 }
 0x673   : > { %v7360_v54 = vpop.eup %7359  ;;  %v6103_v4 = vmul.f32 %v10787_v28, %v10712_v30  ;;  %7367 = vrcp.f32 %v10772_v15  ;;  %vm6062_vm1 = vweird.f32 %v10634_v16  ;;  %v6066_v2 = vand.u32 2147483647, %v10634_v16 }
 0x674   : > { %v10797_v36 = vpop.eup %7361  ;;  %v10809_v59 = vmul.f32 %v10750_v20, %v10694_v51  ;;  %v10811_v1 = vadd.f32 1.0, %v7360_v54  ;;  %vm10817_vm2 = vmor %vm6062_vm1, %vm6063_vm0  ;;  %v7236_v47 = vmul.f32 -1.442695, %v5742_v10  ;;  %v6075_v63 = vmul.f32 %v10735_v56, %v6074_v17 }
 0x675   : > { %12013 = vst [vmem:[#allocation35_spill] sm:$0xff] %v10797_v36  ;;  %v6065_v16 = vsel %vm10817_vm2, %v10689_v22, %v6061_v48  ;;  %v6069_v8 = vor.u32 1.1754944e-38, %v6068_v26  ;;  %vm6067_vm3 = vcmp.eq.f32.partialorder %v6066_v2, 8.507059e+37  ;;  %v6081_v10 = vand.u32 2147483647, %v10676_v24 }
 0x676   : > { %12014 = vst [vmem:[#allocation36_spill] sm:$0xff] %v10809_v59  ;;  %v10826_v32 = vpop.eup %7363  ;;  %vm6077_vm4 = vweird.f32 %v10676_v24  ;;  %v6076_v48 = vadd.f32 %v10735_v56, %v6075_v63  ;;  %vm6078_vm5 = vweird.f32 %v10735_v56  ;;  %vm6093_vm6 = vweird.f32 %v10741_v21 }
 0x677   : > { %v6148_v17 = vmul.f32 %v10826_v32, %v10746_v38  ;;  %vm10855_vm7 = vcmp.eq.f32.partialorder %v6081_v10, 8.507059e+37  ;;  %vm10871_vm8 = vmor %vm6077_vm4, %vm6078_vm5  ;;  %vm6092_vm9 = vweird.f32 %v10683_v14  ;;  %v6128_v43 = vand.u32 2147483648, %v10772_v15 }
 0x678   : > { %v7366_v5 = vpop.eup %7365  ;;  %vm10883_vm10 = vmor %vm6092_vm9, %vm6093_vm6  ;;  %vm6107_vm13 = vweird.f32 %v10712_v30  ;;  %vm6137_vm1 = vweird.f32 %v10794_v60  ;;  %vm6152_vm2 = vweird.f32 %v10746_v38 }
 0x679   : > { %v10840_v54 = vpop.eup %7367 }
 0x67a   : > { %vm6123_vm0 = vweird.f32 %v10840_v54 }
 0x6dc   : > { %v5625_v9 = vpop.f32.mrf.mxu3 }
 0x6dd   : > { %v5626_v0 = vadd.f32 %v5625_v9, %v5599_v40  ;;  %v6040_v40 = vsel %vm10767_vm12, %v6039_v18, %v6035_v23  ;;  %v6055_v23 = vsel %vm10783_vm15, %v6054_v25, %v6050_v37  ;;  %v6090_v9 = vmul.f32 %v10741_v21, %v6089_v49 }
 0x6de   : > { %v6104_v25 = vsub.f32 1.0, %v6103_v4  ;;  %v10837_v22 = vmul.f32 %v6055_v23, %v10272_v52  ;;  %v6070_v37 = vsel %vm6067_vm3, %v6069_v8, %v6065_v16  ;;  %v6096_v4 = vand.u32 2147483647, %v10683_v14 }
 0x6df   : > { %v7216_v7 = vmul.f32 -1.442695, %v5626_v0  ;;  %v6083_v0 = vand.u32 2147483648, %v10676_v24  ;;  %v6091_v26 = vadd.f32 %v10741_v21, %v6090_v9  ;;  %v6118_v8 = vmul.f32 %v10840_v54, %v10772_v15  ;;  %v5745_v9 = vpop.xlane.xlu2 %5744 }
 0x6e0   : > { %v6105_v16 = vmul.f32 %v10787_v28, %v6104_v25  ;;  %v6098_v25 = vand.u32 2147483648, %v10683_v14  ;;  %v6113_v24 = vand.u32 2147483648, %v10712_v30  ;;  %vm10896_vm11 = vcmp.eq.f32.partialorder %v6096_v4, 8.507059e+37 }
 0x6e1   : > { %7369 = vpow2.f32 %v7216_v7  ;;  %v10830_v7 = vmul.f32 %v6040_v40, %v10253_v6  ;;  %v10846_v40 = vadd.f32 1.0, %v7366_v5  ;;  %v10865_v5 = vmul.f32 %v6070_v37, %v10289_v57 }
 0x6e2   : > { %7371 = vrcp.f32 %v10794_v60  ;;  %v6080_v37 = vsel %vm10871_vm8, %v10735_v56, %v6076_v48  ;;  %v7237_v10 = vmul.f32 -1.442695, %v5745_v9  ;;  %v10901_v11 = vadd.f32 %v10787_v28, %v6105_v16 }
 0x6e3   : > { %7373 = vrcp.f32 %v10726_v50  ;;  %vm6108_vm12 = vweird.f32 %v10787_v28  ;;  %v6119_v51 = vsub.f32 1.0, %v6118_v8  ;;  %v6111_v4 = vand.u32 2147483647, %v10712_v30 }
 0x6e4   : > { %7375 = vrcp.f32 %v10811_v1  ;;  %v10914_v16 = vor.u32 1.1754944e-38, %v6113_v24  ;;  %vm10922_vm14 = vmor %vm6107_vm13, %vm6108_vm12  ;;  %v6126_v8 = vand.u32 2147483647, %v10772_v15  ;;  %vm6122_vm15 = vweird.f32 %v10772_v15  ;;  %v5748_v24 = vpop.xlane.xlu0 %5747 }
 0x6e5   : > { %7377 = vpow2.f32 %v7236_v47  ;;  %v6084_v47 = vor.u32 1.1754944e-38, %v6083_v0  ;;  %v6149_v0 = vsub.f32 1.0, %v6148_v17  ;;  %v6095_v17 = vsel %vm10883_vm10, %v10741_v21, %v6091_v26  ;;  %vm10982_vm13 = vmor %vm6122_vm15, %vm6123_vm0 }
 0x6e6   : > { %vm6153_vm3 = vweird.f32 %v10826_v32  ;;  %v6158_v30 = vand.u32 2147483648, %v10746_v38  ;;  %v7238_v56 = vmul.f32 -1.442695, %v5748_v24  ;;  %vm10957_vm6 = vcmp.eq.f32.partialorder %v6111_v4, 8.507059e+37 }
 0x6e7   : > { %v7370_v49 = vpop.eup %7369  ;;  %v10907_v20 = vsel %vm10855_vm7, %v6084_v47, %v6080_v37  ;;  %v6150_v26 = vmul.f32 %v10826_v32, %v6149_v0  ;;  %v10933_v0 = vor.u32 1.1754944e-38, %v6128_v43  ;;  %vm10953_vm5 = vmor %vm6152_vm2, %vm6153_vm3  ;;  %vm10961_vm7 = vcmp.eq.f32.partialorder %v6126_v8, 8.507059e+37 }
 0x6e8   : > { %v10851_v2 = vpop.eup %7371  ;;  %v10853_v23 = vadd.f32 1.0, %v7370_v49  ;;  %v6099_v49 = vor.u32 1.1754944e-38, %v6098_v25  ;;  %v6159_v39 = vor.u32 1.1754944e-38, %v6158_v30  ;;  %vm6167_vm15 = vweird.f32 %v10811_v1 }
 0x6e9   : > { %v10860_v63 = vpop.eup %7373  ;;  %v6133_v14 = vmul.f32 %v10851_v2, %v10794_v60  ;;  %vm6138_vm8 = vweird.f32 %v10851_v2  ;;  %v6173_v15 = vand.u32 2147483648, %v10811_v1 }
 0x6ea   : > { %12019 = vst [vmem:[#allocation39_spill] sm:$0xff] %v10860_v63  ;;  %7379 = vrcp.f32 %v10853_v23  ;;  %v10888_v46 = vpop.eup %7375  ;;  %v10920_v18 = vsel %vm10896_vm11, %v6099_v49, %v6095_v17  ;;  %v6120_v17 = vmul.f32 %v10840_v54, %v6119_v51  ;;  %v6151_v49 = vadd.f32 %v10826_v32, %v6150_v26  ;;  %vm10995_vm3 = vmor %vm6137_vm1, %vm6138_vm8 }
 0x6eb   : > { %7381 = vrcp.f32 %v10846_v40  ;;  %v7378_v48 = vpop.eup %7377  ;;  %v6163_v21 = vmul.f32 %v10888_v46, %v10811_v1  ;;  %v6134_v9 = vsub.f32 1.0, %v6133_v14  ;;  %v5643_v53 = vand.u32 2147483648, %v10853_v23 }
 0x6ec   : > { %v10916_v63 = vadd.f32 1.0, %v7378_v48  ;;  %7383 = vpow2.f32 %v7237_v10  ;;  %v6143_v48 = vand.u32 2147483648, %v10794_v60  ;;  %v5641_v41 = vand.u32 2147483647, %v10853_v23 }
 0x6ed   : > { %v6164_v10 = vsub.f32 1.0, %v6163_v21  ;;  %v6135_v51 = vmul.f32 %v10851_v2, %v6134_v9  ;;  %v6156_v21 = vand.u32 2147483647, %v10746_v38  ;;  %v6155_v38 = vsel %vm10953_vm5, %v10826_v32, %v6151_v49 }
 0x6ee   : > { %7385 = vrcp.f32 %v10916_v63  ;;  %v6144_v24 = vor.u32 1.1754944e-38, %v6143_v48  ;;  %v6121_v59 = vadd.f32 %v10840_v54, %v6120_v17  ;;  %vm5637_vm9 = vweird.f32 %v10853_v23 }
 0x6ef   : > { %v6136_v8 = vadd.f32 %v10851_v2, %v6135_v51  ;;  %7387 = vpow2.f32 %v7238_v56  ;;  %v5644_v48 = vor.u32 1.1754944e-38, %v5643_v53  ;;  %vm6157_vm11 = vcmp.eq.f32.partialorder %v6156_v21, 8.507059e+37 }
 0x6f0   : > { %v7380_v25 = vpop.eup %7379  ;;  %vm5642_vm12 = vcmp.eq.f32.partialorder %v5641_v41, 8.507059e+37  ;;  %v6160_v17 = vsel %vm6157_vm11, %v6159_v39, %v6155_v38  ;;  %vm6168_vm2 = vweird.f32 %v10888_v46  ;;  %v6171_v56 = vand.u32 2147483647, %v10811_v1 }
 0x6f1   : > { %v10935_v37 = vpop.eup %7381  ;;  %v5633_v14 = vmul.f32 %v7380_v25, %v10853_v23  ;;  %vm5638_vm4 = vweird.f32 %v7380_v25  ;;  %vm11018_vm0 = vmor %vm6167_vm15, %vm6168_vm2  ;;  %v12040_v1 = vsel %vm10922_vm14, %v10787_v28, %v10901_v11  ;;  %v6186_v11 = vand.u32 2147483647, %v10846_v40 }
 0x6f2   : > { %v6178_v50 = vmul.f32 %v10935_v37, %v10846_v40  ;;  %v7384_v36 = vpop.eup %7383  ;;  %vm5639_vm10 = vmor %vm5637_vm9, %vm5638_vm4  ;;  %vm6172_vm4 = vcmp.eq.f32.partialorder %v6171_v56, 8.507059e+37  ;;  %vm6183_vm14 = vweird.f32 %v10935_v37  ;;  %vm6182_vm5 = vweird.f32 %v10846_v40 }
 0x6f3   : > { %v5634_v43 = vsub.f32 1.0, %v5633_v14  ;;  %v10976_v32 = vadd.f32 1.0, %v7384_v36  ;;  %v6125_v36 = vsel %vm10982_vm13, %v10840_v54, %v6121_v59  ;;  %v6436_v54 = vmul.f32 %v6160_v17, %v10372_v19 }
 0x6f4   : > { %v6179_v13 = vsub.f32 1.0, %v6178_v50  ;;  %v10974_v33 = vpop.eup %7385  ;;  %v5751_v50 = vpop.xlane.xlu1 %5750  ;;  %v6431_v14 = vmul.f32 %v10907_v20, %v10304_v29  ;;  %v6432_v9 = vmul.f32 %v10920_v18, %v10320_v61  ;;  %vm5972_vm9 = vweird.f32 %v10605_v34 }
 0x6f5   : > { %v5635_v26 = vmul.f32 %v7380_v25, %v5634_v43  ;;  %v6165_v43 = vmul.f32 %v10888_v46, %v6164_v10  ;;  %v6193_v59 = vmul.f32 %v10974_v33, %v10916_v63  ;;  %7389 = vrcp.f32 %v10976_v32  ;;  %v7388_v38 = vpop.eup %7387 }
 0x6f6   : > { %v6180_v49 = vmul.f32 %v10935_v37, %v6179_v13  ;;  %v7239_v51 = vmul.f32 -1.442695, %v5751_v50  ;;  %vm6198_vm8 = vweird.f32 %v10974_v33 }
 0x6f7   : > { %v5636_v4 = vadd.f32 %v7380_v25, %v5635_v26  ;;  %v6166_v53 = vadd.f32 %v10888_v46, %v6165_v43  ;;  %v12041_v43 = vand.u32 2147483647, %v10794_v60  ;;  %v6194_v28 = vsub.f32 1.0, %v6193_v59 }
 0x6f8   : > { %v6181_v47 = vadd.f32 %v10935_v37, %v6180_v49  ;;  %7391 = vpow2.f32 %v7239_v51  ;;  %v5757_v51 = vpop.xlane.xlu0 %5756 }
 0x6f9   : > { %v5640_v10 = vsel %vm5639_vm10, %v7380_v25, %v5636_v4  ;;  %v6140_v25 = vsel %vm10995_vm3, %v10851_v2, %v6136_v8  ;;  %v6170_v13 = vsel %vm11018_vm0, %v10888_v46, %v6166_v53  ;;  %vm6142_vm1 = vcmp.eq.f32.partialorder %v12041_v43, 8.507059e+37 }
 0x6fa   : > { %v5645_v30 = vsel %vm5642_vm12, %v5644_v48, %v5640_v10  ;;  %v6174_v46 = vor.u32 1.1754944e-38, %v6173_v15  ;;  %v6145_v48 = vsel %vm6142_vm1, %v6144_v24, %v6140_v25  ;;  %v6195_v53 = vmul.f32 %v10974_v33, %v6194_v28 }
 0x6fb   : > { %v10999_v41 = vperm.slane %v5645_v30, 0  ;;  %v11050_v24 = vpop.eup %7389  ;;  %v6435_v30 = vmul.f32 %v6145_v48, %v10359_v42  ;;  %vm6197_vm10 = vweird.f32 %v10916_v63  ;;  %vm6212_vm0 = vweird.f32 %v10976_v32 }
 0x6fc   : > { %v6175_v60 = vsel %vm6172_vm4, %v6174_v46, %v6170_v13  ;;  %v6208_v39 = vmul.f32 %v11050_v24, %v10976_v32  ;;  %vm11129_vm11 = vmor %vm6197_vm10, %vm6198_vm8  ;;  %v12046_v46 = vld [vmem:[#allocation20_spill] sm:$0xff]  ;;  %vm6213_vm15 = vweird.f32 %v11050_v24 }
 0x6fd   : > { %v6404_v21 = vmul.f32 %v10999_v41, %v10372_v19  ;;  %v6388_v26 = vmul.f32 %v10999_v41, %v10111_v58  ;;  %v6115_v58 = vsel %vm10957_vm6, %v10914_v16, %v12040_v1  ;;  %v6130_v19 = vsel %vm10961_vm7, %v10933_v0, %v6125_v36  ;;  %v5754_v0 = vpop.xlane.xlu2 %5753  ;;  %vm11058_vm6 = vmor %vm6182_vm5, %vm6183_vm14 }
 0x6fe   : > { %v11042_v16 = vadd.f32 1.0, %v7388_v38  ;;  %v6405_v10 = vmul.f32 %v10999_v41, %v10384_v62  ;;  %v6389_v17 = vmul.f32 %v10999_v41, %v10128_v55  ;;  %v6434_v20 = vmul.f32 %v6130_v19, %v10347_v35  ;;  %v7392_v25 = vpop.eup %7391  ;;  %vm11183_vm1 = vmor %vm6212_vm0, %vm6213_vm15 }
 0x6ff   : > { %v6468_v4 = vadd.f32 %v6436_v54, %v6404_v21  ;;  %v6452_v8 = vadd.f32 %v10659_v31, %v6388_v26  ;;  %v6188_v31 = vand.u32 2147483648, %v10846_v40  ;;  %v6433_v40 = vmul.f32 %v6115_v58, %v10334_v12 }
 0x700   : > { %v6437_v18 = vmul.f32 %v6175_v60, %v10384_v62  ;;  %v6185_v50 = vsel %vm11058_vm6, %v10935_v37, %v6181_v47  ;;  %vm6187_vm7 = vcmp.eq.f32.partialorder %v6186_v11, 8.507059e+37  ;;  %7393 = vrcp.f32 %v11042_v16  ;;  %v12047_v47 = vld [vmem:[#allocation24_spill] sm:$0xff] }
 0x701   : > { %6516 = vxpose.xlu0.b32.start [1/16] (narrow) %v6468_v4, 16  ;;  %6484 = vxpose.xlu2.b32.start [1/16] (narrow) %v6452_v8, 16  ;;  %v7240_v55 = vmul.f32 -1.442695, %v5754_v0  ;;  %v6396_v36 = vmul.f32 %v10999_v41, %v10253_v6  ;;  %v6189_v15 = vor.u32 1.1754944e-38, %v6188_v31  ;;  %v6397_v62 = vmul.f32 %v10999_v41, %v10272_v52  ;;  %v12048_v0 = vld [vmem:[#allocation36_spill] sm:$0xff] }
 0x702   : > { %v6398_v37 = vmul.f32 %v10999_v41, %v10289_v57  ;;  %v6469_v59 = vadd.f32 %v6437_v18, %v6405_v10  ;;  %v6453_v54 = vadd.f32 %v10686_v44, %v6389_v17  ;;  %v6399_v6 = vmul.f32 %v10999_v41, %v10304_v29  ;;  %v12051_v17 = vld [vmem:[#allocation28_spill] sm:$0xff] }
 0x703   : > { %v11081_v56 = vadd.f32 %v10830_v7, %v6396_v36  ;;  %v6190_v49 = vsel %vm6187_vm7, %v6189_v15, %v6185_v50  ;;  %v11088_v52 = vadd.f32 %v10837_v22, %v6397_v62  ;;  %7395 = vpow2.f32 %v7240_v55  ;;  %v12058_v15 = vld [vmem:[#allocation55_spill] sm:$0xff] }
 0x704   : > { %v11091_v57 = vadd.f32 %v10865_v5, %v6398_v37  ;;  %v6196_v44 = vadd.f32 %v10974_v33, %v6195_v53  ;;  %v11094_v7 = vadd.f32 %v6431_v14, %v6399_v6  ;;  %v6400_v29 = vmul.f32 %v10999_v41, %v10320_v61  ;;  %v12049_v14 = vld [vmem:[#allocation35_spill] sm:$0xff]  ;;  %v5760_v53 = vpop.xlane.xlu1 %5759 }
 0x705   : > { %v6209_v21 = vsub.f32 1.0, %v6208_v39  ;;  %v11098_v26 = vadd.f32 1.0, %v7392_v25  ;;  %v6401_v22 = vmul.f32 %v10999_v41, %v10334_v12  ;;  %v6402_v5 = vmul.f32 %v10999_v41, %v10347_v35 }
 0x706   : > { %v11104_v2 = vpop.eup %7393  ;;  %v6406_v38 = vmul.f32 %v10999_v41, %v10393_v27  ;;  %v6390_v13 = vmul.f32 %v10999_v41, %v10145_v45  ;;  %v11110_v1 = vadd.f32 %v6432_v9, %v6400_v29  ;;  %v6403_v61 = vmul.f32 %v10999_v41, %v10359_v42 }
 0x707   : > { %v7241_v58 = vmul.f32 -1.442695, %v5757_v51  ;;  %v6203_v19 = vand.u32 2147483648, %v10916_v63  ;;  %v11115_v12 = vadd.f32 %v6433_v40, %v6401_v22  ;;  %v11117_v43 = vadd.f32 %v6434_v20, %v6402_v5  ;;  %v12061_v51 = vld [vmem:[#allocation33_spill] sm:$0xff] }
 0x708   : > { %v6438_v35 = vmul.f32 %v6190_v49, %v10393_v27  ;;  %v6201_v4 = vand.u32 2147483647, %v10916_v63  ;;  %v11122_v8 = vadd.f32 %v6435_v30, %v6403_v61  ;;  %v6223_v45 = vmul.f32 %v11104_v2, %v11042_v16 }
 0x709   : > { %6517 = vxpose.xlu0.b32.cont [2/16] (narrow) %v6469_v59, 16  ;;  %6485 = vxpose.xlu2.b32.cont [2/16] (narrow) %v6453_v54, 16  ;;  %7397 = vrcp.f32 %v11098_v26  ;;  %v5971_v27 = vadd.f32 %v12046_v46, %v10733_v3  ;;  %vm5973_vm12 = vweird.f32 %v12046_v46  ;;  %v7396_v48 = vpop.eup %7395  ;;  %v6454_v11 = vadd.f32 %v12047_v47, %v6390_v13  ;;  %v12050_v3 = vld [vmem:[#allocation49_spill] sm:$0xff]  ;;  %v12060_v54 = vld [vmem:[#allocation39_spill] sm:$0xff]  ;;  %v5763_v47 = vpop.xlane.xlu2 %5762 }
 0x70a   : > { %v6470_v63 = vadd.f32 %v6438_v35, %v6406_v38  ;;  %v6200_v28 = vsel %vm11129_vm11, %v10974_v33, %v6196_v44  ;;  %v6210_v60 = vmul.f32 %v11050_v24, %v6209_v21  ;;  %v5984_v31 = vsub.f32 1.0, %v12048_v0  ;;  %vm11149_vm2 = vmor %vm5972_vm9, %vm5973_vm12  ;;  %v12059_v59 = vld [vmem:[#allocation29_spill] sm:$0xff] }
 0x70b   : > { %v11143_v9 = vadd.f32 1.0, %v12049_v14  ;;  %7399 = vpow2.f32 %v7241_v58  ;;  %v6204_v10 = vor.u32 1.1754944e-38, %v6203_v19  ;;  %vm6202_vm13 = vcmp.eq.f32.partialorder %v6201_v4, 8.507059e+37  ;;  %v12064_v58 = vld [vmem:[#allocation25_spill] sm:$0xff]  ;;  %v12066_v14 = vld [vmem:[#allocation48_spill] sm:$0xff] }
 0x70c   : > { %v6423_v23 = vmul.f32 %v12051_v17, %v12050_v3  ;;  %v12054_v33 = vand.u32 2147483647, %v10605_v34  ;;  %v12057_v18 = vand.u32 2147483648, %v10605_v34  ;;  %v6224_v30 = vsub.f32 1.0, %v6223_v45  ;;  %v12065_v0 = vld [vmem:[#allocation61_spill] sm:$0xff] }
 0x70d   : > { %v11161_v55 = vadd.f32 1.0, %v7396_v48  ;;  %v6205_v36 = vsel %vm6202_vm13, %v6204_v10, %v6200_v28  ;;  %v5975_v39 = vsel %vm11149_vm2, %v12046_v46, %v5971_v27  ;;  %v6407_v62 = vmul.f32 %v10999_v41, %v12058_v15 }
 0x70e   : > { %vm11155_vm3 = vcmp.eq.f32.partialorder %v12054_v33, 8.507059e+37  ;;  %v5979_v50 = vor.u32 1.1754944e-38, %v12057_v18  ;;  %v6391_v37 = vmul.f32 %v10999_v41, %v12050_v3  ;;  %v6211_v25 = vadd.f32 %v11050_v24, %v6210_v60 }
 0x70f   : > { %v11172_v34 = vpop.eup %7397  ;;  %v5998_v6 = vmul.f32 %v12060_v54, %v12059_v59  ;;  %7401 = vrcp.f32 %v11143_v9  ;;  %v6218_v49 = vand.u32 2147483648, %v10976_v32  ;;  %v5985_v44 = vmul.f32 %v12061_v51, %v5984_v31 }
 0x710   : > { %v7242_v29 = vmul.f32 -1.442695, %v5760_v53  ;;  %v6439_v21 = vmul.f32 %v6205_v36, %v12058_v15  ;;  %v6216_v22 = vand.u32 2147483647, %v10976_v32  ;;  %7403 = vrcp.f32 %v11161_v55 }
 0x711   : > { %6518 = vxpose.xlu0.b32.cont [3/16] (narrow) %v6470_v63, 16  ;;  %6486 = vxpose.xlu2.b32.cont [3/16] (narrow) %v6454_v11, 16  ;;  %v7400_v5 = vpop.eup %7399  ;;  %v5980_v13 = vsel %vm11155_vm3, %v5979_v50, %v5975_v39  ;;  %v6225_v61 = vmul.f32 %v11104_v2, %v6224_v30  ;;  %vm5987_vm4 = vweird.f32 %v12064_v58  ;;  %v6238_v19 = vmul.f32 %v11172_v34, %v11098_v26  ;;  %v12077_v30 = vld [vmem:[#allocation66_spill] sm:$0xff] }
 0x712   : > { %v6471_v35 = vadd.f32 %v6439_v21, %v6407_v62  ;;  %v6455_v4 = vadd.f32 %v6423_v23, %v6391_v37  ;;  %v6215_v32 = vsel %vm11183_vm1, %v11050_v24, %v6211_v25  ;;  %v5999_v45 = vsub.f32 1.0, %v5998_v6 }
 0x713   : > { %v6219_v42 = vor.u32 1.1754944e-38, %v6218_v49  ;;  %v5986_v46 = vadd.f32 %v12061_v51, %v5985_v44  ;;  %vm5988_vm14 = vweird.f32 %v12061_v51  ;;  %v11198_v27 = vadd.f32 1.0, %v7400_v5 }
 0x714   : > { %7405 = vpow2.f32 %v7242_v29  ;;  %vm6217_vm5 = vcmp.eq.f32.partialorder %v6216_v22, 8.507059e+37  ;;  %v5991_v48 = vand.u32 2147483647, %v12064_v58  ;;  %v6226_v24 = vadd.f32 %v11104_v2, %v6225_v61  ;;  %vm11215_vm7 = vmor %vm5987_vm4, %vm5988_vm14  ;;  %v5766_v22 = vpop.xlane.xlu0 %5765  ;;  %v12071_v61 = vld [vmem:[#allocation60_spill] sm:$0xff] }
 0x715   : > { %v11201_v63 = vpop.eup %7401  ;;  %v6220_v11 = vsel %vm6217_vm5, %v6219_v42, %v6215_v32  ;;  %vm6228_vm6 = vweird.f32 %v11104_v2  ;;  %v5993_v28 = vand.u32 2147483648, %v12064_v58  ;;  %v6239_v60 = vsub.f32 1.0, %v6238_v19  ;;  %v12072_v19 = vld [vmem:[#allocation52_spill] sm:$0xff] }
 0x716   : > { %v6408_v31 = vmul.f32 %v10999_v41, %v12065_v0  ;;  %v6392_v10 = vmul.f32 %v10999_v41, %v12066_v14  ;;  %v6424_v3 = vmul.f32 %v5980_v13, %v12066_v14  ;;  %v11219_v23 = vpop.eup %7403  ;;  %vm6227_vm8 = vweird.f32 %v11042_v16 }
 0x717   : > { %v6233_v40 = vand.u32 2147483648, %v11042_v16  ;;  %v5990_v33 = vsel %vm11215_vm7, %v12061_v51, %v5986_v46  ;;  %v6000_v20 = vmul.f32 %v12060_v54, %v5999_v45  ;;  %7407 = vrcp.f32 %v11198_v27  ;;  %vm11231_vm9 = vmor %vm6227_vm8, %vm6228_vm6 }
 0x718   : > { %v7243_v18 = vmul.f32 -1.442695, %v5763_v47  ;;  %v6440_v50 = vmul.f32 %v6220_v11, %v12065_v0  ;;  %v6231_v53 = vand.u32 2147483647, %v11042_v16  ;;  %v6013_v36 = vmul.f32 %v11201_v63, %v11143_v9 }
 0x719   : > { %6519 = vxpose.xlu0.b32.cont [4/16] (narrow) %v6471_v35, 16  ;;  %6487 = vxpose.xlu2.b32.cont [4/16] (narrow) %v6455_v4, 16  ;;  %v6230_v39 = vsel %vm11231_vm9, %v11104_v2, %v6226_v24  ;;  %vm5992_vm10 = vcmp.eq.f32.partialorder %v5991_v48, 8.507059e+37  ;;  %v5994_v15 = vor.u32 1.1754944e-38, %v5993_v28  ;;  %v6253_v37 = vmul.f32 %v11219_v23, %v11161_v55 }
 0x71a   : > { %v7406_v62 = vpop.eup %7405  ;;  %v6472_v25 = vadd.f32 %v6440_v50, %v6408_v31  ;;  %v6456_v6 = vadd.f32 %v6424_v3, %v6392_v10  ;;  %v6240_v49 = vmul.f32 %v11172_v34, %v6239_v60  ;;  %v6234_v51 = vor.u32 1.1754944e-38, %v6233_v40 }
 0x71b   : > { %v5995_v44 = vsel %vm5992_vm10, %v5994_v15, %v5990_v33  ;;  %vm6002_vm11 = vweird.f32 %v12059_v59  ;;  %v6008_v16 = vand.u32 2147483648, %v12059_v59  ;;  %7409 = vpow2.f32 %v7243_v18  ;;  %v5769_v18 = vpop.xlane.xlu1 %5768 }
 0x71c   : > { %vm6232_vm12 = vcmp.eq.f32.partialorder %v6231_v53, 8.507059e+37  ;;  %v6001_v2 = vadd.f32 %v12060_v54, %v6000_v20  ;;  %vm6003_vm13 = vweird.f32 %v12060_v54  ;;  %v6014_v29 = vsub.f32 1.0, %v6013_v36  ;;  %v12078_v36 = vld [vmem:[#allocation51_spill] sm:$0xff] }
 0x71d   : > { %v11248_v21 = vadd.f32 1.0, %v7406_v62  ;;  %v6235_v5 = vsel %vm6232_vm12, %v6234_v51, %v6230_v39  ;;  %vm6243_vm2 = vweird.f32 %v11172_v34  ;;  %v11251_v38 = vpop.eup %7407  ;;  %v6254_v13 = vsub.f32 1.0, %v6253_v37  ;;  %vm11268_vm15 = vmor %vm6002_vm11, %vm6003_vm13 }
 0x71e   : > { %v6409_v58 = vmul.f32 %v10999_v41, %v12071_v61  ;;  %v6393_v35 = vmul.f32 %v10999_v41, %v12072_v19  ;;  %v6241_v4 = vadd.f32 %v11172_v34, %v6240_v49  ;;  %v6425_v32 = vmul.f32 %v5995_v44, %v12072_v19 }
 0x71f   : > { %v6248_v45 = vand.u32 2147483648, %v11098_v26  ;;  %v6006_v42 = vand.u32 2147483647, %v12059_v59  ;;  %v6009_v46 = vor.u32 1.1754944e-38, %v6008_v16  ;;  %v7244_v48 = vmul.f32 -1.442695, %v5766_v22 }
 0x720   : > { %v6441_v47 = vmul.f32 %v6235_v5, %v12071_v61  ;;  %vm6242_vm3 = vweird.f32 %v11098_v26  ;;  %v6246_v11 = vand.u32 2147483647, %v11098_v26  ;;  %v6268_v28 = vmul.f32 %v11251_v38, %v11198_v27 }
 0x721   : > { %6520 = vxpose.xlu0.b32.cont [5/16] (narrow) %v6472_v25, 16  ;;  %6488 = vxpose.xlu2.b32.cont [5/16] (narrow) %v6456_v6, 16  ;;  %7411 = vrcp.f32 %v11248_v21  ;;  %vm11277_vm0 = vmor %vm6242_vm3, %vm6243_vm2  ;;  %v6005_v26 = vsel %vm11268_vm15, %v12060_v54, %v6001_v2  ;;  %v6015_v59 = vmul.f32 %v11201_v63, %v6014_v29  ;;  %v7410_v0 = vpop.eup %7409  ;;  %v6457_v14 = vadd.f32 %v6425_v32, %v6393_v35 }
 0x722   : > { %v6473_v31 = vadd.f32 %v6441_v47, %v6409_v58  ;;  %v6245_v10 = vsel %vm11277_vm0, %v11172_v34, %v6241_v4  ;;  %v6255_v3 = vmul.f32 %v11219_v23, %v6254_v13  ;;  %v6249_v17 = vor.u32 1.1754944e-38, %v6248_v45  ;;  %v5772_v4 = vpop.xlane.xlu2 %5771 }
 0x723   : > { %vm6007_vm1 = vcmp.eq.f32.partialorder %v6006_v42, 8.507059e+37  ;;  %v6023_v40 = vand.u32 2147483648, %v11143_v9  ;;  %7413 = vpow2.f32 %v7244_v48  ;;  %vm6247_vm4 = vcmp.eq.f32.partialorder %v6246_v11, 8.507059e+37 }
 0x724   : > { %v6010_v54 = vsel %vm6007_vm1, %v6009_v46, %v6005_v26  ;;  %vm6018_vm14 = vweird.f32 %v11201_v63  ;;  %v6269_v33 = vsub.f32 1.0, %v6268_v28  ;;  %v11291_v20 = vadd.f32 1.0, %v7410_v0  ;;  %v12083_v46 = vld [vmem:[#allocation65_spill] sm:$0xff] }
 0x725   : > { %v6250_v50 = vsel %vm6247_vm4, %v6249_v17, %v6245_v10  ;;  %v6016_v34 = vadd.f32 %v11201_v63, %v6015_v59  ;;  %v6410_v53 = vmul.f32 %v10999_v41, %v12077_v30  ;;  %v6394_v39 = vmul.f32 %v10999_v41, %v12078_v36 }
 0x726   : > { %v6256_v15 = vadd.f32 %v11219_v23, %v6255_v3  ;;  %vm6258_vm5 = vweird.f32 %v11219_v23  ;;  %v6426_v37 = vmul.f32 %v6010_v54, %v12078_v36  ;;  %v6263_v25 = vand.u32 2147483648, %v11161_v55 }
 0x727   : > { %v11300_v62 = vpop.eup %7411  ;;  %vm6017_vm6 = vweird.f32 %v11143_v9  ;;  %v6021_v6 = vand.u32 2147483647, %v11143_v9  ;;  %v7245_v49 = vmul.f32 -1.442695, %v5769_v18  ;;  %v6442_v51 = vmul.f32 %v6250_v50, %v12077_v30 }
 0x728   : > { %vm6257_vm7 = vweird.f32 %v11161_v55  ;;  %v6261_v44 = vand.u32 2147483647, %v11161_v55  ;;  %vm11311_vm8 = vmor %vm6017_vm6, %vm6018_vm14  ;;  %7415 = vrcp.f32 %v11291_v20  ;;  %v6024_v29 = vor.u32 1.1754944e-38, %v6023_v40 }
 0x729   : > { %6521 = vxpose.xlu0.b32.cont [6/16] (narrow) %v6473_v31, 16  ;;  %6489 = vxpose.xlu2.b32.cont [6/16] (narrow) %v6457_v14, 16  ;;  %vm11316_vm9 = vmor %vm6257_vm7, %vm6258_vm5  ;;  %v6020_v9 = vsel %vm11311_vm8, %v11201_v63, %v6016_v34  ;;  %v6270_v22 = vmul.f32 %v11251_v38, %v6269_v33  ;;  %v7414_v55 = vpop.eup %7413  ;;  %v6283_v5 = vmul.f32 %v11300_v62, %v11248_v21  ;;  %v6264_v19 = vor.u32 1.1754944e-38, %v6263_v25  ;;  %v5775_v33 = vpop.xlane.xlu0 %5774  ;;  %v12087_v34 = vld [vmem:[#allocation70_spill] sm:$0xff] }
 0x72a   : > { %v6474_v13 = vadd.f32 %v6442_v51, %v6410_v53  ;;  %v6458_v61 = vadd.f32 %v6426_v37, %v6394_v39  ;;  %v6260_v58 = vsel %vm11316_vm9, %v11219_v23, %v6256_v15  ;;  %vm6022_vm10 = vcmp.eq.f32.partialorder %v6021_v6, 8.507059e+37  ;;  %v12084_v23 = vld [vmem:[#allocation56_spill] sm:$0xff] }
 0x72b   : > { %7417 = vpow2.f32 %v7245_v49  ;;  %vm6262_vm11 = vcmp.eq.f32.partialorder %v6261_v44, 8.507059e+37  ;;  %v6025_v63 = vsel %vm6022_vm10, %v6024_v29, %v6020_v9  ;;  %v11329_v35 = vadd.f32 1.0, %v7414_v55 }
 0x72c   : > { %v6265_v32 = vsel %vm6262_vm11, %v6264_v19, %v6260_v58  ;;  %v6271_v45 = vadd.f32 %v11251_v38, %v6270_v22  ;;  %vm6273_vm12 = vweird.f32 %v11251_v38  ;;  %v6284_v42 = vsub.f32 1.0, %v6283_v5  ;;  %v12088_v22 = vld [vmem:[#allocation69_spill] sm:$0xff] }
 0x72d   : > { %v6411_v48 = vmul.f32 %v10999_v41, %v12083_v46  ;;  %v6395_v47 = vmul.f32 %v10999_v41, %v12084_v23  ;;  %vm6272_vm13 = vweird.f32 %v11198_v27  ;;  %v6278_v24 = vand.u32 2147483648, %v11198_v27 }
 0x72e   : > { %v11337_v11 = vpop.eup %7415  ;;  %v7246_v28 = vmul.f32 -1.442695, %v5772_v4  ;;  %v6443_v60 = vmul.f32 %v6265_v32, %v12083_v46  ;;  %v6427_v26 = vmul.f32 %v6025_v63, %v12084_v23  ;;  %vm11343_vm2 = vmor %vm6272_vm13, %vm6273_vm12  ;;  %v6276_v0 = vand.u32 2147483647, %v11198_v27  ;;  %v12089_v23 = vld [vmem:[#allocation74_spill] sm:$0xff] }
 0x72f   : > { %7419 = vrcp.f32 %v11329_v35  ;;  %v6275_v31 = vsel %vm11343_vm2, %v11251_v38, %v6271_v45  ;;  %v6298_v10 = vmul.f32 %v11337_v11, %v11291_v20  ;;  %v6285_v40 = vmul.f32 %v11300_v62, %v6284_v42 }
 0x730   : > { %v6475_v3 = vadd.f32 %v6443_v60, %v6411_v48  ;;  %v6459_v17 = vadd.f32 %v6427_v26, %v6395_v47  ;;  %v6279_v54 = vor.u32 1.1754944e-38, %v6278_v24  ;;  %7421 = vpow2.f32 %v7246_v28 }
 0x731   : > { %6522 = vxpose.xlu0.b32.cont [7/16] (narrow) %v6474_v13, 16  ;;  %6490 = vxpose.xlu2.b32.cont [7/16] (narrow) %v6458_v61, 16  ;;  %v7418_v14 = vpop.eup %7417  ;;  %vm6277_vm3 = vcmp.eq.f32.partialorder %v6276_v0, 8.507059e+37  ;;  %v6299_v50 = vsub.f32 1.0, %v6298_v10  ;;  %v6412_v38 = vmul.f32 %v10999_v41, %v12087_v34  ;;  %v6286_v30 = vadd.f32 %v11300_v62, %v6285_v40  ;;  %v12090_v40 = vld [vmem:[#allocation73_spill] sm:$0xff] }
 0x732   : > { %v11355_v27 = vadd.f32 1.0, %v7418_v14  ;;  %v6280_v18 = vsel %vm6277_vm3, %v6279_v54, %v6275_v31  ;;  %vm6288_vm15 = vweird.f32 %v11300_v62  ;;  %v6293_v36 = vand.u32 2147483648, %v11248_v21 }
 0x733   : > { %v7247_v39 = vmul.f32 -1.442695, %v5775_v33  ;;  %v6444_v15 = vmul.f32 %v6280_v18, %v12087_v34  ;;  %vm6287_vm0 = vweird.f32 %v11248_v21  ;;  %v6291_v37 = vand.u32 2147483647, %v11248_v21  ;;  %v5778_v21 = vpop.xlane.xlu1 %5777 }
 0x734   : > { %7423 = vrcp.f32 %v11355_v27  ;;  %vm6289_vm1 = vmor %vm6287_vm0, %vm6288_vm15  ;;  %v6300_v44 = vmul.f32 %v11337_v11, %v6299_v50  ;;  %v6294_v16 = vor.u32 1.1754944e-38, %v6293_v36  ;;  %v6413_v55 = vmul.f32 %v10999_v41, %v12088_v22 }
 0x735   : > { %v11361_v53 = vpop.eup %7419  ;;  %v6476_v49 = vadd.f32 %v6444_v15, %v6412_v38  ;;  %v6290_v51 = vsel %vm6289_vm1, %v11300_v62, %v6286_v30  ;;  %7425 = vpow2.f32 %v7247_v39  ;;  %vm6292_vm4 = vcmp.eq.f32.partialorder %v6291_v37, 8.507059e+37 }
 0x736   : > { %v7422_v25 = vpop.eup %7421  ;;  %v6313_v6 = vmul.f32 %v11361_v53, %v11329_v35  ;;  %v6295_v9 = vsel %vm6292_vm4, %v6294_v16, %v6290_v51  ;;  %v6301_v5 = vadd.f32 %v11337_v11, %v6300_v44  ;;  %vm6303_vm14 = vweird.f32 %v11337_v11 }
 0x737   : > { %v11373_v2 = vadd.f32 1.0, %v7422_v25  ;;  %v6308_v13 = vand.u32 2147483648, %v11291_v20  ;;  %v7248_v61 = vmul.f32 -1.442695, %v5778_v21  ;;  %vm6302_vm5 = vweird.f32 %v11291_v20  ;;  %v12091_v25 = vld [vmem:[#allocation78_spill] sm:$0xff] }
 0x738   : > { %v6314_v29 = vsub.f32 1.0, %v6313_v6  ;;  %v6306_v58 = vand.u32 2147483647, %v11291_v20  ;;  %vm6304_vm6 = vmor %vm6302_vm5, %vm6303_vm14  ;;  %v6414_v47 = vmul.f32 %v10999_v41, %v12089_v23  ;;  %vm6318_vm8 = vweird.f32 %v11361_v53 }
 0x739   : > { %6523 = vxpose.xlu0.b32.cont [8/16] (narrow) %v6475_v3, 16  ;;  %6491 = vxpose.xlu2.b32.cont [8/16] (narrow) %v6459_v17, 16  ;;  %7427 = vrcp.f32 %v11373_v2  ;;  %v6305_v32 = vsel %vm6304_vm6, %v11337_v11, %v6301_v5  ;;  %v6309_v42 = vor.u32 1.1754944e-38, %v6308_v13  ;;  %v6323_v28 = vand.u32 2147483648, %v11329_v35 }
 0x73a   : > { %v11379_v62 = vpop.eup %7423  ;;  %v6315_v45 = vmul.f32 %v11361_v53, %v6314_v29  ;;  %7429 = vpow2.f32 %v7248_v61  ;;  %vm6307_vm7 = vcmp.eq.f32.partialorder %v6306_v58, 8.507059e+37  ;;  %vm6317_vm9 = vweird.f32 %v11329_v35 }
 0x73b   : > { %v7426_v19 = vpop.eup %7425  ;;  %v6328_v63 = vmul.f32 %v11379_v62, %v11355_v27  ;;  %v6310_v20 = vsel %vm6307_vm7, %v6309_v42, %v6305_v32  ;;  %vm6319_vm10 = vmor %vm6317_vm9, %vm6318_vm8  ;;  %v6324_v10 = vor.u32 1.1754944e-38, %v6323_v28  ;;  %v6415_v54 = vmul.f32 %v10999_v41, %v12090_v40  ;;  %v12094_v28 = vld [vmem:[#allocation21_spill] sm:$0xff] }
 0x73c   : > { %v11391_v46 = vadd.f32 1.0, %v7426_v19  ;;  %v6316_v24 = vadd.f32 %v11361_v53, %v6315_v45  ;;  %v6446_v60 = vmul.f32 %v6310_v20, %v12089_v23  ;;  %vm6333_vm12 = vweird.f32 %v11379_v62  ;;  %v12093_v45 = vld [vmem:[#allocation16_spill] sm:$0xff] }
 0x73d   : > { %v6329_v48 = vsub.f32 1.0, %v6328_v63  ;;  %v6338_v50 = vand.u32 2147483648, %v11355_v27  ;;  %vm6332_vm13 = vweird.f32 %v11355_v27  ;;  %v6416_v6 = vmul.f32 %v10999_v41, %v12091_v25 }
 0x73e   : > { %7431 = vrcp.f32 %v11391_v46  ;;  %v6478_v0 = vadd.f32 %v6446_v60, %v6414_v47  ;;  %v6320_v31 = vsel %vm6319_vm10, %v11361_v53, %v6316_v24  ;;  %vm6334_vm2 = vmor %vm6332_vm13, %vm6333_vm12  ;;  %v6353_v51 = vand.u32 2147483648, %v11373_v2 }
 0x73f   : > { %v7428_v11 = vpop.eup %7427  ;;  %v6330_v14 = vmul.f32 %v11379_v62, %v6329_v48  ;;  %v6339_v39 = vor.u32 1.1754944e-38, %v6338_v50  ;;  %vm6347_vm0 = vweird.f32 %v11373_v2  ;;  %v6351_v16 = vand.u32 2147483647, %v11373_v2 }
 0x740   : > { %v7430_v26 = vpop.eup %7429  ;;  %v6343_v59 = vmul.f32 %v7428_v11, %v11373_v2  ;;  %vm6348_vm15 = vweird.f32 %v7428_v11  ;;  %v6368_v2 = vand.u32 2147483648, %v11391_v46  ;;  %vm6362_vm5 = vweird.f32 %v11391_v46 }
 0x741   : > { %6524 = vxpose.xlu0.b32.cont [9/16] (narrow) %v6476_v49, 16  ;;  %6492 = vxpose.xlu2.b32.cont [9/16] (narrow) %v11081_v56, 16  ;;  %v6445_v56 = vmul.f32 %v6295_v9, %v12088_v22  ;;  %v11406_v3 = vadd.f32 1.0, %v7430_v26  ;;  %v6331_v33 = vadd.f32 %v11379_v62, %v6330_v14  ;;  %vm6349_vm1 = vmor %vm6347_vm0, %vm6348_vm15  ;;  %v6354_v22 = vor.u32 1.1754944e-38, %v6353_v51 }
 0x742   : > { %vm6352_vm4 = vcmp.eq.f32.partialorder %v6351_v16, 8.507059e+37  ;;  %v6366_v58 = vand.u32 2147483647, %v11391_v46  ;;  %v6418_v42 = vmul.f32 %v10999_v41, %v12093_v45  ;;  %v6419_v60 = vmul.f32 %v10999_v41, %v12094_v28 }
 0x743   : > { %v6477_v4 = vadd.f32 %v6445_v56, %v6413_v55  ;;  %7433 = vrcp.f32 %v11406_v3  ;;  %v6335_v53 = vsel %vm6334_vm2, %v11379_v62, %v6331_v33  ;;  %v12092_v62 = vld [vmem:[#allocation17_spill] sm:$0xff]  ;;  %v6383_v48 = vand.u32 2147483648, %v11406_v3 }
 0x744   : > { %v7432_v18 = vpop.eup %7431  ;;  %v6417_v13 = vmul.f32 %v10999_v41, %v12092_v62  ;;  %vm6367_vm7 = vcmp.eq.f32.partialorder %v6366_v58, 8.507059e+37  ;;  %vm6377_vm9 = vweird.f32 %v11406_v3 }
 0x745   : > { %v6358_v38 = vmul.f32 %v7432_v18, %v11391_v46  ;;  %vm6363_vm14 = vweird.f32 %v7432_v18  ;;  %v6381_v46 = vand.u32 2147483647, %v11406_v3 }
 0x746   : > { %vm6364_vm6 = vmor %vm6362_vm5, %vm6363_vm14 }
 0x747   : > { %v6359_v37 = vsub.f32 1.0, %v6358_v38 }
 0x749   : > { %6525 = vxpose.xlu0.b32.cont [10/16] (narrow) %v6477_v4, 16  ;;  %6493 = vxpose.xlu2.b32.cont [10/16] (narrow) %v11088_v52, 16  ;;  %v6321_v52 = vand.u32 2147483647, %v11329_v35  ;;  %v6344_v35 = vsub.f32 1.0, %v6343_v59  ;;  %v7434_v49 = vpop.eup %7433  ;;  %v6360_v29 = vmul.f32 %v7432_v18, %v6359_v37  ;;  %v6369_v4 = vor.u32 1.1754944e-38, %v6368_v2 }
 0x74a   : > { %vm6378_vm8 = vweird.f32 %v7434_v49 }
 0x74b   : > { %vm6322_vm11 = vcmp.eq.f32.partialorder %v6321_v52, 8.507059e+37  ;;  %v6345_v36 = vmul.f32 %v7428_v11, %v6344_v35  ;;  %v6361_v61 = vadd.f32 %v7432_v18, %v6360_v29  ;;  %vm6379_vm10 = vmor %vm6377_vm9, %vm6378_vm8 }
 0x74c   : > { %v6325_v17 = vsel %vm6322_vm11, %v6324_v10, %v6320_v31  ;;  %vm6382_vm11 = vcmp.eq.f32.partialorder %v6381_v46, 8.507059e+37 }
 0x74d   : > { %v6447_v34 = vmul.f32 %v6325_v17, %v12090_v40  ;;  %v6365_v63 = vsel %vm6364_vm6, %v7432_v18, %v6361_v61 }
 0x74e   : > { %v6370_v32 = vsel %vm6367_vm7, %v6369_v4, %v6365_v63 }
 0x74f   : > { %v6479_v30 = vadd.f32 %v6447_v34, %v6415_v54  ;;  %v6450_v23 = vmul.f32 %v6370_v32, %v12093_v45 }
 0x751   : > { %6526 = vxpose.xlu0.b32.cont [11/16] (narrow) %v6478_v0, 16  ;;  %6494 = vxpose.xlu2.b32.cont [11/16] (narrow) %v11091_v57, 16  ;;  %v6336_v57 = vand.u32 2147483647, %v11355_v27  ;;  %v6346_v27 = vadd.f32 %v7428_v11, %v6345_v36  ;;  %v6482_v47 = vadd.f32 %v6450_v23, %v6418_v42 }
 0x753   : > { %vm6337_vm3 = vcmp.eq.f32.partialorder %v6336_v57, 8.507059e+37  ;;  %v6350_v9 = vsel %vm6349_vm1, %v7428_v11, %v6346_v27 }
 0x754   : > { %v6340_v15 = vsel %vm6337_vm3, %v6339_v39, %v6335_v53  ;;  %v6355_v55 = vsel %vm6352_vm4, %v6354_v22, %v6350_v9 }
 0x755   : > { %v6448_v44 = vmul.f32 %v6340_v15, %v12091_v25  ;;  %v6449_v56 = vmul.f32 %v6355_v55, %v12092_v62 }
 0x757   : > { %v6480_v21 = vadd.f32 %v6448_v44, %v6416_v6  ;;  %v6481_v19 = vadd.f32 %v6449_v56, %v6417_v13 }
 0x759   : > { %6527 = vxpose.xlu0.b32.cont [12/16] (narrow) %v6479_v30, 16  ;;  %6495 = vxpose.xlu2.b32.cont [12/16] (narrow) %v11094_v7, 16  ;;  %v6373_v7 = vmul.f32 %v7434_v49, %v11406_v3 }
 0x75b   : > { %v6374_v5 = vsub.f32 1.0, %v6373_v7 }
 0x761   : > { %6528 = vxpose.xlu0.b32.cont [13/16] (narrow) %v6480_v21, 16  ;;  %6496 = vxpose.xlu2.b32.cont [13/16] (narrow) %v11110_v1, 16  ;;  %v6375_v1 = vmul.f32 %v7434_v49, %v6374_v5 }
 0x763   : > { %v6376_v20 = vadd.f32 %v7434_v49, %v6375_v1 }
 0x765   : > { %v6380_v24 = vsel %vm6379_vm10, %v7434_v49, %v6376_v20 }
 0x769   : > { %6529 = vxpose.xlu0.b32.cont [14/16] (narrow) %v6481_v19, 16  ;;  %6497 = vxpose.xlu2.b32.cont [14/16] (narrow) %v11115_v12, 16  ;;  %v6384_v12 = vor.u32 1.1754944e-38, %v6383_v48 }
 0x76b   : > { %v6385_v11 = vsel %vm6382_vm11, %v6384_v12, %v6380_v24 }
 0x76c   : > { %v6451_v52 = vmul.f32 %v6385_v11, %v12094_v28 }
 0x76e   : > { %v6483_v26 = vadd.f32 %v6451_v52, %v6419_v60 }
 0x771   : > { %6530 = vxpose.xlu0.b32.cont [15/16] (narrow) %v6482_v47, 16  ;;  %6498 = vxpose.xlu2.b32.cont [15/16] (narrow) %v11117_v43, 16 }
 0x779   : > { %6531 = vxpose.xlu0.b32.end [16/16] (narrow) %v6483_v26, 16  ;;  %6499 = vxpose.xlu2.b32.end [16/16] (narrow) %v11122_v8, 16 }
 0x79a   : > { %v6500_v59 = vpop.trf.xlu2 }
 0x79b   : > { %6548 = vst [vmem:[%s354_s19] sm:$0xff] %v6500_v59 }
 0x7a2   : > { %v6501_v0 = vpop.trf.xlu2 }
 0x7a3   : > { %6550 = vst [vmem:[%s354_s19 + $0x10] sm:$0xff] %v6501_v0 }
 0x7a5   : > { %v6532_v43 = vpop.trf.xlu0 }
 0x7a6   : > { %6549 = vst [vmem:[%s354_s19 + $0x8] sm:$0xff] %v6532_v43 }
 0x7ad   : > { %v6533_v41 = vpop.trf.xlu0 }
 0x7ae   : > { %6551 = vst [vmem:[%s354_s19 + $0x18] sm:$0xff] %v6533_v41 }
 0x7af   : > { %7465 = shalt.err (!%p7462_p3)
}
 0x7b0   : > { %s7503_s13 = smov 256   ;;  %s7504_s19 = smov 16  }
 0x7b1   : > { %7258 = dma.vmem_to_hbm [thread:$0]  (%p7601_p5), %s6566_s28, 512, %s6568_s29, %s6553_s30, %s7503_s13, %s7503_s13, %s7504_s19  }
 0x7b2 PF: > { %p7264_p4 = scmp.ge.s32.totalorder %s7500_s18, 2  ;;  %s6582_s26 = sand.u32 1, %s7488_s15  }
 0x7b3   : > { %s6583_s27 = scalar_lea.sflag [#allocation6], %s6582_s26 }
 0x7b4   : > { %p7261_p7 = pnand %p7264_p4, %p7605_p6 }
 0x7b6   : > { %p7262_p8 = pneg %p7261_p7 }
 0x7b8   : > { %7483 = dma.done.wait (%p7262_p8), %s6583_s27, 512  }
 0x7b9   : > { %7485 = vsyncadd (%p7262_p8), %s6583_s27, 4294966784  ;;  %p22_p9 = scmp.ge.s32.totalorder %s7588_s20, 4   ;;  %s12095_s15 = smov %s7492_s16 }
 0x7ba   : > { %s12096_s16 = smov %s7496_s17  ;;  %s12097_s17 = smov %s7599_s23 }
 0x7bb   : > { %s12098_s18 = smov %s7588_s20  ;;  %24 = sbr.rel (!%p22_p9) target bundleno = 6 (0x6), region = 101 }
 0x7c0   :  { %6589 = vsyncpa [#allocation6], 1 }
 0x7c1   :  { %6591 = vsyncpa [#allocation6 + $0x1], 1 }

</bundles_post_ra>
